<compile_context>
chip_gen: v7x
topology: tpu7x:2x2x1
jax: 0.10.0
libtpu: 0.0.40
codegen_flags: <defaults>
</compile_context>

<pallas_src>
import functools

import jax
import jax.numpy as jnp
from jax.experimental import pallas as pl
from jax.experimental.pallas import tpu as pltpu


# --------------------------------------------------------------------------
# Helpers / chip-aware configuration
# --------------------------------------------------------------------------
def _round_up(x, m):
    return ((x + m - 1) // m) * m


def _cpad(c):
    """Pad a channel count to a multiple of 128 (lane-dense stores, full MXU)."""
    return _round_up(c, 128)


@functools.lru_cache(maxsize=None)
def _tpu_caps():
    """Trace-time chip query. v7x-class (64 MiB VMEM/TC, 2 TCs) vs v5e/v6e."""
    vmem_phys = 64 * 1024 * 1024
    try:
        vmem_phys = int(pltpu.get_tpu_info().vmem_capacity_bytes)
    except Exception:
        pass
    if vmem_phys <= 64 * 1024 * 1024:      # v7x-class: 2 TensorCores, 64 MiB VMEM
        return {"two_cores": True, "vmem_budget": 56 * 1024 * 1024,
                "tile_m": 512, "tile_k": 512}
    # v5e / v6e: single TensorCore, 128 MiB VMEM -> bigger tiles, bigger budget
    return {"two_cores": False, "vmem_budget": 112 * 1024 * 1024,
            "tile_m": 1024, "tile_k": 1024}


def _compiler_params(semantics, block_bytes):
    caps = _tpu_caps()
    vmem = int(min(caps["vmem_budget"],
                   max(16 * 1024 * 1024, 4 * block_bytes + (4 << 20))))
    return pltpu.CompilerParams(dimension_semantics=semantics,
                                vmem_limit_bytes=vmem)


def _pick_tk(kw, cap):
    """K tile: never an unbounded single block for awkward K."""
    if kw <= cap:
        return kw
    if kw % cap == 0:
        return cap
    for d in range(cap, 127, -128):
        if kw % d == 0:
            return d
    return kw


# --------------------------------------------------------------------------
# Pallas kernels
# --------------------------------------------------------------------------
def _fused_matmul_direct_kernel(*refs, relu, has_res):
    """Single-K-step matmul: dot + bias (+res) (+relu), no accumulator scratch."""
    if has_res:
        x_ref, w_ref, b_ref, r_ref, o_ref = refs
    else:
        x_ref, w_ref, b_ref, o_ref = refs
        r_ref = None
    y = jnp.dot(x_ref[...], w_ref[...],
                preferred_element_type=jnp.float32) + b_ref[...]
    if r_ref is not None:
        y = y + r_ref[...].astype(jnp.float32)
    if relu:
        y = jnp.maximum(y, 0.0)
    o_ref[...] = y.astype(o_ref.dtype)


def _fused_matmul_acc_kernel(*refs, relu, has_res):
    """acc += x @ w (bf16 -> f32 on MXU); f32 epilogue at the last K step."""
    if has_res:
        x_ref, w_ref, b_ref, r_ref, o_ref, acc_ref = refs
    else:
        x_ref, w_ref, b_ref, o_ref, acc_ref = refs
        r_ref = None

    @pl.when(pl.program_id(1) == 0)
    def _init():
        acc_ref[...] = jnp.zeros_like(acc_ref)

    acc_ref[...] += jnp.dot(x_ref[...], w_ref[...],
                            preferred_element_type=jnp.float32)

    @pl.when(pl.program_id(1) == pl.num_programs(1) - 1)
    def _epilogue():
        y = acc_ref[...] + b_ref[...]
        if r_ref is not None:
            y = y + r_ref[...].astype(jnp.float32)
        if relu:
            y = jnp.maximum(y, 0.0)
        o_ref[...] = y.astype(o_ref.dtype)


def _conv3x3_kernel(x_ref, w_ref, b_ref, o_ref, col_ref, *, Ho, Wo, Cin, Cout):
    """3x3 / stride-1 / pad-1 conv: build the 9-tap im2col once into a VMEM
    scratch, then ONE (Ho*Wo, 9*Cin) @ (9*Cin, Cout) MXU matmul. BN folded into
    weights/bias; ReLU fused."""
    for dh in range(3):
        for dw in range(3):
            tap = dh * 3 + dw
            col_ref[0, :, :, tap * Cin:(tap + 1) * Cin] = (
                x_ref[0, dh:dh + Ho, dw:dw + Wo, :])
    cols = col_ref[...].reshape(Ho * Wo, 9 * Cin)
    y = jnp.dot(cols, w_ref[...], preferred_element_type=jnp.float32)
    y = jnp.maximum(y + b_ref[...], 0.0)
    o_ref[...] = y.reshape(1, Ho, Wo, Cout).astype(o_ref.dtype)


# --------------------------------------------------------------------------
# Pallas wrappers
# --------------------------------------------------------------------------
def fused_matmul(x, w, bias, residual=None, relu=True,
                 out_dtype=jnp.bfloat16, w_taps=1):
    """(M, w_taps*Kw) @ (Kw, C) with fused bias (+ residual) (+ relu).
    When w_taps > 1 the same weight block serves every tap of x (pool fusion)."""
    caps = _tpu_caps()
    x = x.astype(jnp.bfloat16)
    w = w.astype(jnp.bfloat16)
    M, Ktot = x.shape
    Kw, C = w.shape
    assert Ktot == w_taps * Kw, (Ktot, w_taps, Kw)

    tm = min(caps["tile_m"], _round_up(M, 16))           # bf16: 16-row granules
    if caps["two_cores"] and tm >= 256 and M <= tm:
        tm = _round_up(tm // 2, 16)                       # feed both v7x cores
    Mp = _round_up(M, tm)
    if Mp != M:
        x = jnp.pad(x, ((0, Mp - M), (0, 0)))

    tk = _pick_tk(Kw, caps["tile_k"])
    nkw = Kw // tk
    nk = w_taps * nkw

    has_res = residual is not None
    bias2 = bias.reshape(1, C).astype(jnp.float32)
    inputs = [x, w, bias2]
    if has_res:
        r = residual.astype(jnp.bfloat16)
        if Mp != M:
            r = jnp.pad(r, ((0, Mp - M), (0, 0)))
        inputs.append(r)

    block_bytes = (tm * tk * 2 + tk * C * 2 + C * 4 + tm * C * 2
                   + (tm * C * 4 if nk > 1 else 0)
                   + (tm * C * 2 if has_res else 0))
    flops = 2 * Mp * Ktot * C
    bytes_accessed = 2 * (Mp * Ktot + Kw * C + Mp * C
                          + (Mp * C if has_res else 0)) + 4 * C

    if nk == 1:
        in_specs = [pl.BlockSpec((tm, Ktot), lambda i: (i, 0)),
                    pl.BlockSpec((Kw, C), lambda i: (0, 0)),
                    pl.BlockSpec((1, C), lambda i: (0, 0))]
        if has_res:
            in_specs.append(pl.BlockSpec((tm, C), lambda i: (i, 0)))
        grid_spec = pltpu.PrefetchScalarGridSpec(
            num_scalar_prefetch=0, grid=(Mp // tm,),
            in_specs=in_specs,
            out_specs=pl.BlockSpec((tm, C), lambda i: (i, 0)))
        kernel = functools.partial(_fused_matmul_direct_kernel,
                                   relu=relu, has_res=has_res)
        semantics = ("parallel",)
    else:
        if w_taps == 1:
            w_index = lambda i, k: (k, 0)
        elif nkw == 1:
            w_index = lambda i, k: (0, 0)          # same weight block for all taps
        else:
            w_index = lambda i, k, _n=nkw: (k % _n, 0)
        in_specs = [pl.BlockSpec((tm, tk), lambda i, k: (i, k)),
                    pl.BlockSpec((tk, C), w_index),
                    pl.BlockSpec((1, C), lambda i, k: (0, 0))]
        if has_res:
            in_specs.append(pl.BlockSpec((tm, C), lambda i, k: (i, 0)))
        grid_spec = pltpu.PrefetchScalarGridSpec(
            num_scalar_prefetch=0, grid=(Mp // tm, nk),
            in_specs=in_specs,
            out_specs=pl.BlockSpec((tm, C), lambda i, k: (i, 0)),
            scratch_shapes=[pltpu.VMEM((tm, C), jnp.float32)])
        kernel = functools.partial(_fused_matmul_acc_kernel,
                                   relu=relu, has_res=has_res)
        semantics = ("parallel", "arbitrary")

    out = pl.pallas_call(
        kernel,
        out_shape=jax.ShapeDtypeStruct((Mp, C), out_dtype),
        grid_spec=grid_spec,
        compiler_params=_compiler_params(semantics, block_bytes),
        cost_estimate=pl.CostEstimate(flops=flops, transcendentals=0,
                                      bytes_accessed=bytes_accessed),
    )(*inputs)
    return out[:M] if Mp != M else out


def conv3x3_bn_relu(x, p):
    """Stride-1 3x3 conv + folded BN + ReLU; grid over the batch dimension."""
    N, H, W, Cin = x.shape
    Cout = p["w"].shape[-1]
    assert p["w"].shape[0] == 9 * Cin, (p["w"].shape, Cin)
    xp = jnp.pad(x.astype(jnp.bfloat16), ((0, 0), (1, 1), (1, 1), (0, 0)))
    Ho, Wo = H, W
    bias = p["bias"].reshape(1, Cout).astype(jnp.float32)

    block_bytes = ((H + 2) * (W + 2) * Cin * 2 + Ho * Wo * 9 * Cin * 2
                   + 9 * Cin * Cout * 2 + Cout * 4 + Ho * Wo * Cout * 2)
    flops = 2 * N * Ho * Wo * 9 * Cin * Cout
    bytes_accessed = 2 * (N * (H + 2) * (W + 2) * Cin + 9 * Cin * Cout
                          + N * Ho * Wo * Cout) + 4 * Cout

    return pl.pallas_call(
        functools.partial(_conv3x3_kernel, Ho=Ho, Wo=Wo, Cin=Cin, Cout=Cout),
        out_shape=jax.ShapeDtypeStruct((N, Ho, Wo, Cout), jnp.bfloat16),
        grid=(N,),
        in_specs=[
            pl.BlockSpec((1, H + 2, W + 2, Cin), lambda n: (n, 0, 0, 0)),
            pl.BlockSpec((9 * Cin, Cout), lambda n: (0, 0)),
            pl.BlockSpec((1, Cout), lambda n: (0, 0)),
        ],
        out_specs=pl.BlockSpec((1, Ho, Wo, Cout), lambda n: (n, 0, 0, 0)),
        scratch_shapes=[pltpu.VMEM((1, Ho, Wo, 9 * Cin), jnp.bfloat16)],
        compiler_params=_compiler_params(("parallel",), block_bytes),
        cost_estimate=pl.CostEstimate(flops=flops, transcendentals=0,
                                      bytes_accessed=bytes_accessed),
    )(xp, p["w"], bias)


# --------------------------------------------------------------------------
# Conv / pooling glue (im2col only used for the tiny stride-2 stem conv)
# --------------------------------------------------------------------------
def _im2col_3x3(x, stride):
    N, H, W, C = x.shape
    xp = jnp.pad(x, ((0, 0), (1, 1), (1, 1), (0, 0)))
    Ho = (H + 2 - 3) // stride + 1
    Wo = (W + 2 - 3) // stride + 1
    patches = [xp[:, dh:dh + stride * (Ho - 1) + 1:stride,
                     dw:dw + stride * (Wo - 1) + 1:stride, :]
               for dh in range(3) for dw in range(3)]
    cols = jnp.stack(patches, axis=3)           # (N, Ho, Wo, 9, C)
    return cols.reshape(N * Ho * Wo, 9 * C), (N, Ho, Wo)


def conv3x3_s2_bn_relu(x, p):
    # Stem conv1 (stride 2, Cin=3): K = 27, the materialized im2col is tiny.
    cols, (N, Ho, Wo) = _im2col_3x3(x, stride=2)
    out = fused_matmul(cols, p["w"], p["bias"], relu=True)
    return out.reshape(N, Ho, Wo, -1)


def conv1x1(x, p, relu=True, residual=None):
    N, H, W, C = x.shape
    res = residual.reshape(N * H * W, -1) if residual is not None else None
    out = fused_matmul(x.reshape(N * H * W, C), p["w"], p["bias"],
                       residual=res, relu=relu)
    return out.reshape(N, H, W, -1)


def _pool2x2_cols(x):
    N, H, W, C = x.shape
    Ho, Wo = H // 2, W // 2
    cols = x.reshape(N, Ho, 2, Wo, 2, C).transpose(0, 1, 3, 2, 4, 5)
    return cols.reshape(N * Ho * Wo, 4 * C), (N, Ho, Wo)


def pooled_conv1x1(x, p, relu=True, residual=None):
    # AvgPool2d(2) + 1x1 conv in ONE MXU pass.  The 0.25 is folded into the f32
    # weights at init; the same (Cin, Cout) weight block is reused for all 4 pool
    # taps via the K-axis index_map (w_taps=4) -> no per-forward weight tiling.
    cols, (N, Ho, Wo) = _pool2x2_cols(x)
    res = residual.reshape(N * Ho * Wo, -1) if residual is not None else None
    out = fused_matmul(cols, p["w"], p["bias"], residual=res, relu=relu, w_taps=4)
    return out.reshape(N, Ho, Wo, -1)


# --------------------------------------------------------------------------
# Parameter init (BN folded; channels zero-padded to multiples of 128)
# --------------------------------------------------------------------------
def _init_conv_bn(key, cin, cout, ksize, cin_pad=None, pool_scale=1.0):
    cin_pad = cin if cin_pad is None else cin_pad
    cout_pad = _cpad(cout)
    k1, k2, k3, k4, k5 = jax.random.split(key, 5)
    fan_in = cin * ksize * ksize
    if ksize == 1:
        w = jax.random.normal(k1, (cin, cout), jnp.float32) / jnp.sqrt(fan_in)
    else:  # (tap, cin, cout), tap = kh*3 + kw
        w = jax.random.normal(k1, (ksize * ksize, cin, cout),
                              jnp.float32) / jnp.sqrt(fan_in)
    gamma = jax.random.uniform(k2, (cout,), jnp.float32, 0.5, 1.5)
    beta = jax.random.normal(k3, (cout,), jnp.float32) * 0.1
    mean = jax.random.normal(k4, (cout,), jnp.float32) * 0.1
    var = jax.random.uniform(k5, (cout,), jnp.float32, 0.5, 1.5)
    eps = 1e-5
    scale = gamma / jnp.sqrt(var + eps)
    bias = beta - mean * scale
    w = w * scale * pool_scale            # BN scale (+ avgpool 0.25) folded in f32

    if ksize == 1:
        wp = jnp.zeros((cin_pad, cout_pad), jnp.float32).at[:cin, :cout].set(w)
    else:
        wp = jnp.zeros((9, cin_pad, cout_pad), jnp.float32
                       ).at[:, :cin, :cout].set(w)
        wp = wp.reshape(9 * cin_pad, cout_pad)           # tap-major rows
    bp = jnp.zeros((cout_pad,), jnp.float32).at[:cout].set(bias)
    return {"w": wp.astype(jnp.bfloat16), "bias": bp}


def init_clip_resnet(key, width=16, layers=(1, 1, 1, 1)):
    """Returns (params, config): params = arrays only (jit-traced),
    config = static python structure (stride / downsample / pre_pool / channels)."""
    keys = iter(jax.random.split(key, 256))
    c_stem = width // 2
    params = {
        "conv1": _init_conv_bn(next(keys), 3, c_stem, 3, cin_pad=3),
        "conv2": _init_conv_bn(next(keys), c_stem, c_stem, 3, cin_pad=_cpad(c_stem)),
        "conv3": _init_conv_bn(next(keys), c_stem, width, 3, cin_pad=_cpad(c_stem)),
    }
    config = {}
    inplanes = width
    layer_strides = (1, 2, 2, 2)
    for li, name in enumerate(("layer1", "layer2", "layer3", "layer4")):
        planes = width * (2 ** li)
        p_blks, c_blks = [], []
        for bi in range(layers[li]):
            s = layer_strides[li] if bi == 0 else 1
            need_ds = (s > 1) or (inplanes != planes * 4)
            # the stem AvgPool2d(2) is fused into layer1's first block
            pre_pool = (name == "layer1" and bi == 0)
            pool_c1 = pre_pool
            pool_ds = (s > 1) or pre_pool
            pool_c3 = s > 1
            in_pad = _cpad(inplanes)
            p_blks.append({
                "conv1": _init_conv_bn(next(keys), inplanes, planes, 1,
                                       cin_pad=in_pad,
                                       pool_scale=0.25 if pool_c1 else 1.0),
                "conv2": _init_conv_bn(next(keys), planes, planes, 3,
                                       cin_pad=_cpad(planes)),
                "conv3": _init_conv_bn(next(keys), planes, planes * 4, 1,
                                       cin_pad=_cpad(planes),
                                       pool_scale=0.25 if pool_c3 else 1.0),
                "downsample": (_init_conv_bn(next(keys), inplanes, planes * 4, 1,
                                             cin_pad=in_pad,
                                             pool_scale=0.25 if pool_ds else 1.0)
                               if need_ds else None),
            })
            c_blks.append({
                "stride": s,                      # static python int
                "has_downsample": need_ds,        # static python bool
                "pre_pool": pre_pool,
            })
            inplanes = planes * 4
        params[name] = p_blks
        config[name] = c_blks
        config[name + "_channels"] = inplanes     # true (un-padded) channel count
    return params, config


# --------------------------------------------------------------------------
# Forward (stem + layer1..4, returning the hook-captured features dict)
# --------------------------------------------------------------------------
def _bottleneck(x, p, cfg):
    stride = cfg["stride"]
    pre_pool = cfg["pre_pool"]

    # conv1 + bn1 + relu1 (optionally fused with the stem's AvgPool2d(2))
    out = pooled_conv1x1(x, p["conv1"]) if pre_pool else conv1x1(x, p["conv1"])

    # conv2 (3x3, stride 1) + bn2 + relu2
    out = conv3x3_bn_relu(out, p["conv2"])

    # identity / downsample path (CLIP's anti-alias avgpool fused into the 1x1)
    if cfg["has_downsample"]:
        if stride > 1 or pre_pool:
            identity = pooled_conv1x1(x, p["downsample"], relu=False)
        else:
            identity = conv1x1(x, p["downsample"], relu=False)
    else:
        identity = x   # pre_pool blocks always carry a downsample by construction

    # [avgpool(stride)] + conv3 + bn3 + residual add + relu3 in one fused call
    if stride > 1:
        out = pooled_conv1x1(out, p["conv3"], relu=True, residual=identity)
    else:
        out = conv1x1(out, p["conv3"], relu=True, residual=identity)
    return out


def clip_feature_extractor_forward(x_nchw, params, config):
    x = jnp.transpose(x_nchw, (0, 2, 3, 1)).astype(jnp.bfloat16)  # NCHW -> NHWC
    # stem
    x = conv3x3_s2_bn_relu(x, params["conv1"])
    x = conv3x3_bn_relu(x, params["conv2"])
    x = conv3x3_bn_relu(x, params["conv3"])
    # (stem AvgPool2d(2) is fused into layer1 block 0 via pre_pool)
    features = {}
    for name in ("layer1", "layer2", "layer3", "layer4"):
        for p_blk, c_blk in zip(params[name], config[name]):
            x = _bottleneck(x, p_blk, c_blk)
        # forward-hook layout: NCHW, f32 (slice away the channel padding)
        c_true = config[name + "_channels"]
        features[name] = jnp.transpose(
            x[..., :c_true], (0, 3, 1, 2)).astype(jnp.float32)
    return features


# --------------------------------------------------------------------------
if __name__ == "__main__":
    key = jax.random.PRNGKey(0)
    k_param, k_in = jax.random.split(key)

    width = 16                       # scaled-down "RN50" width (real model uses 64)
    params, config = init_clip_resnet(k_param, width=width, layers=(1, 1, 1, 1))

    x = jax.random.normal(k_in, (2, 3, 32, 32), jnp.float32)  # NCHW input

    fwd = jax.jit(functools.partial(clip_feature_extractor_forward, config=config))
    feats = fwd(x, params)
    feats = jax.tree_util.tree_map(jax.block_until_ready, feats)

    expected = {
        "layer1": (2, width * 4, 8, 8),
        "layer2": (2, width * 8, 4, 4),
        "layer3": (2, width * 16, 2, 2),
        "layer4": (2, width * 32, 1, 1),
    }
    for name, shp in expected.items():
        assert feats[name].shape == shp, (name, feats[name].shape, shp)
        assert bool(jnp.all(jnp.isfinite(feats[name])))

    print("KERNEL_OK")
</pallas_src>

<mosaic_0001>
module attributes {stable_mosaic.version = 11 : i64} {
  func.func @_fused_matmul_direct_kernel(%arg0: i32, %arg1: memref<256x27xbf16, #tpu.memory_space<vmem>>, %arg2: memref<27x128xbf16, #tpu.memory_space<vmem>>, %arg3: memref<1x128xf32, #tpu.memory_space<vmem>>, %arg4: memref<256x128xbf16, #tpu.memory_space<vmem>>) attributes {dimension_semantics = [#tpu.dimension_semantics<parallel>], iteration_bounds = array<i64: 2>, scalar_prefetch = 0 : i64, scratch_operands = 0 : i64, tpu.core_type = #tpu.core_type<tc>, window_params = [{transform_indices = @transform_0, window_bounds = array<i64: 256, 27>}, {pipeline_mode = #tpu.pipeline_mode<synchronous>, transform_indices = @transform_1, window_bounds = array<i64: 27, 128>}, {pipeline_mode = #tpu.pipeline_mode<synchronous>, transform_indices = @transform_2, window_bounds = array<i64: 1, 128>}, {transform_indices = @transform_3, window_bounds = array<i64: 256, 128>}]} {
    %c0 = arith.constant 0 : index
    %c0_0 = arith.constant 0 : index
    %0 = vector.load %arg1[%c0, %c0_0] : memref<256x27xbf16, #tpu.memory_space<vmem>>, vector<256x27xbf16>
    %c0_1 = arith.constant 0 : index
    %c0_2 = arith.constant 0 : index
    %1 = vector.load %arg2[%c0_1, %c0_2] : memref<27x128xbf16, #tpu.memory_space<vmem>>, vector<27x128xbf16>
    %cst = arith.constant dense<0.000000e+00> : vector<256x128xf32>
    %2 = tpu.matmul %0, %1, %cst {dimension_numbers = #tpu.dot_dimension_numbers<[1], [0], [0], [1], [0, 0, 1, 1], [], []>} : vector<256x27xbf16>, vector<27x128xbf16>, vector<256x128xf32> -> vector<256x128xf32>
    %c0_3 = arith.constant 0 : index
    %c0_4 = arith.constant 0 : index
    %3 = vector.load %arg3[%c0_3, %c0_4] : memref<1x128xf32, #tpu.memory_space<vmem>>, vector<1x128xf32>
    %4 = vector.broadcast %3 : vector<1x128xf32> to vector<256x128xf32>
    %5 = arith.addf %2, %4 : vector<256x128xf32>
    %cst_5 = arith.constant 0.000000e+00 : f32
    %6 = vector.broadcast %cst_5 : f32 to vector<256x128xf32>
    %7 = arith.maximumf %5, %6 : vector<256x128xf32>
    %8 = arith.truncf %7 : vector<256x128xf32> to vector<256x128xbf16>
    %c0_6 = arith.constant 0 : index
    %c0_7 = arith.constant 0 : index
    %9 = vector.load %arg4[%c0_6, %c0_7] : memref<256x128xbf16, #tpu.memory_space<vmem>>, vector<256x128xbf16>
    tpu.vector_store %arg4[%c0_6, %c0_7], %8 {strides = array<i32>} : memref<256x128xbf16, #tpu.memory_space<vmem>>, vector<256x128xbf16>,
    return
  }
  func.func @transform_0(%arg0: i32) -> (i32, i32) {
    %c0_i32 = arith.constant 0 : i32
    %c0_i32_0 = arith.constant 0 : i32
    return %arg0, %c0_i32 : i32, i32
  }
  func.func @transform_1(%arg0: i32) -> (i32, i32) {
    %c0_i32 = arith.constant 0 : i32
    %c0_i32_0 = arith.constant 0 : i32
    %c0_i32_1 = arith.constant 0 : i32
    return %c0_i32, %c0_i32_0 : i32, i32
  }
  func.func @transform_2(%arg0: i32) -> (i32, i32) {
    %c0_i32 = arith.constant 0 : i32
    %c0_i32_0 = arith.constant 0 : i32
    %c0_i32_1 = arith.constant 0 : i32
    return %c0_i32, %c0_i32_0 : i32, i32
  }
  func.func @transform_3(%arg0: i32) -> (i32, i32) {
    %c0_i32 = arith.constant 0 : i32
    %c0_i32_0 = arith.constant 0 : i32
    return %arg0, %c0_i32 : i32, i32
  }
}

module attributes {stable_mosaic.version = 11 : i64} {
  func.func @_conv3x3_kernel(%arg0: i32, %arg1: memref<1x18x18x128xbf16, #tpu.memory_space<vmem>>, %arg2: memref<1152x128xbf16, #tpu.memory_space<vmem>>, %arg3: memref<1x128xf32, #tpu.memory_space<vmem>>, %arg4: memref<1x16x16x128xbf16, #tpu.memory_space<vmem>>, %arg5: memref<1x16x16x1152xbf16, #tpu.memory_space<vmem>>) attributes {dimension_semantics = [#tpu.dimension_semantics<parallel>], iteration_bounds = array<i64: 2>, scalar_prefetch = 0 : i64, scratch_operands = 1 : i64, tpu.core_type = #tpu.core_type<tc>, window_params = [{transform_indices = @transform_0, window_bounds = array<i64: 1, 18, 18, 128>}, {pipeline_mode = #tpu.pipeline_mode<synchronous>, transform_indices = @transform_1, window_bounds = array<i64: 1152, 128>}, {pipeline_mode = #tpu.pipeline_mode<synchronous>, transform_indices = @transform_2, window_bounds = array<i64: 1, 128>}, {transform_indices = @transform_3, window_bounds = array<i64: 1, 16, 16, 128>}]} {
    %c0 = arith.constant 0 : index
    %c0_0 = arith.constant 0 : index
    %c0_1 = arith.constant 0 : index
    %c0_2 = arith.constant 0 : index
    %0 = vector.load %arg1[%c0, %c0_0, %c0_1, %c0_2] : memref<1x18x18x128xbf16, #tpu.memory_space<vmem>>, vector<1x16x16x128xbf16>
    %1 = vector.shape_cast %0 : vector<1x16x16x128xbf16> to vector<16x16x128xbf16>
    %c0_3 = arith.constant 0 : index
    %c0_4 = arith.constant 0 : index
    %c0_5 = arith.constant 0 : index
    %c0_6 = arith.constant 0 : index
    %2 = vector.load %arg5[%c0_3, %c0_4, %c0_5, %c0_6] : memref<1x16x16x1152xbf16, #tpu.memory_space<vmem>>, vector<1x16x16x128xbf16>
    %3 = vector.shape_cast %2 : vector<1x16x16x128xbf16> to vector<16x16x128xbf16>
    %4 = vector.shape_cast %1 : vector<16x16x128xbf16> to vector<1x16x16x128xbf16>
    tpu.vector_store %arg5[%c0_3, %c0_4, %c0_5, %c0_6], %4 {strides = array<i32>} : memref<1x16x16x1152xbf16, #tpu.memory_space<vmem>>, vector<1x16x16x128xbf16>,
    %c0_7 = arith.constant 0 : index
    %c0_8 = arith.constant 0 : index
    %c1 = arith.constant 1 : index
    %c0_9 = arith.constant 0 : index
    %5 = vector.load %arg1[%c0_7, %c0_8, %c1, %c0_9] : memref<1x18x18x128xbf16, #tpu.memory_space<vmem>>, vector<1x16x16x128xbf16>
    %6 = vector.shape_cast %5 : vector<1x16x16x128xbf16> to vector<16x16x128xbf16>
    %c0_10 = arith.constant 0 : index
    %c0_11 = arith.constant 0 : index
    %c0_12 = arith.constant 0 : index
    %c128 = arith.constant 128 : index
    %7 = vector.load %arg5[%c0_10, %c0_11, %c0_12, %c128] : memref<1x16x16x1152xbf16, #tpu.memory_space<vmem>>, vector<1x16x16x128xbf16>
    %8 = vector.shape_cast %7 : vector<1x16x16x128xbf16> to vector<16x16x128xbf16>
    %9 = vector.shape_cast %6 : vector<16x16x128xbf16> to vector<1x16x16x128xbf16>
    tpu.vector_store %arg5[%c0_10, %c0_11, %c0_12, %c128], %9 {strides = array<i32>} : memref<1x16x16x1152xbf16, #tpu.memory_space<vmem>>, vector<1x16x16x128xbf16>,
    %c0_13 = arith.constant 0 : index
    %c0_14 = arith.constant 0 : index
    %c2 = arith.constant 2 : index
    %c0_15 = arith.constant 0 : index
    %10 = vector.load %arg1[%c0_13, %c0_14, %c2, %c0_15] : memref<1x18x18x128xbf16, #tpu.memory_space<vmem>>, vector<1x16x16x128xbf16>
    %11 = vector.shape_cast %10 : vector<1x16x16x128xbf16> to vector<16x16x128xbf16>
    %c0_16 = arith.constant 0 : index
    %c0_17 = arith.constant 0 : index
    %c0_18 = arith.constant 0 : index
    %c256 = arith.constant 256 : index
    %12 = vector.load %arg5[%c0_16, %c0_17, %c0_18, %c256] : memref<1x16x16x1152xbf16, #tpu.memory_space<vmem>>, vector<1x16x16x128xbf16>
    %13 = vector.shape_cast %12 : vector<1x16x16x128xbf16> to vector<16x16x128xbf16>
    %14 = vector.shape_cast %11 : vector<16x16x128xbf16> to vector<1x16x16x128xbf16>
    tpu.vector_store %arg5[%c0_16, %c0_17, %c0_18, %c256], %14 {strides = array<i32>} : memref<1x16x16x1152xbf16, #tpu.memory_space<vmem>>, vector<1x16x16x128xbf16>,
    %c0_19 = arith.constant 0 : index
    %c1_20 = arith.constant 1 : index
    %c0_21 = arith.constant 0 : index
    %c0_22 = arith.constant 0 : index
    %15 = vector.load %arg1[%c0_19, %c1_20, %c0_21, %c0_22] : memref<1x18x18x128xbf16, #tpu.memory_space<vmem>>, vector<1x16x16x128xbf16>
    %16 = vector.shape_cast %15 : vector<1x16x16x128xbf16> to vector<16x16x128xbf16>
    %c0_23 = arith.constant 0 : index
    %c0_24 = arith.constant 0 : index
    %c0_25 = arith.constant 0 : index
    %c384 = arith.constant 384 : index
    %17 = vector.load %arg5[%c0_23, %c0_24, %c0_25, %c384] : memref<1x16x16x1152xbf16, #tpu.memory_space<vmem>>, vector<1x16x16x128xbf16>
    %18 = vector.shape_cast %17 : vector<1x16x16x128xbf16> to vector<16x16x128xbf16>
    %19 = vector.shape_cast %16 : vector<16x16x128xbf16> to vector<1x16x16x128xbf16>
    tpu.vector_store %arg5[%c0_23, %c0_24, %c0_25, %c384], %19 {strides = array<i32>} : memref<1x16x16x1152xbf16, #tpu.memory_space<vmem>>, vector<1x16x16x128xbf16>,
    %c0_26 = arith.constant 0 : index
    %c1_27 = arith.constant 1 : index
    %c1_28 = arith.constant 1 : index
    %c0_29 = arith.constant 0 : index
    %20 = vector.load %arg1[%c0_26, %c1_27, %c1_28, %c0_29] : memref<1x18x18x128xbf16, #tpu.memory_space<vmem>>, vector<1x16x16x128xbf16>
    %21 = vector.shape_cast %20 : vector<1x16x16x128xbf16> to vector<16x16x128xbf16>
    %c0_30 = arith.constant 0 : index
    %c0_31 = arith.constant 0 : index
    %c0_32 = arith.constant 0 : index
    %c512 = arith.constant 512 : index
    %22 = vector.load %arg5[%c0_30, %c0_31, %c0_32, %c512] : memref<1x16x16x1152xbf16, #tpu.memory_space<vmem>>, vector<1x16x16x128xbf16>
    %23 = vector.shape_cast %22 : vector<1x16x16x128xbf16> to vector<16x16x128xbf16>
    %24 = vector.shape_cast %21 : vector<16x16x128xbf16> to vector<1x16x16x128xbf16>
    tpu.vector_store %arg5[%c0_30, %c0_31, %c0_32, %c512], %24 {strides = array<i32>} : memref<1x16x16x1152xbf16, #tpu.memory_space<vmem>>, vector<1x16x16x128xbf16>,
    %c0_33 = arith.constant 0 : index
    %c1_34 = arith.constant 1 : index
    %c2_35 = arith.constant 2 : index
    %c0_36 = arith.constant 0 : index
    %25 = vector.load %arg1[%c0_33, %c1_34, %c2_35, %c0_36] : memref<1x18x18x128xbf16, #tpu.memory_space<vmem>>, vector<1x16x16x128xbf16>
    %26 = vector.shape_cast %25 : vector<1x16x16x128xbf16> to vector<16x16x128xbf16>
    %c0_37 = arith.constant 0 : index
    %c0_38 = arith.constant 0 : index
    %c0_39 = arith.constant 0 : index
    %c640 = arith.constant 640 : index
    %27 = vector.load %arg5[%c0_37, %c0_38, %c0_39, %c640] : memref<1x16x16x1152xbf16, #tpu.memory_space<vmem>>, vector<1x16x16x128xbf16>
    %28 = vector.shape_cast %27 : vector<1x16x16x128xbf16> to vector<16x16x128xbf16>
    %29 = vector.shape_cast %26 : vector<16x16x128xbf16> to vector<1x16x16x128xbf16>
    tpu.vector_store %arg5[%c0_37, %c0_38, %c0_39, %c640], %29 {strides = array<i32>} : memref<1x16x16x1152xbf16, #tpu.memory_space<vmem>>, vector<1x16x16x128xbf16>,
    %c0_40 = arith.constant 0 : index
    %c2_41 = arith.constant 2 : index
    %c0_42 = arith.constant 0 : index
    %c0_43 = arith.constant 0 : index
    %30 = vector.load %arg1[%c0_40, %c2_41, %c0_42, %c0_43] : memref<1x18x18x128xbf16, #tpu.memory_space<vmem>>, vector<1x16x16x128xbf16>
    %31 = vector.shape_cast %30 : vector<1x16x16x128xbf16> to vector<16x16x128xbf16>
    %c0_44 = arith.constant 0 : index
    %c0_45 = arith.constant 0 : index
    %c0_46 = arith.constant 0 : index
    %c768 = arith.constant 768 : index
    %32 = vector.load %arg5[%c0_44, %c0_45, %c0_46, %c768] : memref<1x16x16x1152xbf16, #tpu.memory_space<vmem>>, vector<1x16x16x128xbf16>
    %33 = vector.shape_cast %32 : vector<1x16x16x128xbf16> to vector<16x16x128xbf16>
    %34 = vector.shape_cast %31 : vector<16x16x128xbf16> to vector<1x16x16x128xbf16>
    tpu.vector_store %arg5[%c0_44, %c0_45, %c0_46, %c768], %34 {strides = array<i32>} : memref<1x16x16x1152xbf16, #tpu.memory_space<vmem>>, vector<1x16x16x128xbf16>,
    %c0_47 = arith.constant 0 : index
    %c2_48 = arith.constant 2 : index
    %c1_49 = arith.constant 1 : index
    %c0_50 = arith.constant 0 : index
    %35 = vector.load %arg1[%c0_47, %c2_48, %c1_49, %c0_50] : memref<1x18x18x128xbf16, #tpu.memory_space<vmem>>, vector<1x16x16x128xbf16>
    %36 = vector.shape_cast %35 : vector<1x16x16x128xbf16> to vector<16x16x128xbf16>
    %c0_51 = arith.constant 0 : index
    %c0_52 = arith.constant 0 : index
    %c0_53 = arith.constant 0 : index
    %c896 = arith.constant 896 : index
    %37 = vector.load %arg5[%c0_51, %c0_52, %c0_53, %c896] : memref<1x16x16x1152xbf16, #tpu.memory_space<vmem>>, vector<1x16x16x128xbf16>
    %38 = vector.shape_cast %37 : vector<1x16x16x128xbf16> to vector<16x16x128xbf16>
    %39 = vector.shape_cast %36 : vector<16x16x128xbf16> to vector<1x16x16x128xbf16>
    tpu.vector_store %arg5[%c0_51, %c0_52, %c0_53, %c896], %39 {strides = array<i32>} : memref<1x16x16x1152xbf16, #tpu.memory_space<vmem>>, vector<1x16x16x128xbf16>,
    %c0_54 = arith.constant 0 : index
    %c2_55 = arith.constant 2 : index
    %c2_56 = arith.constant 2 : index
    %c0_57 = arith.constant 0 : index
    %40 = vector.load %arg1[%c0_54, %c2_55, %c2_56, %c0_57] : memref<1x18x18x128xbf16, #tpu.memory_space<vmem>>, vector<1x16x16x128xbf16>
    %41 = vector.shape_cast %40 : vector<1x16x16x128xbf16> to vector<16x16x128xbf16>
    %c0_58 = arith.constant 0 : index
    %c0_59 = arith.constant 0 : index
    %c0_60 = arith.constant 0 : index
    %c1024 = arith.constant 1024 : index
    %42 = vector.load %arg5[%c0_58, %c0_59, %c0_60, %c1024] : memref<1x16x16x1152xbf16, #tpu.memory_space<vmem>>, vector<1x16x16x128xbf16>
    %43 = vector.shape_cast %42 : vector<1x16x16x128xbf16> to vector<16x16x128xbf16>
    %44 = vector.shape_cast %41 : vector<16x16x128xbf16> to vector<1x16x16x128xbf16>
    tpu.vector_store %arg5[%c0_58, %c0_59, %c0_60, %c1024], %44 {strides = array<i32>} : memref<1x16x16x1152xbf16, #tpu.memory_space<vmem>>, vector<1x16x16x128xbf16>,
    %c0_61 = arith.constant 0 : index
    %c0_62 = arith.constant 0 : index
    %c0_63 = arith.constant 0 : index
    %c0_64 = arith.constant 0 : index
    %45 = vector.load %arg5[%c0_61, %c0_62, %c0_63, %c0_64] : memref<1x16x16x1152xbf16, #tpu.memory_space<vmem>>, vector<1x16x16x1152xbf16>
    %46 = vector.shape_cast %45 : vector<1x16x16x1152xbf16> to vector<256x1152xbf16>
    %c0_65 = arith.constant 0 : index
    %c0_66 = arith.constant 0 : index
    %47 = vector.load %arg2[%c0_65, %c0_66] : memref<1152x128xbf16, #tpu.memory_space<vmem>>, vector<1152x128xbf16>
    %cst = arith.constant dense<0.000000e+00> : vector<256x128xf32>
    %48 = tpu.matmul %46, %47, %cst {dimension_numbers = #tpu.dot_dimension_numbers<[1], [0], [0], [1], [0, 0, 1, 1], [], []>} : vector<256x1152xbf16>, vector<1152x128xbf16>, vector<256x128xf32> -> vector<256x128xf32>
    %c0_67 = arith.constant 0 : index
    %c0_68 = arith.constant 0 : index
    %49 = vector.load %arg3[%c0_67, %c0_68] : memref<1x128xf32, #tpu.memory_space<vmem>>, vector<1x128xf32>
    %50 = vector.broadcast %49 : vector<1x128xf32> to vector<256x128xf32>
    %51 = arith.addf %48, %50 : vector<256x128xf32>
    %cst_69 = arith.constant 0.000000e+00 : f32
    %52 = vector.broadcast %cst_69 : f32 to vector<256x128xf32>
    %53 = arith.maximumf %51, %52 : vector<256x128xf32>
    %54 = vector.shape_cast %53 : vector<256x128xf32> to vector<1x16x16x128xf32>
    %55 = arith.truncf %54 : vector<1x16x16x128xf32> to vector<1x16x16x128xbf16>
    %c0_70 = arith.constant 0 : index
    %c0_71 = arith.constant 0 : index
    %c0_72 = arith.constant 0 : index
    %c0_73 = arith.constant 0 : index
    %56 = vector.load %arg4[%c0_70, %c0_71, %c0_72, %c0_73] : memref<1x16x16x128xbf16, #tpu.memory_space<vmem>>, vector<1x16x16x128xbf16>
    tpu.vector_store %arg4[%c0_70, %c0_71, %c0_72, %c0_73], %55 {strides = array<i32>} : memref<1x16x16x128xbf16, #tpu.memory_space<vmem>>, vector<1x16x16x128xbf16>,
    return
  }
  func.func @transform_0(%arg0: i32) -> (i32, i32, i32, i32) {
    %c0_i32 = arith.constant 0 : i32
    %c0_i32_0 = arith.constant 0 : i32
    %c0_i32_1 = arith.constant 0 : i32
    %c0_i32_2 = arith.constant 0 : i32
    return %arg0, %c0_i32, %c0_i32_0, %c0_i32_1 : i32, i32, i32, i32
  }
  func.func @transform_1(%arg0: i32) -> (i32, i32) {
    %c0_i32 = arith.constant 0 : i32
    %c0_i32_0 = arith.constant 0 : i32
    %c0_i32_1 = arith.constant 0 : i32
    return %c0_i32, %c0_i32_0 : i32, i32
  }
  func.func @transform_2(%arg0: i32) -> (i32, i32) {
    %c0_i32 = arith.constant 0 : i32
    %c0_i32_0 = arith.constant 0 : i32
    %c0_i32_1 = arith.constant 0 : i32
    return %c0_i32, %c0_i32_0 : i32, i32
  }
  func.func @transform_3(%arg0: i32) -> (i32, i32, i32, i32) {
    %c0_i32 = arith.constant 0 : i32
    %c0_i32_0 = arith.constant 0 : i32
    %c0_i32_1 = arith.constant 0 : i32
    %c0_i32_2 = arith.constant 0 : i32
    return %arg0, %c0_i32, %c0_i32_0, %c0_i32_1 : i32, i32, i32, i32
  }
}

module attributes {stable_mosaic.version = 11 : i64} {
  func.func @_fused_matmul_acc_kernel(%arg0: i32, %arg1: i32, %arg2: memref<128x128xbf16, #tpu.memory_space<vmem>>, %arg3: memref<128x128xbf16, #tpu.memory_space<vmem>>, %arg4: memref<1x128xf32, #tpu.memory_space<vmem>>, %arg5: memref<128x128xbf16, #tpu.memory_space<vmem>>, %arg6: memref<128x128xf32, #tpu.memory_space<vmem>>) attributes {dimension_semantics = [#tpu.dimension_semantics<parallel>, #tpu.dimension_semantics<arbitrary>], iteration_bounds = array<i64: 1, 4>, scalar_prefetch = 0 : i64, scratch_operands = 1 : i64, tpu.core_type = #tpu.core_type<tc>, window_params = [{transform_indices = @transform_0, window_bounds = array<i64: 128, 128>}, {pipeline_mode = #tpu.pipeline_mode<synchronous>, transform_indices = @transform_1, window_bounds = array<i64: 128, 128>}, {pipeline_mode = #tpu.pipeline_mode<synchronous>, transform_indices = @transform_2, window_bounds = array<i64: 1, 128>}, {transform_indices = @transform_3, window_bounds = array<i64: 128, 128>}]} {
    %c0_i32 = arith.constant 0 : i32
    %0 = arith.cmpi eq, %arg1, %c0_i32 : i32
    %1 = arith.extui %0 : i1 to i32
    %c0_i32_0 = arith.constant 0 : i32
    %2 = arith.cmpi ne, %1, %c0_i32_0 : i32
    scf.if %2 {
      %cst_9 = arith.constant 0.000000e+00 : f32
      %12 = vector.broadcast %cst_9 : f32 to vector<128x128xf32>
      %c0_10 = arith.constant 0 : index
      %c0_11 = arith.constant 0 : index
      %13 = vector.load %arg6[%c0_10, %c0_11] : memref<128x128xf32, #tpu.memory_space<vmem>>, vector<128x128xf32>
      tpu.vector_store %arg6[%c0_10, %c0_11], %12 {strides = array<i32>} : memref<128x128xf32, #tpu.memory_space<vmem>>, vector<128x128xf32>,
    } else {
    }
    %c0 = arith.constant 0 : index
    %c0_1 = arith.constant 0 : index
    %3 = vector.load %arg6[%c0, %c0_1] : memref<128x128xf32, #tpu.memory_space<vmem>>, vector<128x128xf32>
    %c0_2 = arith.constant 0 : index
    %c0_3 = arith.constant 0 : index
    %4 = vector.load %arg2[%c0_2, %c0_3] : memref<128x128xbf16, #tpu.memory_space<vmem>>, vector<128x128xbf16>
    %c0_4 = arith.constant 0 : index
    %c0_5 = arith.constant 0 : index
    %5 = vector.load %arg3[%c0_4, %c0_5] : memref<128x128xbf16, #tpu.memory_space<vmem>>, vector<128x128xbf16>
    %cst = arith.constant dense<0.000000e+00> : vector<128x128xf32>
    %6 = tpu.matmul %4, %5, %cst {dimension_numbers = #tpu.dot_dimension_numbers<[1], [0], [0], [1], [0, 0, 1, 1], [], []>} : vector<128x128xbf16>, vector<128x128xbf16>, vector<128x128xf32> -> vector<128x128xf32>
    %7 = arith.addf %3, %6 : vector<128x128xf32>
    %c0_6 = arith.constant 0 : index
    %c0_7 = arith.constant 0 : index
    %8 = vector.load %arg6[%c0_6, %c0_7] : memref<128x128xf32, #tpu.memory_space<vmem>>, vector<128x128xf32>
    tpu.vector_store %arg6[%c0_6, %c0_7], %7 {strides = array<i32>} : memref<128x128xf32, #tpu.memory_space<vmem>>, vector<128x128xf32>,
    %c3_i32 = arith.constant 3 : i32
    %9 = arith.cmpi eq, %arg1, %c3_i32 : i32
    %10 = arith.extui %9 : i1 to i32
    %c0_i32_8 = arith.constant 0 : i32
    %11 = arith.cmpi ne, %10, %c0_i32_8 : i32
    scf.if %11 {
      %c0_9 = arith.constant 0 : index
      %c0_10 = arith.constant 0 : index
      %12 = vector.load %arg6[%c0_9, %c0_10] : memref<128x128xf32, #tpu.memory_space<vmem>>, vector<128x128xf32>
      %c0_11 = arith.constant 0 : index
      %c0_12 = arith.constant 0 : index
      %13 = vector.load %arg4[%c0_11, %c0_12] : memref<1x128xf32, #tpu.memory_space<vmem>>, vector<1x128xf32>
      %14 = vector.broadcast %13 : vector<1x128xf32> to vector<128x128xf32>
      %15 = arith.addf %12, %14 : vector<128x128xf32>
      %cst_13 = arith.constant 0.000000e+00 : f32
      %16 = vector.broadcast %cst_13 : f32 to vector<128x128xf32>
      %17 = arith.maximumf %15, %16 : vector<128x128xf32>
      %18 = arith.truncf %17 : vector<128x128xf32> to vector<128x128xbf16>
      %c0_14 = arith.constant 0 : index
      %c0_15 = arith.constant 0 : index
      %19 = vector.load %arg5[%c0_14, %c0_15] : memref<128x128xbf16, #tpu.memory_space<vmem>>, vector<128x128xbf16>
      tpu.vector_store %arg5[%c0_14, %c0_15], %18 {strides = array<i32>} : memref<128x128xbf16, #tpu.memory_space<vmem>>, vector<128x128xbf16>,
    } else {
    }
    return
  }
  func.func @transform_0(%arg0: i32, %arg1: i32) -> (i32, i32) {
    %c0_i32 = arith.constant 0 : i32
    return %arg0, %arg1 : i32, i32
  }
  func.func @transform_1(%arg0: i32, %arg1: i32) -> (i32, i32) {
    %c0_i32 = arith.constant 0 : i32
    %c0_i32_0 = arith.constant 0 : i32
    %c0_i32_1 = arith.constant 0 : i32
    return %c0_i32, %c0_i32_0 : i32, i32
  }
  func.func @transform_2(%arg0: i32, %arg1: i32) -> (i32, i32) {
    %c0_i32 = arith.constant 0 : i32
    %c0_i32_0 = arith.constant 0 : i32
    %c0_i32_1 = arith.constant 0 : i32
    return %c0_i32, %c0_i32_0 : i32, i32
  }
  func.func @transform_3(%arg0: i32, %arg1: i32) -> (i32, i32) {
    %c0_i32 = arith.constant 0 : i32
    %c0_i32_0 = arith.constant 0 : i32
    return %arg0, %c0_i32 : i32, i32
  }
}

module attributes {stable_mosaic.version = 11 : i64} {
  func.func @_conv3x3_kernel(%arg0: i32, %arg1: memref<1x10x10x128xbf16, #tpu.memory_space<vmem>>, %arg2: memref<1152x128xbf16, #tpu.memory_space<vmem>>, %arg3: memref<1x128xf32, #tpu.memory_space<vmem>>, %arg4: memref<1x8x8x128xbf16, #tpu.memory_space<vmem>>, %arg5: memref<1x8x8x1152xbf16, #tpu.memory_space<vmem>>) attributes {dimension_semantics = [#tpu.dimension_semantics<parallel>], iteration_bounds = array<i64: 2>, scalar_prefetch = 0 : i64, scratch_operands = 1 : i64, tpu.core_type = #tpu.core_type<tc>, window_params = [{transform_indices = @transform_0, window_bounds = array<i64: 1, 10, 10, 128>}, {pipeline_mode = #tpu.pipeline_mode<synchronous>, transform_indices = @transform_1, window_bounds = array<i64: 1152, 128>}, {pipeline_mode = #tpu.pipeline_mode<synchronous>, transform_indices = @transform_2, window_bounds = array<i64: 1, 128>}, {transform_indices = @transform_3, window_bounds = array<i64: 1, 8, 8, 128>}]} {
    %c0 = arith.constant 0 : index
    %c0_0 = arith.constant 0 : index
    %c0_1 = arith.constant 0 : index
    %c0_2 = arith.constant 0 : index
    %0 = vector.load %arg1[%c0, %c0_0, %c0_1, %c0_2] : memref<1x10x10x128xbf16, #tpu.memory_space<vmem>>, vector<1x8x8x128xbf16>
    %1 = vector.shape_cast %0 : vector<1x8x8x128xbf16> to vector<8x8x128xbf16>
    %c0_3 = arith.constant 0 : index
    %c0_4 = arith.constant 0 : index
    %c0_5 = arith.constant 0 : index
    %c0_6 = arith.constant 0 : index
    %2 = vector.load %arg5[%c0_3, %c0_4, %c0_5, %c0_6] : memref<1x8x8x1152xbf16, #tpu.memory_space<vmem>>, vector<1x8x8x128xbf16>
    %3 = vector.shape_cast %2 : vector<1x8x8x128xbf16> to vector<8x8x128xbf16>
    %4 = vector.shape_cast %1 : vector<8x8x128xbf16> to vector<1x8x8x128xbf16>
    tpu.vector_store %arg5[%c0_3, %c0_4, %c0_5, %c0_6], %4 {strides = array<i32>} : memref<1x8x8x1152xbf16, #tpu.memory_space<vmem>>, vector<1x8x8x128xbf16>,
    %c0_7 = arith.constant 0 : index
    %c0_8 = arith.constant 0 : index
    %c1 = arith.constant 1 : index
    %c0_9 = arith.constant 0 : index
    %5 = vector.load %arg1[%c0_7, %c0_8, %c1, %c0_9] : memref<1x10x10x128xbf16, #tpu.memory_space<vmem>>, vector<1x8x8x128xbf16>
    %6 = vector.shape_cast %5 : vector<1x8x8x128xbf16> to vector<8x8x128xbf16>
    %c0_10 = arith.constant 0 : index
    %c0_11 = arith.constant 0 : index
    %c0_12 = arith.constant 0 : index
    %c128 = arith.constant 128 : index
    %7 = vector.load %arg5[%c0_10, %c0_11, %c0_12, %c128] : memref<1x8x8x1152xbf16, #tpu.memory_space<vmem>>, vector<1x8x8x128xbf16>
    %8 = vector.shape_cast %7 : vector<1x8x8x128xbf16> to vector<8x8x128xbf16>
    %9 = vector.shape_cast %6 : vector<8x8x128xbf16> to vector<1x8x8x128xbf16>
    tpu.vector_store %arg5[%c0_10, %c0_11, %c0_12, %c128], %9 {strides = array<i32>} : memref<1x8x8x1152xbf16, #tpu.memory_space<vmem>>, vector<1x8x8x128xbf16>,
    %c0_13 = arith.constant 0 : index
    %c0_14 = arith.constant 0 : index
    %c2 = arith.constant 2 : index
    %c0_15 = arith.constant 0 : index
    %10 = vector.load %arg1[%c0_13, %c0_14, %c2, %c0_15] : memref<1x10x10x128xbf16, #tpu.memory_space<vmem>>, vector<1x8x8x128xbf16>
    %11 = vector.shape_cast %10 : vector<1x8x8x128xbf16> to vector<8x8x128xbf16>
    %c0_16 = arith.constant 0 : index
    %c0_17 = arith.constant 0 : index
    %c0_18 = arith.constant 0 : index
    %c256 = arith.constant 256 : index
    %12 = vector.load %arg5[%c0_16, %c0_17, %c0_18, %c256] : memref<1x8x8x1152xbf16, #tpu.memory_space<vmem>>, vector<1x8x8x128xbf16>
    %13 = vector.shape_cast %12 : vector<1x8x8x128xbf16> to vector<8x8x128xbf16>
    %14 = vector.shape_cast %11 : vector<8x8x128xbf16> to vector<1x8x8x128xbf16>
    tpu.vector_store %arg5[%c0_16, %c0_17, %c0_18, %c256], %14 {strides = array<i32>} : memref<1x8x8x1152xbf16, #tpu.memory_space<vmem>>, vector<1x8x8x128xbf16>,
    %c0_19 = arith.constant 0 : index
    %c1_20 = arith.constant 1 : index
    %c0_21 = arith.constant 0 : index
    %c0_22 = arith.constant 0 : index
    %15 = vector.load %arg1[%c0_19, %c1_20, %c0_21, %c0_22] : memref<1x10x10x128xbf16, #tpu.memory_space<vmem>>, vector<1x8x8x128xbf16>
    %16 = vector.shape_cast %15 : vector<1x8x8x128xbf16> to vector<8x8x128xbf16>
    %c0_23 = arith.constant 0 : index
    %c0_24 = arith.constant 0 : index
    %c0_25 = arith.constant 0 : index
    %c384 = arith.constant 384 : index
    %17 = vector.load %arg5[%c0_23, %c0_24, %c0_25, %c384] : memref<1x8x8x1152xbf16, #tpu.memory_space<vmem>>, vector<1x8x8x128xbf16>
    %18 = vector.shape_cast %17 : vector<1x8x8x128xbf16> to vector<8x8x128xbf16>
    %19 = vector.shape_cast %16 : vector<8x8x128xbf16> to vector<1x8x8x128xbf16>
    tpu.vector_store %arg5[%c0_23, %c0_24, %c0_25, %c384], %19 {strides = array<i32>} : memref<1x8x8x1152xbf16, #tpu.memory_space<vmem>>, vector<1x8x8x128xbf16>,
    %c0_26 = arith.constant 0 : index
    %c1_27 = arith.constant 1 : index
    %c1_28 = arith.constant 1 : index
    %c0_29 = arith.constant 0 : index
    %20 = vector.load %arg1[%c0_26, %c1_27, %c1_28, %c0_29] : memref<1x10x10x128xbf16, #tpu.memory_space<vmem>>, vector<1x8x8x128xbf16>
    %21 = vector.shape_cast %20 : vector<1x8x8x128xbf16> to vector<8x8x128xbf16>
    %c0_30 = arith.constant 0 : index
    %c0_31 = arith.constant 0 : index
    %c0_32 = arith.constant 0 : index
    %c512 = arith.constant 512 : index
    %22 = vector.load %arg5[%c0_30, %c0_31, %c0_32, %c512] : memref<1x8x8x1152xbf16, #tpu.memory_space<vmem>>, vector<1x8x8x128xbf16>
    %23 = vector.shape_cast %22 : vector<1x8x8x128xbf16> to vector<8x8x128xbf16>
    %24 = vector.shape_cast %21 : vector<8x8x128xbf16> to vector<1x8x8x128xbf16>
    tpu.vector_store %arg5[%c0_30, %c0_31, %c0_32, %c512], %24 {strides = array<i32>} : memref<1x8x8x1152xbf16, #tpu.memory_space<vmem>>, vector<1x8x8x128xbf16>,
    %c0_33 = arith.constant 0 : index
    %c1_34 = arith.constant 1 : index
    %c2_35 = arith.constant 2 : index
    %c0_36 = arith.constant 0 : index
    %25 = vector.load %arg1[%c0_33, %c1_34, %c2_35, %c0_36] : memref<1x10x10x128xbf16, #tpu.memory_space<vmem>>, vector<1x8x8x128xbf16>
    %26 = vector.shape_cast %25 : vector<1x8x8x128xbf16> to vector<8x8x128xbf16>
    %c0_37 = arith.constant 0 : index
    %c0_38 = arith.constant 0 : index
    %c0_39 = arith.constant 0 : index
    %c640 = arith.constant 640 : index
    %27 = vector.load %arg5[%c0_37, %c0_38, %c0_39, %c640] : memref<1x8x8x1152xbf16, #tpu.memory_space<vmem>>, vector<1x8x8x128xbf16>
    %28 = vector.shape_cast %27 : vector<1x8x8x128xbf16> to vector<8x8x128xbf16>
    %29 = vector.shape_cast %26 : vector<8x8x128xbf16> to vector<1x8x8x128xbf16>
    tpu.vector_store %arg5[%c0_37, %c0_38, %c0_39, %c640], %29 {strides = array<i32>} : memref<1x8x8x1152xbf16, #tpu.memory_space<vmem>>, vector<1x8x8x128xbf16>,
    %c0_40 = arith.constant 0 : index
    %c2_41 = arith.constant 2 : index
    %c0_42 = arith.constant 0 : index
    %c0_43 = arith.constant 0 : index
    %30 = vector.load %arg1[%c0_40, %c2_41, %c0_42, %c0_43] : memref<1x10x10x128xbf16, #tpu.memory_space<vmem>>, vector<1x8x8x128xbf16>
    %31 = vector.shape_cast %30 : vector<1x8x8x128xbf16> to vector<8x8x128xbf16>
    %c0_44 = arith.constant 0 : index
    %c0_45 = arith.constant 0 : index
    %c0_46 = arith.constant 0 : index
    %c768 = arith.constant 768 : index
    %32 = vector.load %arg5[%c0_44, %c0_45, %c0_46, %c768] : memref<1x8x8x1152xbf16, #tpu.memory_space<vmem>>, vector<1x8x8x128xbf16>
    %33 = vector.shape_cast %32 : vector<1x8x8x128xbf16> to vector<8x8x128xbf16>
    %34 = vector.shape_cast %31 : vector<8x8x128xbf16> to vector<1x8x8x128xbf16>
    tpu.vector_store %arg5[%c0_44, %c0_45, %c0_46, %c768], %34 {strides = array<i32>} : memref<1x8x8x1152xbf16, #tpu.memory_space<vmem>>, vector<1x8x8x128xbf16>,
    %c0_47 = arith.constant 0 : index
    %c2_48 = arith.constant 2 : index
    %c1_49 = arith.constant 1 : index
    %c0_50 = arith.constant 0 : index
    %35 = vector.load %arg1[%c0_47, %c2_48, %c1_49, %c0_50] : memref<1x10x10x128xbf16, #tpu.memory_space<vmem>>, vector<1x8x8x128xbf16>
    %36 = vector.shape_cast %35 : vector<1x8x8x128xbf16> to vector<8x8x128xbf16>
    %c0_51 = arith.constant 0 : index
    %c0_52 = arith.constant 0 : index
    %c0_53 = arith.constant 0 : index
    %c896 = arith.constant 896 : index
    %37 = vector.load %arg5[%c0_51, %c0_52, %c0_53, %c896] : memref<1x8x8x1152xbf16, #tpu.memory_space<vmem>>, vector<1x8x8x128xbf16>
    %38 = vector.shape_cast %37 : vector<1x8x8x128xbf16> to vector<8x8x128xbf16>
    %39 = vector.shape_cast %36 : vector<8x8x128xbf16> to vector<1x8x8x128xbf16>
    tpu.vector_store %arg5[%c0_51, %c0_52, %c0_53, %c896], %39 {strides = array<i32>} : memref<1x8x8x1152xbf16, #tpu.memory_space<vmem>>, vector<1x8x8x128xbf16>,
    %c0_54 = arith.constant 0 : index
    %c2_55 = arith.constant 2 : index
    %c2_56 = arith.constant 2 : index
    %c0_57 = arith.constant 0 : index
    %40 = vector.load %arg1[%c0_54, %c2_55, %c2_56, %c0_57] : memref<1x10x10x128xbf16, #tpu.memory_space<vmem>>, vector<1x8x8x128xbf16>
    %41 = vector.shape_cast %40 : vector<1x8x8x128xbf16> to vector<8x8x128xbf16>
    %c0_58 = arith.constant 0 : index
    %c0_59 = arith.constant 0 : index
    %c0_60 = arith.constant 0 : index
    %c1024 = arith.constant 1024 : index
    %42 = vector.load %arg5[%c0_58, %c0_59, %c0_60, %c1024] : memref<1x8x8x1152xbf16, #tpu.memory_space<vmem>>, vector<1x8x8x128xbf16>
    %43 = vector.shape_cast %42 : vector<1x8x8x128xbf16> to vector<8x8x128xbf16>
    %44 = vector.shape_cast %41 : vector<8x8x128xbf16> to vector<1x8x8x128xbf16>
    tpu.vector_store %arg5[%c0_58, %c0_59, %c0_60, %c1024], %44 {strides = array<i32>} : memref<1x8x8x1152xbf16, #tpu.memory_space<vmem>>, vector<1x8x8x128xbf16>,
    %c0_61 = arith.constant 0 : index
    %c0_62 = arith.constant 0 : index
    %c0_63 = arith.constant 0 : index
    %c0_64 = arith.constant 0 : index
    %45 = vector.load %arg5[%c0_61, %c0_62, %c0_63, %c0_64] : memref<1x8x8x1152xbf16, #tpu.memory_space<vmem>>, vector<1x8x8x1152xbf16>
    %46 = vector.shape_cast %45 : vector<1x8x8x1152xbf16> to vector<64x1152xbf16>
    %c0_65 = arith.constant 0 : index
    %c0_66 = arith.constant 0 : index
    %47 = vector.load %arg2[%c0_65, %c0_66] : memref<1152x128xbf16, #tpu.memory_space<vmem>>, vector<1152x128xbf16>
    %cst = arith.constant dense<0.000000e+00> : vector<64x128xf32>
    %48 = tpu.matmul %46, %47, %cst {dimension_numbers = #tpu.dot_dimension_numbers<[1], [0], [0], [1], [0, 0, 1, 1], [], []>} : vector<64x1152xbf16>, vector<1152x128xbf16>, vector<64x128xf32> -> vector<64x128xf32>
    %c0_67 = arith.constant 0 : index
    %c0_68 = arith.constant 0 : index
    %49 = vector.load %arg3[%c0_67, %c0_68] : memref<1x128xf32, #tpu.memory_space<vmem>>, vector<1x128xf32>
    %50 = vector.broadcast %49 : vector<1x128xf32> to vector<64x128xf32>
    %51 = arith.addf %48, %50 : vector<64x128xf32>
    %cst_69 = arith.constant 0.000000e+00 : f32
    %52 = vector.broadcast %cst_69 : f32 to vector<64x128xf32>
    %53 = arith.maximumf %51, %52 : vector<64x128xf32>
    %54 = vector.shape_cast %53 : vector<64x128xf32> to vector<1x8x8x128xf32>
    %55 = arith.truncf %54 : vector<1x8x8x128xf32> to vector<1x8x8x128xbf16>
    %c0_70 = arith.constant 0 : index
    %c0_71 = arith.constant 0 : index
    %c0_72 = arith.constant 0 : index
    %c0_73 = arith.constant 0 : index
    %56 = vector.load %arg4[%c0_70, %c0_71, %c0_72, %c0_73] : memref<1x8x8x128xbf16, #tpu.memory_space<vmem>>, vector<1x8x8x128xbf16>
    tpu.vector_store %arg4[%c0_70, %c0_71, %c0_72, %c0_73], %55 {strides = array<i32>} : memref<1x8x8x128xbf16, #tpu.memory_space<vmem>>, vector<1x8x8x128xbf16>,
    return
  }
  func.func @transform_0(%arg0: i32) -> (i32, i32, i32, i32) {
    %c0_i32 = arith.constant 0 : i32
    %c0_i32_0 = arith.constant 0 : i32
    %c0_i32_1 = arith.constant 0 : i32
    %c0_i32_2 = arith.constant 0 : i32
    return %arg0, %c0_i32, %c0_i32_0, %c0_i32_1 : i32, i32, i32, i32
  }
  func.func @transform_1(%arg0: i32) -> (i32, i32) {
    %c0_i32 = arith.constant 0 : i32
    %c0_i32_0 = arith.constant 0 : i32
    %c0_i32_1 = arith.constant 0 : i32
    return %c0_i32, %c0_i32_0 : i32, i32
  }
  func.func @transform_2(%arg0: i32) -> (i32, i32) {
    %c0_i32 = arith.constant 0 : i32
    %c0_i32_0 = arith.constant 0 : i32
    %c0_i32_1 = arith.constant 0 : i32
    return %c0_i32, %c0_i32_0 : i32, i32
  }
  func.func @transform_3(%arg0: i32) -> (i32, i32, i32, i32) {
    %c0_i32 = arith.constant 0 : i32
    %c0_i32_0 = arith.constant 0 : i32
    %c0_i32_1 = arith.constant 0 : i32
    %c0_i32_2 = arith.constant 0 : i32
    return %arg0, %c0_i32, %c0_i32_0, %c0_i32_1 : i32, i32, i32, i32
  }
}

module attributes {stable_mosaic.version = 11 : i64} {
  func.func @_fused_matmul_acc_kernel(%arg0: i32, %arg1: i32, %arg2: memref<128x128xbf16, #tpu.memory_space<vmem>>, %arg3: memref<128x128xbf16, #tpu.memory_space<vmem>>, %arg4: memref<1x128xf32, #tpu.memory_space<vmem>>, %arg5: memref<128x128xbf16, #tpu.memory_space<vmem>>, %arg6: memref<128x128xf32, #tpu.memory_space<vmem>>) attributes {dimension_semantics = [#tpu.dimension_semantics<parallel>, #tpu.dimension_semantics<arbitrary>], iteration_bounds = array<i64: 1, 4>, scalar_prefetch = 0 : i64, scratch_operands = 1 : i64, tpu.core_type = #tpu.core_type<tc>, window_params = [{transform_indices = @transform_0, window_bounds = array<i64: 128, 128>}, {pipeline_mode = #tpu.pipeline_mode<synchronous>, transform_indices = @transform_1, window_bounds = array<i64: 128, 128>}, {pipeline_mode = #tpu.pipeline_mode<synchronous>, transform_indices = @transform_2, window_bounds = array<i64: 1, 128>}, {transform_indices = @transform_3, window_bounds = array<i64: 128, 128>}]} {
    %c0_i32 = arith.constant 0 : i32
    %0 = arith.cmpi eq, %arg1, %c0_i32 : i32
    %1 = arith.extui %0 : i1 to i32
    %c0_i32_0 = arith.constant 0 : i32
    %2 = arith.cmpi ne, %1, %c0_i32_0 : i32
    scf.if %2 {
      %cst_9 = arith.constant 0.000000e+00 : f32
      %12 = vector.broadcast %cst_9 : f32 to vector<128x128xf32>
      %c0_10 = arith.constant 0 : index
      %c0_11 = arith.constant 0 : index
      %13 = vector.load %arg6[%c0_10, %c0_11] : memref<128x128xf32, #tpu.memory_space<vmem>>, vector<128x128xf32>
      tpu.vector_store %arg6[%c0_10, %c0_11], %12 {strides = array<i32>} : memref<128x128xf32, #tpu.memory_space<vmem>>, vector<128x128xf32>,
    } else {
    }
    %c0 = arith.constant 0 : index
    %c0_1 = arith.constant 0 : index
    %3 = vector.load %arg6[%c0, %c0_1] : memref<128x128xf32, #tpu.memory_space<vmem>>, vector<128x128xf32>
    %c0_2 = arith.constant 0 : index
    %c0_3 = arith.constant 0 : index
    %4 = vector.load %arg2[%c0_2, %c0_3] : memref<128x128xbf16, #tpu.memory_space<vmem>>, vector<128x128xbf16>
    %c0_4 = arith.constant 0 : index
    %c0_5 = arith.constant 0 : index
    %5 = vector.load %arg3[%c0_4, %c0_5] : memref<128x128xbf16, #tpu.memory_space<vmem>>, vector<128x128xbf16>
    %cst = arith.constant dense<0.000000e+00> : vector<128x128xf32>
    %6 = tpu.matmul %4, %5, %cst {dimension_numbers = #tpu.dot_dimension_numbers<[1], [0], [0], [1], [0, 0, 1, 1], [], []>} : vector<128x128xbf16>, vector<128x128xbf16>, vector<128x128xf32> -> vector<128x128xf32>
    %7 = arith.addf %3, %6 : vector<128x128xf32>
    %c0_6 = arith.constant 0 : index
    %c0_7 = arith.constant 0 : index
    %8 = vector.load %arg6[%c0_6, %c0_7] : memref<128x128xf32, #tpu.memory_space<vmem>>, vector<128x128xf32>
    tpu.vector_store %arg6[%c0_6, %c0_7], %7 {strides = array<i32>} : memref<128x128xf32, #tpu.memory_space<vmem>>, vector<128x128xf32>,
    %c3_i32 = arith.constant 3 : i32
    %9 = arith.cmpi eq, %arg1, %c3_i32 : i32
    %10 = arith.extui %9 : i1 to i32
    %c0_i32_8 = arith.constant 0 : i32
    %11 = arith.cmpi ne, %10, %c0_i32_8 : i32
    scf.if %11 {
      %c0_9 = arith.constant 0 : index
      %c0_10 = arith.constant 0 : index
      %12 = vector.load %arg6[%c0_9, %c0_10] : memref<128x128xf32, #tpu.memory_space<vmem>>, vector<128x128xf32>
      %c0_11 = arith.constant 0 : index
      %c0_12 = arith.constant 0 : index
      %13 = vector.load %arg4[%c0_11, %c0_12] : memref<1x128xf32, #tpu.memory_space<vmem>>, vector<1x128xf32>
      %14 = vector.broadcast %13 : vector<1x128xf32> to vector<128x128xf32>
      %15 = arith.addf %12, %14 : vector<128x128xf32>
      %16 = arith.truncf %15 : vector<128x128xf32> to vector<128x128xbf16>
      %c0_13 = arith.constant 0 : index
      %c0_14 = arith.constant 0 : index
      %17 = vector.load %arg5[%c0_13, %c0_14] : memref<128x128xbf16, #tpu.memory_space<vmem>>, vector<128x128xbf16>
      tpu.vector_store %arg5[%c0_13, %c0_14], %16 {strides = array<i32>} : memref<128x128xbf16, #tpu.memory_space<vmem>>, vector<128x128xbf16>,
    } else {
    }
    return
  }
  func.func @transform_0(%arg0: i32, %arg1: i32) -> (i32, i32) {
    %c0_i32 = arith.constant 0 : i32
    return %arg0, %arg1 : i32, i32
  }
  func.func @transform_1(%arg0: i32, %arg1: i32) -> (i32, i32) {
    %c0_i32 = arith.constant 0 : i32
    %c0_i32_0 = arith.constant 0 : i32
    %c0_i32_1 = arith.constant 0 : i32
    return %c0_i32, %c0_i32_0 : i32, i32
  }
  func.func @transform_2(%arg0: i32, %arg1: i32) -> (i32, i32) {
    %c0_i32 = arith.constant 0 : i32
    %c0_i32_0 = arith.constant 0 : i32
    %c0_i32_1 = arith.constant 0 : i32
    return %c0_i32, %c0_i32_0 : i32, i32
  }
  func.func @transform_3(%arg0: i32, %arg1: i32) -> (i32, i32) {
    %c0_i32 = arith.constant 0 : i32
    %c0_i32_0 = arith.constant 0 : i32
    return %arg0, %c0_i32 : i32, i32
  }
}

module attributes {stable_mosaic.version = 11 : i64} {
  func.func @_fused_matmul_direct_kernel(%arg0: i32, %arg1: memref<128x128xbf16, #tpu.memory_space<vmem>>, %arg2: memref<128x128xbf16, #tpu.memory_space<vmem>>, %arg3: memref<1x128xf32, #tpu.memory_space<vmem>>, %arg4: memref<128x128xbf16, #tpu.memory_space<vmem>>, %arg5: memref<128x128xbf16, #tpu.memory_space<vmem>>) attributes {dimension_semantics = [#tpu.dimension_semantics<parallel>], iteration_bounds = array<i64: 1>, scalar_prefetch = 0 : i64, scratch_operands = 0 : i64, tpu.core_type = #tpu.core_type<tc>, window_params = [{transform_indices = @transform_0, window_bounds = array<i64: 128, 128>}, {pipeline_mode = #tpu.pipeline_mode<synchronous>, transform_indices = @transform_1, window_bounds = array<i64: 128, 128>}, {pipeline_mode = #tpu.pipeline_mode<synchronous>, transform_indices = @transform_2, window_bounds = array<i64: 1, 128>}, {transform_indices = @transform_3, window_bounds = array<i64: 128, 128>}, {transform_indices = @transform_4, window_bounds = array<i64: 128, 128>}]} {
    %c0 = arith.constant 0 : index
    %c0_0 = arith.constant 0 : index
    %0 = vector.load %arg1[%c0, %c0_0] : memref<128x128xbf16, #tpu.memory_space<vmem>>, vector<128x128xbf16>
    %c0_1 = arith.constant 0 : index
    %c0_2 = arith.constant 0 : index
    %1 = vector.load %arg2[%c0_1, %c0_2] : memref<128x128xbf16, #tpu.memory_space<vmem>>, vector<128x128xbf16>
    %cst = arith.constant dense<0.000000e+00> : vector<128x128xf32>
    %2 = tpu.matmul %0, %1, %cst {dimension_numbers = #tpu.dot_dimension_numbers<[1], [0], [0], [1], [0, 0, 1, 1], [], []>} : vector<128x128xbf16>, vector<128x128xbf16>, vector<128x128xf32> -> vector<128x128xf32>
    %c0_3 = arith.constant 0 : index
    %c0_4 = arith.constant 0 : index
    %3 = vector.load %arg3[%c0_3, %c0_4] : memref<1x128xf32, #tpu.memory_space<vmem>>, vector<1x128xf32>
    %4 = vector.broadcast %3 : vector<1x128xf32> to vector<128x128xf32>
    %5 = arith.addf %2, %4 : vector<128x128xf32>
    %c0_5 = arith.constant 0 : index
    %c0_6 = arith.constant 0 : index
    %6 = vector.load %arg4[%c0_5, %c0_6] : memref<128x128xbf16, #tpu.memory_space<vmem>>, vector<128x128xbf16>
    %7 = arith.extf %6 : vector<128x128xbf16> to vector<128x128xf32>
    %8 = arith.addf %5, %7 : vector<128x128xf32>
    %cst_7 = arith.constant 0.000000e+00 : f32
    %9 = vector.broadcast %cst_7 : f32 to vector<128x128xf32>
    %10 = arith.maximumf %8, %9 : vector<128x128xf32>
    %11 = arith.truncf %10 : vector<128x128xf32> to vector<128x128xbf16>
    %c0_8 = arith.constant 0 : index
    %c0_9 = arith.constant 0 : index
    %12 = vector.load %arg5[%c0_8, %c0_9] : memref<128x128xbf16, #tpu.memory_space<vmem>>, vector<128x128xbf16>
    tpu.vector_store %arg5[%c0_8, %c0_9], %11 {strides = array<i32>} : memref<128x128xbf16, #tpu.memory_space<vmem>>, vector<128x128xbf16>,
    return
  }
  func.func @transform_0(%arg0: i32) -> (i32, i32) {
    %c0_i32 = arith.constant 0 : i32
    %c0_i32_0 = arith.constant 0 : i32
    return %arg0, %c0_i32 : i32, i32
  }
  func.func @transform_1(%arg0: i32) -> (i32, i32) {
    %c0_i32 = arith.constant 0 : i32
    %c0_i32_0 = arith.constant 0 : i32
    %c0_i32_1 = arith.constant 0 : i32
    return %c0_i32, %c0_i32_0 : i32, i32
  }
  func.func @transform_2(%arg0: i32) -> (i32, i32) {
    %c0_i32 = arith.constant 0 : i32
    %c0_i32_0 = arith.constant 0 : i32
    %c0_i32_1 = arith.constant 0 : i32
    return %c0_i32, %c0_i32_0 : i32, i32
  }
  func.func @transform_3(%arg0: i32) -> (i32, i32) {
    %c0_i32 = arith.constant 0 : i32
    %c0_i32_0 = arith.constant 0 : i32
    return %arg0, %c0_i32 : i32, i32
  }
  func.func @transform_4(%arg0: i32) -> (i32, i32) {
    %c0_i32 = arith.constant 0 : i32
    %c0_i32_0 = arith.constant 0 : i32
    return %arg0, %c0_i32 : i32, i32
  }
}

module attributes {stable_mosaic.version = 11 : i64} {
  func.func @_fused_matmul_direct_kernel(%arg0: i32, %arg1: memref<128x128xbf16, #tpu.memory_space<vmem>>, %arg2: memref<128x128xbf16, #tpu.memory_space<vmem>>, %arg3: memref<1x128xf32, #tpu.memory_space<vmem>>, %arg4: memref<128x128xbf16, #tpu.memory_space<vmem>>) attributes {dimension_semantics = [#tpu.dimension_semantics<parallel>], iteration_bounds = array<i64: 1>, scalar_prefetch = 0 : i64, scratch_operands = 0 : i64, tpu.core_type = #tpu.core_type<tc>, window_params = [{transform_indices = @transform_0, window_bounds = array<i64: 128, 128>}, {pipeline_mode = #tpu.pipeline_mode<synchronous>, transform_indices = @transform_1, window_bounds = array<i64: 128, 128>}, {pipeline_mode = #tpu.pipeline_mode<synchronous>, transform_indices = @transform_2, window_bounds = array<i64: 1, 128>}, {transform_indices = @transform_3, window_bounds = array<i64: 128, 128>}]} {
    %c0 = arith.constant 0 : index
    %c0_0 = arith.constant 0 : index
    %0 = vector.load %arg1[%c0, %c0_0] : memref<128x128xbf16, #tpu.memory_space<vmem>>, vector<128x128xbf16>
    %c0_1 = arith.constant 0 : index
    %c0_2 = arith.constant 0 : index
    %1 = vector.load %arg2[%c0_1, %c0_2] : memref<128x128xbf16, #tpu.memory_space<vmem>>, vector<128x128xbf16>
    %cst = arith.constant dense<0.000000e+00> : vector<128x128xf32>
    %2 = tpu.matmul %0, %1, %cst {dimension_numbers = #tpu.dot_dimension_numbers<[1], [0], [0], [1], [0, 0, 1, 1], [], []>} : vector<128x128xbf16>, vector<128x128xbf16>, vector<128x128xf32> -> vector<128x128xf32>
    %c0_3 = arith.constant 0 : index
    %c0_4 = arith.constant 0 : index
    %3 = vector.load %arg3[%c0_3, %c0_4] : memref<1x128xf32, #tpu.memory_space<vmem>>, vector<1x128xf32>
    %4 = vector.broadcast %3 : vector<1x128xf32> to vector<128x128xf32>
    %5 = arith.addf %2, %4 : vector<128x128xf32>
    %cst_5 = arith.constant 0.000000e+00 : f32
    %6 = vector.broadcast %cst_5 : f32 to vector<128x128xf32>
    %7 = arith.maximumf %5, %6 : vector<128x128xf32>
    %8 = arith.truncf %7 : vector<128x128xf32> to vector<128x128xbf16>
    %c0_6 = arith.constant 0 : index
    %c0_7 = arith.constant 0 : index
    %9 = vector.load %arg4[%c0_6, %c0_7] : memref<128x128xbf16, #tpu.memory_space<vmem>>, vector<128x128xbf16>
    tpu.vector_store %arg4[%c0_6, %c0_7], %8 {strides = array<i32>} : memref<128x128xbf16, #tpu.memory_space<vmem>>, vector<128x128xbf16>,
    return
  }
  func.func @transform_0(%arg0: i32) -> (i32, i32) {
    %c0_i32 = arith.constant 0 : i32
    %c0_i32_0 = arith.constant 0 : i32
    return %arg0, %c0_i32 : i32, i32
  }
  func.func @transform_1(%arg0: i32) -> (i32, i32) {
    %c0_i32 = arith.constant 0 : i32
    %c0_i32_0 = arith.constant 0 : i32
    %c0_i32_1 = arith.constant 0 : i32
    return %c0_i32, %c0_i32_0 : i32, i32
  }
  func.func @transform_2(%arg0: i32) -> (i32, i32) {
    %c0_i32 = arith.constant 0 : i32
    %c0_i32_0 = arith.constant 0 : i32
    %c0_i32_1 = arith.constant 0 : i32
    return %c0_i32, %c0_i32_0 : i32, i32
  }
  func.func @transform_3(%arg0: i32) -> (i32, i32) {
    %c0_i32 = arith.constant 0 : i32
    %c0_i32_0 = arith.constant 0 : i32
    return %arg0, %c0_i32 : i32, i32
  }
}

module attributes {stable_mosaic.version = 11 : i64} {
  func.func @_fused_matmul_acc_kernel(%arg0: i32, %arg1: i32, %arg2: memref<32x128xbf16, #tpu.memory_space<vmem>>, %arg3: memref<128x128xbf16, #tpu.memory_space<vmem>>, %arg4: memref<1x128xf32, #tpu.memory_space<vmem>>, %arg5: memref<32x128xbf16, #tpu.memory_space<vmem>>, %arg6: memref<32x128xf32, #tpu.memory_space<vmem>>) attributes {dimension_semantics = [#tpu.dimension_semantics<parallel>, #tpu.dimension_semantics<arbitrary>], iteration_bounds = array<i64: 1, 4>, scalar_prefetch = 0 : i64, scratch_operands = 1 : i64, tpu.core_type = #tpu.core_type<tc>, window_params = [{transform_indices = @transform_0, window_bounds = array<i64: 32, 128>}, {pipeline_mode = #tpu.pipeline_mode<synchronous>, transform_indices = @transform_1, window_bounds = array<i64: 128, 128>}, {pipeline_mode = #tpu.pipeline_mode<synchronous>, transform_indices = @transform_2, window_bounds = array<i64: 1, 128>}, {transform_indices = @transform_3, window_bounds = array<i64: 32, 128>}]} {
    %c0_i32 = arith.constant 0 : i32
    %0 = arith.cmpi eq, %arg1, %c0_i32 : i32
    %1 = arith.extui %0 : i1 to i32
    %c0_i32_0 = arith.constant 0 : i32
    %2 = arith.cmpi ne, %1, %c0_i32_0 : i32
    scf.if %2 {
      %cst_9 = arith.constant 0.000000e+00 : f32
      %12 = vector.broadcast %cst_9 : f32 to vector<32x128xf32>
      %c0_10 = arith.constant 0 : index
      %c0_11 = arith.constant 0 : index
      %13 = vector.load %arg6[%c0_10, %c0_11] : memref<32x128xf32, #tpu.memory_space<vmem>>, vector<32x128xf32>
      tpu.vector_store %arg6[%c0_10, %c0_11], %12 {strides = array<i32>} : memref<32x128xf32, #tpu.memory_space<vmem>>, vector<32x128xf32>,
    } else {
    }
    %c0 = arith.constant 0 : index
    %c0_1 = arith.constant 0 : index
    %3 = vector.load %arg6[%c0, %c0_1] : memref<32x128xf32, #tpu.memory_space<vmem>>, vector<32x128xf32>
    %c0_2 = arith.constant 0 : index
    %c0_3 = arith.constant 0 : index
    %4 = vector.load %arg2[%c0_2, %c0_3] : memref<32x128xbf16, #tpu.memory_space<vmem>>, vector<32x128xbf16>
    %c0_4 = arith.constant 0 : index
    %c0_5 = arith.constant 0 : index
    %5 = vector.load %arg3[%c0_4, %c0_5] : memref<128x128xbf16, #tpu.memory_space<vmem>>, vector<128x128xbf16>
    %cst = arith.constant dense<0.000000e+00> : vector<32x128xf32>
    %6 = tpu.matmul %4, %5, %cst {dimension_numbers = #tpu.dot_dimension_numbers<[1], [0], [0], [1], [0, 0, 1, 1], [], []>} : vector<32x128xbf16>, vector<128x128xbf16>, vector<32x128xf32> -> vector<32x128xf32>
    %7 = arith.addf %3, %6 : vector<32x128xf32>
    %c0_6 = arith.constant 0 : index
    %c0_7 = arith.constant 0 : index
    %8 = vector.load %arg6[%c0_6, %c0_7] : memref<32x128xf32, #tpu.memory_space<vmem>>, vector<32x128xf32>
    tpu.vector_store %arg6[%c0_6, %c0_7], %7 {strides = array<i32>} : memref<32x128xf32, #tpu.memory_space<vmem>>, vector<32x128xf32>,
    %c3_i32 = arith.constant 3 : i32
    %9 = arith.cmpi eq, %arg1, %c3_i32 : i32
    %10 = arith.extui %9 : i1 to i32
    %c0_i32_8 = arith.constant 0 : i32
    %11 = arith.cmpi ne, %10, %c0_i32_8 : i32
    scf.if %11 {
      %c0_9 = arith.constant 0 : index
      %c0_10 = arith.constant 0 : index
      %12 = vector.load %arg6[%c0_9, %c0_10] : memref<32x128xf32, #tpu.memory_space<vmem>>, vector<32x128xf32>
      %c0_11 = arith.constant 0 : index
      %c0_12 = arith.constant 0 : index
      %13 = vector.load %arg4[%c0_11, %c0_12] : memref<1x128xf32, #tpu.memory_space<vmem>>, vector<1x128xf32>
      %14 = vector.broadcast %13 : vector<1x128xf32> to vector<32x128xf32>
      %15 = arith.addf %12, %14 : vector<32x128xf32>
      %16 = arith.truncf %15 : vector<32x128xf32> to vector<32x128xbf16>
      %c0_13 = arith.constant 0 : index
      %c0_14 = arith.constant 0 : index
      %17 = vector.load %arg5[%c0_13, %c0_14] : memref<32x128xbf16, #tpu.memory_space<vmem>>, vector<32x128xbf16>
      tpu.vector_store %arg5[%c0_13, %c0_14], %16 {strides = array<i32>} : memref<32x128xbf16, #tpu.memory_space<vmem>>, vector<32x128xbf16>,
    } else {
    }
    return
  }
  func.func @transform_0(%arg0: i32, %arg1: i32) -> (i32, i32) {
    %c0_i32 = arith.constant 0 : i32
    return %arg0, %arg1 : i32, i32
  }
  func.func @transform_1(%arg0: i32, %arg1: i32) -> (i32, i32) {
    %c0_i32 = arith.constant 0 : i32
    %c0_i32_0 = arith.constant 0 : i32
    %c0_i32_1 = arith.constant 0 : i32
    return %c0_i32, %c0_i32_0 : i32, i32
  }
  func.func @transform_2(%arg0: i32, %arg1: i32) -> (i32, i32) {
    %c0_i32 = arith.constant 0 : i32
    %c0_i32_0 = arith.constant 0 : i32
    %c0_i32_1 = arith.constant 0 : i32
    return %c0_i32, %c0_i32_0 : i32, i32
  }
  func.func @transform_3(%arg0: i32, %arg1: i32) -> (i32, i32) {
    %c0_i32 = arith.constant 0 : i32
    %c0_i32_0 = arith.constant 0 : i32
    return %arg0, %c0_i32 : i32, i32
  }
}

module attributes {stable_mosaic.version = 11 : i64} {
  func.func @_fused_matmul_acc_kernel(%arg0: i32, %arg1: i32, %arg2: memref<32x128xbf16, #tpu.memory_space<vmem>>, %arg3: memref<128x128xbf16, #tpu.memory_space<vmem>>, %arg4: memref<1x128xf32, #tpu.memory_space<vmem>>, %arg5: memref<32x128xbf16, #tpu.memory_space<vmem>>, %arg6: memref<32x128xbf16, #tpu.memory_space<vmem>>, %arg7: memref<32x128xf32, #tpu.memory_space<vmem>>) attributes {dimension_semantics = [#tpu.dimension_semantics<parallel>, #tpu.dimension_semantics<arbitrary>], iteration_bounds = array<i64: 1, 4>, scalar_prefetch = 0 : i64, scratch_operands = 1 : i64, tpu.core_type = #tpu.core_type<tc>, window_params = [{transform_indices = @transform_0, window_bounds = array<i64: 32, 128>}, {pipeline_mode = #tpu.pipeline_mode<synchronous>, transform_indices = @transform_1, window_bounds = array<i64: 128, 128>}, {pipeline_mode = #tpu.pipeline_mode<synchronous>, transform_indices = @transform_2, window_bounds = array<i64: 1, 128>}, {transform_indices = @transform_3, window_bounds = array<i64: 32, 128>}, {transform_indices = @transform_4, window_bounds = array<i64: 32, 128>}]} {
    %c0_i32 = arith.constant 0 : i32
    %0 = arith.cmpi eq, %arg1, %c0_i32 : i32
    %1 = arith.extui %0 : i1 to i32
    %c0_i32_0 = arith.constant 0 : i32
    %2 = arith.cmpi ne, %1, %c0_i32_0 : i32
    scf.if %2 {
      %cst_9 = arith.constant 0.000000e+00 : f32
      %12 = vector.broadcast %cst_9 : f32 to vector<32x128xf32>
      %c0_10 = arith.constant 0 : index
      %c0_11 = arith.constant 0 : index
      %13 = vector.load %arg7[%c0_10, %c0_11] : memref<32x128xf32, #tpu.memory_space<vmem>>, vector<32x128xf32>
      tpu.vector_store %arg7[%c0_10, %c0_11], %12 {strides = array<i32>} : memref<32x128xf32, #tpu.memory_space<vmem>>, vector<32x128xf32>,
    } else {
    }
    %c0 = arith.constant 0 : index
    %c0_1 = arith.constant 0 : index
    %3 = vector.load %arg7[%c0, %c0_1] : memref<32x128xf32, #tpu.memory_space<vmem>>, vector<32x128xf32>
    %c0_2 = arith.constant 0 : index
    %c0_3 = arith.constant 0 : index
    %4 = vector.load %arg2[%c0_2, %c0_3] : memref<32x128xbf16, #tpu.memory_space<vmem>>, vector<32x128xbf16>
    %c0_4 = arith.constant 0 : index
    %c0_5 = arith.constant 0 : index
    %5 = vector.load %arg3[%c0_4, %c0_5] : memref<128x128xbf16, #tpu.memory_space<vmem>>, vector<128x128xbf16>
    %cst = arith.constant dense<0.000000e+00> : vector<32x128xf32>
    %6 = tpu.matmul %4, %5, %cst {dimension_numbers = #tpu.dot_dimension_numbers<[1], [0], [0], [1], [0, 0, 1, 1], [], []>} : vector<32x128xbf16>, vector<128x128xbf16>, vector<32x128xf32> -> vector<32x128xf32>
    %7 = arith.addf %3, %6 : vector<32x128xf32>
    %c0_6 = arith.constant 0 : index
    %c0_7 = arith.constant 0 : index
    %8 = vector.load %arg7[%c0_6, %c0_7] : memref<32x128xf32, #tpu.memory_space<vmem>>, vector<32x128xf32>
    tpu.vector_store %arg7[%c0_6, %c0_7], %7 {strides = array<i32>} : memref<32x128xf32, #tpu.memory_space<vmem>>, vector<32x128xf32>,
    %c3_i32 = arith.constant 3 : i32
    %9 = arith.cmpi eq, %arg1, %c3_i32 : i32
    %10 = arith.extui %9 : i1 to i32
    %c0_i32_8 = arith.constant 0 : i32
    %11 = arith.cmpi ne, %10, %c0_i32_8 : i32
    scf.if %11 {
      %c0_9 = arith.constant 0 : index
      %c0_10 = arith.constant 0 : index
      %12 = vector.load %arg7[%c0_9, %c0_10] : memref<32x128xf32, #tpu.memory_space<vmem>>, vector<32x128xf32>
      %c0_11 = arith.constant 0 : index
      %c0_12 = arith.constant 0 : index
      %13 = vector.load %arg4[%c0_11, %c0_12] : memref<1x128xf32, #tpu.memory_space<vmem>>, vector<1x128xf32>
      %14 = vector.broadcast %13 : vector<1x128xf32> to vector<32x128xf32>
      %15 = arith.addf %12, %14 : vector<32x128xf32>
      %c0_13 = arith.constant 0 : index
      %c0_14 = arith.constant 0 : index
      %16 = vector.load %arg5[%c0_13, %c0_14] : memref<32x128xbf16, #tpu.memory_space<vmem>>, vector<32x128xbf16>
      %17 = arith.extf %16 : vector<32x128xbf16> to vector<32x128xf32>
      %18 = arith.addf %15, %17 : vector<32x128xf32>
      %cst_15 = arith.constant 0.000000e+00 : f32
      %19 = vector.broadcast %cst_15 : f32 to vector<32x128xf32>
      %20 = arith.maximumf %18, %19 : vector<32x128xf32>
      %21 = arith.truncf %20 : vector<32x128xf32> to vector<32x128xbf16>
      %c0_16 = arith.constant 0 : index
      %c0_17 = arith.constant 0 : index
      %22 = vector.load %arg6[%c0_16, %c0_17] : memref<32x128xbf16, #tpu.memory_space<vmem>>, vector<32x128xbf16>
      tpu.vector_store %arg6[%c0_16, %c0_17], %21 {strides = array<i32>} : memref<32x128xbf16, #tpu.memory_space<vmem>>, vector<32x128xbf16>,
    } else {
    }
    return
  }
  func.func @transform_0(%arg0: i32, %arg1: i32) -> (i32, i32) {
    %c0_i32 = arith.constant 0 : i32
    return %arg0, %arg1 : i32, i32
  }
  func.func @transform_1(%arg0: i32, %arg1: i32) -> (i32, i32) {
    %c0_i32 = arith.constant 0 : i32
    %c0_i32_0 = arith.constant 0 : i32
    %c0_i32_1 = arith.constant 0 : i32
    return %c0_i32, %c0_i32_0 : i32, i32
  }
  func.func @transform_2(%arg0: i32, %arg1: i32) -> (i32, i32) {
    %c0_i32 = arith.constant 0 : i32
    %c0_i32_0 = arith.constant 0 : i32
    %c0_i32_1 = arith.constant 0 : i32
    return %c0_i32, %c0_i32_0 : i32, i32
  }
  func.func @transform_3(%arg0: i32, %arg1: i32) -> (i32, i32) {
    %c0_i32 = arith.constant 0 : i32
    %c0_i32_0 = arith.constant 0 : i32
    return %arg0, %c0_i32 : i32, i32
  }
  func.func @transform_4(%arg0: i32, %arg1: i32) -> (i32, i32) {
    %c0_i32 = arith.constant 0 : i32
    %c0_i32_0 = arith.constant 0 : i32
    return %arg0, %c0_i32 : i32, i32
  }
}

module attributes {stable_mosaic.version = 11 : i64} {
  func.func @_conv3x3_kernel(%arg0: i32, %arg1: memref<1x6x6x128xbf16, #tpu.memory_space<vmem>>, %arg2: memref<1152x128xbf16, #tpu.memory_space<vmem>>, %arg3: memref<1x128xf32, #tpu.memory_space<vmem>>, %arg4: memref<1x4x4x128xbf16, #tpu.memory_space<vmem>>, %arg5: memref<1x4x4x1152xbf16, #tpu.memory_space<vmem>>) attributes {dimension_semantics = [#tpu.dimension_semantics<parallel>], iteration_bounds = array<i64: 2>, scalar_prefetch = 0 : i64, scratch_operands = 1 : i64, tpu.core_type = #tpu.core_type<tc>, window_params = [{transform_indices = @transform_0, window_bounds = array<i64: 1, 6, 6, 128>}, {pipeline_mode = #tpu.pipeline_mode<synchronous>, transform_indices = @transform_1, window_bounds = array<i64: 1152, 128>}, {pipeline_mode = #tpu.pipeline_mode<synchronous>, transform_indices = @transform_2, window_bounds = array<i64: 1, 128>}, {transform_indices = @transform_3, window_bounds = array<i64: 1, 4, 4, 128>}]} {
    %c0 = arith.constant 0 : index
    %c0_0 = arith.constant 0 : index
    %c0_1 = arith.constant 0 : index
    %c0_2 = arith.constant 0 : index
    %0 = vector.load %arg1[%c0, %c0_0, %c0_1, %c0_2] : memref<1x6x6x128xbf16, #tpu.memory_space<vmem>>, vector<1x4x4x128xbf16>
    %1 = vector.shape_cast %0 : vector<1x4x4x128xbf16> to vector<4x4x128xbf16>
    %c0_3 = arith.constant 0 : index
    %c0_4 = arith.constant 0 : index
    %c0_5 = arith.constant 0 : index
    %c0_6 = arith.constant 0 : index
    %2 = vector.load %arg5[%c0_3, %c0_4, %c0_5, %c0_6] : memref<1x4x4x1152xbf16, #tpu.memory_space<vmem>>, vector<1x4x4x128xbf16>
    %3 = vector.shape_cast %2 : vector<1x4x4x128xbf16> to vector<4x4x128xbf16>
    %4 = vector.shape_cast %1 : vector<4x4x128xbf16> to vector<1x4x4x128xbf16>
    tpu.vector_store %arg5[%c0_3, %c0_4, %c0_5, %c0_6], %4 {strides = array<i32>} : memref<1x4x4x1152xbf16, #tpu.memory_space<vmem>>, vector<1x4x4x128xbf16>,
    %c0_7 = arith.constant 0 : index
    %c0_8 = arith.constant 0 : index
    %c1 = arith.constant 1 : index
    %c0_9 = arith.constant 0 : index
    %5 = vector.load %arg1[%c0_7, %c0_8, %c1, %c0_9] : memref<1x6x6x128xbf16, #tpu.memory_space<vmem>>, vector<1x4x4x128xbf16>
    %6 = vector.shape_cast %5 : vector<1x4x4x128xbf16> to vector<4x4x128xbf16>
    %c0_10 = arith.constant 0 : index
    %c0_11 = arith.constant 0 : index
    %c0_12 = arith.constant 0 : index
    %c128 = arith.constant 128 : index
    %7 = vector.load %arg5[%c0_10, %c0_11, %c0_12, %c128] : memref<1x4x4x1152xbf16, #tpu.memory_space<vmem>>, vector<1x4x4x128xbf16>
    %8 = vector.shape_cast %7 : vector<1x4x4x128xbf16> to vector<4x4x128xbf16>
    %9 = vector.shape_cast %6 : vector<4x4x128xbf16> to vector<1x4x4x128xbf16>
    tpu.vector_store %arg5[%c0_10, %c0_11, %c0_12, %c128], %9 {strides = array<i32>} : memref<1x4x4x1152xbf16, #tpu.memory_space<vmem>>, vector<1x4x4x128xbf16>,
    %c0_13 = arith.constant 0 : index
    %c0_14 = arith.constant 0 : index
    %c2 = arith.constant 2 : index
    %c0_15 = arith.constant 0 : index
    %10 = vector.load %arg1[%c0_13, %c0_14, %c2, %c0_15] : memref<1x6x6x128xbf16, #tpu.memory_space<vmem>>, vector<1x4x4x128xbf16>
    %11 = vector.shape_cast %10 : vector<1x4x4x128xbf16> to vector<4x4x128xbf16>
    %c0_16 = arith.constant 0 : index
    %c0_17 = arith.constant 0 : index
    %c0_18 = arith.constant 0 : index
    %c256 = arith.constant 256 : index
    %12 = vector.load %arg5[%c0_16, %c0_17, %c0_18, %c256] : memref<1x4x4x1152xbf16, #tpu.memory_space<vmem>>, vector<1x4x4x128xbf16>
    %13 = vector.shape_cast %12 : vector<1x4x4x128xbf16> to vector<4x4x128xbf16>
    %14 = vector.shape_cast %11 : vector<4x4x128xbf16> to vector<1x4x4x128xbf16>
    tpu.vector_store %arg5[%c0_16, %c0_17, %c0_18, %c256], %14 {strides = array<i32>} : memref<1x4x4x1152xbf16, #tpu.memory_space<vmem>>, vector<1x4x4x128xbf16>,
    %c0_19 = arith.constant 0 : index
    %c1_20 = arith.constant 1 : index
    %c0_21 = arith.constant 0 : index
    %c0_22 = arith.constant 0 : index
    %15 = vector.load %arg1[%c0_19, %c1_20, %c0_21, %c0_22] : memref<1x6x6x128xbf16, #tpu.memory_space<vmem>>, vector<1x4x4x128xbf16>
    %16 = vector.shape_cast %15 : vector<1x4x4x128xbf16> to vector<4x4x128xbf16>
    %c0_23 = arith.constant 0 : index
    %c0_24 = arith.constant 0 : index
    %c0_25 = arith.constant 0 : index
    %c384 = arith.constant 384 : index
    %17 = vector.load %arg5[%c0_23, %c0_24, %c0_25, %c384] : memref<1x4x4x1152xbf16, #tpu.memory_space<vmem>>, vector<1x4x4x128xbf16>
    %18 = vector.shape_cast %17 : vector<1x4x4x128xbf16> to vector<4x4x128xbf16>
    %19 = vector.shape_cast %16 : vector<4x4x128xbf16> to vector<1x4x4x128xbf16>
    tpu.vector_store %arg5[%c0_23, %c0_24, %c0_25, %c384], %19 {strides = array<i32>} : memref<1x4x4x1152xbf16, #tpu.memory_space<vmem>>, vector<1x4x4x128xbf16>,
    %c0_26 = arith.constant 0 : index
    %c1_27 = arith.constant 1 : index
    %c1_28 = arith.constant 1 : index
    %c0_29 = arith.constant 0 : index
    %20 = vector.load %arg1[%c0_26, %c1_27, %c1_28, %c0_29] : memref<1x6x6x128xbf16, #tpu.memory_space<vmem>>, vector<1x4x4x128xbf16>
    %21 = vector.shape_cast %20 : vector<1x4x4x128xbf16> to vector<4x4x128xbf16>
    %c0_30 = arith.constant 0 : index
    %c0_31 = arith.constant 0 : index
    %c0_32 = arith.constant 0 : index
    %c512 = arith.constant 512 : index
    %22 = vector.load %arg5[%c0_30, %c0_31, %c0_32, %c512] : memref<1x4x4x1152xbf16, #tpu.memory_space<vmem>>, vector<1x4x4x128xbf16>
    %23 = vector.shape_cast %22 : vector<1x4x4x128xbf16> to vector<4x4x128xbf16>
    %24 = vector.shape_cast %21 : vector<4x4x128xbf16> to vector<1x4x4x128xbf16>
    tpu.vector_store %arg5[%c0_30, %c0_31, %c0_32, %c512], %24 {strides = array<i32>} : memref<1x4x4x1152xbf16, #tpu.memory_space<vmem>>, vector<1x4x4x128xbf16>,
    %c0_33 = arith.constant 0 : index
    %c1_34 = arith.constant 1 : index
    %c2_35 = arith.constant 2 : index
    %c0_36 = arith.constant 0 : index
    %25 = vector.load %arg1[%c0_33, %c1_34, %c2_35, %c0_36] : memref<1x6x6x128xbf16, #tpu.memory_space<vmem>>, vector<1x4x4x128xbf16>
    %26 = vector.shape_cast %25 : vector<1x4x4x128xbf16> to vector<4x4x128xbf16>
    %c0_37 = arith.constant 0 : index
    %c0_38 = arith.constant 0 : index
    %c0_39 = arith.constant 0 : index
    %c640 = arith.constant 640 : index
    %27 = vector.load %arg5[%c0_37, %c0_38, %c0_39, %c640] : memref<1x4x4x1152xbf16, #tpu.memory_space<vmem>>, vector<1x4x4x128xbf16>
    %28 = vector.shape_cast %27 : vector<1x4x4x128xbf16> to vector<4x4x128xbf16>
    %29 = vector.shape_cast %26 : vector<4x4x128xbf16> to vector<1x4x4x128xbf16>
    tpu.vector_store %arg5[%c0_37, %c0_38, %c0_39, %c640], %29 {strides = array<i32>} : memref<1x4x4x1152xbf16, #tpu.memory_space<vmem>>, vector<1x4x4x128xbf16>,
    %c0_40 = arith.constant 0 : index
    %c2_41 = arith.constant 2 : index
    %c0_42 = arith.constant 0 : index
    %c0_43 = arith.constant 0 : index
    %30 = vector.load %arg1[%c0_40, %c2_41, %c0_42, %c0_43] : memref<1x6x6x128xbf16, #tpu.memory_space<vmem>>, vector<1x4x4x128xbf16>
    %31 = vector.shape_cast %30 : vector<1x4x4x128xbf16> to vector<4x4x128xbf16>
    %c0_44 = arith.constant 0 : index
    %c0_45 = arith.constant 0 : index
    %c0_46 = arith.constant 0 : index
    %c768 = arith.constant 768 : index
    %32 = vector.load %arg5[%c0_44, %c0_45, %c0_46, %c768] : memref<1x4x4x1152xbf16, #tpu.memory_space<vmem>>, vector<1x4x4x128xbf16>
    %33 = vector.shape_cast %32 : vector<1x4x4x128xbf16> to vector<4x4x128xbf16>
    %34 = vector.shape_cast %31 : vector<4x4x128xbf16> to vector<1x4x4x128xbf16>
    tpu.vector_store %arg5[%c0_44, %c0_45, %c0_46, %c768], %34 {strides = array<i32>} : memref<1x4x4x1152xbf16, #tpu.memory_space<vmem>>, vector<1x4x4x128xbf16>,
    %c0_47 = arith.constant 0 : index
    %c2_48 = arith.constant 2 : index
    %c1_49 = arith.constant 1 : index
    %c0_50 = arith.constant 0 : index
    %35 = vector.load %arg1[%c0_47, %c2_48, %c1_49, %c0_50] : memref<1x6x6x128xbf16, #tpu.memory_space<vmem>>, vector<1x4x4x128xbf16>
    %36 = vector.shape_cast %35 : vector<1x4x4x128xbf16> to vector<4x4x128xbf16>
    %c0_51 = arith.constant 0 : index
    %c0_52 = arith.constant 0 : index
    %c0_53 = arith.constant 0 : index
    %c896 = arith.constant 896 : index
    %37 = vector.load %arg5[%c0_51, %c0_52, %c0_53, %c896] : memref<1x4x4x1152xbf16, #tpu.memory_space<vmem>>, vector<1x4x4x128xbf16>
    %38 = vector.shape_cast %37 : vector<1x4x4x128xbf16> to vector<4x4x128xbf16>
    %39 = vector.shape_cast %36 : vector<4x4x128xbf16> to vector<1x4x4x128xbf16>
    tpu.vector_store %arg5[%c0_51, %c0_52, %c0_53, %c896], %39 {strides = array<i32>} : memref<1x4x4x1152xbf16, #tpu.memory_space<vmem>>, vector<1x4x4x128xbf16>,
    %c0_54 = arith.constant 0 : index
    %c2_55 = arith.constant 2 : index
    %c2_56 = arith.constant 2 : index
    %c0_57 = arith.constant 0 : index
    %40 = vector.load %arg1[%c0_54, %c2_55, %c2_56, %c0_57] : memref<1x6x6x128xbf16, #tpu.memory_space<vmem>>, vector<1x4x4x128xbf16>
    %41 = vector.shape_cast %40 : vector<1x4x4x128xbf16> to vector<4x4x128xbf16>
    %c0_58 = arith.constant 0 : index
    %c0_59 = arith.constant 0 : index
    %c0_60 = arith.constant 0 : index
    %c1024 = arith.constant 1024 : index
    %42 = vector.load %arg5[%c0_58, %c0_59, %c0_60, %c1024] : memref<1x4x4x1152xbf16, #tpu.memory_space<vmem>>, vector<1x4x4x128xbf16>
    %43 = vector.shape_cast %42 : vector<1x4x4x128xbf16> to vector<4x4x128xbf16>
    %44 = vector.shape_cast %41 : vector<4x4x128xbf16> to vector<1x4x4x128xbf16>
    tpu.vector_store %arg5[%c0_58, %c0_59, %c0_60, %c1024], %44 {strides = array<i32>} : memref<1x4x4x1152xbf16, #tpu.memory_space<vmem>>, vector<1x4x4x128xbf16>,
    %c0_61 = arith.constant 0 : index
    %c0_62 = arith.constant 0 : index
    %c0_63 = arith.constant 0 : index
    %c0_64 = arith.constant 0 : index
    %45 = vector.load %arg5[%c0_61, %c0_62, %c0_63, %c0_64] : memref<1x4x4x1152xbf16, #tpu.memory_space<vmem>>, vector<1x4x4x1152xbf16>
    %46 = vector.shape_cast %45 : vector<1x4x4x1152xbf16> to vector<16x1152xbf16>
    %c0_65 = arith.constant 0 : index
    %c0_66 = arith.constant 0 : index
    %47 = vector.load %arg2[%c0_65, %c0_66] : memref<1152x128xbf16, #tpu.memory_space<vmem>>, vector<1152x128xbf16>
    %cst = arith.constant dense<0.000000e+00> : vector<16x128xf32>
    %48 = tpu.matmul %46, %47, %cst {dimension_numbers = #tpu.dot_dimension_numbers<[1], [0], [0], [1], [0, 0, 1, 1], [], []>} : vector<16x1152xbf16>, vector<1152x128xbf16>, vector<16x128xf32> -> vector<16x128xf32>
    %c0_67 = arith.constant 0 : index
    %c0_68 = arith.constant 0 : index
    %49 = vector.load %arg3[%c0_67, %c0_68] : memref<1x128xf32, #tpu.memory_space<vmem>>, vector<1x128xf32>
    %50 = vector.broadcast %49 : vector<1x128xf32> to vector<16x128xf32>
    %51 = arith.addf %48, %50 : vector<16x128xf32>
    %cst_69 = arith.constant 0.000000e+00 : f32
    %52 = vector.broadcast %cst_69 : f32 to vector<16x128xf32>
    %53 = arith.maximumf %51, %52 : vector<16x128xf32>
    %54 = vector.shape_cast %53 : vector<16x128xf32> to vector<1x4x4x128xf32>
    %55 = arith.truncf %54 : vector<1x4x4x128xf32> to vector<1x4x4x128xbf16>
    %c0_70 = arith.constant 0 : index
    %c0_71 = arith.constant 0 : index
    %c0_72 = arith.constant 0 : index
    %c0_73 = arith.constant 0 : index
    %56 = vector.load %arg4[%c0_70, %c0_71, %c0_72, %c0_73] : memref<1x4x4x128xbf16, #tpu.memory_space<vmem>>, vector<1x4x4x128xbf16>
    tpu.vector_store %arg4[%c0_70, %c0_71, %c0_72, %c0_73], %55 {strides = array<i32>} : memref<1x4x4x128xbf16, #tpu.memory_space<vmem>>, vector<1x4x4x128xbf16>,
    return
  }
  func.func @transform_0(%arg0: i32) -> (i32, i32, i32, i32) {
    %c0_i32 = arith.constant 0 : i32
    %c0_i32_0 = arith.constant 0 : i32
    %c0_i32_1 = arith.constant 0 : i32
    %c0_i32_2 = arith.constant 0 : i32
    return %arg0, %c0_i32, %c0_i32_0, %c0_i32_1 : i32, i32, i32, i32
  }
  func.func @transform_1(%arg0: i32) -> (i32, i32) {
    %c0_i32 = arith.constant 0 : i32
    %c0_i32_0 = arith.constant 0 : i32
    %c0_i32_1 = arith.constant 0 : i32
    return %c0_i32, %c0_i32_0 : i32, i32
  }
  func.func @transform_2(%arg0: i32) -> (i32, i32) {
    %c0_i32 = arith.constant 0 : i32
    %c0_i32_0 = arith.constant 0 : i32
    %c0_i32_1 = arith.constant 0 : i32
    return %c0_i32, %c0_i32_0 : i32, i32
  }
  func.func @transform_3(%arg0: i32) -> (i32, i32, i32, i32) {
    %c0_i32 = arith.constant 0 : i32
    %c0_i32_0 = arith.constant 0 : i32
    %c0_i32_1 = arith.constant 0 : i32
    %c0_i32_2 = arith.constant 0 : i32
    return %arg0, %c0_i32, %c0_i32_0, %c0_i32_1 : i32, i32, i32, i32
  }
}

module attributes {stable_mosaic.version = 11 : i64} {
  func.func @_fused_matmul_direct_kernel(%arg0: i32, %arg1: memref<32x128xbf16, #tpu.memory_space<vmem>>, %arg2: memref<128x128xbf16, #tpu.memory_space<vmem>>, %arg3: memref<1x128xf32, #tpu.memory_space<vmem>>, %arg4: memref<32x128xbf16, #tpu.memory_space<vmem>>) attributes {dimension_semantics = [#tpu.dimension_semantics<parallel>], iteration_bounds = array<i64: 1>, scalar_prefetch = 0 : i64, scratch_operands = 0 : i64, tpu.core_type = #tpu.core_type<tc>, window_params = [{transform_indices = @transform_0, window_bounds = array<i64: 32, 128>}, {pipeline_mode = #tpu.pipeline_mode<synchronous>, transform_indices = @transform_1, window_bounds = array<i64: 128, 128>}, {pipeline_mode = #tpu.pipeline_mode<synchronous>, transform_indices = @transform_2, window_bounds = array<i64: 1, 128>}, {transform_indices = @transform_3, window_bounds = array<i64: 32, 128>}]} {
    %c0 = arith.constant 0 : index
    %c0_0 = arith.constant 0 : index
    %0 = vector.load %arg1[%c0, %c0_0] : memref<32x128xbf16, #tpu.memory_space<vmem>>, vector<32x128xbf16>
    %c0_1 = arith.constant 0 : index
    %c0_2 = arith.constant 0 : index
    %1 = vector.load %arg2[%c0_1, %c0_2] : memref<128x128xbf16, #tpu.memory_space<vmem>>, vector<128x128xbf16>
    %cst = arith.constant dense<0.000000e+00> : vector<32x128xf32>
    %2 = tpu.matmul %0, %1, %cst {dimension_numbers = #tpu.dot_dimension_numbers<[1], [0], [0], [1], [0, 0, 1, 1], [], []>} : vector<32x128xbf16>, vector<128x128xbf16>, vector<32x128xf32> -> vector<32x128xf32>
    %c0_3 = arith.constant 0 : index
    %c0_4 = arith.constant 0 : index
    %3 = vector.load %arg3[%c0_3, %c0_4] : memref<1x128xf32, #tpu.memory_space<vmem>>, vector<1x128xf32>
    %4 = vector.broadcast %3 : vector<1x128xf32> to vector<32x128xf32>
    %5 = arith.addf %2, %4 : vector<32x128xf32>
    %cst_5 = arith.constant 0.000000e+00 : f32
    %6 = vector.broadcast %cst_5 : f32 to vector<32x128xf32>
    %7 = arith.maximumf %5, %6 : vector<32x128xf32>
    %8 = arith.truncf %7 : vector<32x128xf32> to vector<32x128xbf16>
    %c0_6 = arith.constant 0 : index
    %c0_7 = arith.constant 0 : index
    %9 = vector.load %arg4[%c0_6, %c0_7] : memref<32x128xbf16, #tpu.memory_space<vmem>>, vector<32x128xbf16>
    tpu.vector_store %arg4[%c0_6, %c0_7], %8 {strides = array<i32>} : memref<32x128xbf16, #tpu.memory_space<vmem>>, vector<32x128xbf16>,
    return
  }
  func.func @transform_0(%arg0: i32) -> (i32, i32) {
    %c0_i32 = arith.constant 0 : i32
    %c0_i32_0 = arith.constant 0 : i32
    return %arg0, %c0_i32 : i32, i32
  }
  func.func @transform_1(%arg0: i32) -> (i32, i32) {
    %c0_i32 = arith.constant 0 : i32
    %c0_i32_0 = arith.constant 0 : i32
    %c0_i32_1 = arith.constant 0 : i32
    return %c0_i32, %c0_i32_0 : i32, i32
  }
  func.func @transform_2(%arg0: i32) -> (i32, i32) {
    %c0_i32 = arith.constant 0 : i32
    %c0_i32_0 = arith.constant 0 : i32
    %c0_i32_1 = arith.constant 0 : i32
    return %c0_i32, %c0_i32_0 : i32, i32
  }
  func.func @transform_3(%arg0: i32) -> (i32, i32) {
    %c0_i32 = arith.constant 0 : i32
    %c0_i32_0 = arith.constant 0 : i32
    return %arg0, %c0_i32 : i32, i32
  }
}

module attributes {stable_mosaic.version = 11 : i64} {
  func.func @_fused_matmul_acc_kernel(%arg0: i32, %arg1: i32, %arg2: memref<16x128xbf16, #tpu.memory_space<vmem>>, %arg3: memref<128x256xbf16, #tpu.memory_space<vmem>>, %arg4: memref<1x256xf32, #tpu.memory_space<vmem>>, %arg5: memref<16x256xbf16, #tpu.memory_space<vmem>>, %arg6: memref<16x256xf32, #tpu.memory_space<vmem>>) attributes {dimension_semantics = [#tpu.dimension_semantics<parallel>, #tpu.dimension_semantics<arbitrary>], iteration_bounds = array<i64: 1, 4>, scalar_prefetch = 0 : i64, scratch_operands = 1 : i64, tpu.core_type = #tpu.core_type<tc>, window_params = [{transform_indices = @transform_0, window_bounds = array<i64: 16, 128>}, {pipeline_mode = #tpu.pipeline_mode<synchronous>, transform_indices = @transform_1, window_bounds = array<i64: 128, 256>}, {pipeline_mode = #tpu.pipeline_mode<synchronous>, transform_indices = @transform_2, window_bounds = array<i64: 1, 256>}, {transform_indices = @transform_3, window_bounds = array<i64: 16, 256>}]} {
    %c0_i32 = arith.constant 0 : i32
    %0 = arith.cmpi eq, %arg1, %c0_i32 : i32
    %1 = arith.extui %0 : i1 to i32
    %c0_i32_0 = arith.constant 0 : i32
    %2 = arith.cmpi ne, %1, %c0_i32_0 : i32
    scf.if %2 {
      %cst_9 = arith.constant 0.000000e+00 : f32
      %12 = vector.broadcast %cst_9 : f32 to vector<16x256xf32>
      %c0_10 = arith.constant 0 : index
      %c0_11 = arith.constant 0 : index
      %13 = vector.load %arg6[%c0_10, %c0_11] : memref<16x256xf32, #tpu.memory_space<vmem>>, vector<16x256xf32>
      tpu.vector_store %arg6[%c0_10, %c0_11], %12 {strides = array<i32>} : memref<16x256xf32, #tpu.memory_space<vmem>>, vector<16x256xf32>,
    } else {
    }
    %c0 = arith.constant 0 : index
    %c0_1 = arith.constant 0 : index
    %3 = vector.load %arg6[%c0, %c0_1] : memref<16x256xf32, #tpu.memory_space<vmem>>, vector<16x256xf32>
    %c0_2 = arith.constant 0 : index
    %c0_3 = arith.constant 0 : index
    %4 = vector.load %arg2[%c0_2, %c0_3] : memref<16x128xbf16, #tpu.memory_space<vmem>>, vector<16x128xbf16>
    %c0_4 = arith.constant 0 : index
    %c0_5 = arith.constant 0 : index
    %5 = vector.load %arg3[%c0_4, %c0_5] : memref<128x256xbf16, #tpu.memory_space<vmem>>, vector<128x256xbf16>
    %cst = arith.constant dense<0.000000e+00> : vector<16x256xf32>
    %6 = tpu.matmul %4, %5, %cst {dimension_numbers = #tpu.dot_dimension_numbers<[1], [0], [0], [1], [0, 0, 1, 1], [], []>} : vector<16x128xbf16>, vector<128x256xbf16>, vector<16x256xf32> -> vector<16x256xf32>
    %7 = arith.addf %3, %6 : vector<16x256xf32>
    %c0_6 = arith.constant 0 : index
    %c0_7 = arith.constant 0 : index
    %8 = vector.load %arg6[%c0_6, %c0_7] : memref<16x256xf32, #tpu.memory_space<vmem>>, vector<16x256xf32>
    tpu.vector_store %arg6[%c0_6, %c0_7], %7 {strides = array<i32>} : memref<16x256xf32, #tpu.memory_space<vmem>>, vector<16x256xf32>,
    %c3_i32 = arith.constant 3 : i32
    %9 = arith.cmpi eq, %arg1, %c3_i32 : i32
    %10 = arith.extui %9 : i1 to i32
    %c0_i32_8 = arith.constant 0 : i32
    %11 = arith.cmpi ne, %10, %c0_i32_8 : i32
    scf.if %11 {
      %c0_9 = arith.constant 0 : index
      %c0_10 = arith.constant 0 : index
      %12 = vector.load %arg6[%c0_9, %c0_10] : memref<16x256xf32, #tpu.memory_space<vmem>>, vector<16x256xf32>
      %c0_11 = arith.constant 0 : index
      %c0_12 = arith.constant 0 : index
      %13 = vector.load %arg4[%c0_11, %c0_12] : memref<1x256xf32, #tpu.memory_space<vmem>>, vector<1x256xf32>
      %14 = vector.broadcast %13 : vector<1x256xf32> to vector<16x256xf32>
      %15 = arith.addf %12, %14 : vector<16x256xf32>
      %16 = arith.truncf %15 : vector<16x256xf32> to vector<16x256xbf16>
      %c0_13 = arith.constant 0 : index
      %c0_14 = arith.constant 0 : index
      %17 = vector.load %arg5[%c0_13, %c0_14] : memref<16x256xbf16, #tpu.memory_space<vmem>>, vector<16x256xbf16>
      tpu.vector_store %arg5[%c0_13, %c0_14], %16 {strides = array<i32>} : memref<16x256xbf16, #tpu.memory_space<vmem>>, vector<16x256xbf16>,
    } else {
    }
    return
  }
  func.func @transform_0(%arg0: i32, %arg1: i32) -> (i32, i32) {
    %c0_i32 = arith.constant 0 : i32
    return %arg0, %arg1 : i32, i32
  }
  func.func @transform_1(%arg0: i32, %arg1: i32) -> (i32, i32) {
    %c0_i32 = arith.constant 0 : i32
    %c0_i32_0 = arith.constant 0 : i32
    %c0_i32_1 = arith.constant 0 : i32
    return %c0_i32, %c0_i32_0 : i32, i32
  }
  func.func @transform_2(%arg0: i32, %arg1: i32) -> (i32, i32) {
    %c0_i32 = arith.constant 0 : i32
    %c0_i32_0 = arith.constant 0 : i32
    %c0_i32_1 = arith.constant 0 : i32
    return %c0_i32, %c0_i32_0 : i32, i32
  }
  func.func @transform_3(%arg0: i32, %arg1: i32) -> (i32, i32) {
    %c0_i32 = arith.constant 0 : i32
    %c0_i32_0 = arith.constant 0 : i32
    return %arg0, %c0_i32 : i32, i32
  }
}

module attributes {stable_mosaic.version = 11 : i64} {
  func.func @_fused_matmul_acc_kernel(%arg0: i32, %arg1: i32, %arg2: memref<16x128xbf16, #tpu.memory_space<vmem>>, %arg3: memref<128x256xbf16, #tpu.memory_space<vmem>>, %arg4: memref<1x256xf32, #tpu.memory_space<vmem>>, %arg5: memref<16x256xbf16, #tpu.memory_space<vmem>>, %arg6: memref<16x256xbf16, #tpu.memory_space<vmem>>, %arg7: memref<16x256xf32, #tpu.memory_space<vmem>>) attributes {dimension_semantics = [#tpu.dimension_semantics<parallel>, #tpu.dimension_semantics<arbitrary>], iteration_bounds = array<i64: 1, 4>, scalar_prefetch = 0 : i64, scratch_operands = 1 : i64, tpu.core_type = #tpu.core_type<tc>, window_params = [{transform_indices = @transform_0, window_bounds = array<i64: 16, 128>}, {pipeline_mode = #tpu.pipeline_mode<synchronous>, transform_indices = @transform_1, window_bounds = array<i64: 128, 256>}, {pipeline_mode = #tpu.pipeline_mode<synchronous>, transform_indices = @transform_2, window_bounds = array<i64: 1, 256>}, {transform_indices = @transform_3, window_bounds = array<i64: 16, 256>}, {transform_indices = @transform_4, window_bounds = array<i64: 16, 256>}]} {
    %c0_i32 = arith.constant 0 : i32
    %0 = arith.cmpi eq, %arg1, %c0_i32 : i32
    %1 = arith.extui %0 : i1 to i32
    %c0_i32_0 = arith.constant 0 : i32
    %2 = arith.cmpi ne, %1, %c0_i32_0 : i32
    scf.if %2 {
      %cst_9 = arith.constant 0.000000e+00 : f32
      %12 = vector.broadcast %cst_9 : f32 to vector<16x256xf32>
      %c0_10 = arith.constant 0 : index
      %c0_11 = arith.constant 0 : index
      %13 = vector.load %arg7[%c0_10, %c0_11] : memref<16x256xf32, #tpu.memory_space<vmem>>, vector<16x256xf32>
      tpu.vector_store %arg7[%c0_10, %c0_11], %12 {strides = array<i32>} : memref<16x256xf32, #tpu.memory_space<vmem>>, vector<16x256xf32>,
    } else {
    }
    %c0 = arith.constant 0 : index
    %c0_1 = arith.constant 0 : index
    %3 = vector.load %arg7[%c0, %c0_1] : memref<16x256xf32, #tpu.memory_space<vmem>>, vector<16x256xf32>
    %c0_2 = arith.constant 0 : index
    %c0_3 = arith.constant 0 : index
    %4 = vector.load %arg2[%c0_2, %c0_3] : memref<16x128xbf16, #tpu.memory_space<vmem>>, vector<16x128xbf16>
    %c0_4 = arith.constant 0 : index
    %c0_5 = arith.constant 0 : index
    %5 = vector.load %arg3[%c0_4, %c0_5] : memref<128x256xbf16, #tpu.memory_space<vmem>>, vector<128x256xbf16>
    %cst = arith.constant dense<0.000000e+00> : vector<16x256xf32>
    %6 = tpu.matmul %4, %5, %cst {dimension_numbers = #tpu.dot_dimension_numbers<[1], [0], [0], [1], [0, 0, 1, 1], [], []>} : vector<16x128xbf16>, vector<128x256xbf16>, vector<16x256xf32> -> vector<16x256xf32>
    %7 = arith.addf %3, %6 : vector<16x256xf32>
    %c0_6 = arith.constant 0 : index
    %c0_7 = arith.constant 0 : index
    %8 = vector.load %arg7[%c0_6, %c0_7] : memref<16x256xf32, #tpu.memory_space<vmem>>, vector<16x256xf32>
    tpu.vector_store %arg7[%c0_6, %c0_7], %7 {strides = array<i32>} : memref<16x256xf32, #tpu.memory_space<vmem>>, vector<16x256xf32>,
    %c3_i32 = arith.constant 3 : i32
    %9 = arith.cmpi eq, %arg1, %c3_i32 : i32
    %10 = arith.extui %9 : i1 to i32
    %c0_i32_8 = arith.constant 0 : i32
    %11 = arith.cmpi ne, %10, %c0_i32_8 : i32
    scf.if %11 {
      %c0_9 = arith.constant 0 : index
      %c0_10 = arith.constant 0 : index
      %12 = vector.load %arg7[%c0_9, %c0_10] : memref<16x256xf32, #tpu.memory_space<vmem>>, vector<16x256xf32>
      %c0_11 = arith.constant 0 : index
      %c0_12 = arith.constant 0 : index
      %13 = vector.load %arg4[%c0_11, %c0_12] : memref<1x256xf32, #tpu.memory_space<vmem>>, vector<1x256xf32>
      %14 = vector.broadcast %13 : vector<1x256xf32> to vector<16x256xf32>
      %15 = arith.addf %12, %14 : vector<16x256xf32>
      %c0_13 = arith.constant 0 : index
      %c0_14 = arith.constant 0 : index
      %16 = vector.load %arg5[%c0_13, %c0_14] : memref<16x256xbf16, #tpu.memory_space<vmem>>, vector<16x256xbf16>
      %17 = arith.extf %16 : vector<16x256xbf16> to vector<16x256xf32>
      %18 = arith.addf %15, %17 : vector<16x256xf32>
      %cst_15 = arith.constant 0.000000e+00 : f32
      %19 = vector.broadcast %cst_15 : f32 to vector<16x256xf32>
      %20 = arith.maximumf %18, %19 : vector<16x256xf32>
      %21 = arith.truncf %20 : vector<16x256xf32> to vector<16x256xbf16>
      %c0_16 = arith.constant 0 : index
      %c0_17 = arith.constant 0 : index
      %22 = vector.load %arg6[%c0_16, %c0_17] : memref<16x256xbf16, #tpu.memory_space<vmem>>, vector<16x256xbf16>
      tpu.vector_store %arg6[%c0_16, %c0_17], %21 {strides = array<i32>} : memref<16x256xbf16, #tpu.memory_space<vmem>>, vector<16x256xbf16>,
    } else {
    }
    return
  }
  func.func @transform_0(%arg0: i32, %arg1: i32) -> (i32, i32) {
    %c0_i32 = arith.constant 0 : i32
    return %arg0, %arg1 : i32, i32
  }
  func.func @transform_1(%arg0: i32, %arg1: i32) -> (i32, i32) {
    %c0_i32 = arith.constant 0 : i32
    %c0_i32_0 = arith.constant 0 : i32
    %c0_i32_1 = arith.constant 0 : i32
    return %c0_i32, %c0_i32_0 : i32, i32
  }
  func.func @transform_2(%arg0: i32, %arg1: i32) -> (i32, i32) {
    %c0_i32 = arith.constant 0 : i32
    %c0_i32_0 = arith.constant 0 : i32
    %c0_i32_1 = arith.constant 0 : i32
    return %c0_i32, %c0_i32_0 : i32, i32
  }
  func.func @transform_3(%arg0: i32, %arg1: i32) -> (i32, i32) {
    %c0_i32 = arith.constant 0 : i32
    %c0_i32_0 = arith.constant 0 : i32
    return %arg0, %c0_i32 : i32, i32
  }
  func.func @transform_4(%arg0: i32, %arg1: i32) -> (i32, i32) {
    %c0_i32 = arith.constant 0 : i32
    %c0_i32_0 = arith.constant 0 : i32
    return %arg0, %c0_i32 : i32, i32
  }
}

module attributes {stable_mosaic.version = 11 : i64} {
  func.func @_fused_matmul_acc_kernel(%arg0: i32, %arg1: i32, %arg2: memref<16x256xbf16, #tpu.memory_space<vmem>>, %arg3: memref<256x512xbf16, #tpu.memory_space<vmem>>, %arg4: memref<1x512xf32, #tpu.memory_space<vmem>>, %arg5: memref<16x512xbf16, #tpu.memory_space<vmem>>, %arg6: memref<16x512xf32, #tpu.memory_space<vmem>>) attributes {dimension_semantics = [#tpu.dimension_semantics<parallel>, #tpu.dimension_semantics<arbitrary>], iteration_bounds = array<i64: 1, 4>, scalar_prefetch = 0 : i64, scratch_operands = 1 : i64, tpu.core_type = #tpu.core_type<tc>, window_params = [{transform_indices = @transform_0, window_bounds = array<i64: 16, 256>}, {pipeline_mode = #tpu.pipeline_mode<synchronous>, transform_indices = @transform_1, window_bounds = array<i64: 256, 512>}, {pipeline_mode = #tpu.pipeline_mode<synchronous>, transform_indices = @transform_2, window_bounds = array<i64: 1, 512>}, {transform_indices = @transform_3, window_bounds = array<i64: 16, 512>}]} {
    %c0_i32 = arith.constant 0 : i32
    %0 = arith.cmpi eq, %arg1, %c0_i32 : i32
    %1 = arith.extui %0 : i1 to i32
    %c0_i32_0 = arith.constant 0 : i32
    %2 = arith.cmpi ne, %1, %c0_i32_0 : i32
    scf.if %2 {
      %cst_9 = arith.constant 0.000000e+00 : f32
      %12 = vector.broadcast %cst_9 : f32 to vector<16x512xf32>
      %c0_10 = arith.constant 0 : index
      %c0_11 = arith.constant 0 : index
      %13 = vector.load %arg6[%c0_10, %c0_11] : memref<16x512xf32, #tpu.memory_space<vmem>>, vector<16x512xf32>
      tpu.vector_store %arg6[%c0_10, %c0_11], %12 {strides = array<i32>} : memref<16x512xf32, #tpu.memory_space<vmem>>, vector<16x512xf32>,
    } else {
    }
    %c0 = arith.constant 0 : index
    %c0_1 = arith.constant 0 : index
    %3 = vector.load %arg6[%c0, %c0_1] : memref<16x512xf32, #tpu.memory_space<vmem>>, vector<16x512xf32>
    %c0_2 = arith.constant 0 : index
    %c0_3 = arith.constant 0 : index
    %4 = vector.load %arg2[%c0_2, %c0_3] : memref<16x256xbf16, #tpu.memory_space<vmem>>, vector<16x256xbf16>
    %c0_4 = arith.constant 0 : index
    %c0_5 = arith.constant 0 : index
    %5 = vector.load %arg3[%c0_4, %c0_5] : memref<256x512xbf16, #tpu.memory_space<vmem>>, vector<256x512xbf16>
    %cst = arith.constant dense<0.000000e+00> : vector<16x512xf32>
    %6 = tpu.matmul %4, %5, %cst {dimension_numbers = #tpu.dot_dimension_numbers<[1], [0], [0], [1], [0, 0, 1, 1], [], []>} : vector<16x256xbf16>, vector<256x512xbf16>, vector<16x512xf32> -> vector<16x512xf32>
    %7 = arith.addf %3, %6 : vector<16x512xf32>
    %c0_6 = arith.constant 0 : index
    %c0_7 = arith.constant 0 : index
    %8 = vector.load %arg6[%c0_6, %c0_7] : memref<16x512xf32, #tpu.memory_space<vmem>>, vector<16x512xf32>
    tpu.vector_store %arg6[%c0_6, %c0_7], %7 {strides = array<i32>} : memref<16x512xf32, #tpu.memory_space<vmem>>, vector<16x512xf32>,
    %c3_i32 = arith.constant 3 : i32
    %9 = arith.cmpi eq, %arg1, %c3_i32 : i32
    %10 = arith.extui %9 : i1 to i32
    %c0_i32_8 = arith.constant 0 : i32
    %11 = arith.cmpi ne, %10, %c0_i32_8 : i32
    scf.if %11 {
      %c0_9 = arith.constant 0 : index
      %c0_10 = arith.constant 0 : index
      %12 = vector.load %arg6[%c0_9, %c0_10] : memref<16x512xf32, #tpu.memory_space<vmem>>, vector<16x512xf32>
      %c0_11 = arith.constant 0 : index
      %c0_12 = arith.constant 0 : index
      %13 = vector.load %arg4[%c0_11, %c0_12] : memref<1x512xf32, #tpu.memory_space<vmem>>, vector<1x512xf32>
      %14 = vector.broadcast %13 : vector<1x512xf32> to vector<16x512xf32>
      %15 = arith.addf %12, %14 : vector<16x512xf32>
      %16 = arith.truncf %15 : vector<16x512xf32> to vector<16x512xbf16>
      %c0_13 = arith.constant 0 : index
      %c0_14 = arith.constant 0 : index
      %17 = vector.load %arg5[%c0_13, %c0_14] : memref<16x512xbf16, #tpu.memory_space<vmem>>, vector<16x512xbf16>
      tpu.vector_store %arg5[%c0_13, %c0_14], %16 {strides = array<i32>} : memref<16x512xbf16, #tpu.memory_space<vmem>>, vector<16x512xbf16>,
    } else {
    }
    return
  }
  func.func @transform_0(%arg0: i32, %arg1: i32) -> (i32, i32) {
    %c0_i32 = arith.constant 0 : i32
    return %arg0, %arg1 : i32, i32
  }
  func.func @transform_1(%arg0: i32, %arg1: i32) -> (i32, i32) {
    %c0_i32 = arith.constant 0 : i32
    %c0_i32_0 = arith.constant 0 : i32
    %c0_i32_1 = arith.constant 0 : i32
    return %c0_i32, %c0_i32_0 : i32, i32
  }
  func.func @transform_2(%arg0: i32, %arg1: i32) -> (i32, i32) {
    %c0_i32 = arith.constant 0 : i32
    %c0_i32_0 = arith.constant 0 : i32
    %c0_i32_1 = arith.constant 0 : i32
    return %c0_i32, %c0_i32_0 : i32, i32
  }
  func.func @transform_3(%arg0: i32, %arg1: i32) -> (i32, i32) {
    %c0_i32 = arith.constant 0 : i32
    %c0_i32_0 = arith.constant 0 : i32
    return %arg0, %c0_i32 : i32, i32
  }
}

module attributes {stable_mosaic.version = 11 : i64} {
  func.func @_fused_matmul_direct_kernel(%arg0: i32, %arg1: memref<16x256xbf16, #tpu.memory_space<vmem>>, %arg2: memref<256x128xbf16, #tpu.memory_space<vmem>>, %arg3: memref<1x128xf32, #tpu.memory_space<vmem>>, %arg4: memref<16x128xbf16, #tpu.memory_space<vmem>>) attributes {dimension_semantics = [#tpu.dimension_semantics<parallel>], iteration_bounds = array<i64: 1>, scalar_prefetch = 0 : i64, scratch_operands = 0 : i64, tpu.core_type = #tpu.core_type<tc>, window_params = [{transform_indices = @transform_0, window_bounds = array<i64: 16, 256>}, {pipeline_mode = #tpu.pipeline_mode<synchronous>, transform_indices = @transform_1, window_bounds = array<i64: 256, 128>}, {pipeline_mode = #tpu.pipeline_mode<synchronous>, transform_indices = @transform_2, window_bounds = array<i64: 1, 128>}, {transform_indices = @transform_3, window_bounds = array<i64: 16, 128>}]} {
    %c0 = arith.constant 0 : index
    %c0_0 = arith.constant 0 : index
    %0 = vector.load %arg1[%c0, %c0_0] : memref<16x256xbf16, #tpu.memory_space<vmem>>, vector<16x256xbf16>
    %c0_1 = arith.constant 0 : index
    %c0_2 = arith.constant 0 : index
    %1 = vector.load %arg2[%c0_1, %c0_2] : memref<256x128xbf16, #tpu.memory_space<vmem>>, vector<256x128xbf16>
    %cst = arith.constant dense<0.000000e+00> : vector<16x128xf32>
    %2 = tpu.matmul %0, %1, %cst {dimension_numbers = #tpu.dot_dimension_numbers<[1], [0], [0], [1], [0, 0, 1, 1], [], []>} : vector<16x256xbf16>, vector<256x128xbf16>, vector<16x128xf32> -> vector<16x128xf32>
    %c0_3 = arith.constant 0 : index
    %c0_4 = arith.constant 0 : index
    %3 = vector.load %arg3[%c0_3, %c0_4] : memref<1x128xf32, #tpu.memory_space<vmem>>, vector<1x128xf32>
    %4 = vector.broadcast %3 : vector<1x128xf32> to vector<16x128xf32>
    %5 = arith.addf %2, %4 : vector<16x128xf32>
    %cst_5 = arith.constant 0.000000e+00 : f32
    %6 = vector.broadcast %cst_5 : f32 to vector<16x128xf32>
    %7 = arith.maximumf %5, %6 : vector<16x128xf32>
    %8 = arith.truncf %7 : vector<16x128xf32> to vector<16x128xbf16>
    %c0_6 = arith.constant 0 : index
    %c0_7 = arith.constant 0 : index
    %9 = vector.load %arg4[%c0_6, %c0_7] : memref<16x128xbf16, #tpu.memory_space<vmem>>, vector<16x128xbf16>
    tpu.vector_store %arg4[%c0_6, %c0_7], %8 {strides = array<i32>} : memref<16x128xbf16, #tpu.memory_space<vmem>>, vector<16x128xbf16>,
    return
  }
  func.func @transform_0(%arg0: i32) -> (i32, i32) {
    %c0_i32 = arith.constant 0 : i32
    %c0_i32_0 = arith.constant 0 : i32
    return %arg0, %c0_i32 : i32, i32
  }
  func.func @transform_1(%arg0: i32) -> (i32, i32) {
    %c0_i32 = arith.constant 0 : i32
    %c0_i32_0 = arith.constant 0 : i32
    %c0_i32_1 = arith.constant 0 : i32
    return %c0_i32, %c0_i32_0 : i32, i32
  }
  func.func @transform_2(%arg0: i32) -> (i32, i32) {
    %c0_i32 = arith.constant 0 : i32
    %c0_i32_0 = arith.constant 0 : i32
    %c0_i32_1 = arith.constant 0 : i32
    return %c0_i32, %c0_i32_0 : i32, i32
  }
  func.func @transform_3(%arg0: i32) -> (i32, i32) {
    %c0_i32 = arith.constant 0 : i32
    %c0_i32_0 = arith.constant 0 : i32
    return %arg0, %c0_i32 : i32, i32
  }
}

module attributes {stable_mosaic.version = 11 : i64} {
  func.func @_conv3x3_kernel(%arg0: i32, %arg1: memref<1x4x4x128xbf16, #tpu.memory_space<vmem>>, %arg2: memref<1152x128xbf16, #tpu.memory_space<vmem>>, %arg3: memref<1x128xf32, #tpu.memory_space<vmem>>, %arg4: memref<1x2x2x128xbf16, #tpu.memory_space<vmem>>, %arg5: memref<1x2x2x1152xbf16, #tpu.memory_space<vmem>>) attributes {dimension_semantics = [#tpu.dimension_semantics<parallel>], iteration_bounds = array<i64: 2>, scalar_prefetch = 0 : i64, scratch_operands = 1 : i64, tpu.core_type = #tpu.core_type<tc>, window_params = [{transform_indices = @transform_0, window_bounds = array<i64: 1, 4, 4, 128>}, {pipeline_mode = #tpu.pipeline_mode<synchronous>, transform_indices = @transform_1, window_bounds = array<i64: 1152, 128>}, {pipeline_mode = #tpu.pipeline_mode<synchronous>, transform_indices = @transform_2, window_bounds = array<i64: 1, 128>}, {transform_indices = @transform_3, window_bounds = array<i64: 1, 2, 2, 128>}]} {
    %c0 = arith.constant 0 : index
    %c0_0 = arith.constant 0 : index
    %c0_1 = arith.constant 0 : index
    %c0_2 = arith.constant 0 : index
    %0 = vector.load %arg1[%c0, %c0_0, %c0_1, %c0_2] : memref<1x4x4x128xbf16, #tpu.memory_space<vmem>>, vector<1x2x2x128xbf16>
    %1 = vector.shape_cast %0 : vector<1x2x2x128xbf16> to vector<2x2x128xbf16>
    %c0_3 = arith.constant 0 : index
    %c0_4 = arith.constant 0 : index
    %c0_5 = arith.constant 0 : index
    %c0_6 = arith.constant 0 : index
    %2 = vector.load %arg5[%c0_3, %c0_4, %c0_5, %c0_6] : memref<1x2x2x1152xbf16, #tpu.memory_space<vmem>>, vector<1x2x2x128xbf16>
    %3 = vector.shape_cast %2 : vector<1x2x2x128xbf16> to vector<2x2x128xbf16>
    %4 = vector.shape_cast %1 : vector<2x2x128xbf16> to vector<1x2x2x128xbf16>
    tpu.vector_store %arg5[%c0_3, %c0_4, %c0_5, %c0_6], %4 {strides = array<i32>} : memref<1x2x2x1152xbf16, #tpu.memory_space<vmem>>, vector<1x2x2x128xbf16>,
    %c0_7 = arith.constant 0 : index
    %c0_8 = arith.constant 0 : index
    %c1 = arith.constant 1 : index
    %c0_9 = arith.constant 0 : index
    %5 = vector.load %arg1[%c0_7, %c0_8, %c1, %c0_9] : memref<1x4x4x128xbf16, #tpu.memory_space<vmem>>, vector<1x2x2x128xbf16>
    %6 = vector.shape_cast %5 : vector<1x2x2x128xbf16> to vector<2x2x128xbf16>
    %c0_10 = arith.constant 0 : index
    %c0_11 = arith.constant 0 : index
    %c0_12 = arith.constant 0 : index
    %c128 = arith.constant 128 : index
    %7 = vector.load %arg5[%c0_10, %c0_11, %c0_12, %c128] : memref<1x2x2x1152xbf16, #tpu.memory_space<vmem>>, vector<1x2x2x128xbf16>
    %8 = vector.shape_cast %7 : vector<1x2x2x128xbf16> to vector<2x2x128xbf16>
    %9 = vector.shape_cast %6 : vector<2x2x128xbf16> to vector<1x2x2x128xbf16>
    tpu.vector_store %arg5[%c0_10, %c0_11, %c0_12, %c128], %9 {strides = array<i32>} : memref<1x2x2x1152xbf16, #tpu.memory_space<vmem>>, vector<1x2x2x128xbf16>,
    %c0_13 = arith.constant 0 : index
    %c0_14 = arith.constant 0 : index
    %c2 = arith.constant 2 : index
    %c0_15 = arith.constant 0 : index
    %10 = vector.load %arg1[%c0_13, %c0_14, %c2, %c0_15] : memref<1x4x4x128xbf16, #tpu.memory_space<vmem>>, vector<1x2x2x128xbf16>
    %11 = vector.shape_cast %10 : vector<1x2x2x128xbf16> to vector<2x2x128xbf16>
    %c0_16 = arith.constant 0 : index
    %c0_17 = arith.constant 0 : index
    %c0_18 = arith.constant 0 : index
    %c256 = arith.constant 256 : index
    %12 = vector.load %arg5[%c0_16, %c0_17, %c0_18, %c256] : memref<1x2x2x1152xbf16, #tpu.memory_space<vmem>>, vector<1x2x2x128xbf16>
    %13 = vector.shape_cast %12 : vector<1x2x2x128xbf16> to vector<2x2x128xbf16>
    %14 = vector.shape_cast %11 : vector<2x2x128xbf16> to vector<1x2x2x128xbf16>
    tpu.vector_store %arg5[%c0_16, %c0_17, %c0_18, %c256], %14 {strides = array<i32>} : memref<1x2x2x1152xbf16, #tpu.memory_space<vmem>>, vector<1x2x2x128xbf16>,
    %c0_19 = arith.constant 0 : index
    %c1_20 = arith.constant 1 : index
    %c0_21 = arith.constant 0 : index
    %c0_22 = arith.constant 0 : index
    %15 = vector.load %arg1[%c0_19, %c1_20, %c0_21, %c0_22] : memref<1x4x4x128xbf16, #tpu.memory_space<vmem>>, vector<1x2x2x128xbf16>
    %16 = vector.shape_cast %15 : vector<1x2x2x128xbf16> to vector<2x2x128xbf16>
    %c0_23 = arith.constant 0 : index
    %c0_24 = arith.constant 0 : index
    %c0_25 = arith.constant 0 : index
    %c384 = arith.constant 384 : index
    %17 = vector.load %arg5[%c0_23, %c0_24, %c0_25, %c384] : memref<1x2x2x1152xbf16, #tpu.memory_space<vmem>>, vector<1x2x2x128xbf16>
    %18 = vector.shape_cast %17 : vector<1x2x2x128xbf16> to vector<2x2x128xbf16>
    %19 = vector.shape_cast %16 : vector<2x2x128xbf16> to vector<1x2x2x128xbf16>
    tpu.vector_store %arg5[%c0_23, %c0_24, %c0_25, %c384], %19 {strides = array<i32>} : memref<1x2x2x1152xbf16, #tpu.memory_space<vmem>>, vector<1x2x2x128xbf16>,
    %c0_26 = arith.constant 0 : index
    %c1_27 = arith.constant 1 : index
    %c1_28 = arith.constant 1 : index
    %c0_29 = arith.constant 0 : index
    %20 = vector.load %arg1[%c0_26, %c1_27, %c1_28, %c0_29] : memref<1x4x4x128xbf16, #tpu.memory_space<vmem>>, vector<1x2x2x128xbf16>
    %21 = vector.shape_cast %20 : vector<1x2x2x128xbf16> to vector<2x2x128xbf16>
    %c0_30 = arith.constant 0 : index
    %c0_31 = arith.constant 0 : index
    %c0_32 = arith.constant 0 : index
    %c512 = arith.constant 512 : index
    %22 = vector.load %arg5[%c0_30, %c0_31, %c0_32, %c512] : memref<1x2x2x1152xbf16, #tpu.memory_space<vmem>>, vector<1x2x2x128xbf16>
    %23 = vector.shape_cast %22 : vector<1x2x2x128xbf16> to vector<2x2x128xbf16>
    %24 = vector.shape_cast %21 : vector<2x2x128xbf16> to vector<1x2x2x128xbf16>
    tpu.vector_store %arg5[%c0_30, %c0_31, %c0_32, %c512], %24 {strides = array<i32>} : memref<1x2x2x1152xbf16, #tpu.memory_space<vmem>>, vector<1x2x2x128xbf16>,
    %c0_33 = arith.constant 0 : index
    %c1_34 = arith.constant 1 : index
    %c2_35 = arith.constant 2 : index
    %c0_36 = arith.constant 0 : index
    %25 = vector.load %arg1[%c0_33, %c1_34, %c2_35, %c0_36] : memref<1x4x4x128xbf16, #tpu.memory_space<vmem>>, vector<1x2x2x128xbf16>
    %26 = vector.shape_cast %25 : vector<1x2x2x128xbf16> to vector<2x2x128xbf16>
    %c0_37 = arith.constant 0 : index
    %c0_38 = arith.constant 0 : index
    %c0_39 = arith.constant 0 : index
    %c640 = arith.constant 640 : index
    %27 = vector.load %arg5[%c0_37, %c0_38, %c0_39, %c640] : memref<1x2x2x1152xbf16, #tpu.memory_space<vmem>>, vector<1x2x2x128xbf16>
    %28 = vector.shape_cast %27 : vector<1x2x2x128xbf16> to vector<2x2x128xbf16>
    %29 = vector.shape_cast %26 : vector<2x2x128xbf16> to vector<1x2x2x128xbf16>
    tpu.vector_store %arg5[%c0_37, %c0_38, %c0_39, %c640], %29 {strides = array<i32>} : memref<1x2x2x1152xbf16, #tpu.memory_space<vmem>>, vector<1x2x2x128xbf16>,
    %c0_40 = arith.constant 0 : index
    %c2_41 = arith.constant 2 : index
    %c0_42 = arith.constant 0 : index
    %c0_43 = arith.constant 0 : index
    %30 = vector.load %arg1[%c0_40, %c2_41, %c0_42, %c0_43] : memref<1x4x4x128xbf16, #tpu.memory_space<vmem>>, vector<1x2x2x128xbf16>
    %31 = vector.shape_cast %30 : vector<1x2x2x128xbf16> to vector<2x2x128xbf16>
    %c0_44 = arith.constant 0 : index
    %c0_45 = arith.constant 0 : index
    %c0_46 = arith.constant 0 : index
    %c768 = arith.constant 768 : index
    %32 = vector.load %arg5[%c0_44, %c0_45, %c0_46, %c768] : memref<1x2x2x1152xbf16, #tpu.memory_space<vmem>>, vector<1x2x2x128xbf16>
    %33 = vector.shape_cast %32 : vector<1x2x2x128xbf16> to vector<2x2x128xbf16>
    %34 = vector.shape_cast %31 : vector<2x2x128xbf16> to vector<1x2x2x128xbf16>
    tpu.vector_store %arg5[%c0_44, %c0_45, %c0_46, %c768], %34 {strides = array<i32>} : memref<1x2x2x1152xbf16, #tpu.memory_space<vmem>>, vector<1x2x2x128xbf16>,
    %c0_47 = arith.constant 0 : index
    %c2_48 = arith.constant 2 : index
    %c1_49 = arith.constant 1 : index
    %c0_50 = arith.constant 0 : index
    %35 = vector.load %arg1[%c0_47, %c2_48, %c1_49, %c0_50] : memref<1x4x4x128xbf16, #tpu.memory_space<vmem>>, vector<1x2x2x128xbf16>
    %36 = vector.shape_cast %35 : vector<1x2x2x128xbf16> to vector<2x2x128xbf16>
    %c0_51 = arith.constant 0 : index
    %c0_52 = arith.constant 0 : index
    %c0_53 = arith.constant 0 : index
    %c896 = arith.constant 896 : index
    %37 = vector.load %arg5[%c0_51, %c0_52, %c0_53, %c896] : memref<1x2x2x1152xbf16, #tpu.memory_space<vmem>>, vector<1x2x2x128xbf16>
    %38 = vector.shape_cast %37 : vector<1x2x2x128xbf16> to vector<2x2x128xbf16>
    %39 = vector.shape_cast %36 : vector<2x2x128xbf16> to vector<1x2x2x128xbf16>
    tpu.vector_store %arg5[%c0_51, %c0_52, %c0_53, %c896], %39 {strides = array<i32>} : memref<1x2x2x1152xbf16, #tpu.memory_space<vmem>>, vector<1x2x2x128xbf16>,
    %c0_54 = arith.constant 0 : index
    %c2_55 = arith.constant 2 : index
    %c2_56 = arith.constant 2 : index
    %c0_57 = arith.constant 0 : index
    %40 = vector.load %arg1[%c0_54, %c2_55, %c2_56, %c0_57] : memref<1x4x4x128xbf16, #tpu.memory_space<vmem>>, vector<1x2x2x128xbf16>
    %41 = vector.shape_cast %40 : vector<1x2x2x128xbf16> to vector<2x2x128xbf16>
    %c0_58 = arith.constant 0 : index
    %c0_59 = arith.constant 0 : index
    %c0_60 = arith.constant 0 : index
    %c1024 = arith.constant 1024 : index
    %42 = vector.load %arg5[%c0_58, %c0_59, %c0_60, %c1024] : memref<1x2x2x1152xbf16, #tpu.memory_space<vmem>>, vector<1x2x2x128xbf16>
    %43 = vector.shape_cast %42 : vector<1x2x2x128xbf16> to vector<2x2x128xbf16>
    %44 = vector.shape_cast %41 : vector<2x2x128xbf16> to vector<1x2x2x128xbf16>
    tpu.vector_store %arg5[%c0_58, %c0_59, %c0_60, %c1024], %44 {strides = array<i32>} : memref<1x2x2x1152xbf16, #tpu.memory_space<vmem>>, vector<1x2x2x128xbf16>,
    %c0_61 = arith.constant 0 : index
    %c0_62 = arith.constant 0 : index
    %c0_63 = arith.constant 0 : index
    %c0_64 = arith.constant 0 : index
    %45 = vector.load %arg5[%c0_61, %c0_62, %c0_63, %c0_64] : memref<1x2x2x1152xbf16, #tpu.memory_space<vmem>>, vector<1x2x2x1152xbf16>
    %46 = vector.shape_cast %45 : vector<1x2x2x1152xbf16> to vector<4x1152xbf16>
    %c0_65 = arith.constant 0 : index
    %c0_66 = arith.constant 0 : index
    %47 = vector.load %arg2[%c0_65, %c0_66] : memref<1152x128xbf16, #tpu.memory_space<vmem>>, vector<1152x128xbf16>
    %cst = arith.constant dense<0.000000e+00> : vector<4x128xf32>
    %48 = tpu.matmul %46, %47, %cst {dimension_numbers = #tpu.dot_dimension_numbers<[1], [0], [0], [1], [0, 0, 1, 1], [], []>} : vector<4x1152xbf16>, vector<1152x128xbf16>, vector<4x128xf32> -> vector<4x128xf32>
    %c0_67 = arith.constant 0 : index
    %c0_68 = arith.constant 0 : index
    %49 = vector.load %arg3[%c0_67, %c0_68] : memref<1x128xf32, #tpu.memory_space<vmem>>, vector<1x128xf32>
    %50 = vector.broadcast %49 : vector<1x128xf32> to vector<4x128xf32>
    %51 = arith.addf %48, %50 : vector<4x128xf32>
    %cst_69 = arith.constant 0.000000e+00 : f32
    %52 = vector.broadcast %cst_69 : f32 to vector<4x128xf32>
    %53 = arith.maximumf %51, %52 : vector<4x128xf32>
    %54 = vector.shape_cast %53 : vector<4x128xf32> to vector<1x2x2x128xf32>
    %55 = arith.truncf %54 : vector<1x2x2x128xf32> to vector<1x2x2x128xbf16>
    %c0_70 = arith.constant 0 : index
    %c0_71 = arith.constant 0 : index
    %c0_72 = arith.constant 0 : index
    %c0_73 = arith.constant 0 : index
    %56 = vector.load %arg4[%c0_70, %c0_71, %c0_72, %c0_73] : memref<1x2x2x128xbf16, #tpu.memory_space<vmem>>, vector<1x2x2x128xbf16>
    tpu.vector_store %arg4[%c0_70, %c0_71, %c0_72, %c0_73], %55 {strides = array<i32>} : memref<1x2x2x128xbf16, #tpu.memory_space<vmem>>, vector<1x2x2x128xbf16>,
    return
  }
  func.func @transform_0(%arg0: i32) -> (i32, i32, i32, i32) {
    %c0_i32 = arith.constant 0 : i32
    %c0_i32_0 = arith.constant 0 : i32
    %c0_i32_1 = arith.constant 0 : i32
    %c0_i32_2 = arith.constant 0 : i32
    return %arg0, %c0_i32, %c0_i32_0, %c0_i32_1 : i32, i32, i32, i32
  }
  func.func @transform_1(%arg0: i32) -> (i32, i32) {
    %c0_i32 = arith.constant 0 : i32
    %c0_i32_0 = arith.constant 0 : i32
    %c0_i32_1 = arith.constant 0 : i32
    return %c0_i32, %c0_i32_0 : i32, i32
  }
  func.func @transform_2(%arg0: i32) -> (i32, i32) {
    %c0_i32 = arith.constant 0 : i32
    %c0_i32_0 = arith.constant 0 : i32
    %c0_i32_1 = arith.constant 0 : i32
    return %c0_i32, %c0_i32_0 : i32, i32
  }
  func.func @transform_3(%arg0: i32) -> (i32, i32, i32, i32) {
    %c0_i32 = arith.constant 0 : i32
    %c0_i32_0 = arith.constant 0 : i32
    %c0_i32_1 = arith.constant 0 : i32
    %c0_i32_2 = arith.constant 0 : i32
    return %arg0, %c0_i32, %c0_i32_0, %c0_i32_1 : i32, i32, i32, i32
  }
}

module attributes {stable_mosaic.version = 11 : i64} {
  func.func @_fused_matmul_acc_kernel(%arg0: i32, %arg1: i32, %arg2: memref<16x128xbf16, #tpu.memory_space<vmem>>, %arg3: memref<128x512xbf16, #tpu.memory_space<vmem>>, %arg4: memref<1x512xf32, #tpu.memory_space<vmem>>, %arg5: memref<16x512xbf16, #tpu.memory_space<vmem>>, %arg6: memref<16x512xbf16, #tpu.memory_space<vmem>>, %arg7: memref<16x512xf32, #tpu.memory_space<vmem>>) attributes {dimension_semantics = [#tpu.dimension_semantics<parallel>, #tpu.dimension_semantics<arbitrary>], iteration_bounds = array<i64: 1, 4>, scalar_prefetch = 0 : i64, scratch_operands = 1 : i64, tpu.core_type = #tpu.core_type<tc>, window_params = [{transform_indices = @transform_0, window_bounds = array<i64: 16, 128>}, {pipeline_mode = #tpu.pipeline_mode<synchronous>, transform_indices = @transform_1, window_bounds = array<i64: 128, 512>}, {pipeline_mode = #tpu.pipeline_mode<synchronous>, transform_indices = @transform_2, window_bounds = array<i64: 1, 512>}, {transform_indices = @transform_3, window_bounds = array<i64: 16, 512>}, {transform_indices = @transform_4, window_bounds = array<i64: 16, 512>}]} {
    %c0_i32 = arith.constant 0 : i32
    %0 = arith.cmpi eq, %arg1, %c0_i32 : i32
    %1 = arith.extui %0 : i1 to i32
    %c0_i32_0 = arith.constant 0 : i32
    %2 = arith.cmpi ne, %1, %c0_i32_0 : i32
    scf.if %2 {
      %cst_9 = arith.constant 0.000000e+00 : f32
      %12 = vector.broadcast %cst_9 : f32 to vector<16x512xf32>
      %c0_10 = arith.constant 0 : index
      %c0_11 = arith.constant 0 : index
      %13 = vector.load %arg7[%c0_10, %c0_11] : memref<16x512xf32, #tpu.memory_space<vmem>>, vector<16x512xf32>
      tpu.vector_store %arg7[%c0_10, %c0_11], %12 {strides = array<i32>} : memref<16x512xf32, #tpu.memory_space<vmem>>, vector<16x512xf32>,
    } else {
    }
    %c0 = arith.constant 0 : index
    %c0_1 = arith.constant 0 : index
    %3 = vector.load %arg7[%c0, %c0_1] : memref<16x512xf32, #tpu.memory_space<vmem>>, vector<16x512xf32>
    %c0_2 = arith.constant 0 : index
    %c0_3 = arith.constant 0 : index
    %4 = vector.load %arg2[%c0_2, %c0_3] : memref<16x128xbf16, #tpu.memory_space<vmem>>, vector<16x128xbf16>
    %c0_4 = arith.constant 0 : index
    %c0_5 = arith.constant 0 : index
    %5 = vector.load %arg3[%c0_4, %c0_5] : memref<128x512xbf16, #tpu.memory_space<vmem>>, vector<128x512xbf16>
    %cst = arith.constant dense<0.000000e+00> : vector<16x512xf32>
    %6 = tpu.matmul %4, %5, %cst {dimension_numbers = #tpu.dot_dimension_numbers<[1], [0], [0], [1], [0, 0, 1, 1], [], []>} : vector<16x128xbf16>, vector<128x512xbf16>, vector<16x512xf32> -> vector<16x512xf32>
    %7 = arith.addf %3, %6 : vector<16x512xf32>
    %c0_6 = arith.constant 0 : index
    %c0_7 = arith.constant 0 : index
    %8 = vector.load %arg7[%c0_6, %c0_7] : memref<16x512xf32, #tpu.memory_space<vmem>>, vector<16x512xf32>
    tpu.vector_store %arg7[%c0_6, %c0_7], %7 {strides = array<i32>} : memref<16x512xf32, #tpu.memory_space<vmem>>, vector<16x512xf32>,
    %c3_i32 = arith.constant 3 : i32
    %9 = arith.cmpi eq, %arg1, %c3_i32 : i32
    %10 = arith.extui %9 : i1 to i32
    %c0_i32_8 = arith.constant 0 : i32
    %11 = arith.cmpi ne, %10, %c0_i32_8 : i32
    scf.if %11 {
      %c0_9 = arith.constant 0 : index
      %c0_10 = arith.constant 0 : index
      %12 = vector.load %arg7[%c0_9, %c0_10] : memref<16x512xf32, #tpu.memory_space<vmem>>, vector<16x512xf32>
      %c0_11 = arith.constant 0 : index
      %c0_12 = arith.constant 0 : index
      %13 = vector.load %arg4[%c0_11, %c0_12] : memref<1x512xf32, #tpu.memory_space<vmem>>, vector<1x512xf32>
      %14 = vector.broadcast %13 : vector<1x512xf32> to vector<16x512xf32>
      %15 = arith.addf %12, %14 : vector<16x512xf32>
      %c0_13 = arith.constant 0 : index
      %c0_14 = arith.constant 0 : index
      %16 = vector.load %arg5[%c0_13, %c0_14] : memref<16x512xbf16, #tpu.memory_space<vmem>>, vector<16x512xbf16>
      %17 = arith.extf %16 : vector<16x512xbf16> to vector<16x512xf32>
      %18 = arith.addf %15, %17 : vector<16x512xf32>
      %cst_15 = arith.constant 0.000000e+00 : f32
      %19 = vector.broadcast %cst_15 : f32 to vector<16x512xf32>
      %20 = arith.maximumf %18, %19 : vector<16x512xf32>
      %21 = arith.truncf %20 : vector<16x512xf32> to vector<16x512xbf16>
      %c0_16 = arith.constant 0 : index
      %c0_17 = arith.constant 0 : index
      %22 = vector.load %arg6[%c0_16, %c0_17] : memref<16x512xbf16, #tpu.memory_space<vmem>>, vector<16x512xbf16>
      tpu.vector_store %arg6[%c0_16, %c0_17], %21 {strides = array<i32>} : memref<16x512xbf16, #tpu.memory_space<vmem>>, vector<16x512xbf16>,
    } else {
    }
    return
  }
  func.func @transform_0(%arg0: i32, %arg1: i32) -> (i32, i32) {
    %c0_i32 = arith.constant 0 : i32
    return %arg0, %arg1 : i32, i32
  }
  func.func @transform_1(%arg0: i32, %arg1: i32) -> (i32, i32) {
    %c0_i32 = arith.constant 0 : i32
    %c0_i32_0 = arith.constant 0 : i32
    %c0_i32_1 = arith.constant 0 : i32
    return %c0_i32, %c0_i32_0 : i32, i32
  }
  func.func @transform_2(%arg0: i32, %arg1: i32) -> (i32, i32) {
    %c0_i32 = arith.constant 0 : i32
    %c0_i32_0 = arith.constant 0 : i32
    %c0_i32_1 = arith.constant 0 : i32
    return %c0_i32, %c0_i32_0 : i32, i32
  }
  func.func @transform_3(%arg0: i32, %arg1: i32) -> (i32, i32) {
    %c0_i32 = arith.constant 0 : i32
    %c0_i32_0 = arith.constant 0 : i32
    return %arg0, %c0_i32 : i32, i32
  }
  func.func @transform_4(%arg0: i32, %arg1: i32) -> (i32, i32) {
    %c0_i32 = arith.constant 0 : i32
    %c0_i32_0 = arith.constant 0 : i32
    return %arg0, %c0_i32 : i32, i32
  }
}

</mosaic_0001>

<bundles_post_ra>
// kernel: clip_feature_extractor_forward.19
= control target key start
LH: loop header
LB: loop body
LE: loop exit
PB: predicated region body
PF: predicated region fallthrough
CT: control target
= control target key end

     0   :  { %s1093_s12 = smov 0   ;;  %s1212_s0 = inlined_call_operand.vmem [shape: bf16[512,27], index: 0, kind: input, shape index: {}]   ;;  %s1213_s1 = inlined_call_operand.vmem [shape: bf16[27,128], index: 1, kind: input, shape index: {}]   ;;  %s1214_s2 = inlined_call_operand.vmem [shape: f32[1,128], index: 2, kind: input, shape index: {}]   ;;  %s1215_s3 = inlined_call_operand.vmem [shape: bf16[512,128], index: 3, kind: output, shape index: {}]  }
   0x1 LB: > { %s774_s13 = sadd.s32 4294967295, %s1070_s12   ;;  %p778_p0 = scmp.ge.s32.totalorder %s1070_s12, 1  ;;  %s1070_s12 = sphi %s1093_s12, %s13_s12  }
   0x2   : > { %p138_p1 = scmp.lt.s32.totalorder %s1070_s12, 3 }
   0x4   : > { %p139_p2 = pnand %p778_p0, %p138_p1 }
   0x5   : > { %v1046_v0 = vld [vmem:[%s1213_s1] sm:$0xff] (!%p139_p2)   ;;  %vm358_vm0 = vcmask (!%p139_p2), 1044480   ;;  %v1047_v1 = vld [vmem:[%s1213_s1 + $0x8] sm:$0x3f] (!%p139_p2)   ;;  %vm359_vm1 = vcmask (!%p139_p2), 1045504   ;;  %s779_s18 = sshll.u32 (!%p139_p2), %s774_s13, 5 }
   0x6   : > { %142 = sbr.rel (%p139_p2) target bundleno = 265 (0x109), region = 32  ;;  %997 = vmatprep.subr.bf16.mxu0 (!%p139_p2), %v1046_v0  ;;  %1033 = vmatprep.subr.bf16.mxu1 (!%p139_p2), %v1046_v0  ;;  %v1072_v2 = vmov (!%p139_p2), 65535   ;;  %p163_p3 = scmp.lt.s32.totalorder (!%p139_p2), %s779_s18, 63  ;;  %vm309_vm2 = vcmask (!%p139_p2), 220160   ;;  %v1152_v22 = vld [vmem:[%s1214_s2] ss:$0 sm:$0xff] (!%p139_p2) }
   0x7   : > { %998 = vmatpush3.bf16.msra.mxu0 (!%p139_p2), %v1046_v0  ;;  %1035 = vmatpush3.bf16.msra.mxu1 (!%p139_p2), %v1046_v0  ;;  %v360_v3 = vsel (!%p139_p2), %vm358_vm0, 4294967295, %v1072_v2 }
   0x8   : > { %v361_v4 = vsel (!%p139_p2), %vm359_vm1, %v360_v3, 0 }
   0x9   : > { %v363_v5 = vand.u32 (!%p139_p2), %v1047_v1, %v361_v4 }
   0xb   : > { %999 = vmatprep.subr.bf16.mxu0 (!%p139_p2), %v363_v5  ;;  %1034 = vmatprep.subr.bf16.mxu1 (!%p139_p2), %v363_v5 }
   0xc   : > { %1000 = vmatpush3.bf16.msra.mxu0 (!%p139_p2), %v363_v5  ;;  %1036 = vmatpush3.bf16.msra.mxu1 (!%p139_p2), %v363_v5 }
   0xd   : > { %s1217_s18 = smov (!%p163_p3, %s779_s18), 63 }
   0xe   : > { %s780_s19 = sshll.u32 %s1217_s18, 2 }
   0xf   : > { %s1115_s22 = scalar_lea.vmem %s1212_s0, %s780_s19  ;;  %s1167_s27 = scalar_lea.vmem %s1215_s3, %s780_s19 }
  0x10   : > { %v1048_v6 = vld [vmem:[%s1115_s22] sm:$0xff]   ;;  %v1050_v8 = vld [vmem:[%s1115_s22 + $0x8] sm:$0xff]   ;;  %v1052_v10 = vld [vmem:[%s1115_s22 + $0x10] sm:$0xff]  }
  0x11   : > { %v1049_v7 = vld [vmem:[%s1115_s22 + $0x40] sm:$0xff]   ;;  %1001 = vmatprep.mubr.msk.bf16.mxu0 %vm309_vm2, %v1048_v6  ;;  %v1051_v9 = vld [vmem:[%s1115_s22 + $0x48] sm:$0xff]   ;;  %v1053_v11 = vld [vmem:[%s1115_s22 + $0x50] sm:$0xff]  }
  0x12   : > { %1017 = vmatprep.mubr.msk.bf16.mxu1 %vm309_vm2, %v1049_v7  ;;  %1002 = vmatmul.mubr.msk.bf16.vlgmr.msra.gmra.mrb[0].mxu0 %vm309_vm2, %v1050_v8  ;;  %v1054_v12 = vld [vmem:[%s1115_s22 + $0x18] sm:$0xff]   ;;  %v1056_v14 = vld [vmem:[%s1115_s22 + $0x20] sm:$0xff]   ;;  %v1058_v16 = vld [vmem:[%s1115_s22 + $0x28] sm:$0xff]  }
  0x13   : > { %1018 = vmatmul.mubr.msk.bf16.vlgmr.msra.gmra.mrb[0].mxu1 %vm309_vm2, %v1051_v9  ;;  %1005 = vmatprep.mubr.msk.bf16.mxu0 %vm309_vm2, %v1052_v10  ;;  %v1055_v13 = vld [vmem:[%s1115_s22 + $0x58] sm:$0xff]   ;;  %v1057_v15 = vld [vmem:[%s1115_s22 + $0x60] sm:$0xff]   ;;  %v1059_v17 = vld [vmem:[%s1115_s22 + $0x68] sm:$0xff]  }
  0x14   : > { %1021 = vmatprep.mubr.msk.bf16.mxu1 %vm309_vm2, %v1053_v11  ;;  %v1060_v18 = vld [vmem:[%s1115_s22 + $0x30] sm:$0xff]   ;;  %v1062_v20 = vld [vmem:[%s1115_s22 + $0x38] sm:$0xff]  }
  0x15   : > { %v1061_v19 = vld [vmem:[%s1115_s22 + $0x70] sm:$0xff]   ;;  %v1063_v21 = vld [vmem:[%s1115_s22 + $0x78] sm:$0xff]  }
  0x1a   : > { %1006 = vmatmul.mubr.msk.bf16.gmra.mrb[4].mxu0 %vm309_vm2, %v1054_v12 }
  0x1b   : > { %1022 = vmatmul.mubr.msk.bf16.gmra.mrb[4].mxu1 %vm309_vm2, %v1055_v13  ;;  %1009 = vmatprep.mubr.msk.bf16.mxu0 %vm309_vm2, %v1056_v14 }
  0x1c   : > { %1025 = vmatprep.mubr.msk.bf16.mxu1 %vm309_vm2, %v1057_v15 }
  0x22   : > { %1010 = vmatmul.mubr.msk.bf16.gmra.mrb[8].mxu0 %vm309_vm2, %v1058_v16 }
  0x23   : > { %1026 = vmatmul.mubr.msk.bf16.gmra.mrb[8].mxu1 %vm309_vm2, %v1059_v17  ;;  %1013 = vmatprep.mubr.msk.bf16.mxu0 %vm309_vm2, %v1060_v18 }
  0x24   : > { %1029 = vmatprep.mubr.msk.bf16.mxu1 %vm309_vm2, %v1061_v19 }
  0x2a   : > { %1014 = vmatmul.mubr.msk.bf16.gmra.mrb[12].mxu0 %vm309_vm2, %v1062_v20 }
  0x2b   : > { %1030 = vmatmul.mubr.msk.bf16.gmra.mrb[12].mxu1 %vm309_vm2, %v1063_v21 }
  0xe5   : > { %v1003_v23 = vpop.f32.mrb[0].mxu0 }
  0xe6   : > { %v408_v24 = vadd.f32 %v1003_v23, %v1152_v22  ;;  %v1019_v25 = vpop.f32.mrb[0].mxu1  ;;  %v399_v26 = vpop.f32.mrb[1].mxu0 }
  0xe7   : > { %v472_v27 = vadd.f32 %v1019_v25, %v1152_v22  ;;  %v400_v28 = vadd.f32 %v1152_v22, %v399_v26  ;;  %v463_v29 = vpop.f32.mrb[1].mxu1  ;;  %v1004_v30 = vpop.f32.mrb[2].mxu0 }
  0xe8   : > { %v464_v31 = vadd.f32 %v1152_v22, %v463_v29  ;;  %v411_v32 = vadd.f32 %v1004_v30, %v1152_v22  ;;  %v1020_v33 = vpop.f32.mrb[2].mxu1  ;;  %v402_v34 = vpop.f32.mrb[3].mxu0  ;;  %v528_v38 = vmax.f32 %v408_v24, 0.0 }
  0xe9   : > { %v475_v35 = vadd.f32 %v1020_v33, %v1152_v22  ;;  %v403_v36 = vadd.f32 %v1152_v22, %v402_v34  ;;  %v466_v37 = vpop.f32.mrb[3].mxu1  ;;  %v544_v41 = vmax.f32 %v472_v27, 0.0  ;;  %v526_v42 = vmax.f32 %v400_v28, 0.0 }
  0xea   : > { %v529_v39 = vmax.f32 %v411_v32, 0.0  ;;  %v467_v40 = vadd.f32 %v1152_v22, %v466_v37  ;;  %v542_v45 = vmax.f32 %v464_v31, 0.0 }
  0xeb   : > { %v545_v43 = vmax.f32 %v475_v35, 0.0  ;;  %v527_v44 = vmax.f32 %v403_v36, 0.0 }
  0xec   : > { %v892_v46 = vpack.c.bf16 %v529_v39, %v528_v38  ;;  %v543_v47 = vmax.f32 %v467_v40, 0.0 }
  0xed   : > { %v932_v48 = vpack.c.bf16 %v545_v43, %v544_v41  ;;  %v887_v49 = vpack.c.bf16 %v527_v44, %v526_v42  ;;  %v1007_v50 = vpop.f32.mrb[4].mxu0 }
  0xee   : > { %964 = vst [vmem:[%s1167_s27 + $0x8] sm:$0xff] %v892_v46   ;;  %v927_v51 = vpack.c.bf16 %v543_v47, %v542_v45  ;;  %v424_v52 = vadd.f32 %v1007_v50, %v1152_v22  ;;  %v1023_v53 = vpop.f32.mrb[4].mxu1  ;;  %v415_v54 = vpop.f32.mrb[5].mxu0 }
  0xef   : > { %972 = vst [vmem:[%s1167_s27 + $0x48] sm:$0xff] %v932_v48   ;;  %888 = vst [vmem:[%s1167_s27] sm:$0xff] %v887_v49   ;;  %v488_v55 = vadd.f32 %v1023_v53, %v1152_v22  ;;  %v416_v56 = vadd.f32 %v1152_v22, %v415_v54  ;;  %v479_v57 = vpop.f32.mrb[5].mxu1  ;;  %v1008_v58 = vpop.f32.mrb[6].mxu0 }
  0xf0   : > { %971 = vst [vmem:[%s1167_s27 + $0x40] sm:$0xff] %v927_v51   ;;  %v480_v59 = vadd.f32 %v1152_v22, %v479_v57  ;;  %v427_v60 = vadd.f32 %v1008_v58, %v1152_v22  ;;  %v1024_v61 = vpop.f32.mrb[6].mxu1  ;;  %v418_v62 = vpop.f32.mrb[7].mxu0  ;;  %v532_v2 = vmax.f32 %v424_v52, 0.0 }
  0xf1   : > { %v491_v63 = vadd.f32 %v1024_v61, %v1152_v22  ;;  %v419_v0 = vadd.f32 %v1152_v22, %v418_v62  ;;  %v482_v1 = vpop.f32.mrb[7].mxu1  ;;  %v548_v5 = vmax.f32 %v488_v55, 0.0  ;;  %v530_v6 = vmax.f32 %v416_v56, 0.0 }
  0xf2   : > { %v533_v3 = vmax.f32 %v427_v60, 0.0  ;;  %v483_v4 = vadd.f32 %v1152_v22, %v482_v1  ;;  %v546_v9 = vmax.f32 %v480_v59, 0.0 }
  0xf3   : > { %v549_v7 = vmax.f32 %v491_v63, 0.0  ;;  %v531_v8 = vmax.f32 %v419_v0, 0.0 }
  0xf4   : > { %v902_v10 = vpack.c.bf16 %v533_v3, %v532_v2  ;;  %v547_v11 = vmax.f32 %v483_v4, 0.0 }
  0xf5   : > { %v942_v12 = vpack.c.bf16 %v549_v7, %v548_v5  ;;  %v897_v13 = vpack.c.bf16 %v531_v8, %v530_v6  ;;  %v1011_v14 = vpop.f32.mrb[8].mxu0 }
  0xf6   : > { %966 = vst [vmem:[%s1167_s27 + $0x18] sm:$0xff] %v902_v10   ;;  %v937_v15 = vpack.c.bf16 %v547_v11, %v546_v9  ;;  %v440_v16 = vadd.f32 %v1011_v14, %v1152_v22  ;;  %v1027_v17 = vpop.f32.mrb[8].mxu1  ;;  %v431_v18 = vpop.f32.mrb[9].mxu0 }
  0xf7   : > { %974 = vst [vmem:[%s1167_s27 + $0x58] sm:$0xff] %v942_v12   ;;  %965 = vst [vmem:[%s1167_s27 + $0x10] sm:$0xff] %v897_v13   ;;  %v504_v19 = vadd.f32 %v1027_v17, %v1152_v22  ;;  %v432_v20 = vadd.f32 %v1152_v22, %v431_v18  ;;  %v495_v21 = vpop.f32.mrb[9].mxu1  ;;  %v1012_v23 = vpop.f32.mrb[10].mxu0 }
  0xf8   : > { %973 = vst [vmem:[%s1167_s27 + $0x50] sm:$0xff] %v937_v15   ;;  %v496_v24 = vadd.f32 %v1152_v22, %v495_v21  ;;  %v443_v25 = vadd.f32 %v1012_v23, %v1152_v22  ;;  %v1028_v26 = vpop.f32.mrb[10].mxu1  ;;  %v434_v27 = vpop.f32.mrb[11].mxu0  ;;  %v536_v31 = vmax.f32 %v440_v16, 0.0 }
  0xf9   : > { %v507_v28 = vadd.f32 %v1028_v26, %v1152_v22  ;;  %v435_v29 = vadd.f32 %v1152_v22, %v434_v27  ;;  %v498_v30 = vpop.f32.mrb[11].mxu1  ;;  %v552_v34 = vmax.f32 %v504_v19, 0.0  ;;  %v534_v35 = vmax.f32 %v432_v20, 0.0 }
  0xfa   : > { %v537_v32 = vmax.f32 %v443_v25, 0.0  ;;  %v499_v33 = vadd.f32 %v1152_v22, %v498_v30  ;;  %v550_v38 = vmax.f32 %v496_v24, 0.0 }
  0xfb   : > { %v553_v36 = vmax.f32 %v507_v28, 0.0  ;;  %v535_v37 = vmax.f32 %v435_v29, 0.0 }
  0xfc   : > { %v912_v39 = vpack.c.bf16 %v537_v32, %v536_v31  ;;  %v551_v40 = vmax.f32 %v499_v33, 0.0 }
  0xfd   : > { %v952_v41 = vpack.c.bf16 %v553_v36, %v552_v34  ;;  %v907_v42 = vpack.c.bf16 %v535_v37, %v534_v35  ;;  %v1015_v43 = vpop.f32.mrb[12].mxu0 }
  0xfe   : > { %968 = vst [vmem:[%s1167_s27 + $0x28] sm:$0xff] %v912_v39   ;;  %v947_v44 = vpack.c.bf16 %v551_v40, %v550_v38  ;;  %v456_v45 = vadd.f32 %v1015_v43, %v1152_v22  ;;  %v1031_v46 = vpop.f32.mrb[12].mxu1  ;;  %v447_v47 = vpop.f32.mrb[13].mxu0 }
  0xff   : > { %976 = vst [vmem:[%s1167_s27 + $0x68] sm:$0xff] %v952_v41   ;;  %967 = vst [vmem:[%s1167_s27 + $0x20] sm:$0xff] %v907_v42   ;;  %v520_v48 = vadd.f32 %v1031_v46, %v1152_v22  ;;  %v448_v49 = vadd.f32 %v1152_v22, %v447_v47  ;;  %v511_v50 = vpop.f32.mrb[13].mxu1  ;;  %v1016_v51 = vpop.f32.mrb[14].mxu0 }
 0x100   : > { %975 = vst [vmem:[%s1167_s27 + $0x60] sm:$0xff] %v947_v44   ;;  %v512_v52 = vadd.f32 %v1152_v22, %v511_v50  ;;  %v459_v53 = vadd.f32 %v1016_v51, %v1152_v22  ;;  %v1032_v54 = vpop.f32.mrb[14].mxu1  ;;  %v450_v55 = vpop.f32.mrb[15].mxu0  ;;  %v540_v59 = vmax.f32 %v456_v45, 0.0 }
 0x101   : > { %v523_v56 = vadd.f32 %v1032_v54, %v1152_v22  ;;  %v451_v57 = vadd.f32 %v1152_v22, %v450_v55  ;;  %v514_v58 = vpop.f32.mrb[15].mxu1  ;;  %v556_v62 = vmax.f32 %v520_v48, 0.0  ;;  %v538_v63 = vmax.f32 %v448_v49, 0.0 }
 0x102   : > { %v541_v60 = vmax.f32 %v459_v53, 0.0  ;;  %v515_v61 = vadd.f32 %v1152_v22, %v514_v58  ;;  %v554_v2 = vmax.f32 %v512_v52, 0.0 }
 0x103   : > { %v557_v0 = vmax.f32 %v523_v56, 0.0  ;;  %v539_v1 = vmax.f32 %v451_v57, 0.0 }
 0x104   : > { %v922_v3 = vpack.c.bf16 %v541_v60, %v540_v59  ;;  %v555_v4 = vmax.f32 %v515_v61, 0.0 }
 0x105   : > { %v962_v5 = vpack.c.bf16 %v557_v0, %v556_v62  ;;  %v917_v6 = vpack.c.bf16 %v539_v1, %v538_v63 }
 0x106   : > { %970 = vst [vmem:[%s1167_s27 + $0x38] sm:$0xff] %v922_v3   ;;  %v957_v7 = vpack.c.bf16 %v555_v4, %v554_v2 }
 0x107   : > { %978 = vst [vmem:[%s1167_s27 + $0x78] sm:$0xff] %v962_v5   ;;  %969 = vst [vmem:[%s1167_s27 + $0x30] sm:$0xff] %v917_v6  }
 0x108   : > { %977 = vst [vmem:[%s1167_s27 + $0x70] sm:$0xff] %v957_v7  }
 0x109 PF: > { %s13_s12 = sadd.s32 1, %s1070_s12  }
 0x10a   : > { %p10_p4 = scmp.ge.s32.totalorder %s13_s12, 4  }
 0x10c   :  { %12 = sbr.rel (!%p10_p4) target bundleno = 1 (0x1), region = 62 }

// kernel: clip_feature_extractor_forward.22
= control target key start
LH: loop header
LB: loop body
LE: loop exit
PB: predicated region body
PF: predicated region fallthrough
CT: control target
= control target key end

     0   :  { %s1085_s12 = smov 0   ;;  %s1087_s13 = smov 0   ;;  %s1227_s0 = inlined_call_operand.vmem [shape: bf16[128,512], index: 0, kind: input, shape index: {}]   ;;  %s1228_s1 = inlined_call_operand.vmem [shape: bf16[128,128], index: 1, kind: input, shape index: {}]   ;;  %s1229_s2 = inlined_call_operand.vmem [shape: f32[1,128], index: 2, kind: input, shape index: {}]   ;;  %s1230_s3 = inlined_call_operand.vmem [shape: bf16[128,128], index: 3, kind: output, shape index: {}]  }
   0x1   :  { %s1089_s14 = smov 0   ;;  %s1091_s15 = smov 0  }
   0x2   :  { %s1093_s16 = smov 0  }
   0x3 LB: > { %s22_s17 = sadd.s32 1, %s1058_s15  ;;  %p41_p1 = scmp.ne.s32.totalorder %s1050_s13, %s1046_s12  ;;  %s1062_s16 = sphi %s1093_s16, %s13_s16   ;;  %s1058_s15 = sphi %s1091_s15, %s1234_s15   ;;  %s1054_s14 = sphi %s1089_s14, %s1233_s14   ;;  %s1050_s13 = sphi %s1087_s13, %s1232_s13   ;;  %s1046_s12 = sphi %s1085_s12, %s1231_s12  }
   0x4   : > { %p23_p0 = scmp.ge.s32.totalorder %s22_s17, 4  ;;  %p42_p2 = scmp.eq.s32.totalorder %s1062_s16, 0 }
   0x5   : > { %s34_s19 = sadd.s32 1, %s1050_s13  ;;  %p796_p5 = scmp.ge.s32.totalorder %s1062_s16, 4 }
   0x6   : > { %s1236_s17 = smov (%p23_p0, %s22_s17), 0  ;;  %p43_p3 = por %p42_p2, %p41_p1 }
   0x7   : > { %s30_s18 = ssub.s32 %s1058_s15, %s1236_s17  ;;  %141 = sbr.rel (%p796_p5) target bundleno = 29 (0x1d), region = 24 }
   0x8   : > { %p32_p4 = scmp.eq.s32.totalorder %s30_s18, 0 }
   0xa   : > { %s1120_s20 = scalar_select %p32_p4, %s1050_s13, %s34_s19  }
   0xe   : > { %144 = sbr.rel (!%p43_p3) target bundleno = 29 (0x1d), region = 28  ;;  %s146_s21 = sand.u32 (%p43_p3), 1, %s1050_s13  }
   0xf   : > { %s798_s22 = sshll.u32 (%p43_p3), %s1058_s15, 2  ;;  %s797_s23 = sshll.u32 (%p43_p3), %s146_s21, 6 }
  0x10   : > { %s1128_s26 = scalar_lea.vmem (%p43_p3), %s1227_s0, %s798_s22  ;;  %s148_s27 = scalar_lea.vmem (%p43_p3), [#allocation3], %s797_s23 }
  0x11   : > { %v169_v0 = vld [vmem:[%s1128_s26] sm:$0xf] (%p43_p3)  ;;  %v171_v1 = vld [vmem:[%s1128_s26 + $0x10] sm:$0xf] (%p43_p3) }
  0x12   : > { %170 = vst [vmem:[%s148_s27] sm:$0xf] (%p43_p3), %v169_v0  ;;  %172 = vst [vmem:[%s148_s27 + $0x4] sm:$0xf] (%p43_p3), %v171_v1  ;;  %v173_v2 = vld [vmem:[%s1128_s26 + $0x20] sm:$0xf] (%p43_p3) }
  0x13   : > { %v175_v3 = vld [vmem:[%s1128_s26 + $0x30] sm:$0xf] (%p43_p3)  ;;  %v177_v4 = vld [vmem:[%s1128_s26 + $0x40] sm:$0xf] (%p43_p3)  ;;  %174 = vst [vmem:[%s148_s27 + $0x8] sm:$0xf] (%p43_p3), %v173_v2 }
  0x14   : > { %176 = vst [vmem:[%s148_s27 + $0xc] sm:$0xf] (%p43_p3), %v175_v3  ;;  %178 = vst [vmem:[%s148_s27 + $0x10] sm:$0xf] (%p43_p3), %v177_v4  ;;  %v179_v5 = vld [vmem:[%s1128_s26 + $0x50] sm:$0xf] (%p43_p3) }
  0x15   : > { %v181_v6 = vld [vmem:[%s1128_s26 + $0x60] sm:$0xf]  ;;  %v183_v7 = vld [vmem:[%s1128_s26 + $0x70] sm:$0xf]  ;;  %180 = vst [vmem:[%s148_s27 + $0x14] sm:$0xf] %v179_v5 }
  0x16   : > { %182 = vst [vmem:[%s148_s27 + $0x18] sm:$0xf] %v181_v6  ;;  %184 = vst [vmem:[%s148_s27 + $0x1c] sm:$0xf] %v183_v7  ;;  %v185_v8 = vld [vmem:[%s1128_s26 + $0x80] sm:$0xf] }
  0x17   : > { %v187_v9 = vld [vmem:[%s1128_s26 + $0x90] sm:$0xf]  ;;  %v189_v10 = vld [vmem:[%s1128_s26 + $0xa0] sm:$0xf]  ;;  %186 = vst [vmem:[%s148_s27 + $0x20] sm:$0xf] %v185_v8 }
  0x18   : > { %188 = vst [vmem:[%s148_s27 + $0x24] sm:$0xf] %v187_v9  ;;  %190 = vst [vmem:[%s148_s27 + $0x28] sm:$0xf] %v189_v10  ;;  %v191_v11 = vld [vmem:[%s1128_s26 + $0xb0] sm:$0xf] }
  0x19   : > { %v193_v12 = vld [vmem:[%s1128_s26 + $0xc0] sm:$0xf]  ;;  %v195_v13 = vld [vmem:[%s1128_s26 + $0xd0] sm:$0xf]  ;;  %192 = vst [vmem:[%s148_s27 + $0x2c] sm:$0xf] %v191_v11 }
  0x1a   : > { %194 = vst [vmem:[%s148_s27 + $0x30] sm:$0xf] %v193_v12  ;;  %196 = vst [vmem:[%s148_s27 + $0x34] sm:$0xf] %v195_v13  ;;  %v197_v14 = vld [vmem:[%s1128_s26 + $0xe0] sm:$0xf] }
  0x1b   : > { %v199_v15 = vld [vmem:[%s1128_s26 + $0xf0] sm:$0xf]  ;;  %198 = vst [vmem:[%s148_s27 + $0x38] sm:$0xf] %v197_v14 }
  0x1c   : > { %200 = vst [vmem:[%s148_s27 + $0x3c] sm:$0xf] %v199_v15 }
  0x1d PF: > { %p799_p6 = scmp.ge.s32.totalorder %s1062_s16, 1  ;;  %p254_p7 = scmp.lt.s32.totalorder %s1062_s16, 5 }
  0x1f   : > { %p255_p8 = pnand %p799_p6, %p254_p7 }
  0x20   : > { %s261_s28 = sand.u32 (!%p255_p8), 1, %s1046_s12   ;;  %p801_p9 = scmp.ne.s32.totalorder (!%p255_p8), %s1054_s14, 0 }
  0x21   : > { %258 = sbr.rel (%p255_p8) target bundleno = 323 (0x143), region = 69  ;;  %s800_s29 = sshll.u32 (!%p255_p8), %s261_s28, 6 }
  0x22   : > { %s1149_s30 = scalar_lea.vmem (!%p255_p8), [#allocation3], %s800_s29 }
  0x28   : > { %295 = sbr.rel (%p801_p9) target bundleno = 49 (0x31), region = 77  ;;  %v1064_v16 = vmov (!%p801_p9), 0.0  }
  0x29   : > { %296 = vst [vmem:[#allocation2] sm:$0xff] (!%p801_p9), %v1064_v16  ;;  %297 = vst [vmem:[#allocation2 + $0x8] sm:$0xff] (!%p801_p9), %v1064_v16 }
  0x2a   : > { %298 = vst [vmem:[#allocation2 + $0x10] sm:$0xff] (!%p801_p9), %v1064_v16  ;;  %299 = vst [vmem:[#allocation2 + $0x18] sm:$0xff] (!%p801_p9), %v1064_v16 }
  0x2b   : > { %300 = vst [vmem:[#allocation2 + $0x20] sm:$0xff] (!%p801_p9), %v1064_v16  ;;  %301 = vst [vmem:[#allocation2 + $0x28] sm:$0xff] (!%p801_p9), %v1064_v16 }
  0x2c   : > { %302 = vst [vmem:[#allocation2 + $0x30] sm:$0xff] (!%p801_p9), %v1064_v16  ;;  %303 = vst [vmem:[#allocation2 + $0x38] sm:$0xff] (!%p801_p9), %v1064_v16 }
  0x2d   : > { %304 = vst [vmem:[#allocation2 + $0x40] sm:$0xff] (!%p801_p9), %v1064_v16  ;;  %305 = vst [vmem:[#allocation2 + $0x48] sm:$0xff] (!%p801_p9), %v1064_v16 }
  0x2e   : > { %306 = vst [vmem:[#allocation2 + $0x50] sm:$0xff] (!%p801_p9), %v1064_v16  ;;  %307 = vst [vmem:[#allocation2 + $0x58] sm:$0xff] (!%p801_p9), %v1064_v16 }
  0x2f   : > { %308 = vst [vmem:[#allocation2 + $0x60] sm:$0xff] %v1064_v16  ;;  %309 = vst [vmem:[#allocation2 + $0x68] sm:$0xff] %v1064_v16 }
  0x30   : > { %310 = vst [vmem:[#allocation2 + $0x70] sm:$0xff] %v1064_v16  ;;  %311 = vst [vmem:[#allocation2 + $0x78] sm:$0xff] %v1064_v16 }
  0x31 PF: > { %v1008_v17 = vld [vmem:[%s1228_s1] sm:$0xff]   ;;  %v1009_v18 = vld [vmem:[%s1228_s1 + $0x8] sm:$0xff]   ;;  %v1010_v19 = vld [vmem:[%s1228_s1 + $0x10] sm:$0xff]   ;;  %p818_p10 = scmp.ne.s32.totalorder %s1054_s14, 3 }
  0x32   : > { %919 = vmatprep.subr.bf16.mxu0 %v1008_v17  ;;  %951 = vmatprep.subr.bf16.mxu1 %v1008_v17  ;;  %v1011_v20 = vld [vmem:[%s1228_s1 + $0x18] sm:$0xff]   ;;  %v1016_v21 = vld [vmem:[%s1149_s30] sm:$0xff]   ;;  %v1013_v24 = vld [vmem:[%s1228_s1 + $0x28] sm:$0xff]  }
  0x33   : > { %920 = vmatpush3.bf16.msra.mxu0 %v1008_v17  ;;  %959 = vmatpush3.bf16.msra.mxu1 %v1008_v17  ;;  %v1017_v22 = vld [vmem:[%s1149_s30 + $0x20] sm:$0xff]   ;;  %v1014_v25 = vld [vmem:[%s1228_s1 + $0x30] sm:$0xff]   ;;  %v1015_v26 = vld [vmem:[%s1228_s1 + $0x38] sm:$0xff]  }
  0x34   : > { %921 = vmatprep.subr.bf16.mxu0 %v1009_v18  ;;  %952 = vmatprep.subr.bf16.mxu1 %v1009_v18  ;;  %v1012_v23 = vld [vmem:[%s1228_s1 + $0x20] sm:$0xff]   ;;  %v1018_v27 = vld [vmem:[%s1149_s30 + $0x8] sm:$0xff]   ;;  %v1020_v29 = vld [vmem:[%s1149_s30 + $0x10] sm:$0xff]  }
  0x35   : > { %935 = vmatprep.mubr.bf16.mxu0 %v1016_v21  ;;  %943 = vmatprep.mubr.bf16.mxu1 %v1017_v22  ;;  %v1019_v28 = vld [vmem:[%s1149_s30 + $0x28] sm:$0xff]   ;;  %v1021_v30 = vld [vmem:[%s1149_s30 + $0x30] sm:$0xff]   ;;  %v1022_v31 = vld [vmem:[%s1149_s30 + $0x18] sm:$0xff]  }
  0x36   : > { %v1023_v32 = vld [vmem:[%s1149_s30 + $0x38] sm:$0xff]   ;;  %v314_v33 = vld [vmem:[#allocation2 + $0x10] sm:$0xff]  ;;  %v312_v35 = vld [vmem:[#allocation2] sm:$0xff] }
  0x37   : > { %922 = vmatpush3.bf16.msra.mxu0 %v1009_v18  ;;  %960 = vmatpush3.bf16.msra.mxu1 %v1009_v18  ;;  %v322_v34 = vld [vmem:[#allocation2 + $0x50] sm:$0xff]  ;;  %v320_v36 = vld [vmem:[#allocation2 + $0x40] sm:$0xff]  ;;  %v315_v39 = vld [vmem:[#allocation2 + $0x18] sm:$0xff] }
  0x38   : > { %923 = vmatprep.subr.bf16.mxu0 %v1010_v19  ;;  %953 = vmatprep.subr.bf16.mxu1 %v1010_v19  ;;  %v323_v40 = vld [vmem:[#allocation2 + $0x58] sm:$0xff]  ;;  %v313_v45 = vld [vmem:[#allocation2 + $0x8] sm:$0xff]  ;;  %v318_v57 = vld [vmem:[#allocation2 + $0x30] sm:$0xff] }
  0x39   : > { %v321_v46 = vld [vmem:[#allocation2 + $0x48] sm:$0xff]  ;;  %v326_v58 = vld [vmem:[#allocation2 + $0x70] sm:$0xff]  ;;  %v316_v59 = vld [vmem:[#allocation2 + $0x20] sm:$0xff] }
  0x3a   : > { %v324_v60 = vld [vmem:[#allocation2 + $0x60] sm:$0xff]  ;;  %v319_v63 = vld [vmem:[#allocation2 + $0x38] sm:$0xff]  ;;  %v317_v5 = vld [vmem:[#allocation2 + $0x28] sm:$0xff] }
  0x3b   : > { %924 = vmatpush3.bf16.msra.mxu0 %v1010_v19  ;;  %961 = vmatpush3.bf16.msra.mxu1 %v1010_v19  ;;  %v327_v0 = vld [vmem:[#allocation2 + $0x78] sm:$0xff]  ;;  %v325_v6 = vld [vmem:[#allocation2 + $0x68] sm:$0xff]  ;;  %v819_v19 = vld [vmem:[%s1229_s2] ss:$0 sm:$0xff] (!%p818_p10) }
  0x3c   : > { %925 = vmatprep.subr.bf16.mxu0 %v1011_v20  ;;  %954 = vmatprep.subr.bf16.mxu1 %v1011_v20 }
  0x3f   : > { %926 = vmatpush3.bf16.msra.mxu0 %v1011_v20  ;;  %962 = vmatpush3.bf16.msra.mxu1 %v1011_v20 }
  0x40   : > { %927 = vmatprep.subr.bf16.mxu0 %v1012_v23  ;;  %955 = vmatprep.subr.bf16.mxu1 %v1012_v23 }
  0x43   : > { %928 = vmatpush3.bf16.msra.mxu0 %v1012_v23  ;;  %963 = vmatpush3.bf16.msra.mxu1 %v1012_v23 }
  0x44   : > { %929 = vmatprep.subr.bf16.mxu0 %v1013_v24  ;;  %956 = vmatprep.subr.bf16.mxu1 %v1013_v24 }
  0x47   : > { %930 = vmatpush3.bf16.msra.mxu0 %v1013_v24  ;;  %964 = vmatpush3.bf16.msra.mxu1 %v1013_v24 }
  0x48   : > { %931 = vmatprep.subr.bf16.mxu0 %v1014_v25  ;;  %957 = vmatprep.subr.bf16.mxu1 %v1014_v25 }
  0x4b   : > { %932 = vmatpush3.bf16.msra.mxu0 %v1014_v25  ;;  %965 = vmatpush3.bf16.msra.mxu1 %v1014_v25 }
  0x4c   : > { %933 = vmatprep.subr.bf16.mxu0 %v1015_v26  ;;  %958 = vmatprep.subr.bf16.mxu1 %v1015_v26 }
  0x4f   : > { %934 = vmatpush3.bf16.msra.mxu0 %v1015_v26  ;;  %966 = vmatpush3.bf16.msra.mxu1 %v1015_v26 }
  0x52   : > { %936 = vmatmul.mubr.bf16.vlgmr.msra.gmra.mrb[0].mxu0 %v1018_v27  ;;  %944 = vmatmul.mubr.bf16.vlgmr.msra.gmra.mrb[0].mxu1 %v1019_v28 }
  0x53   : > { %939 = vmatprep.mubr.bf16.mxu0 %v1020_v29  ;;  %947 = vmatprep.mubr.bf16.mxu1 %v1021_v30 }
  0x5a   : > { %940 = vmatmul.mubr.bf16.gmra.mrb[4].mxu0 %v1022_v31  ;;  %948 = vmatmul.mubr.bf16.gmra.mrb[4].mxu1 %v1023_v32 }
 0x125   : > { %v937_v37 = vpop.f32.mrb[0].mxu0  ;;  %v945_v38 = vpop.f32.mrb[0].mxu1 }
 0x126   : > { %v555_v41 = vadd.f32 %v937_v37, %v314_v33  ;;  %v563_v42 = vadd.f32 %v945_v38, %v322_v34  ;;  %v490_v43 = vpop.f32.mrb[1].mxu0  ;;  %v522_v44 = vpop.f32.mrb[1].mxu1 }
 0x127   : > { %v553_v47 = vadd.f32 %v490_v43, %v312_v35  ;;  %v561_v48 = vadd.f32 %v522_v44, %v320_v36  ;;  %v938_v49 = vpop.f32.mrb[2].mxu0  ;;  %v946_v50 = vpop.f32.mrb[2].mxu1 }
 0x128   : > { %571 = vst [vmem:[#allocation2 + $0x10] sm:$0xff] %v555_v41  ;;  %579 = vst [vmem:[#allocation2 + $0x50] sm:$0xff] %v563_v42  ;;  %v556_v51 = vadd.f32 %v938_v49, %v315_v39  ;;  %v564_v52 = vadd.f32 %v946_v50, %v323_v40  ;;  %v493_v53 = vpop.f32.mrb[3].mxu0  ;;  %v525_v54 = vpop.f32.mrb[3].mxu1 }
 0x129   : > { %569 = vst [vmem:[#allocation2] sm:$0xff] %v553_v47  ;;  %577 = vst [vmem:[#allocation2 + $0x40] sm:$0xff] %v561_v48  ;;  %v554_v55 = vadd.f32 %v493_v53, %v313_v45  ;;  %v562_v56 = vadd.f32 %v525_v54, %v321_v46 }
 0x12a   : > { %572 = vst [vmem:[#allocation2 + $0x18] sm:$0xff] %v556_v51  ;;  %580 = vst [vmem:[#allocation2 + $0x58] sm:$0xff] %v564_v52 }
 0x12b   : > { %570 = vst [vmem:[#allocation2 + $0x8] sm:$0xff] %v554_v55  ;;  %578 = vst [vmem:[#allocation2 + $0x48] sm:$0xff] %v562_v56 }
 0x12d   : > { %v941_v61 = vpop.f32.mrb[4].mxu0  ;;  %v949_v62 = vpop.f32.mrb[4].mxu1  ;;  %588 = sbr.rel (%p818_p10) target bundleno = 323 (0x143), region = 81 }
 0x12e   : > { %v559_v1 = vadd.f32 %v941_v61, %v318_v57  ;;  %v567_v2 = vadd.f32 %v949_v62, %v326_v58  ;;  %v506_v3 = vpop.f32.mrb[5].mxu0  ;;  %v538_v4 = vpop.f32.mrb[5].mxu1 }
 0x12f   : > { %v557_v7 = vadd.f32 %v506_v3, %v316_v59  ;;  %v565_v8 = vadd.f32 %v538_v4, %v324_v60  ;;  %v942_v9 = vpop.f32.mrb[6].mxu0  ;;  %v950_v10 = vpop.f32.mrb[6].mxu1  ;;  %v591_v22 = vld [vmem:[#allocation2 + $0x10] sm:$0xff] (!%p818_p10) }
 0x130   : > { %575 = vst [vmem:[#allocation2 + $0x30] sm:$0xff] %v559_v1  ;;  %583 = vst [vmem:[#allocation2 + $0x70] sm:$0xff] %v567_v2  ;;  %v560_v11 = vadd.f32 %v942_v9, %v319_v63  ;;  %v568_v12 = vadd.f32 %v950_v10, %v327_v0  ;;  %v509_v13 = vpop.f32.mrb[7].mxu0  ;;  %v541_v14 = vpop.f32.mrb[7].mxu1  ;;  %v589_v17 = vld [vmem:[#allocation2] sm:$0xff] (!%p818_p10)  ;;  %v614_v25 = vadd.f32 (!%p818_p10), %v819_v19, %v591_v22  ;;  %v599_v37 = vld [vmem:[#allocation2 + $0x50] sm:$0xff] (!%p818_p10) }
 0x131   : > { %573 = vst [vmem:[#allocation2 + $0x20] sm:$0xff] %v557_v7  ;;  %581 = vst [vmem:[#allocation2 + $0x60] sm:$0xff] %v565_v8  ;;  %v558_v15 = vadd.f32 %v509_v13, %v317_v5  ;;  %v566_v16 = vadd.f32 %v541_v14, %v325_v6  ;;  %v612_v20 = vadd.f32 (!%p818_p10), %v819_v19, %v589_v17  ;;  %v592_v23 = vld [vmem:[#allocation2 + $0x18] sm:$0xff] (!%p818_p10)  ;;  %v597_v35 = vld [vmem:[#allocation2 + $0x40] sm:$0xff] (!%p818_p10) }
 0x132   : > { %576 = vst [vmem:[#allocation2 + $0x38] sm:$0xff] %v560_v11  ;;  %584 = vst [vmem:[#allocation2 + $0x78] sm:$0xff] %v568_v12  ;;  %v590_v18 = vld [vmem:[#allocation2 + $0x8] sm:$0xff] (!%p818_p10)  ;;  %v615_v26 = vadd.f32 (!%p818_p10), %v819_v19, %v592_v23  ;;  %v630_v38 = vmax.f32 (!%p818_p10), %v614_v25, 0.0  ;;  %v600_v42 = vld [vmem:[#allocation2 + $0x58] sm:$0xff] (!%p818_p10)  ;;  %v620_v47 = vadd.f32 (!%p818_p10), %v819_v19, %v597_v35  ;;  %v622_v52 = vadd.f32 (!%p818_p10), %v819_v19, %v599_v37 }
 0x133   : > { %574 = vst [vmem:[#allocation2 + $0x28] sm:$0xff] %v558_v15  ;;  %582 = vst [vmem:[#allocation2 + $0x68] sm:$0xff] %v566_v16  ;;  %v613_v21 = vadd.f32 (!%p818_p10), %v819_v19, %v590_v18  ;;  %v628_v31 = vmax.f32 (!%p818_p10), %v612_v20, 0.0  ;;  %v598_v36 = vld [vmem:[#allocation2 + $0x48] sm:$0xff] (!%p818_p10)  ;;  %v623_v57 = vadd.f32 (!%p818_p10), %v819_v19, %v600_v42 }
 0x134   : > { %v631_v39 = vmax.f32 %v615_v26, 0.0  ;;  %v621_v51 = vadd.f32 %v819_v19, %v598_v36  ;;  %v636_v56 = vmax.f32 %v620_v47, 0.0  ;;  %v638_v61 = vmax.f32 %v622_v52, 0.0 }
 0x135   : > { %v629_v32 = vmax.f32 %v613_v21, 0.0  ;;  %v639_v63 = vmax.f32 %v623_v57, 0.0 }
 0x136   : > { %v864_v49 = vpack.c.bf16 %v631_v39, %v630_v38  ;;  %v637_v60 = vmax.f32 %v621_v51, 0.0 }
 0x137   : > { %v595_v29 = vld [vmem:[#allocation2 + $0x30] sm:$0xff]  ;;  %v859_v44 = vpack.c.bf16 %v629_v32, %v628_v31  ;;  %v884_v5 = vpack.c.bf16 %v639_v63, %v638_v61 }
 0x138   : > { %v593_v24 = vld [vmem:[#allocation2 + $0x20] sm:$0xff]  ;;  %v618_v34 = vadd.f32 %v819_v19, %v595_v29  ;;  %v603_v53 = vld [vmem:[#allocation2 + $0x70] sm:$0xff]  ;;  %896 = vst [vmem:[%s1230_s3 + $0x8] sm:$0xff] %v864_v49   ;;  %v879_v3 = vpack.c.bf16 %v637_v60, %v636_v56 }
 0x139   : > { %v616_v28 = vadd.f32 %v819_v19, %v593_v24  ;;  %v596_v30 = vld [vmem:[#allocation2 + $0x38] sm:$0xff]  ;;  %v601_v43 = vld [vmem:[#allocation2 + $0x60] sm:$0xff]  ;;  %860 = vst [vmem:[%s1230_s3] sm:$0xff] %v859_v44   ;;  %v626_v1 = vadd.f32 %v819_v19, %v603_v53  ;;  %900 = vst [vmem:[%s1230_s3 + $0x28] sm:$0xff] %v884_v5  }
 0x13a   : > { %v594_v27 = vld [vmem:[#allocation2 + $0x28] sm:$0xff]  ;;  %v619_v41 = vadd.f32 %v819_v19, %v596_v30  ;;  %v634_v46 = vmax.f32 %v618_v34, 0.0  ;;  %v604_v54 = vld [vmem:[#allocation2 + $0x78] sm:$0xff]  ;;  %v624_v58 = vadd.f32 %v819_v19, %v601_v43  ;;  %899 = vst [vmem:[%s1230_s3 + $0x20] sm:$0xff] %v879_v3  }
 0x13b   : > { %v617_v33 = vadd.f32 %v819_v19, %v594_v27  ;;  %v632_v40 = vmax.f32 %v616_v28, 0.0  ;;  %v602_v48 = vld [vmem:[#allocation2 + $0x68] sm:$0xff]  ;;  %v627_v2 = vadd.f32 %v819_v19, %v604_v54  ;;  %v642_v6 = vmax.f32 %v626_v1, 0.0 }
 0x13c   : > { %v635_v50 = vmax.f32 %v619_v41, 0.0  ;;  %v625_v62 = vadd.f32 %v819_v19, %v602_v48  ;;  %v640_v0 = vmax.f32 %v624_v58, 0.0 }
 0x13d   : > { %v633_v45 = vmax.f32 %v617_v33, 0.0  ;;  %v643_v7 = vmax.f32 %v627_v2, 0.0 }
 0x13e   : > { %v874_v59 = vpack.c.bf16 %v635_v50, %v634_v46  ;;  %v641_v4 = vmax.f32 %v625_v62, 0.0 }
 0x13f   : > { %v869_v55 = vpack.c.bf16 %v633_v45, %v632_v40  ;;  %v894_v9 = vpack.c.bf16 %v643_v7, %v642_v6 }
 0x140   : > { %898 = vst [vmem:[%s1230_s3 + $0x18] sm:$0xff] %v874_v59   ;;  %v889_v8 = vpack.c.bf16 %v641_v4, %v640_v0 }
 0x141   : > { %897 = vst [vmem:[%s1230_s3 + $0x10] sm:$0xff] %v869_v55   ;;  %902 = vst [vmem:[%s1230_s3 + $0x38] sm:$0xff] %v894_v9  }
 0x142   : > { %901 = vst [vmem:[%s1230_s3 + $0x30] sm:$0xff] %v889_v8  }
 0x143 PF: > { %s13_s16 = sadd.s32 1, %s1062_s16   ;;  %s1231_s12 = smov %s1050_s13 }
 0x144   : > { %p10_p11 = scmp.ge.s32.totalorder %s13_s16, 6   ;;  %s1232_s13 = smov %s1120_s20 }
 0x145   : > { %s1233_s14 = smov %s1058_s15  ;;  %s1234_s15 = smov %s1236_s17 }
 0x146   :  { %12 = sbr.rel (!%p10_p11) target bundleno = 3 (0x3), region = 116 }

// kernel: clip_feature_extractor_forward.24
= control target key start
LH: loop header
LB: loop body
LE: loop exit
PB: predicated region body
PF: predicated region fallthrough
CT: control target
= control target key end

     0   :  { %s1069_s12 = smov 0   ;;  %s1071_s13 = smov 0   ;;  %s1211_s0 = inlined_call_operand.vmem [shape: bf16[128,512], index: 0, kind: input, shape index: {}]   ;;  %s1212_s1 = inlined_call_operand.vmem [shape: bf16[128,128], index: 1, kind: input, shape index: {}]   ;;  %s1213_s2 = inlined_call_operand.vmem [shape: f32[1,128], index: 2, kind: input, shape index: {}]   ;;  %s1214_s3 = inlined_call_operand.vmem [shape: bf16[128,128], index: 3, kind: output, shape index: {}]  }
   0x1   :  { %s1073_s14 = smov 0   ;;  %s1075_s15 = smov 0  }
   0x2   :  { %s1077_s16 = smov 0  }
   0x3 LB: > { %s22_s17 = sadd.s32 1, %s1042_s15  ;;  %p41_p1 = scmp.ne.s32.totalorder %s1034_s13, %s1030_s12  ;;  %s1046_s16 = sphi %s1077_s16, %s13_s16   ;;  %s1042_s15 = sphi %s1075_s15, %s1218_s15   ;;  %s1038_s14 = sphi %s1073_s14, %s1217_s14   ;;  %s1034_s13 = sphi %s1071_s13, %s1216_s13   ;;  %s1030_s12 = sphi %s1069_s12, %s1215_s12  }
   0x4   : > { %p23_p0 = scmp.ge.s32.totalorder %s22_s17, 4  ;;  %p42_p2 = scmp.eq.s32.totalorder %s1046_s16, 0 }
   0x5   : > { %s34_s19 = sadd.s32 1, %s1034_s13  ;;  %p780_p5 = scmp.ge.s32.totalorder %s1046_s16, 4 }
   0x6   : > { %s1220_s17 = smov (%p23_p0, %s22_s17), 0  ;;  %p43_p3 = por %p42_p2, %p41_p1 }
   0x7   : > { %s30_s18 = ssub.s32 %s1042_s15, %s1220_s17  ;;  %141 = sbr.rel (%p780_p5) target bundleno = 29 (0x1d), region = 24 }
   0x8   : > { %p32_p4 = scmp.eq.s32.totalorder %s30_s18, 0 }
   0xa   : > { %s1104_s20 = scalar_select %p32_p4, %s1034_s13, %s34_s19  }
   0xe   : > { %144 = sbr.rel (!%p43_p3) target bundleno = 29 (0x1d), region = 28  ;;  %s146_s21 = sand.u32 (%p43_p3), 1, %s1034_s13  }
   0xf   : > { %s782_s22 = sshll.u32 (%p43_p3), %s1042_s15, 2  ;;  %s781_s23 = sshll.u32 (%p43_p3), %s146_s21, 6 }
  0x10   : > { %s1112_s26 = scalar_lea.vmem (%p43_p3), %s1211_s0, %s782_s22  ;;  %s148_s27 = scalar_lea.vmem (%p43_p3), [#allocation3], %s781_s23 }
  0x11   : > { %v169_v0 = vld [vmem:[%s1112_s26] sm:$0xf] (%p43_p3)  ;;  %v171_v1 = vld [vmem:[%s1112_s26 + $0x10] sm:$0xf] (%p43_p3) }
  0x12   : > { %170 = vst [vmem:[%s148_s27] sm:$0xf] (%p43_p3), %v169_v0  ;;  %172 = vst [vmem:[%s148_s27 + $0x4] sm:$0xf] (%p43_p3), %v171_v1  ;;  %v173_v2 = vld [vmem:[%s1112_s26 + $0x20] sm:$0xf] (%p43_p3) }
  0x13   : > { %v175_v3 = vld [vmem:[%s1112_s26 + $0x30] sm:$0xf] (%p43_p3)  ;;  %v177_v4 = vld [vmem:[%s1112_s26 + $0x40] sm:$0xf] (%p43_p3)  ;;  %174 = vst [vmem:[%s148_s27 + $0x8] sm:$0xf] (%p43_p3), %v173_v2 }
  0x14   : > { %176 = vst [vmem:[%s148_s27 + $0xc] sm:$0xf] (%p43_p3), %v175_v3  ;;  %178 = vst [vmem:[%s148_s27 + $0x10] sm:$0xf] (%p43_p3), %v177_v4  ;;  %v179_v5 = vld [vmem:[%s1112_s26 + $0x50] sm:$0xf] (%p43_p3) }
  0x15   : > { %v181_v6 = vld [vmem:[%s1112_s26 + $0x60] sm:$0xf]  ;;  %v183_v7 = vld [vmem:[%s1112_s26 + $0x70] sm:$0xf]  ;;  %180 = vst [vmem:[%s148_s27 + $0x14] sm:$0xf] %v179_v5 }
  0x16   : > { %182 = vst [vmem:[%s148_s27 + $0x18] sm:$0xf] %v181_v6  ;;  %184 = vst [vmem:[%s148_s27 + $0x1c] sm:$0xf] %v183_v7  ;;  %v185_v8 = vld [vmem:[%s1112_s26 + $0x80] sm:$0xf] }
  0x17   : > { %v187_v9 = vld [vmem:[%s1112_s26 + $0x90] sm:$0xf]  ;;  %v189_v10 = vld [vmem:[%s1112_s26 + $0xa0] sm:$0xf]  ;;  %186 = vst [vmem:[%s148_s27 + $0x20] sm:$0xf] %v185_v8 }
  0x18   : > { %188 = vst [vmem:[%s148_s27 + $0x24] sm:$0xf] %v187_v9  ;;  %190 = vst [vmem:[%s148_s27 + $0x28] sm:$0xf] %v189_v10  ;;  %v191_v11 = vld [vmem:[%s1112_s26 + $0xb0] sm:$0xf] }
  0x19   : > { %v193_v12 = vld [vmem:[%s1112_s26 + $0xc0] sm:$0xf]  ;;  %v195_v13 = vld [vmem:[%s1112_s26 + $0xd0] sm:$0xf]  ;;  %192 = vst [vmem:[%s148_s27 + $0x2c] sm:$0xf] %v191_v11 }
  0x1a   : > { %194 = vst [vmem:[%s148_s27 + $0x30] sm:$0xf] %v193_v12  ;;  %196 = vst [vmem:[%s148_s27 + $0x34] sm:$0xf] %v195_v13  ;;  %v197_v14 = vld [vmem:[%s1112_s26 + $0xe0] sm:$0xf] }
  0x1b   : > { %v199_v15 = vld [vmem:[%s1112_s26 + $0xf0] sm:$0xf]  ;;  %198 = vst [vmem:[%s148_s27 + $0x38] sm:$0xf] %v197_v14 }
  0x1c   : > { %200 = vst [vmem:[%s148_s27 + $0x3c] sm:$0xf] %v199_v15 }
  0x1d PF: > { %p783_p6 = scmp.ge.s32.totalorder %s1046_s16, 1  ;;  %p254_p7 = scmp.lt.s32.totalorder %s1046_s16, 5 }
  0x1f   : > { %p255_p8 = pnand %p783_p6, %p254_p7 }
  0x20   : > { %s261_s28 = sand.u32 (!%p255_p8), 1, %s1030_s12   ;;  %p785_p9 = scmp.ne.s32.totalorder (!%p255_p8), %s1038_s14, 0 }
  0x21   : > { %258 = sbr.rel (%p255_p8) target bundleno = 321 (0x141), region = 69  ;;  %s784_s29 = sshll.u32 (!%p255_p8), %s261_s28, 6 }
  0x22   : > { %s1133_s30 = scalar_lea.vmem (!%p255_p8), [#allocation3], %s784_s29 }
  0x28   : > { %295 = sbr.rel (%p785_p9) target bundleno = 49 (0x31), region = 77  ;;  %v1048_v16 = vmov (!%p785_p9), 0.0  }
  0x29   : > { %296 = vst [vmem:[#allocation2] sm:$0xff] (!%p785_p9), %v1048_v16  ;;  %297 = vst [vmem:[#allocation2 + $0x8] sm:$0xff] (!%p785_p9), %v1048_v16 }
  0x2a   : > { %298 = vst [vmem:[#allocation2 + $0x10] sm:$0xff] (!%p785_p9), %v1048_v16  ;;  %299 = vst [vmem:[#allocation2 + $0x18] sm:$0xff] (!%p785_p9), %v1048_v16 }
  0x2b   : > { %300 = vst [vmem:[#allocation2 + $0x20] sm:$0xff] (!%p785_p9), %v1048_v16  ;;  %301 = vst [vmem:[#allocation2 + $0x28] sm:$0xff] (!%p785_p9), %v1048_v16 }
  0x2c   : > { %302 = vst [vmem:[#allocation2 + $0x30] sm:$0xff] (!%p785_p9), %v1048_v16  ;;  %303 = vst [vmem:[#allocation2 + $0x38] sm:$0xff] (!%p785_p9), %v1048_v16 }
  0x2d   : > { %304 = vst [vmem:[#allocation2 + $0x40] sm:$0xff] (!%p785_p9), %v1048_v16  ;;  %305 = vst [vmem:[#allocation2 + $0x48] sm:$0xff] (!%p785_p9), %v1048_v16 }
  0x2e   : > { %306 = vst [vmem:[#allocation2 + $0x50] sm:$0xff] (!%p785_p9), %v1048_v16  ;;  %307 = vst [vmem:[#allocation2 + $0x58] sm:$0xff] (!%p785_p9), %v1048_v16 }
  0x2f   : > { %308 = vst [vmem:[#allocation2 + $0x60] sm:$0xff] %v1048_v16  ;;  %309 = vst [vmem:[#allocation2 + $0x68] sm:$0xff] %v1048_v16 }
  0x30   : > { %310 = vst [vmem:[#allocation2 + $0x70] sm:$0xff] %v1048_v16  ;;  %311 = vst [vmem:[#allocation2 + $0x78] sm:$0xff] %v1048_v16 }
  0x31 PF: > { %v992_v17 = vld [vmem:[%s1212_s1] sm:$0xff]   ;;  %v993_v18 = vld [vmem:[%s1212_s1 + $0x8] sm:$0xff]   ;;  %v994_v19 = vld [vmem:[%s1212_s1 + $0x10] sm:$0xff]   ;;  %p802_p10 = scmp.ne.s32.totalorder %s1038_s14, 3 }
  0x32   : > { %903 = vmatprep.subr.bf16.mxu0 %v992_v17  ;;  %935 = vmatprep.subr.bf16.mxu1 %v992_v17  ;;  %v995_v20 = vld [vmem:[%s1212_s1 + $0x18] sm:$0xff]   ;;  %v1000_v21 = vld [vmem:[%s1133_s30] sm:$0xff]   ;;  %v997_v24 = vld [vmem:[%s1212_s1 + $0x28] sm:$0xff]  }
  0x33   : > { %904 = vmatpush3.bf16.msra.mxu0 %v992_v17  ;;  %943 = vmatpush3.bf16.msra.mxu1 %v992_v17  ;;  %v1001_v22 = vld [vmem:[%s1133_s30 + $0x20] sm:$0xff]   ;;  %v998_v25 = vld [vmem:[%s1212_s1 + $0x30] sm:$0xff]   ;;  %v999_v26 = vld [vmem:[%s1212_s1 + $0x38] sm:$0xff]  }
  0x34   : > { %905 = vmatprep.subr.bf16.mxu0 %v993_v18  ;;  %936 = vmatprep.subr.bf16.mxu1 %v993_v18  ;;  %v996_v23 = vld [vmem:[%s1212_s1 + $0x20] sm:$0xff]   ;;  %v1002_v27 = vld [vmem:[%s1133_s30 + $0x8] sm:$0xff]   ;;  %v1004_v29 = vld [vmem:[%s1133_s30 + $0x10] sm:$0xff]  }
  0x35   : > { %919 = vmatprep.mubr.bf16.mxu0 %v1000_v21  ;;  %927 = vmatprep.mubr.bf16.mxu1 %v1001_v22  ;;  %v1003_v28 = vld [vmem:[%s1133_s30 + $0x28] sm:$0xff]   ;;  %v1005_v30 = vld [vmem:[%s1133_s30 + $0x30] sm:$0xff]   ;;  %v1006_v31 = vld [vmem:[%s1133_s30 + $0x18] sm:$0xff]  }
  0x36   : > { %v1007_v32 = vld [vmem:[%s1133_s30 + $0x38] sm:$0xff]   ;;  %v314_v33 = vld [vmem:[#allocation2 + $0x10] sm:$0xff]  ;;  %v312_v35 = vld [vmem:[#allocation2] sm:$0xff] }
  0x37   : > { %906 = vmatpush3.bf16.msra.mxu0 %v993_v18  ;;  %944 = vmatpush3.bf16.msra.mxu1 %v993_v18  ;;  %v322_v34 = vld [vmem:[#allocation2 + $0x50] sm:$0xff]  ;;  %v320_v36 = vld [vmem:[#allocation2 + $0x40] sm:$0xff]  ;;  %v315_v39 = vld [vmem:[#allocation2 + $0x18] sm:$0xff] }
  0x38   : > { %907 = vmatprep.subr.bf16.mxu0 %v994_v19  ;;  %937 = vmatprep.subr.bf16.mxu1 %v994_v19  ;;  %v323_v40 = vld [vmem:[#allocation2 + $0x58] sm:$0xff]  ;;  %v313_v45 = vld [vmem:[#allocation2 + $0x8] sm:$0xff]  ;;  %v318_v57 = vld [vmem:[#allocation2 + $0x30] sm:$0xff] }
  0x39   : > { %v321_v46 = vld [vmem:[#allocation2 + $0x48] sm:$0xff]  ;;  %v326_v58 = vld [vmem:[#allocation2 + $0x70] sm:$0xff]  ;;  %v316_v59 = vld [vmem:[#allocation2 + $0x20] sm:$0xff] }
  0x3a   : > { %v324_v60 = vld [vmem:[#allocation2 + $0x60] sm:$0xff]  ;;  %v319_v63 = vld [vmem:[#allocation2 + $0x38] sm:$0xff]  ;;  %v317_v5 = vld [vmem:[#allocation2 + $0x28] sm:$0xff] }
  0x3b   : > { %908 = vmatpush3.bf16.msra.mxu0 %v994_v19  ;;  %945 = vmatpush3.bf16.msra.mxu1 %v994_v19  ;;  %v327_v0 = vld [vmem:[#allocation2 + $0x78] sm:$0xff]  ;;  %v325_v6 = vld [vmem:[#allocation2 + $0x68] sm:$0xff]  ;;  %v803_v19 = vld [vmem:[%s1213_s2] ss:$0 sm:$0xff] (!%p802_p10) }
  0x3c   : > { %909 = vmatprep.subr.bf16.mxu0 %v995_v20  ;;  %938 = vmatprep.subr.bf16.mxu1 %v995_v20 }
  0x3f   : > { %910 = vmatpush3.bf16.msra.mxu0 %v995_v20  ;;  %946 = vmatpush3.bf16.msra.mxu1 %v995_v20 }
  0x40   : > { %911 = vmatprep.subr.bf16.mxu0 %v996_v23  ;;  %939 = vmatprep.subr.bf16.mxu1 %v996_v23 }
  0x43   : > { %912 = vmatpush3.bf16.msra.mxu0 %v996_v23  ;;  %947 = vmatpush3.bf16.msra.mxu1 %v996_v23 }
  0x44   : > { %913 = vmatprep.subr.bf16.mxu0 %v997_v24  ;;  %940 = vmatprep.subr.bf16.mxu1 %v997_v24 }
  0x47   : > { %914 = vmatpush3.bf16.msra.mxu0 %v997_v24  ;;  %948 = vmatpush3.bf16.msra.mxu1 %v997_v24 }
  0x48   : > { %915 = vmatprep.subr.bf16.mxu0 %v998_v25  ;;  %941 = vmatprep.subr.bf16.mxu1 %v998_v25 }
  0x4b   : > { %916 = vmatpush3.bf16.msra.mxu0 %v998_v25  ;;  %949 = vmatpush3.bf16.msra.mxu1 %v998_v25 }
  0x4c   : > { %917 = vmatprep.subr.bf16.mxu0 %v999_v26  ;;  %942 = vmatprep.subr.bf16.mxu1 %v999_v26 }
  0x4f   : > { %918 = vmatpush3.bf16.msra.mxu0 %v999_v26  ;;  %950 = vmatpush3.bf16.msra.mxu1 %v999_v26 }
  0x52   : > { %920 = vmatmul.mubr.bf16.vlgmr.msra.gmra.mrb[0].mxu0 %v1002_v27  ;;  %928 = vmatmul.mubr.bf16.vlgmr.msra.gmra.mrb[0].mxu1 %v1003_v28 }
  0x53   : > { %923 = vmatprep.mubr.bf16.mxu0 %v1004_v29  ;;  %931 = vmatprep.mubr.bf16.mxu1 %v1005_v30 }
  0x5a   : > { %924 = vmatmul.mubr.bf16.gmra.mrb[4].mxu0 %v1006_v31  ;;  %932 = vmatmul.mubr.bf16.gmra.mrb[4].mxu1 %v1007_v32 }
 0x125   : > { %v921_v37 = vpop.f32.mrb[0].mxu0  ;;  %v929_v38 = vpop.f32.mrb[0].mxu1 }
 0x126   : > { %v555_v41 = vadd.f32 %v921_v37, %v314_v33  ;;  %v563_v42 = vadd.f32 %v929_v38, %v322_v34  ;;  %v490_v43 = vpop.f32.mrb[1].mxu0  ;;  %v522_v44 = vpop.f32.mrb[1].mxu1 }
 0x127   : > { %v553_v47 = vadd.f32 %v490_v43, %v312_v35  ;;  %v561_v48 = vadd.f32 %v522_v44, %v320_v36  ;;  %v922_v49 = vpop.f32.mrb[2].mxu0  ;;  %v930_v50 = vpop.f32.mrb[2].mxu1 }
 0x128   : > { %571 = vst [vmem:[#allocation2 + $0x10] sm:$0xff] %v555_v41  ;;  %579 = vst [vmem:[#allocation2 + $0x50] sm:$0xff] %v563_v42  ;;  %v556_v51 = vadd.f32 %v922_v49, %v315_v39  ;;  %v564_v52 = vadd.f32 %v930_v50, %v323_v40  ;;  %v493_v53 = vpop.f32.mrb[3].mxu0  ;;  %v525_v54 = vpop.f32.mrb[3].mxu1 }
 0x129   : > { %569 = vst [vmem:[#allocation2] sm:$0xff] %v553_v47  ;;  %577 = vst [vmem:[#allocation2 + $0x40] sm:$0xff] %v561_v48  ;;  %v554_v55 = vadd.f32 %v493_v53, %v313_v45  ;;  %v562_v56 = vadd.f32 %v525_v54, %v321_v46 }
 0x12a   : > { %572 = vst [vmem:[#allocation2 + $0x18] sm:$0xff] %v556_v51  ;;  %580 = vst [vmem:[#allocation2 + $0x58] sm:$0xff] %v564_v52 }
 0x12b   : > { %570 = vst [vmem:[#allocation2 + $0x8] sm:$0xff] %v554_v55  ;;  %578 = vst [vmem:[#allocation2 + $0x48] sm:$0xff] %v562_v56 }
 0x12d   : > { %v925_v61 = vpop.f32.mrb[4].mxu0  ;;  %v933_v62 = vpop.f32.mrb[4].mxu1  ;;  %588 = sbr.rel (%p802_p10) target bundleno = 321 (0x141), region = 81 }
 0x12e   : > { %v559_v1 = vadd.f32 %v925_v61, %v318_v57  ;;  %v567_v2 = vadd.f32 %v933_v62, %v326_v58  ;;  %v506_v3 = vpop.f32.mrb[5].mxu0  ;;  %v538_v4 = vpop.f32.mrb[5].mxu1 }
 0x12f   : > { %v557_v7 = vadd.f32 %v506_v3, %v316_v59  ;;  %v565_v8 = vadd.f32 %v538_v4, %v324_v60  ;;  %v926_v9 = vpop.f32.mrb[6].mxu0  ;;  %v934_v10 = vpop.f32.mrb[6].mxu1  ;;  %v591_v22 = vld [vmem:[#allocation2 + $0x10] sm:$0xff] (!%p802_p10) }
 0x130   : > { %575 = vst [vmem:[#allocation2 + $0x30] sm:$0xff] %v559_v1  ;;  %583 = vst [vmem:[#allocation2 + $0x70] sm:$0xff] %v567_v2  ;;  %v560_v11 = vadd.f32 %v926_v9, %v319_v63  ;;  %v568_v12 = vadd.f32 %v934_v10, %v327_v0  ;;  %v509_v13 = vpop.f32.mrb[7].mxu0  ;;  %v541_v14 = vpop.f32.mrb[7].mxu1  ;;  %v589_v17 = vld [vmem:[#allocation2] sm:$0xff] (!%p802_p10)  ;;  %v614_v25 = vadd.f32 (!%p802_p10), %v803_v19, %v591_v22  ;;  %v599_v37 = vld [vmem:[#allocation2 + $0x50] sm:$0xff] (!%p802_p10) }
 0x131   : > { %573 = vst [vmem:[#allocation2 + $0x20] sm:$0xff] %v557_v7  ;;  %581 = vst [vmem:[#allocation2 + $0x60] sm:$0xff] %v565_v8  ;;  %v558_v15 = vadd.f32 %v509_v13, %v317_v5  ;;  %v566_v16 = vadd.f32 %v541_v14, %v325_v6  ;;  %v612_v20 = vadd.f32 (!%p802_p10), %v803_v19, %v589_v17  ;;  %v592_v23 = vld [vmem:[#allocation2 + $0x18] sm:$0xff] (!%p802_p10)  ;;  %v597_v35 = vld [vmem:[#allocation2 + $0x40] sm:$0xff] (!%p802_p10) }
 0x132   : > { %576 = vst [vmem:[#allocation2 + $0x38] sm:$0xff] %v560_v11  ;;  %584 = vst [vmem:[#allocation2 + $0x78] sm:$0xff] %v568_v12  ;;  %v590_v18 = vld [vmem:[#allocation2 + $0x8] sm:$0xff] (!%p802_p10)  ;;  %v615_v26 = vadd.f32 (!%p802_p10), %v803_v19, %v592_v23  ;;  %v620_v39 = vadd.f32 (!%p802_p10), %v803_v19, %v597_v35  ;;  %v600_v41 = vld [vmem:[#allocation2 + $0x58] sm:$0xff] (!%p802_p10)  ;;  %v622_v42 = vadd.f32 (!%p802_p10), %v803_v19, %v599_v37 }
 0x133   : > { %574 = vst [vmem:[#allocation2 + $0x28] sm:$0xff] %v558_v15  ;;  %582 = vst [vmem:[#allocation2 + $0x68] sm:$0xff] %v566_v16  ;;  %v613_v21 = vadd.f32 (!%p802_p10), %v803_v19, %v590_v18  ;;  %v598_v36 = vld [vmem:[#allocation2 + $0x48] sm:$0xff] (!%p802_p10)  ;;  %v623_v47 = vadd.f32 (!%p802_p10), %v803_v19, %v600_v41 }
 0x134   : > { %v848_v38 = vpack.c.bf16 %v615_v26, %v614_v25  ;;  %v621_v40 = vadd.f32 %v803_v19, %v598_v36 }
 0x135   : > { %v843_v31 = vpack.c.bf16 %v613_v21, %v612_v20  ;;  %v868_v55 = vpack.c.bf16 %v623_v47, %v622_v42 }
 0x136   : > { %880 = vst [vmem:[%s1214_s3 + $0x8] sm:$0xff] %v848_v38   ;;  %v863_v51 = vpack.c.bf16 %v621_v40, %v620_v39 }
 0x137   : > { %v595_v29 = vld [vmem:[#allocation2 + $0x30] sm:$0xff]  ;;  %844 = vst [vmem:[%s1214_s3] sm:$0xff] %v843_v31   ;;  %884 = vst [vmem:[%s1214_s3 + $0x28] sm:$0xff] %v868_v55  }
 0x138   : > { %v593_v24 = vld [vmem:[#allocation2 + $0x20] sm:$0xff]  ;;  %v618_v33 = vadd.f32 %v803_v19, %v595_v29  ;;  %v603_v49 = vld [vmem:[#allocation2 + $0x70] sm:$0xff]  ;;  %883 = vst [vmem:[%s1214_s3 + $0x20] sm:$0xff] %v863_v51  }
 0x139   : > { %v616_v28 = vadd.f32 %v803_v19, %v593_v24  ;;  %v596_v30 = vld [vmem:[#allocation2 + $0x38] sm:$0xff]  ;;  %v601_v43 = vld [vmem:[#allocation2 + $0x60] sm:$0xff]  ;;  %v626_v53 = vadd.f32 %v803_v19, %v603_v49 }
 0x13a   : > { %v594_v27 = vld [vmem:[#allocation2 + $0x28] sm:$0xff]  ;;  %v619_v34 = vadd.f32 %v803_v19, %v596_v30  ;;  %v624_v48 = vadd.f32 %v803_v19, %v601_v43  ;;  %v604_v50 = vld [vmem:[#allocation2 + $0x78] sm:$0xff] }
 0x13b   : > { %v617_v32 = vadd.f32 %v803_v19, %v594_v27  ;;  %v602_v44 = vld [vmem:[#allocation2 + $0x68] sm:$0xff]  ;;  %v627_v54 = vadd.f32 %v803_v19, %v604_v50 }
 0x13c   : > { %v858_v46 = vpack.c.bf16 %v619_v34, %v618_v33  ;;  %v625_v52 = vadd.f32 %v803_v19, %v602_v44 }
 0x13d   : > { %v853_v45 = vpack.c.bf16 %v617_v32, %v616_v28  ;;  %v878_v57 = vpack.c.bf16 %v627_v54, %v626_v53 }
 0x13e   : > { %882 = vst [vmem:[%s1214_s3 + $0x18] sm:$0xff] %v858_v46   ;;  %v873_v56 = vpack.c.bf16 %v625_v52, %v624_v48 }
 0x13f   : > { %881 = vst [vmem:[%s1214_s3 + $0x10] sm:$0xff] %v853_v45   ;;  %886 = vst [vmem:[%s1214_s3 + $0x38] sm:$0xff] %v878_v57  }
 0x140   : > { %885 = vst [vmem:[%s1214_s3 + $0x30] sm:$0xff] %v873_v56  }
 0x141 PF: > { %s13_s16 = sadd.s32 1, %s1046_s16   ;;  %s1215_s12 = smov %s1034_s13 }
 0x142   : > { %p10_p11 = scmp.ge.s32.totalorder %s13_s16, 6   ;;  %s1216_s13 = smov %s1104_s20 }
 0x143   : > { %s1217_s14 = smov %s1042_s15  ;;  %s1218_s15 = smov %s1220_s17 }
 0x144   :  { %12 = sbr.rel (!%p10_p11) target bundleno = 3 (0x3), region = 116 }

// kernel: clip_feature_extractor_forward.25
= control target key start
LH: loop header
LB: loop body
LE: loop exit
PB: predicated region body
PF: predicated region fallthrough
CT: control target
= control target key end

     0   :  { %s771_s1 = inlined_call_operand.vmem [shape: bf16[128,128], index: 1, kind: input, shape index: {}]   ;;  %s772_s0 = inlined_call_operand.vmem [shape: bf16[128,128], index: 0, kind: input, shape index: {}]   ;;  %s773_s3 = inlined_call_operand.vmem [shape: bf16[128,128], index: 3, kind: input, shape index: {}]   ;;  %s774_s2 = inlined_call_operand.vmem [shape: f32[1,128], index: 2, kind: input, shape index: {}]   ;;  %s775_s4 = inlined_call_operand.vmem [shape: bf16[128,128], index: 4, kind: output, shape index: {}]  }
   0x1   :  { %v597_v0 = vld [vmem:[%s771_s1] sm:$0xff]   ;;  %v598_v1 = vld [vmem:[%s771_s1 + $0x8] sm:$0xff]   ;;  %v599_v2 = vld [vmem:[%s771_s1 + $0x10] sm:$0xff]  }
   0x2   :  { %549 = vmatprep.subr.bf16.mxu0 %v597_v0  ;;  %581 = vmatprep.subr.bf16.mxu1 %v597_v0  ;;  %v600_v3 = vld [vmem:[%s771_s1 + $0x18] sm:$0xff]   ;;  %v605_v4 = vld [vmem:[%s772_s0] sm:$0xff]   ;;  %v602_v7 = vld [vmem:[%s771_s1 + $0x28] sm:$0xff]  }
   0x3   :  { %550 = vmatpush3.bf16.msra.mxu0 %v597_v0  ;;  %589 = vmatpush3.bf16.msra.mxu1 %v597_v0  ;;  %v606_v5 = vld [vmem:[%s772_s0 + $0x20] sm:$0xff]   ;;  %v603_v8 = vld [vmem:[%s771_s1 + $0x30] sm:$0xff]   ;;  %v604_v9 = vld [vmem:[%s771_s1 + $0x38] sm:$0xff]  }
   0x4   :  { %551 = vmatprep.subr.bf16.mxu0 %v598_v1  ;;  %582 = vmatprep.subr.bf16.mxu1 %v598_v1  ;;  %v601_v6 = vld [vmem:[%s771_s1 + $0x20] sm:$0xff]   ;;  %v607_v10 = vld [vmem:[%s772_s0 + $0x8] sm:$0xff]   ;;  %v609_v12 = vld [vmem:[%s772_s0 + $0x10] sm:$0xff]  }
   0x5   :  { %565 = vmatprep.mubr.bf16.mxu0 %v605_v4  ;;  %573 = vmatprep.mubr.bf16.mxu1 %v606_v5  ;;  %v608_v11 = vld [vmem:[%s772_s0 + $0x28] sm:$0xff]   ;;  %v610_v13 = vld [vmem:[%s772_s0 + $0x30] sm:$0xff]   ;;  %v611_v14 = vld [vmem:[%s772_s0 + $0x18] sm:$0xff]  }
   0x6   :  { %v612_v15 = vld [vmem:[%s772_s0 + $0x38] sm:$0xff]   ;;  %v519_v16 = vld [vmem:[%s773_s3 + $0x8] sm:$0xff]   ;;  %v448_v18 = vld [vmem:[%s773_s3] sm:$0xff]  }
   0x7   :  { %552 = vmatpush3.bf16.msra.mxu0 %v598_v1  ;;  %590 = vmatpush3.bf16.msra.mxu1 %v598_v1  ;;  %v523_v17 = vld [vmem:[%s773_s3 + $0x28] sm:$0xff]   ;;  %v522_v19 = vld [vmem:[%s773_s3 + $0x20] sm:$0xff]   ;;  %v706_v21 = vld [vmem:[%s773_s3 + $0x18] sm:$0xff]   ;;  %v453_v23 = vunpack.c.l.bf16 %v519_v16  ;;  %v449_v25 = vunpack.c.l.bf16 %v448_v18  ;;  %v454_v31 = vunpack.c.h.bf16 %v519_v16  ;;  %v450_v33 = vunpack.c.h.bf16 %v448_v18 }
   0x8   :  { %553 = vmatprep.subr.bf16.mxu0 %v599_v2  ;;  %583 = vmatprep.subr.bf16.mxu1 %v599_v2  ;;  %v701_v20 = vld [vmem:[%s774_s2] ss:$0 sm:$0xff]  ;;  %v711_v22 = vld [vmem:[%s773_s3 + $0x38] sm:$0xff]   ;;  %v469_v24 = vunpack.c.l.bf16 %v523_v17  ;;  %v465_v26 = vunpack.c.l.bf16 %v522_v19  ;;  %v716_v27 = vld [vmem:[%s773_s3 + $0x10] sm:$0xff]   ;;  %v470_v32 = vunpack.c.h.bf16 %v523_v17  ;;  %v466_v34 = vunpack.c.h.bf16 %v522_v19 }
   0x9   :  { %v721_v28 = vld [vmem:[%s773_s3 + $0x30] sm:$0xff]   ;;  %v461_v39 = vunpack.c.l.bf16 %v706_v21  ;;  %v477_v40 = vunpack.c.l.bf16 %v711_v22  ;;  %v457_v45 = vunpack.c.l.bf16 %v716_v27  ;;  %v462_v59 = vunpack.c.h.bf16 %v706_v21 }
   0xa   :  { %v473_v46 = vunpack.c.l.bf16 %v721_v28  ;;  %v478_v60 = vunpack.c.h.bf16 %v711_v22  ;;  %v458_v63 = vunpack.c.h.bf16 %v716_v27  ;;  %v474_v0 = vunpack.c.h.bf16 %v721_v28 }
   0xb   :  { %554 = vmatpush3.bf16.msra.mxu0 %v599_v2  ;;  %591 = vmatpush3.bf16.msra.mxu1 %v599_v2 }
   0xc   :  { %555 = vmatprep.subr.bf16.mxu0 %v600_v3  ;;  %584 = vmatprep.subr.bf16.mxu1 %v600_v3 }
   0xf   :  { %556 = vmatpush3.bf16.msra.mxu0 %v600_v3  ;;  %592 = vmatpush3.bf16.msra.mxu1 %v600_v3 }
  0x10   :  { %557 = vmatprep.subr.bf16.mxu0 %v601_v6  ;;  %585 = vmatprep.subr.bf16.mxu1 %v601_v6 }
  0x13   :  { %558 = vmatpush3.bf16.msra.mxu0 %v601_v6  ;;  %593 = vmatpush3.bf16.msra.mxu1 %v601_v6 }
  0x14   :  { %559 = vmatprep.subr.bf16.mxu0 %v602_v7  ;;  %586 = vmatprep.subr.bf16.mxu1 %v602_v7 }
  0x17   :  { %560 = vmatpush3.bf16.msra.mxu0 %v602_v7  ;;  %594 = vmatpush3.bf16.msra.mxu1 %v602_v7 }
  0x18   :  { %561 = vmatprep.subr.bf16.mxu0 %v603_v8  ;;  %587 = vmatprep.subr.bf16.mxu1 %v603_v8 }
  0x1b   :  { %562 = vmatpush3.bf16.msra.mxu0 %v603_v8  ;;  %595 = vmatpush3.bf16.msra.mxu1 %v603_v8 }
  0x1c   :  { %563 = vmatprep.subr.bf16.mxu0 %v604_v9  ;;  %588 = vmatprep.subr.bf16.mxu1 %v604_v9 }
  0x1f   :  { %564 = vmatpush3.bf16.msra.mxu0 %v604_v9  ;;  %596 = vmatpush3.bf16.msra.mxu1 %v604_v9 }
  0x22   :  { %566 = vmatmul.mubr.bf16.vlgmr.msra.gmra.mrb[0].mxu0 %v607_v10  ;;  %574 = vmatmul.mubr.bf16.vlgmr.msra.gmra.mrb[0].mxu1 %v608_v11 }
  0x23   :  { %569 = vmatprep.mubr.bf16.mxu0 %v609_v12  ;;  %577 = vmatprep.mubr.bf16.mxu1 %v610_v13 }
  0x2a   :  { %570 = vmatmul.mubr.bf16.gmra.mrb[4].mxu0 %v611_v14  ;;  %578 = vmatmul.mubr.bf16.gmra.mrb[4].mxu1 %v612_v15 }
  0xf5   :  { %v567_v29 = vpop.f32.mrb[0].mxu0  ;;  %v575_v30 = vpop.f32.mrb[0].mxu1 }
  0xf6   :  { %v196_v35 = vadd.f32 %v567_v29, %v701_v20  ;;  %v228_v36 = vadd.f32 %v575_v30, %v701_v20  ;;  %v187_v37 = vpop.f32.mrb[1].mxu0  ;;  %v219_v38 = vpop.f32.mrb[1].mxu1 }
  0xf7   :  { %v188_v41 = vadd.f32 %v701_v20, %v187_v37  ;;  %v220_v42 = vadd.f32 %v701_v20, %v219_v38  ;;  %v568_v43 = vpop.f32.mrb[2].mxu0  ;;  %v576_v44 = vpop.f32.mrb[2].mxu1 }
  0xf8   :  { %v284_v47 = vadd.f32 %v453_v23, %v196_v35  ;;  %v292_v48 = vadd.f32 %v469_v24, %v228_v36  ;;  %v199_v49 = vadd.f32 %v568_v43, %v701_v20  ;;  %v231_v50 = vadd.f32 %v576_v44, %v701_v20  ;;  %v190_v51 = vpop.f32.mrb[3].mxu0  ;;  %v222_v52 = vpop.f32.mrb[3].mxu1 }
  0xf9   :  { %v282_v53 = vadd.f32 %v449_v25, %v188_v41  ;;  %v290_v54 = vadd.f32 %v465_v26, %v220_v42  ;;  %v191_v55 = vadd.f32 %v701_v20, %v190_v51  ;;  %v223_v56 = vadd.f32 %v701_v20, %v222_v52 }
  0xfa   :  { %v285_v57 = vadd.f32 %v454_v31, %v199_v49  ;;  %v293_v58 = vadd.f32 %v470_v32, %v231_v50  ;;  %v300_v1 = vmax.f32 %v284_v47, 0.0  ;;  %v308_v2 = vmax.f32 %v292_v48, 0.0 }
  0xfb   :  { %v283_v61 = vadd.f32 %v450_v33, %v191_v55  ;;  %v291_v62 = vadd.f32 %v466_v34, %v223_v56  ;;  %v298_v5 = vmax.f32 %v282_v53, 0.0  ;;  %v306_v6 = vmax.f32 %v290_v54, 0.0 }
  0xfc   :  { %v301_v3 = vmax.f32 %v285_v57, 0.0  ;;  %v309_v4 = vmax.f32 %v293_v58, 0.0 }
  0xfd   :  { %v299_v7 = vmax.f32 %v283_v61, 0.0  ;;  %v307_v8 = vmax.f32 %v291_v62, 0.0  ;;  %v571_v9 = vpop.f32.mrb[4].mxu0  ;;  %v579_v10 = vpop.f32.mrb[4].mxu1 }
  0xfe   :  { %v487_v11 = vpack.c.bf16 %v301_v3, %v300_v1  ;;  %v507_v12 = vpack.c.bf16 %v309_v4, %v308_v2  ;;  %v212_v13 = vadd.f32 %v571_v9, %v701_v20  ;;  %v244_v14 = vadd.f32 %v579_v10, %v701_v20  ;;  %v203_v15 = vpop.f32.mrb[5].mxu0  ;;  %v235_v16 = vpop.f32.mrb[5].mxu1 }
  0xff   :  { %v482_v17 = vpack.c.bf16 %v299_v7, %v298_v5  ;;  %v502_v18 = vpack.c.bf16 %v307_v8, %v306_v6  ;;  %v204_v19 = vadd.f32 %v701_v20, %v203_v15  ;;  %v236_v21 = vadd.f32 %v701_v20, %v235_v16  ;;  %v572_v22 = vpop.f32.mrb[6].mxu0  ;;  %v580_v23 = vpop.f32.mrb[6].mxu1 }
 0x100   :  { %526 = vst [vmem:[%s775_s4 + $0x8] sm:$0xff] %v487_v11   ;;  %530 = vst [vmem:[%s775_s4 + $0x28] sm:$0xff] %v507_v12   ;;  %v288_v24 = vadd.f32 %v461_v39, %v212_v13  ;;  %v296_v25 = vadd.f32 %v477_v40, %v244_v14  ;;  %v215_v26 = vadd.f32 %v572_v22, %v701_v20  ;;  %v206_v28 = vpop.f32.mrb[7].mxu0  ;;  %v238_v29 = vpop.f32.mrb[7].mxu1 }
 0x101   :  { %v247_v27 = vadd.f32 %v580_v23, %v701_v20  ;;  %483 = vst [vmem:[%s775_s4] sm:$0xff] %v482_v17   ;;  %529 = vst [vmem:[%s775_s4 + $0x20] sm:$0xff] %v502_v18   ;;  %v286_v30 = vadd.f32 %v457_v45, %v204_v19  ;;  %v294_v31 = vadd.f32 %v473_v46, %v236_v21 }
 0x102   :  { %v207_v32 = vadd.f32 %v701_v20, %v206_v28  ;;  %v239_v33 = vadd.f32 %v701_v20, %v238_v29  ;;  %v289_v34 = vadd.f32 %v462_v59, %v215_v26  ;;  %v304_v38 = vmax.f32 %v288_v24, 0.0 }
 0x103   :  { %v297_v35 = vadd.f32 %v478_v60, %v247_v27  ;;  %v312_v39 = vmax.f32 %v296_v25, 0.0  ;;  %v302_v42 = vmax.f32 %v286_v30, 0.0  ;;  %v310_v43 = vmax.f32 %v294_v31, 0.0 }
 0x104   :  { %v287_v36 = vadd.f32 %v458_v63, %v207_v32  ;;  %v295_v37 = vadd.f32 %v474_v0, %v239_v33  ;;  %v305_v40 = vmax.f32 %v289_v34, 0.0 }
 0x105   :  { %v313_v41 = vmax.f32 %v297_v35, 0.0 }
 0x106   :  { %v303_v44 = vmax.f32 %v287_v36, 0.0  ;;  %v311_v47 = vmax.f32 %v295_v37, 0.0  ;;  %v497_v48 = vpack.c.bf16 %v305_v40, %v304_v38 }
 0x107   :  { %v517_v49 = vpack.c.bf16 %v313_v41, %v312_v39 }
 0x108   :  { %v492_v45 = vpack.c.bf16 %v303_v44, %v302_v42  ;;  %v512_v46 = vpack.c.bf16 %v311_v47, %v310_v43  ;;  %528 = vst [vmem:[%s775_s4 + $0x18] sm:$0xff] %v497_v48  }
 0x109   :  { %532 = vst [vmem:[%s775_s4 + $0x38] sm:$0xff] %v517_v49  }
 0x10a   :  { %527 = vst [vmem:[%s775_s4 + $0x10] sm:$0xff] %v492_v45   ;;  %531 = vst [vmem:[%s775_s4 + $0x30] sm:$0xff] %v512_v46  }

// kernel: clip_feature_extractor_forward.26
= control target key start
LH: loop header
LB: loop body
LE: loop exit
PB: predicated region body
PF: predicated region fallthrough
CT: control target
= control target key end

     0   :  { %s618_s1 = inlined_call_operand.vmem [shape: bf16[128,128], index: 1, kind: input, shape index: {}]   ;;  %s619_s0 = inlined_call_operand.vmem [shape: bf16[128,128], index: 0, kind: input, shape index: {}]   ;;  %s620_s2 = inlined_call_operand.vmem [shape: f32[1,128], index: 2, kind: input, shape index: {}]   ;;  %s621_s3 = inlined_call_operand.vmem [shape: bf16[128,128], index: 3, kind: output, shape index: {}]  }
   0x1   :  { %v507_v0 = vld [vmem:[%s618_s1] sm:$0xff]   ;;  %v508_v1 = vld [vmem:[%s618_s1 + $0x8] sm:$0xff]   ;;  %v509_v2 = vld [vmem:[%s618_s1 + $0x10] sm:$0xff]  }
   0x2   :  { %459 = vmatprep.subr.bf16.mxu0 %v507_v0  ;;  %491 = vmatprep.subr.bf16.mxu1 %v507_v0  ;;  %v510_v3 = vld [vmem:[%s618_s1 + $0x18] sm:$0xff]   ;;  %v515_v4 = vld [vmem:[%s619_s0] sm:$0xff]   ;;  %v512_v7 = vld [vmem:[%s618_s1 + $0x28] sm:$0xff]  }
   0x3   :  { %460 = vmatpush3.bf16.msra.mxu0 %v507_v0  ;;  %499 = vmatpush3.bf16.msra.mxu1 %v507_v0  ;;  %v516_v5 = vld [vmem:[%s619_s0 + $0x20] sm:$0xff]   ;;  %v513_v8 = vld [vmem:[%s618_s1 + $0x30] sm:$0xff]   ;;  %v514_v9 = vld [vmem:[%s618_s1 + $0x38] sm:$0xff]  }
   0x4   :  { %461 = vmatprep.subr.bf16.mxu0 %v508_v1  ;;  %492 = vmatprep.subr.bf16.mxu1 %v508_v1  ;;  %v511_v6 = vld [vmem:[%s618_s1 + $0x20] sm:$0xff]   ;;  %v517_v10 = vld [vmem:[%s619_s0 + $0x8] sm:$0xff]   ;;  %v519_v12 = vld [vmem:[%s619_s0 + $0x10] sm:$0xff]  }
   0x5   :  { %475 = vmatprep.mubr.bf16.mxu0 %v515_v4  ;;  %483 = vmatprep.mubr.bf16.mxu1 %v516_v5  ;;  %v518_v11 = vld [vmem:[%s619_s0 + $0x28] sm:$0xff]   ;;  %v520_v13 = vld [vmem:[%s619_s0 + $0x30] sm:$0xff]   ;;  %v521_v14 = vld [vmem:[%s619_s0 + $0x18] sm:$0xff]  }
   0x6   :  { %v522_v15 = vld [vmem:[%s619_s0 + $0x38] sm:$0xff]   ;;  %v347_v16 = vld [vmem:[%s620_s2] ss:$0 sm:$0xff] }
   0x7   :  { %462 = vmatpush3.bf16.msra.mxu0 %v508_v1  ;;  %500 = vmatpush3.bf16.msra.mxu1 %v508_v1 }
   0x8   :  { %463 = vmatprep.subr.bf16.mxu0 %v509_v2  ;;  %493 = vmatprep.subr.bf16.mxu1 %v509_v2 }
   0xb   :  { %464 = vmatpush3.bf16.msra.mxu0 %v509_v2  ;;  %501 = vmatpush3.bf16.msra.mxu1 %v509_v2 }
   0xc   :  { %465 = vmatprep.subr.bf16.mxu0 %v510_v3  ;;  %494 = vmatprep.subr.bf16.mxu1 %v510_v3 }
   0xf   :  { %466 = vmatpush3.bf16.msra.mxu0 %v510_v3  ;;  %502 = vmatpush3.bf16.msra.mxu1 %v510_v3 }
  0x10   :  { %467 = vmatprep.subr.bf16.mxu0 %v511_v6  ;;  %495 = vmatprep.subr.bf16.mxu1 %v511_v6 }
  0x13   :  { %468 = vmatpush3.bf16.msra.mxu0 %v511_v6  ;;  %503 = vmatpush3.bf16.msra.mxu1 %v511_v6 }
  0x14   :  { %469 = vmatprep.subr.bf16.mxu0 %v512_v7  ;;  %496 = vmatprep.subr.bf16.mxu1 %v512_v7 }
  0x17   :  { %470 = vmatpush3.bf16.msra.mxu0 %v512_v7  ;;  %504 = vmatpush3.bf16.msra.mxu1 %v512_v7 }
  0x18   :  { %471 = vmatprep.subr.bf16.mxu0 %v513_v8  ;;  %497 = vmatprep.subr.bf16.mxu1 %v513_v8 }
  0x1b   :  { %472 = vmatpush3.bf16.msra.mxu0 %v513_v8  ;;  %505 = vmatpush3.bf16.msra.mxu1 %v513_v8 }
  0x1c   :  { %473 = vmatprep.subr.bf16.mxu0 %v514_v9  ;;  %498 = vmatprep.subr.bf16.mxu1 %v514_v9 }
  0x1f   :  { %474 = vmatpush3.bf16.msra.mxu0 %v514_v9  ;;  %506 = vmatpush3.bf16.msra.mxu1 %v514_v9 }
  0x22   :  { %476 = vmatmul.mubr.bf16.vlgmr.msra.gmra.mrb[0].mxu0 %v517_v10  ;;  %484 = vmatmul.mubr.bf16.vlgmr.msra.gmra.mrb[0].mxu1 %v518_v11 }
  0x23   :  { %479 = vmatprep.mubr.bf16.mxu0 %v519_v12  ;;  %487 = vmatprep.mubr.bf16.mxu1 %v520_v13 }
  0x2a   :  { %480 = vmatmul.mubr.bf16.gmra.mrb[4].mxu0 %v521_v14  ;;  %488 = vmatmul.mubr.bf16.gmra.mrb[4].mxu1 %v522_v15 }
  0xf5   :  { %v477_v17 = vpop.f32.mrb[0].mxu0  ;;  %v485_v18 = vpop.f32.mrb[0].mxu1 }
  0xf6   :  { %v193_v19 = vadd.f32 %v477_v17, %v347_v16  ;;  %v225_v20 = vadd.f32 %v485_v18, %v347_v16  ;;  %v184_v21 = vpop.f32.mrb[1].mxu0  ;;  %v216_v22 = vpop.f32.mrb[1].mxu1 }
  0xf7   :  { %v185_v23 = vadd.f32 %v347_v16, %v184_v21  ;;  %v217_v24 = vadd.f32 %v347_v16, %v216_v22  ;;  %v478_v25 = vpop.f32.mrb[2].mxu0  ;;  %v486_v26 = vpop.f32.mrb[2].mxu1 }
  0xf8   :  { %v196_v27 = vadd.f32 %v478_v25, %v347_v16  ;;  %v228_v28 = vadd.f32 %v486_v26, %v347_v16  ;;  %v187_v29 = vpop.f32.mrb[3].mxu0  ;;  %v219_v30 = vpop.f32.mrb[3].mxu1  ;;  %v249_v33 = vmax.f32 %v193_v19, 0.0  ;;  %v257_v34 = vmax.f32 %v225_v20, 0.0 }
  0xf9   :  { %v188_v31 = vadd.f32 %v347_v16, %v187_v29  ;;  %v220_v32 = vadd.f32 %v347_v16, %v219_v30  ;;  %v247_v37 = vmax.f32 %v185_v23, 0.0  ;;  %v255_v38 = vmax.f32 %v217_v24, 0.0 }
  0xfa   :  { %v250_v35 = vmax.f32 %v196_v27, 0.0  ;;  %v258_v36 = vmax.f32 %v228_v28, 0.0 }
  0xfb   :  { %v248_v39 = vmax.f32 %v188_v31, 0.0  ;;  %v256_v40 = vmax.f32 %v220_v32, 0.0 }
  0xfc   :  { %v404_v41 = vpack.c.bf16 %v250_v35, %v249_v33  ;;  %v424_v42 = vpack.c.bf16 %v258_v36, %v257_v34 }
  0xfd   :  { %v399_v43 = vpack.c.bf16 %v248_v39, %v247_v37  ;;  %v419_v44 = vpack.c.bf16 %v256_v40, %v255_v38  ;;  %v481_v45 = vpop.f32.mrb[4].mxu0  ;;  %v489_v46 = vpop.f32.mrb[4].mxu1 }
  0xfe   :  { %436 = vst [vmem:[%s621_s3 + $0x8] sm:$0xff] %v404_v41   ;;  %440 = vst [vmem:[%s621_s3 + $0x28] sm:$0xff] %v424_v42   ;;  %v209_v47 = vadd.f32 %v481_v45, %v347_v16  ;;  %v241_v48 = vadd.f32 %v489_v46, %v347_v16  ;;  %v200_v49 = vpop.f32.mrb[5].mxu0  ;;  %v232_v50 = vpop.f32.mrb[5].mxu1 }
  0xff   :  { %400 = vst [vmem:[%s621_s3] sm:$0xff] %v399_v43   ;;  %439 = vst [vmem:[%s621_s3 + $0x20] sm:$0xff] %v419_v44   ;;  %v201_v51 = vadd.f32 %v347_v16, %v200_v49  ;;  %v233_v52 = vadd.f32 %v347_v16, %v232_v50  ;;  %v482_v53 = vpop.f32.mrb[6].mxu0  ;;  %v490_v54 = vpop.f32.mrb[6].mxu1 }
 0x100   :  { %v212_v55 = vadd.f32 %v482_v53, %v347_v16  ;;  %v244_v56 = vadd.f32 %v490_v54, %v347_v16  ;;  %v203_v57 = vpop.f32.mrb[7].mxu0  ;;  %v235_v58 = vpop.f32.mrb[7].mxu1  ;;  %v253_v61 = vmax.f32 %v209_v47, 0.0  ;;  %v261_v62 = vmax.f32 %v241_v48, 0.0 }
 0x101   :  { %v204_v59 = vadd.f32 %v347_v16, %v203_v57  ;;  %v236_v60 = vadd.f32 %v347_v16, %v235_v58  ;;  %v251_v1 = vmax.f32 %v201_v51, 0.0  ;;  %v259_v2 = vmax.f32 %v233_v52, 0.0 }
 0x102   :  { %v254_v63 = vmax.f32 %v212_v55, 0.0  ;;  %v262_v0 = vmax.f32 %v244_v56, 0.0 }
 0x103   :  { %v252_v3 = vmax.f32 %v204_v59, 0.0  ;;  %v260_v4 = vmax.f32 %v236_v60, 0.0 }
 0x104   :  { %v414_v5 = vpack.c.bf16 %v254_v63, %v253_v61  ;;  %v434_v6 = vpack.c.bf16 %v262_v0, %v261_v62 }
 0x105   :  { %v409_v7 = vpack.c.bf16 %v252_v3, %v251_v1  ;;  %v429_v8 = vpack.c.bf16 %v260_v4, %v259_v2 }
 0x106   :  { %438 = vst [vmem:[%s621_s3 + $0x18] sm:$0xff] %v414_v5   ;;  %442 = vst [vmem:[%s621_s3 + $0x38] sm:$0xff] %v434_v6  }
 0x107   :  { %437 = vst [vmem:[%s621_s3 + $0x10] sm:$0xff] %v409_v7   ;;  %441 = vst [vmem:[%s621_s3 + $0x30] sm:$0xff] %v429_v8  }

// kernel: clip_feature_extractor_forward.23
= control target key start
LH: loop header
LB: loop body
LE: loop exit
PB: predicated region body
PF: predicated region fallthrough
CT: control target
= control target key end

     0   :  { %s2725_s12 = smov 0   ;;  %s3247_s0 = inlined_call_operand.vmem [shape: bf16[2,10,10,128], index: 0, kind: input, shape index: {}]   ;;  %s3248_s1 = inlined_call_operand.vmem [shape: bf16[1152,128], index: 1, kind: input, shape index: {}]   ;;  %s3249_s2 = inlined_call_operand.vmem [shape: f32[1,128], index: 2, kind: input, shape index: {}]   ;;  %s3250_s3 = inlined_call_operand.vmem [shape: bf16[2,8,8,128], index: 3, kind: output, shape index: {}]  }
   0x1 LB: > { %s2111_s13 = sadd.s32 4294967295, %s2703_s12   ;;  %p2115_p0 = scmp.ge.s32.totalorder %s2703_s12, 1  ;;  %s2703_s12 = sphi %s2725_s12, %s13_s12  }
   0x2   : > { %p137_p1 = scmp.lt.s32.totalorder %s2703_s12, 3 }
   0x4   : > { %p138_p2 = pnand %p2115_p0, %p137_p1 }
   0x5   : > { %v2579_v0 = vld [vmem:[%s3248_s1 + $0x40] sm:$0xff] (!%p138_p2)   ;;  %v2583_v4 = vld [vmem:[%s3248_s1 + $0x48] sm:$0xff] (!%p138_p2)   ;;  %v2587_v8 = vld [vmem:[%s3248_s1 + $0x50] sm:$0xff] (!%p138_p2)   ;;  %p161_p3 = scmp.lt.s32.totalorder (!%p138_p2), %s2111_s13, 1  ;;  %vm367_vm0 = vcmask (!%p138_p2), 1042432   ;;  %vm368_vm1 = vcmask (!%p138_p2), 1046532  }
   0x6   : > { %141 = sbr.rel (%p138_p2) target bundleno = 368 (0x170), region = 32  ;;  %v2580_v1 = vld [vmem:[%s3248_s1 + $0xc0] sm:$0xff] (!%p138_p2)   ;;  %2358 = vmatprep.subr.bf16.mxu0 (!%p138_p2), %v2579_v0  ;;  %v2584_v5 = vld [vmem:[%s3248_s1 + $0xc8] sm:$0xff] (!%p138_p2)   ;;  %v2588_v9 = vld [vmem:[%s3248_s1 + $0xd0] sm:$0xff] (!%p138_p2)   ;;  %vm204_vm2 = vsmask.f32 (!%p138_p2), 3328 }
   0x7   : > { %v2581_v2 = vld [vmem:[%s3248_s1] sm:$0xff] (!%p138_p2)   ;;  %2398 = vmatprep.subr.bf16.mxu1 (!%p138_p2), %v2580_v1  ;;  %v2585_v6 = vld [vmem:[%s3248_s1 + $0x8] sm:$0xff] (!%p138_p2)   ;;  %v2589_v10 = vld [vmem:[%s3248_s1 + $0x10] sm:$0xff] (!%p138_p2)   ;;  %vm205_vm3 = vsmask.f32 (!%p138_p2), 7440 }
   0x8   : > { %v2582_v3 = vld [vmem:[%s3248_s1 + $0x80] sm:$0xff] (!%p138_p2)   ;;  %2359 = vmatpush3.bf16.msra.mxu0 (!%p138_p2), %v2581_v2  ;;  %v2586_v7 = vld [vmem:[%s3248_s1 + $0x88] sm:$0xff] (!%p138_p2)   ;;  %v2590_v11 = vld [vmem:[%s3248_s1 + $0x90] sm:$0xff] (!%p138_p2)  }
   0x9   : > { %2399 = vmatpush3.bf16.msra.mxu1 (!%p138_p2), %v2582_v3  ;;  %2360 = vmatprep.subr.bf16.mxu0 (!%p138_p2), %v2583_v4  ;;  %v2591_v12 = vld [vmem:[%s3248_s1 + $0x58] sm:$0xff] (!%p138_p2)   ;;  %v2595_v16 = vld [vmem:[%s3248_s1 + $0x60] sm:$0xff] (!%p138_p2)   ;;  %v2599_v20 = vld [vmem:[%s3248_s1 + $0x68] sm:$0xff] (!%p138_p2)  }
   0xa   : > { %2400 = vmatprep.subr.bf16.mxu1 (!%p138_p2), %v2584_v5  ;;  %v2592_v13 = vld [vmem:[%s3248_s1 + $0xd8] sm:$0xff] (!%p138_p2)   ;;  %v2596_v17 = vld [vmem:[%s3248_s1 + $0xe0] sm:$0xff] (!%p138_p2)   ;;  %v2600_v21 = vld [vmem:[%s3248_s1 + $0xe8] sm:$0xff] (!%p138_p2)  }
   0xb   : > { %v2593_v14 = vld [vmem:[%s3248_s1 + $0x18] sm:$0xff] (!%p138_p2)   ;;  %v2597_v18 = vld [vmem:[%s3248_s1 + $0x20] sm:$0xff] (!%p138_p2)   ;;  %v2601_v22 = vld [vmem:[%s3248_s1 + $0x28] sm:$0xff] (!%p138_p2)  }
   0xc   : > { %2361 = vmatpush3.bf16.msra.mxu0 (!%p138_p2), %v2585_v6  ;;  %v2594_v15 = vld [vmem:[%s3248_s1 + $0x98] sm:$0xff] (!%p138_p2)   ;;  %v2598_v19 = vld [vmem:[%s3248_s1 + $0xa0] sm:$0xff] (!%p138_p2)   ;;  %v2602_v23 = vld [vmem:[%s3248_s1 + $0xa8] sm:$0xff] (!%p138_p2)  }
   0xd   : > { %2401 = vmatpush3.bf16.msra.mxu1 %v2586_v7  ;;  %2362 = vmatprep.subr.bf16.mxu0 %v2587_v8  ;;  %s3256_s13 = smov (!%p161_p3, %s2111_s13), 1  ;;  %v2603_v24 = vld [vmem:[%s3248_s1 + $0x70] sm:$0xff]   ;;  %v2607_v28 = vld [vmem:[%s3248_s1 + $0x78] sm:$0xff]   ;;  %vm2853_vm4 = vmor %vm367_vm0, %vm368_vm1 }
   0xe   : > { %2402 = vmatprep.subr.bf16.mxu1 %v2588_v9  ;;  %v2604_v25 = vld [vmem:[%s3248_s1 + $0xf0] sm:$0xff]   ;;  %s2570_s16 = smul.u32 80, %s3256_s13  ;;  %v2608_v29 = vld [vmem:[%s3248_s1 + $0xf8] sm:$0xff]   ;;  %vm2859_vm5 = vmor %vm204_vm2, %vm205_vm3 }
   0xf   : > { %v2605_v26 = vld [vmem:[%s3248_s1 + $0x30] sm:$0xff]   ;;  %v2609_v30 = vld [vmem:[%s3248_s1 + $0x38] sm:$0xff]   ;;  %v2617_v61 = vld [vmem:[%s3248_s1 + $0x140] sm:$0xff]  }
  0x10   : > { %2363 = vmatpush3.bf16.msra.mxu0 %v2589_v10  ;;  %v2606_v27 = vld [vmem:[%s3248_s1 + $0xb0] sm:$0xff]   ;;  %s2833_s27 = scalar_lea.vmem %s3247_s0, %s2570_s16  ;;  %v2610_v31 = vld [vmem:[%s3248_s1 + $0xb8] sm:$0xff]   ;;  %v2618_v1 = vld [vmem:[%s3248_s1 + $0x1c0] sm:$0xff]   ;;  %s2334_s16 = sshll.u32 %s3256_s13, 5 }
  0x11   : > { %2403 = vmatpush3.bf16.msra.mxu1 %v2590_v11  ;;  %2364 = vmatprep.subr.bf16.mxu0 %v2591_v12  ;;  %v172_v32 = vld [vmem:[%s2833_s27] sm:$0xf]  ;;  %v173_v33 = vld [vmem:[%s2833_s27 + $0x8] sm:$0xf]  ;;  %v189_v35 = vld [vmem:[%s2833_s27 + $0x4] sm:$0x1]  ;;  %s170_s19 = scalar_lea.vmem %s3250_s3, %s2334_s16 }
  0x12   : > { %2404 = vmatprep.subr.bf16.mxu1 %v2592_v13  ;;  %v188_v34 = vld [vmem:[%s2833_s27] sm:$0xf]  ;;  %180 = vst [vmem:[#allocation2] sm:$0xf] %v172_v32  ;;  %181 = vst [vmem:[#allocation2 + $0x24] sm:$0xf] %v173_v33 }
  0x13   : > { %v190_v36 = vld [vmem:[%s2833_s27 + $0x8] sm:$0xf]  ;;  %v191_v37 = vld [vmem:[%s2833_s27 + $0xc] sm:$0x1]  ;;  %v208_v38 = vshrl.u32 %v188_v34, 16  ;;  %v211_v39 = vshll.u32 %v188_v34, 16 }
  0x14   : > { %2365 = vmatpush3.bf16.msra.mxu0 %v2593_v14  ;;  %v217_v40 = vshll.u32 %v189_v35, 16  ;;  %v222_v41 = vshrl.u32 %v190_v36, 16  ;;  %v225_v42 = vshll.u32 %v190_v36, 16  ;;  %v231_v43 = vshll.u32 %v191_v37, 16  ;;  %v335_v44 = vld [vmem:[%s2833_s27] sm:$0xe] }
  0x15   : > { %2405 = vmatpush3.bf16.msra.mxu1 %v2594_v15  ;;  %2366 = vmatprep.subr.bf16.mxu0 %v2595_v16  ;;  %v210_v45 = vrot.slane %v208_v38, 4  ;;  %v213_v46 = vrot.slane %v211_v39, 5  ;;  %v336_v47 = vld [vmem:[%s2833_s27 + $0x4] sm:$0x1]  ;;  %v337_v48 = vld [vmem:[%s2833_s27 + $0x8] sm:$0xe] }
  0x16   : > { %2406 = vmatprep.subr.bf16.mxu1 %v2596_v17  ;;  %v219_v49 = vrot.slane %v217_v40, 5  ;;  %v224_v50 = vrot.slane %v222_v41, 4  ;;  %v227_v51 = vrot.slane %v225_v42, 5  ;;  %v233_v52 = vrot.slane %v231_v43, 5  ;;  %v338_v53 = vld [vmem:[%s2833_s27 + $0xc] sm:$0x1] }
  0x17   : > { %v214_v56 = vor.u32 %v213_v46, %v210_v45  ;;  %v2119_v57 = vrot.slane %v335_v44, 9  ;;  %v372_v58 = vrot.slane %v336_v47, 5  ;;  %v2120_v59 = vrot.slane %v337_v48, 9  ;;  %v2127_v60 = vld [vmem:[%s2833_s27 + $0x8] sm:$0xf]  ;;  %v2620_v8 = vld [vmem:[%s3248_s1 + $0x180] sm:$0xff]  }
  0x18   : > { %2367 = vmatpush3.bf16.msra.mxu0 %v2597_v18  ;;  %v228_v62 = vor.u32 %v227_v51, %v224_v50  ;;  %v376_v63 = vrot.slane %v338_v53, 5  ;;  %v2128_v0 = vld [vmem:[%s2833_s27 + $0x10] sm:$0xf]  ;;  %427 = vst [vmem:[#allocation2 + $0xc] sm:$0xf] %v2127_v60  ;;  %v2622_v12 = vld [vmem:[%s3248_s1 + $0x1c8] sm:$0xff]  }
  0x19   : > { %2407 = vmatpush3.bf16.msra.mxu1 %v2598_v19  ;;  %2368 = vmatprep.subr.bf16.mxu0 %v2599_v20  ;;  %v215_v2 = vrot.slane %v214_v56, 4  ;;  %v373_v3 = vsel %vm2853_vm4, %v2119_v57, %v372_v58  ;;  %428 = vst [vmem:[#allocation2 + $0x30] sm:$0xf] %v2128_v0  ;;  %v174_v9 = vld [vmem:[%s2833_s27 + $0x10] sm:$0xf]  ;;  %v2619_v18 = vld [vmem:[%s3248_s1 + $0x100] sm:$0xff]  }
  0x1a   : > { %2408 = vmatprep.subr.bf16.mxu1 %v2600_v21  ;;  %v229_v4 = vrot.slane %v228_v62, 4  ;;  %v377_v5 = vsel %vm2853_vm4, %v2120_v59, %v376_v63  ;;  %410 = vst [vmem:[#allocation2 + $0x8] sm:$0xf] %v373_v3  ;;  %v175_v10 = vld [vmem:[%s2833_s27 + $0x18] sm:$0xf]  ;;  %v2621_v20 = vld [vmem:[%s3248_s1 + $0x148] sm:$0xff]  }
  0x1b   : > { %v220_v6 = vsel %vm2859_vm5, %v215_v2, %v219_v49  ;;  %411 = vst [vmem:[#allocation2 + $0x2c] sm:$0xf] %v377_v5  ;;  %v192_v11 = vld [vmem:[%s2833_s27 + $0x10] sm:$0xf]  ;;  %182 = vst [vmem:[#allocation2 + $0x48] sm:$0xf] %v174_v9 }
  0x1c   : > { %2369 = vmatpush3.bf16.msra.mxu0 %v2601_v22  ;;  %v234_v7 = vsel %vm2859_vm5, %v229_v4, %v233_v52  ;;  %327 = vst [vmem:[#allocation2 + $0x4] sm:$0xf] %v220_v6  ;;  %183 = vst [vmem:[#allocation2 + $0x6c] sm:$0xf] %v175_v10  ;;  %v193_v13 = vld [vmem:[%s2833_s27 + $0x14] sm:$0x1] }
  0x1d   : > { %2409 = vmatpush3.bf16.msra.mxu1 %v2602_v23  ;;  %2370 = vmatprep.subr.bf16.mxu0 %v2603_v24  ;;  %328 = vst [vmem:[#allocation2 + $0x28] sm:$0xf] %v234_v7  ;;  %v194_v14 = vld [vmem:[%s2833_s27 + $0x18] sm:$0xf]  ;;  %v236_v15 = vshrl.u32 %v192_v11, 16  ;;  %v239_v19 = vshll.u32 %v192_v11, 16 }
  0x1e   : > { %2410 = vmatprep.subr.bf16.mxu1 %v2604_v25  ;;  %v195_v21 = vld [vmem:[%s2833_s27 + $0x1c] sm:$0x1]  ;;  %v245_v23 = vshll.u32 %v193_v13, 16  ;;  %v250_v24 = vshrl.u32 %v194_v14, 16  ;;  %v2611_v25 = vld [vmem:[#allocation2] ss:$36 sps:$4 sm:$0xff]  }
  0x1f   : > { %v238_v22 = vrot.slane %v236_v15, 4  ;;  %v259_v32 = vshll.u32 %v195_v21, 16  ;;  %v339_v33 = vld [vmem:[%s2833_s27 + $0x10] sm:$0xe]  ;;  %v2623_v34 = vld [vmem:[%s3248_s1 + $0x108] sm:$0xff]   ;;  %v2634_v60 = vld [vmem:[%s3248_s1 + $0x158] sm:$0xff]  }
  0x20   : > { %2371 = vmatpush3.bf16.msra.mxu0 %v2605_v26  ;;  %v2616_v17 = vld [vmem:[#allocation2 + $0xc] ss:$36 sps:$4 sm:$0xff]   ;;  %v340_v36 = vld [vmem:[%s2833_s27 + $0x14] sm:$0x1]  ;;  %v341_v37 = vld [vmem:[%s2833_s27 + $0x18] sm:$0xe] }
  0x21   : > { %2411 = vmatpush3.bf16.msra.mxu1 %v2606_v27  ;;  %2372 = vmatprep.subr.bf16.mxu0 %v2607_v28  ;;  %v2624_v27 = vld [vmem:[%s3248_s1 + $0x188] sm:$0xff]   ;;  %v241_v28 = vrot.slane %v239_v19, 5  ;;  %v342_v38 = vld [vmem:[%s2833_s27 + $0x1c] sm:$0x1]  ;;  %v261_v40 = vrot.slane %v259_v32, 5  ;;  %v2121_v41 = vrot.slane %v339_v33, 9 }
  0x22   : > { %2412 = vmatprep.subr.bf16.mxu1 %v2608_v29  ;;  %v2614_v16 = vld [vmem:[#allocation2 + $0x8] ss:$36 sps:$4 sm:$0xff]   ;;  %1804 = vmatprep.mubr.bf16.mxu1 %v2616_v17  ;;  %v247_v29 = vrot.slane %v245_v23, 5  ;;  %v380_v42 = vrot.slane %v340_v36, 5  ;;  %v2129_v43 = vld [vmem:[%s2833_s27 + $0x18] sm:$0xf] }
  0x23   : > { %v242_v35 = vor.u32 %v241_v28, %v238_v22  ;;  %v2122_v45 = vrot.slane %v341_v37, 9  ;;  %v384_v46 = vrot.slane %v342_v38, 5  ;;  %v2130_v47 = vld [vmem:[%s2833_s27 + $0x20] sm:$0xf]  ;;  %429 = vst [vmem:[#allocation2 + $0x54] sm:$0xf] %v2129_v43 }
  0x24   : > { %2373 = vmatpush3.bf16.msra.mxu0 %v2609_v30  ;;  %v2613_v26 = vld [vmem:[#allocation2 + $0x4] ss:$36 sps:$4 sm:$0xff]   ;;  %v252_v30 = vrot.slane %v250_v24, 4  ;;  %v2630_v48 = vld [vmem:[%s3248_s1 + $0x150] sm:$0xff]   ;;  %v381_v50 = vsel %vm2853_vm4, %v2121_v41, %v380_v42  ;;  %430 = vst [vmem:[#allocation2 + $0x78] sm:$0xf] %v2130_v47 }
  0x25   : > { %2413 = vmatpush3.bf16.msra.mxu1 %v2610_v31  ;;  %2438 = vmatprep.subr.bf16.mxu0 %v2617_v61  ;;  %v253_v31 = vshll.u32 %v194_v14, 16  ;;  %v243_v44 = vrot.slane %v242_v35, 4  ;;  %v385_v52 = vsel %vm2853_vm4, %v2122_v45, %v384_v46  ;;  %412 = vst [vmem:[#allocation2 + $0x50] sm:$0xf] %v381_v50  ;;  %v2631_v53 = vld [vmem:[%s3248_s1 + $0x1d0] sm:$0xff]   ;;  %v2635_v61 = vld [vmem:[%s3248_s1 + $0x1d8] sm:$0xff]  }
  0x26   : > { %2478 = vmatprep.subr.bf16.mxu1 %v2618_v1  ;;  %1739 = vmatprep.mubr.bf16.mxu0 %v2613_v26  ;;  %413 = vst [vmem:[#allocation2 + $0x74] sm:$0xf] %v385_v52  ;;  %v2632_v57 = vld [vmem:[%s3248_s1 + $0x110] sm:$0xff]   ;;  %v2636_v62 = vld [vmem:[%s3248_s1 + $0x118] sm:$0xff]   ;;  %v176_v0 = vld [vmem:[%s2833_s27 + $0x20] sm:$0xf] }
  0x27   : > { %1740 = vmatmul.mubr.bf16.vlgmr.msra.gmra.mrb[0].mxu0 %v2611_v25  ;;  %v255_v39 = vrot.slane %v253_v31, 5  ;;  %v248_v51 = vsel %vm2859_vm5, %v243_v44, %v247_v29  ;;  %v2633_v58 = vld [vmem:[%s3248_s1 + $0x190] sm:$0xff]   ;;  %v2637_v63 = vld [vmem:[%s3248_s1 + $0x198] sm:$0xff]   ;;  %v177_v1 = vld [vmem:[%s2833_s27 + $0x28] sm:$0xf] }
  0x28   : > { %1805 = vmatmul.mubr.bf16.vlgmr.msra.gmra.mrb[0].mxu1 %v2614_v16  ;;  %2439 = vmatpush3.bf16.msra.mxu0 %v2619_v18  ;;  %329 = vst [vmem:[#allocation2 + $0x4c] sm:$0xf] %v248_v51  ;;  %184 = vst [vmem:[#allocation2 + $0x90] sm:$0xf] %v176_v0  ;;  %v196_v2 = vld [vmem:[%s2833_s27 + $0x20] sm:$0xf] }
  0x29   : > { %2479 = vmatpush3.bf16.msra.mxu1 %v2620_v8  ;;  %2440 = vmatprep.subr.bf16.mxu0 %v2621_v20  ;;  %v256_v49 = vor.u32 %v255_v39, %v252_v30  ;;  %185 = vst [vmem:[#allocation2 + $0xb4] sm:$0xf] %v177_v1  ;;  %v264_v5 = vshrl.u32 %v196_v2, 16  ;;  %v267_v6 = vshll.u32 %v196_v2, 16  ;;  %v197_v8 = vld [vmem:[%s2833_s27 + $0x24] sm:$0x1] }
  0x2a   : > { %2480 = vmatprep.subr.bf16.mxu1 %v2622_v12  ;;  %v198_v9 = vld [vmem:[%s2833_s27 + $0x28] sm:$0xf]  ;;  %v199_v10 = vld [vmem:[%s2833_s27 + $0x2c] sm:$0x1]  ;;  %v273_v13 = vshll.u32 %v197_v8, 16  ;;  %v2643_v19 = vld [vmem:[%s3248_s1 + $0x160] sm:$0xff]  }
  0x2b   : > { %v257_v56 = vrot.slane %v256_v49, 4  ;;  %v2627_v4 = vld [vmem:[#allocation2 + $0x54] ss:$36 sps:$4 sm:$0xff]   ;;  %v266_v11 = vrot.slane %v264_v5, 4  ;;  %v269_v12 = vrot.slane %v267_v6, 5  ;;  %v278_v14 = vshrl.u32 %v198_v9, 16 }
  0x2c   : > { %2441 = vmatpush3.bf16.msra.mxu0 %v2623_v34  ;;  %1812 = vmatprep.mubr.bf16.mxu1 %v2627_v4  ;;  %v281_v17 = vshll.u32 %v198_v9, 16  ;;  %v287_v18 = vshll.u32 %v199_v10, 16  ;;  %v275_v22 = vrot.slane %v273_v13, 5  ;;  %v343_v24 = vld [vmem:[%s2833_s27 + $0x20] sm:$0xe]  ;;  %v2647_v46 = vld [vmem:[%s3248_s1 + $0x168] sm:$0xff]  }
  0x2d   : > { %2481 = vmatpush3.bf16.msra.mxu1 %v2624_v27  ;;  %v262_v59 = vsel %vm2859_vm5, %v257_v56, %v261_v40  ;;  %2442 = vmatprep.subr.bf16.mxu0 %v2630_v48  ;;  %v2629_v7 = vld [vmem:[#allocation2 + $0x50] ss:$36 sps:$4 sm:$0xff]   ;;  %v270_v21 = vor.u32 %v269_v12, %v266_v11  ;;  %v280_v23 = vrot.slane %v278_v14, 4  ;;  %v344_v25 = vld [vmem:[%s2833_s27 + $0x24] sm:$0x1]  ;;  %v2123_v31 = vrot.slane %v343_v24, 9 }
  0x2e   : > { %2482 = vmatprep.subr.bf16.mxu1 %v2631_v53  ;;  %330 = vst [vmem:[#allocation2 + $0x70] sm:$0xf] %v262_v59  ;;  %v283_v26 = vrot.slane %v281_v17, 5  ;;  %v289_v27 = vrot.slane %v287_v18, 5  ;;  %v345_v28 = vld [vmem:[%s2833_s27 + $0x28] sm:$0xe] }
  0x2f   : > { %v910_v3 = vld [vmem:[#allocation2 + $0x48] sm:$0xff]  ;;  %v271_v30 = vrot.slane %v270_v21, 4  ;;  %v388_v32 = vrot.slane %v344_v25, 5  ;;  %v2124_v33 = vrot.slane %v345_v28, 9  ;;  %v2132_v37 = vld [vmem:[%s2833_s27 + $0x30] sm:$0xf] }
  0x30   : > { %2443 = vmatpush3.bf16.msra.mxu0 %v2632_v57  ;;  %1813 = vmatmul.mubr.bf16.gmra.mrb[4].mxu1 %v2629_v7  ;;  %v346_v29 = vld [vmem:[%s2833_s27 + $0x2c] sm:$0x1]  ;;  %v2131_v34 = vld [vmem:[%s2833_s27 + $0x28] sm:$0xf]  ;;  %v284_v35 = vor.u32 %v283_v26, %v280_v23  ;;  %v2644_v38 = vld [vmem:[%s3248_s1 + $0x1e0] sm:$0xff]  }
  0x31   : > { %2483 = vmatpush3.bf16.msra.mxu1 %v2633_v58  ;;  %2444 = vmatprep.subr.bf16.mxu0 %v2634_v60  ;;  %v392_v36 = vrot.slane %v346_v29, 5  ;;  %431 = vst [vmem:[#allocation2 + $0x9c] sm:$0xf] %v2131_v34  ;;  %v276_v39 = vsel %vm2859_vm5, %v271_v30, %v275_v22  ;;  %v389_v40 = vsel %vm2853_vm4, %v2123_v31, %v388_v32  ;;  %432 = vst [vmem:[#allocation2 + $0xc0] sm:$0xf] %v2132_v37  ;;  %v2645_v43 = vld [vmem:[%s3248_s1 + $0x120] sm:$0xff]  }
  0x32   : > { %2484 = vmatprep.subr.bf16.mxu1 %v2635_v61  ;;  %v285_v41 = vrot.slane %v284_v35, 4  ;;  %331 = vst [vmem:[#allocation2 + $0x94] sm:$0xf] %v276_v39  ;;  %414 = vst [vmem:[#allocation2 + $0x98] sm:$0xf] %v389_v40  ;;  %v2646_v44 = vld [vmem:[%s3248_s1 + $0x1a0] sm:$0xff]  }
  0x33   : > { %v393_v42 = vsel %vm2853_vm4, %v2124_v33, %v392_v36  ;;  %v2648_v47 = vld [vmem:[%s3248_s1 + $0x1e8] sm:$0xff]   ;;  %v178_v50 = vld [vmem:[%s2833_s27 + $0x30] sm:$0xf]  ;;  %v179_v51 = vld [vmem:[%s2833_s27 + $0x38] sm:$0xf] }
  0x34   : > { %2445 = vmatpush3.bf16.msra.mxu0 %v2636_v62  ;;  %415 = vst [vmem:[#allocation2 + $0xbc] sm:$0xf] %v393_v42  ;;  %v290_v45 = vsel %vm2859_vm5, %v285_v41, %v289_v27  ;;  %v2649_v48 = vld [vmem:[%s3248_s1 + $0x128] sm:$0xff]   ;;  %v200_v52 = vld [vmem:[%s2833_s27 + $0x30] sm:$0xf]  ;;  %v2660_v34 = vld [vmem:[%s3248_s1 + $0x178] sm:$0xff]  }
  0x35   : > { %2485 = vmatpush3.bf16.msra.mxu1 %v2637_v63  ;;  %v915_v15 = vld [vmem:[#allocation2 + $0x6c] sm:$0xff]  ;;  %2446 = vmatprep.subr.bf16.mxu0 %v2643_v19  ;;  %332 = vst [vmem:[#allocation2 + $0xb8] sm:$0xf] %v290_v45  ;;  %186 = vst [vmem:[#allocation2 + $0xd8] sm:$0xf] %v178_v50  ;;  %v292_v57 = vshrl.u32 %v200_v52, 16 }
  0x36   : > { %v2625_v16 = vld [vmem:[#allocation2 + $0x4c] ss:$36 sps:$4 sm:$0xff]   ;;  %v2233_v20 = vcombine.low %v910_v3, %v915_v15  ;;  %2486 = vmatprep.subr.bf16.mxu1 %v2644_v38  ;;  %187 = vst [vmem:[#allocation2 + $0xfc] sm:$0xf] %v179_v51  ;;  %v201_v56 = vld [vmem:[%s2833_s27 + $0x34] sm:$0x1] }
  0x37   : > { %1747 = vmatprep.mubr.bf16.mxu0 %v2625_v16  ;;  %v2650_v49 = vld [vmem:[%s3248_s1 + $0x1a8] sm:$0xff]   ;;  %v295_v58 = vshll.u32 %v200_v52, 16  ;;  %v301_v61 = vshll.u32 %v201_v56, 16  ;;  %v202_v62 = vld [vmem:[%s2833_s27 + $0x38] sm:$0xf]  ;;  %v294_v0 = vrot.slane %v292_v57, 4 }
  0x38   : > { %1748 = vmatmul.mubr.bf16.gmra.mrb[4].mxu0 %v2233_v20  ;;  %v2640_v59 = vld [vmem:[#allocation2 + $0x9c] ss:$36 sps:$4 sm:$0xff]   ;;  %v306_v5 = vshrl.u32 %v202_v62, 16  ;;  %v309_v6 = vshll.u32 %v202_v62, 16  ;;  %v347_v10 = vld [vmem:[%s2833_s27 + $0x30] sm:$0xe] }
  0x39   : > { %2447 = vmatpush3.bf16.msra.mxu0 %v2645_v43  ;;  %2487 = vmatpush3.bf16.msra.mxu1 %v2646_v44  ;;  %v920_v53 = vld [vmem:[#allocation2 + $0x90] sm:$0xff]  ;;  %v203_v63 = vld [vmem:[%s2833_s27 + $0x3c] sm:$0x1]  ;;  %v297_v1 = vrot.slane %v295_v58, 5  ;;  %v303_v4 = vrot.slane %v301_v61, 5  ;;  %v2125_v19 = vrot.slane %v347_v10, 9 }
  0x3a   : > { %2448 = vmatprep.subr.bf16.mxu0 %v2647_v46  ;;  %2488 = vmatprep.subr.bf16.mxu1 %v2648_v47  ;;  %v315_v9 = vshll.u32 %v203_v63, 16  ;;  %v348_v11 = vld [vmem:[%s2833_s27 + $0x34] sm:$0x1]  ;;  %v308_v13 = vrot.slane %v306_v5, 4  ;;  %v311_v14 = vrot.slane %v309_v6, 5  ;;  %v2661_v35 = vld [vmem:[%s3248_s1 + $0x1f8] sm:$0xff]  }
  0x3b   : > { %v2642_v60 = vld [vmem:[#allocation2 + $0x98] ss:$36 sps:$4 sm:$0xff]   ;;  %1820 = vmatprep.mubr.bf16.mxu1 %v2640_v59  ;;  %v298_v8 = vor.u32 %v297_v1, %v294_v0  ;;  %v2656_v12 = vld [vmem:[%s3248_s1 + $0x170] sm:$0xff]   ;;  %v396_v20 = vrot.slane %v348_v11, 5  ;;  %v2134_v25 = vld [vmem:[%s2833_s27 + $0x40] sm:$0xf] }
  0x3c   : > { %v925_v2 = vld [vmem:[#allocation2 + $0xb4] sm:$0xff]  ;;  %1821 = vmatmul.mubr.bf16.gmra.mrb[8].mxu1 %v2642_v60  ;;  %v350_v16 = vld [vmem:[%s2833_s27 + $0x3c] sm:$0x1]  ;;  %v317_v18 = vrot.slane %v315_v9, 5  ;;  %v312_v22 = vor.u32 %v311_v14, %v308_v13  ;;  %434 = vst [vmem:[#allocation2 + $0x108] sm:$0xf] %v2134_v25 }
  0x3d   : > { %2449 = vmatpush3.bf16.msra.mxu0 %v2649_v48  ;;  %2489 = vmatpush3.bf16.msra.mxu1 %v2650_v49  ;;  %v2638_v3 = vld [vmem:[#allocation2 + $0x94] ss:$36 sps:$4 sm:$0xff]   ;;  %v2242_v7 = vcombine.low %v920_v53, %v925_v2  ;;  %v299_v17 = vrot.slane %v298_v8, 4  ;;  %v400_v24 = vrot.slane %v350_v16, 5  ;;  %v397_v27 = vsel %vm2853_vm4, %v2125_v19, %v396_v20  ;;  %v2135_v38 = vld [vmem:[%s2833_s27 + $0x8] sm:$0xf] }
  0x3e   : > { %1755 = vmatprep.mubr.bf16.mxu0 %v2638_v3  ;;  %v349_v15 = vld [vmem:[%s2833_s27 + $0x38] sm:$0xe]  ;;  %2450 = vmatprep.subr.bf16.mxu0 %v2656_v12  ;;  %v313_v28 = vrot.slane %v312_v22, 4  ;;  %416 = vst [vmem:[#allocation2 + $0xe0] sm:$0xf] %v397_v27  ;;  %v2657_v30 = vld [vmem:[%s3248_s1 + $0x1f0] sm:$0xff]  }
  0x3f   : > { %v2133_v21 = vld [vmem:[%s2833_s27 + $0x38] sm:$0xf]  ;;  %v2126_v23 = vrot.slane %v349_v15, 9  ;;  %v304_v26 = vsel %vm2859_vm5, %v299_v17, %v303_v4  ;;  %v2658_v31 = vld [vmem:[%s3248_s1 + $0x130] sm:$0xff]   ;;  %2490 = vmatprep.subr.bf16.mxu1 %v2657_v30  ;;  %v2136_v39 = vld [vmem:[%s2833_s27 + $0xc] sm:$0x1] }
  0x40   : > { %1756 = vmatmul.mubr.bf16.gmra.mrb[8].mxu0 %v2242_v7  ;;  %433 = vst [vmem:[#allocation2 + $0xe4] sm:$0xf] %v2133_v21  ;;  %333 = vst [vmem:[#allocation2 + $0xdc] sm:$0xf] %v304_v26  ;;  %v318_v32 = vsel %vm2859_vm5, %v313_v28, %v317_v18  ;;  %v2659_v33 = vld [vmem:[%s3248_s1 + $0x1b0] sm:$0xff]   ;;  %v2662_v36 = vld [vmem:[%s3248_s1 + $0x138] sm:$0xff]  }
  0x41   : > { %v401_v29 = vsel %vm2853_vm4, %v2126_v23, %v400_v24  ;;  %334 = vst [vmem:[#allocation2 + $0x100] sm:$0xf] %v318_v32  ;;  %2451 = vmatpush3.bf16.msra.mxu0 %v2658_v31  ;;  %2491 = vmatpush3.bf16.msra.mxu1 %v2659_v33  ;;  %v2663_v37 = vld [vmem:[%s3248_s1 + $0x1b8] sm:$0xff]   ;;  %v2137_v41 = vld [vmem:[%s2833_s27 + $0x10] sm:$0xf]  ;;  %v452_v42 = vshrl.u32 %v2135_v38, 16 }
  0x42   : > { %417 = vst [vmem:[#allocation2 + $0x104] sm:$0xf] %v401_v29  ;;  %2452 = vmatprep.subr.bf16.mxu0 %v2660_v34  ;;  %2492 = vmatprep.subr.bf16.mxu1 %v2661_v35  ;;  %v455_v43 = vshll.u32 %v2135_v38, 16  ;;  %v461_v46 = vshll.u32 %v2136_v39, 16  ;;  %v2138_v47 = vld [vmem:[%s2833_s27 + $0x14] sm:$0x1] }
  0x43   : > { %v454_v48 = vrot.slane %v452_v42, 4  ;;  %v466_v50 = vshrl.u32 %v2137_v41, 16  ;;  %v469_v51 = vshll.u32 %v2137_v41, 16  ;;  %v475_v57 = vshll.u32 %v2138_v47, 16  ;;  %v3036_v58 = vld [vmem:[%s3248_s1 + $0x200] sm:$0xff]  }
  0x44   : > { %v457_v49 = vrot.slane %v455_v43, 5  ;;  %v463_v56 = vrot.slane %v461_v46, 5  ;;  %v2151_v63 = vld [vmem:[%s2833_s27 + $0x8] sm:$0xe]  ;;  %v2152_v0 = vld [vmem:[%s2833_s27 + $0xc] sm:$0x1] }
  0x45   : > { %2453 = vmatpush3.bf16.msra.mxu0 %v2662_v36  ;;  %2493 = vmatpush3.bf16.msra.mxu1 %v2663_v37  ;;  %v468_v61 = vrot.slane %v466_v50, 4  ;;  %v471_v62 = vrot.slane %v469_v51, 5  ;;  %v477_v1 = vrot.slane %v475_v57, 5  ;;  %v2153_v2 = vld [vmem:[%s2833_s27 + $0x10] sm:$0xe]  ;;  %v2167_v4 = vrot.slane %v2151_v63, 9 }
  0x46   : > { %v458_v60 = vor.u32 %v457_v49, %v454_v48  ;;  %v2154_v3 = vld [vmem:[%s2833_s27 + $0x14] sm:$0x1]  ;;  %2530 = vmatprep.subr.bf16.mxu0 %v3036_v58  ;;  %v613_v7 = vrot.slane %v2152_v0, 5  ;;  %v2168_v8 = vrot.slane %v2153_v2, 9  ;;  %v2175_v9 = vld [vmem:[%s2833_s27 + $0x10] sm:$0xf]  ;;  %2554 = vmatprep.subr.bf16.mxu1 %v3036_v58 }
  0x47   : > { %v930_v40 = vld [vmem:[#allocation2 + $0xd8] sm:$0xff]  ;;  %v2653_v44 = vld [vmem:[#allocation2 + $0xe4] ss:$36 sps:$4 sm:$0xff]   ;;  %v472_v6 = vor.u32 %v471_v62, %v468_v61  ;;  %v617_v10 = vrot.slane %v2154_v3, 5  ;;  %668 = vst [vmem:[#allocation2 + $0x18] sm:$0xf] %v2175_v9 }
  0x48   : > { %v935_v52 = vld [vmem:[#allocation2 + $0xfc] sm:$0xff]  ;;  %1828 = vmatprep.mubr.bf16.mxu1 %v2653_v44  ;;  %v459_v5 = vrot.slane %v458_v60, 4  ;;  %v2176_v11 = vld [vmem:[%s2833_s27 + $0x18] sm:$0xf]  ;;  %v2183_v12 = vld [vmem:[%s2833_s27 + $0x10] sm:$0xf]  ;;  %v614_v15 = vsel %vm2853_vm4, %v2167_v4, %v613_v7 }
  0x49   : > { %v2655_v45 = vld [vmem:[#allocation2 + $0xe0] ss:$36 sps:$4 sm:$0xff]   ;;  %v2251_v59 = vcombine.low %v930_v40, %v935_v52  ;;  %v473_v14 = vrot.slane %v472_v6, 4  ;;  %669 = vst [vmem:[#allocation2 + $0x3c] sm:$0xf] %v2176_v11  ;;  %v693_v18 = vshrl.u32 %v2183_v12, 16  ;;  %v618_v19 = vsel %vm2853_vm4, %v2168_v8, %v617_v10 }
  0x4a   : > { %v2651_v53 = vld [vmem:[#allocation2 + $0xdc] ss:$36 sps:$4 sm:$0xff]   ;;  %1829 = vmatmul.mubr.bf16.gmra.mrb[12].mxu1 %v2655_v45  ;;  %v464_v13 = vsel %vm2859_vm5, %v459_v5, %v463_v56  ;;  %v2184_v16 = vld [vmem:[%s2833_s27 + $0x14] sm:$0x1]  ;;  %v2185_v17 = vld [vmem:[%s2833_s27 + $0x18] sm:$0xf] }
  0x4b   : > { %1763 = vmatprep.mubr.bf16.mxu0 %v2651_v53  ;;  %571 = vst [vmem:[#allocation2 + $0x10] sm:$0xf] %v464_v13  ;;  %651 = vst [vmem:[#allocation2 + $0x14] sm:$0xf] %v614_v15  ;;  %v2186_v20 = vld [vmem:[%s2833_s27 + $0x1c] sm:$0x1]  ;;  %v478_v24 = vsel %vm2859_vm5, %v473_v14, %v477_v1 }
  0x4c   : > { %1764 = vmatmul.mubr.bf16.gmra.mrb[12].mxu0 %v2251_v59  ;;  %v696_v21 = vshll.u32 %v2183_v12, 16  ;;  %v702_v22 = vshll.u32 %v2184_v16, 16  ;;  %v707_v23 = vshrl.u32 %v2185_v17, 16  ;;  %652 = vst [vmem:[#allocation2 + $0x38] sm:$0xf] %v618_v19  ;;  %v695_v25 = vrot.slane %v693_v18, 4 }
  0x4d   : > { %v710_v26 = vshll.u32 %v2185_v17, 16  ;;  %v716_v27 = vshll.u32 %v2186_v20, 16  ;;  %572 = vst [vmem:[#allocation2 + $0x34] sm:$0xf] %v478_v24  ;;  %v2139_v34 = vld [vmem:[%s2833_s27 + $0x18] sm:$0xf] }
  0x4e   : > { %v698_v28 = vrot.slane %v696_v21, 5  ;;  %v704_v29 = vrot.slane %v702_v22, 5  ;;  %v709_v30 = vrot.slane %v707_v23, 4  ;;  %v2140_v35 = vld [vmem:[%s2833_s27 + $0x1c] sm:$0x1]  ;;  %v480_v39 = vshrl.u32 %v2139_v34, 16 }
  0x4f   : > { %v712_v31 = vrot.slane %v710_v26, 5  ;;  %v718_v32 = vrot.slane %v716_v27, 5  ;;  %v2141_v36 = vld [vmem:[%s2833_s27 + $0x20] sm:$0xf]  ;;  %v2142_v38 = vld [vmem:[%s2833_s27 + $0x24] sm:$0x1] }
  0x50   : > { %v699_v33 = vor.u32 %v698_v28, %v695_v25  ;;  %v483_v40 = vshll.u32 %v2139_v34, 16  ;;  %v489_v41 = vshll.u32 %v2140_v35, 16  ;;  %v494_v43 = vshrl.u32 %v2141_v36, 16  ;;  %v2155_v46 = vld [vmem:[%s2833_s27 + $0x18] sm:$0xe]  ;;  %v3068_v51 = vld [vmem:[%s3248_s1 + $0x208] sm:$0xff]  }
  0x51   : > { %v713_v37 = vor.u32 %v712_v31, %v709_v30  ;;  %v497_v44 = vshll.u32 %v2141_v36, 16  ;;  %v503_v45 = vshll.u32 %v2142_v38, 16  ;;  %v482_v48 = vrot.slane %v480_v39, 4  ;;  %v2156_v57 = vld [vmem:[%s2833_s27 + $0x1c] sm:$0x1]  ;;  %v3094_v22 = vld [vmem:[%s3248_s1 + $0x210] sm:$0xff]  }
  0x52   : > { %v700_v42 = vrot.slane %v699_v33, 4  ;;  %v485_v49 = vrot.slane %v483_v40, 5  ;;  %v491_v52 = vrot.slane %v489_v41, 5  ;;  %v496_v53 = vrot.slane %v494_v43, 4  ;;  %v2157_v2 = vld [vmem:[%s2833_s27 + $0x20] sm:$0xe] }
  0x53   : > { %v714_v47 = vrot.slane %v713_v37, 4  ;;  %v499_v56 = vrot.slane %v497_v44, 5  ;;  %v2666_v60 = vld [vmem:[#allocation2 + $0x14] ss:$36 sps:$4 sm:$0xff]   ;;  %v2169_v63 = vrot.slane %v2155_v46, 9  ;;  %v505_v1 = vrot.slane %v503_v45, 5 }
  0x54   : > { %v705_v50 = vsel %vm2859_vm5, %v700_v42, %v704_v29  ;;  %v2664_v59 = vld [vmem:[#allocation2 + $0x10] ss:$36 sps:$4 sm:$0xff]   ;;  %v486_v62 = vor.u32 %v485_v49, %v482_v48  ;;  %v2158_v3 = vld [vmem:[%s2833_s27 + $0x24] sm:$0x1]  ;;  %v621_v4 = vrot.slane %v2156_v57, 5  ;;  %1869 = vmatprep.mubr.bf16.mxu0 %v2666_v60  ;;  %v2170_v6 = vrot.slane %v2157_v2, 9 }
  0x55   : > { %v719_v61 = vsel %vm2859_vm5, %v714_v47, %v718_v32  ;;  %812 = vst [vmem:[#allocation2 + $0x1c] sm:$0xf] %v705_v50  ;;  %v500_v0 = vor.u32 %v499_v56, %v496_v53  ;;  %v625_v7 = vrot.slane %v2158_v3, 5  ;;  %v2177_v8 = vld [vmem:[%s2833_s27 + $0x20] sm:$0xf]  ;;  %1870 = vmatmul.mubr.bf16.vlgmr.msra.gmra.mrb[16].mxu0 %v2664_v59  ;;  %v3099_v29 = vld [vmem:[%s3248_s1 + $0x218] sm:$0xff]  }
  0x56   : > { %813 = vst [vmem:[#allocation2 + $0x40] sm:$0xf] %v719_v61  ;;  %v487_v5 = vrot.slane %v486_v62, 4  ;;  %v622_v10 = vsel %vm2853_vm4, %v2169_v63, %v621_v4  ;;  %v2178_v11 = vld [vmem:[%s2833_s27 + $0x28] sm:$0xf]  ;;  %2531 = vmatpush3.bf16.msra.mxu0 %v3036_v58 }
  0x57   : > { %v501_v9 = vrot.slane %v500_v0, 4  ;;  %670 = vst [vmem:[#allocation2 + $0x60] sm:$0xf] %v2177_v8  ;;  %v2187_v12 = vld [vmem:[%s2833_s27 + $0x20] sm:$0xf]  ;;  %v626_v14 = vsel %vm2853_vm4, %v2170_v6, %v625_v7  ;;  %2532 = vmatprep.subr.bf16.mxu0 %v3068_v51 }
  0x58   : > { %v492_v13 = vsel %vm2859_vm5, %v487_v5, %v491_v52  ;;  %653 = vst [vmem:[#allocation2 + $0x5c] sm:$0xf] %v622_v10  ;;  %671 = vst [vmem:[#allocation2 + $0x84] sm:$0xf] %v2178_v11  ;;  %v2188_v15 = vld [vmem:[%s2833_s27 + $0x24] sm:$0x1] }
  0x59   : > { %v2189_v16 = vld [vmem:[%s2833_s27 + $0x28] sm:$0xf]  ;;  %v2190_v17 = vld [vmem:[%s2833_s27 + $0x2c] sm:$0x1]  ;;  %v506_v18 = vsel %vm2859_vm5, %v501_v9, %v505_v1  ;;  %573 = vst [vmem:[#allocation2 + $0x58] sm:$0xf] %v492_v13 }
  0x5a   : > { %654 = vst [vmem:[#allocation2 + $0x80] sm:$0xf] %v626_v14  ;;  %v721_v19 = vshrl.u32 %v2187_v12, 16  ;;  %v724_v20 = vshll.u32 %v2187_v12, 16  ;;  %v730_v21 = vshll.u32 %v2188_v15, 16  ;;  %v735_v23 = vshrl.u32 %v2189_v16, 16  ;;  %2533 = vmatpush3.bf16.msra.mxu0 %v3068_v51 }
  0x5b   : > { %574 = vst [vmem:[#allocation2 + $0x7c] sm:$0xf] %v506_v18  ;;  %v738_v24 = vshll.u32 %v2189_v16, 16  ;;  %v744_v25 = vshll.u32 %v2190_v17, 16  ;;  %v2667_v30 = vld [vmem:[#allocation2 + $0x18] ss:$36 sps:$4 sm:$0xff]   ;;  %2534 = vmatprep.subr.bf16.mxu0 %v3094_v22 }
  0x5c   : > { %v723_v26 = vrot.slane %v721_v19, 4  ;;  %v726_v27 = vrot.slane %v724_v20, 5  ;;  %v732_v28 = vrot.slane %v730_v21, 5  ;;  %v737_v32 = vrot.slane %v735_v23, 4  ;;  %v2143_v36 = vld [vmem:[%s2833_s27 + $0x28] sm:$0xf] }
  0x5d   : > { %v2669_v31 = vld [vmem:[#allocation2 + $0x1c] ss:$36 sps:$4 sm:$0xff]   ;;  %v740_v34 = vrot.slane %v738_v24, 5  ;;  %v746_v35 = vrot.slane %v744_v25, 5  ;;  %v2144_v37 = vld [vmem:[%s2833_s27 + $0x2c] sm:$0x1] }
  0x5e   : > { %v727_v33 = vor.u32 %v726_v27, %v723_v26  ;;  %1934 = vmatprep.mubr.bf16.mxu1 %v2669_v31  ;;  %v2145_v38 = vld [vmem:[%s2833_s27 + $0x30] sm:$0xf]  ;;  %v2146_v39 = vld [vmem:[%s2833_s27 + $0x34] sm:$0x1]  ;;  %v508_v42 = vshrl.u32 %v2143_v36, 16  ;;  %v511_v43 = vshll.u32 %v2143_v36, 16  ;;  %2535 = vmatpush3.bf16.msra.mxu0 %v3094_v22 }
  0x5f   : > { %1935 = vmatmul.mubr.bf16.vlgmr.msra.gmra.mrb[16].mxu1 %v2667_v30  ;;  %v741_v41 = vor.u32 %v740_v34, %v737_v32  ;;  %v2159_v44 = vld [vmem:[%s2833_s27 + $0x28] sm:$0xe]  ;;  %v517_v46 = vshll.u32 %v2144_v37, 16  ;;  %v522_v47 = vshrl.u32 %v2145_v38, 16  ;;  %v525_v48 = vshll.u32 %v2145_v38, 16  ;;  %2536 = vmatprep.subr.bf16.mxu0 %v3099_v29  ;;  %v3118_v0 = vld [vmem:[%s3248_s1 + $0x220] sm:$0xff]  }
  0x60   : > { %v728_v40 = vrot.slane %v727_v33, 4  ;;  %2562 = vmatpush3.bf16.msra.mxu1 %v3036_v58  ;;  %v912_v45 = vld [vmem:[#allocation2 + $0x58] sm:$0xff]  ;;  %v531_v49 = vshll.u32 %v2146_v39, 16  ;;  %v510_v58 = vrot.slane %v508_v42, 4  ;;  %v513_v57 = vrot.slane %v511_v43, 5 }
  0x61   : > { %2555 = vmatprep.subr.bf16.mxu1 %v3068_v51  ;;  %v2672_v52 = vld [vmem:[#allocation2 + $0x5c] ss:$36 sps:$4 sm:$0xff]   ;;  %v742_v56 = vrot.slane %v741_v41, 4  ;;  %v519_v60 = vrot.slane %v517_v46, 5  ;;  %v524_v61 = vrot.slane %v522_v47, 4  ;;  %v527_v62 = vrot.slane %v525_v48, 5 }
  0x62   : > { %v917_v50 = vld [vmem:[#allocation2 + $0x7c] sm:$0xff]  ;;  %v733_v53 = vsel %vm2859_vm5, %v728_v40, %v732_v28  ;;  %v2160_v63 = vld [vmem:[%s2833_s27 + $0x2c] sm:$0x1]  ;;  %1877 = vmatprep.mubr.bf16.mxu0 %v2672_v52  ;;  %v514_v2 = vor.u32 %v513_v57, %v510_v58  ;;  %v533_v3 = vrot.slane %v531_v49, 5  ;;  %v2161_v4 = vld [vmem:[%s2833_s27 + $0x30] sm:$0xe]  ;;  %2537 = vmatpush3.bf16.msra.mxu0 %v3099_v29 }
  0x63   : > { %814 = vst [vmem:[#allocation2 + $0x64] sm:$0xf] %v733_v53  ;;  %v2237_v59 = vcombine.low %v912_v45, %v917_v50  ;;  %v747_v1 = vsel %vm2859_vm5, %v742_v56, %v746_v35  ;;  %v2162_v5 = vld [vmem:[%s2833_s27 + $0x34] sm:$0x1]  ;;  %v2171_v6 = vrot.slane %v2159_v44, 9  ;;  %v528_v7 = vor.u32 %v527_v62, %v524_v61  ;;  %2538 = vmatprep.subr.bf16.mxu0 %v3118_v0  ;;  %v3165_v49 = vld [vmem:[%s3248_s1 + $0x238] sm:$0xff]  }
  0x64   : > { %2563 = vmatpush3.bf16.msra.mxu1 %v3068_v51  ;;  %815 = vst [vmem:[#allocation2 + $0x88] sm:$0xf] %v747_v1  ;;  %v629_v8 = vrot.slane %v2160_v63, 5  ;;  %v2172_v9 = vrot.slane %v2161_v4, 9  ;;  %v633_v10 = vrot.slane %v2162_v5, 5  ;;  %v515_v12 = vrot.slane %v514_v2, 4 }
  0x65   : > { %1878 = vmatmul.mubr.bf16.gmra.mrb[20].mxu0 %v2237_v59  ;;  %v2179_v11 = vld [vmem:[%s2833_s27 + $0x30] sm:$0xf]  ;;  %2556 = vmatprep.subr.bf16.mxu1 %v3094_v22  ;;  %v2180_v13 = vld [vmem:[%s2833_s27 + $0x38] sm:$0xf]  ;;  %v3133_v51 = vld [vmem:[%s3248_s1 + $0x228] sm:$0xff]   ;;  %v529_v15 = vrot.slane %v528_v7, 4 }
  0x66   : > { %672 = vst [vmem:[#allocation2 + $0xa8] sm:$0xf] %v2179_v11  ;;  %v2191_v14 = vld [vmem:[%s2833_s27 + $0x30] sm:$0xf]  ;;  %v630_v16 = vsel %vm2853_vm4, %v2171_v6, %v629_v8  ;;  %v634_v17 = vsel %vm2853_vm4, %v2172_v9, %v633_v10  ;;  %673 = vst [vmem:[#allocation2 + $0xcc] sm:$0xf] %v2180_v13  ;;  %v520_v21 = vsel %vm2859_vm5, %v515_v12, %v519_v60  ;;  %2539 = vmatpush3.bf16.msra.mxu0 %v3118_v0 }
  0x67   : > { %v2192_v18 = vld [vmem:[%s2833_s27 + $0x34] sm:$0x1]  ;;  %v2193_v19 = vld [vmem:[%s2833_s27 + $0x38] sm:$0xf]  ;;  %v749_v20 = vshrl.u32 %v2191_v14, 16  ;;  %v752_v24 = vshll.u32 %v2191_v14, 16  ;;  %v534_v27 = vsel %vm2859_vm5, %v529_v15, %v533_v3  ;;  %2540 = vmatprep.subr.bf16.mxu0 %v3133_v51 }
  0x68   : > { %655 = vst [vmem:[#allocation2 + $0xa4] sm:$0xf] %v630_v16  ;;  %656 = vst [vmem:[#allocation2 + $0xc8] sm:$0xf] %v634_v17  ;;  %v2194_v23 = vld [vmem:[%s2833_s27 + $0x3c] sm:$0x1]  ;;  %2564 = vmatpush3.bf16.msra.mxu1 %v3094_v22 }
  0x69   : > { %v758_v25 = vshll.u32 %v2192_v18, 16  ;;  %v763_v26 = vshrl.u32 %v2193_v19, 16  ;;  %575 = vst [vmem:[#allocation2 + $0xa0] sm:$0xf] %v520_v21  ;;  %v751_v28 = vrot.slane %v749_v20, 4  ;;  %v766_v30 = vshll.u32 %v2193_v19, 16  ;;  %2557 = vmatprep.subr.bf16.mxu1 %v3099_v29 }
  0x6a   : > { %v772_v31 = vshll.u32 %v2194_v23, 16  ;;  %576 = vst [vmem:[#allocation2 + $0xc4] sm:$0xf] %v534_v27  ;;  %v754_v32 = vrot.slane %v752_v24, 5  ;;  %v3153_v22 = vld [vmem:[%s3248_s1 + $0x230] sm:$0xff]   ;;  %2541 = vmatpush3.bf16.msra.mxu0 %v3133_v51 }
  0x6b   : > { %v765_v33 = vrot.slane %v763_v26, 4  ;;  %v760_v34 = vrot.slane %v758_v25, 5  ;;  %v768_v35 = vrot.slane %v766_v30, 5  ;;  %v2674_v36 = vld [vmem:[#allocation2 + $0x64] ss:$36 sps:$4 sm:$0xff]   ;;  %2542 = vmatprep.subr.bf16.mxu0 %v3153_v22 }
  0x6c   : > { %v2676_v37 = vld [vmem:[#allocation2 + $0x60] ss:$36 sps:$4 sm:$0xff]   ;;  %v755_v38 = vor.u32 %v754_v32, %v751_v28  ;;  %v774_v39 = vrot.slane %v772_v31, 5  ;;  %2565 = vmatpush3.bf16.msra.mxu1 %v3099_v29  ;;  %v2147_v41 = vld [vmem:[%s2833_s27 + $0x38] sm:$0xf]  ;;  %1942 = vmatprep.mubr.bf16.mxu1 %v2674_v36 }
  0x6d   : > { %v769_v40 = vor.u32 %v768_v35, %v765_v33  ;;  %v2148_v42 = vld [vmem:[%s2833_s27 + $0x3c] sm:$0x1]  ;;  %v2149_v43 = vld [vmem:[%s2833_s27 + $0x40] sm:$0xf]  ;;  %2558 = vmatprep.subr.bf16.mxu1 %v3118_v0  ;;  %v2150_v45 = vld [vmem:[%s2833_s27 + $0x44] sm:$0x1]  ;;  %1943 = vmatmul.mubr.bf16.gmra.mrb[20].mxu1 %v2676_v37 }
  0x6e   : > { %v756_v44 = vrot.slane %v755_v38, 4  ;;  %v536_v46 = vshrl.u32 %v2147_v41, 16  ;;  %v539_v47 = vshll.u32 %v2147_v41, 16  ;;  %v545_v48 = vshll.u32 %v2148_v42, 16  ;;  %v2163_v56 = vld [vmem:[%s2833_s27 + $0x38] sm:$0xe]  ;;  %2543 = vmatpush3.bf16.msra.mxu0 %v3153_v22 }
  0x6f   : > { %v770_v29 = vrot.slane %v769_v40, 4  ;;  %v550_v50 = vshrl.u32 %v2149_v43, 16  ;;  %v553_v52 = vshll.u32 %v2149_v43, 16  ;;  %v559_v53 = vshll.u32 %v2150_v45, 16  ;;  %v2164_v62 = vld [vmem:[%s2833_s27 + $0x3c] sm:$0x1]  ;;  %2544 = vmatprep.subr.bf16.mxu0 %v3165_v49 }
  0x70   : > { %v922_v58 = vld [vmem:[#allocation2 + $0xa0] sm:$0xff]  ;;  %v761_v57 = vsel %vm2859_vm5, %v756_v44, %v760_v34  ;;  %v538_v59 = vrot.slane %v536_v46, 4  ;;  %v541_v60 = vrot.slane %v539_v47, 5  ;;  %v547_v61 = vrot.slane %v545_v48, 5  ;;  %2566 = vmatpush3.bf16.msra.mxu1 %v3118_v0  ;;  %v2182_v15 = vld [vmem:[%s2833_s27 + $0x48] sm:$0xf] }
  0x71   : > { %v927_v63 = vld [vmem:[#allocation2 + $0xc4] sm:$0xff]  ;;  %v775_v2 = vsel %vm2859_vm5, %v770_v29, %v774_v39  ;;  %816 = vst [vmem:[#allocation2 + $0xac] sm:$0xf] %v761_v57  ;;  %v552_v3 = vrot.slane %v550_v50, 4  ;;  %v555_v4 = vrot.slane %v553_v52, 5  ;;  %v561_v5 = vrot.slane %v559_v53, 5  ;;  %2559 = vmatprep.subr.bf16.mxu1 %v3133_v51 }
  0x72   : > { %v2679_v1 = vld [vmem:[#allocation2 + $0xa4] ss:$36 sps:$4 sm:$0xff]   ;;  %817 = vst [vmem:[#allocation2 + $0xd0] sm:$0xf] %v775_v2  ;;  %v2246_v6 = vcombine.low %v922_v58, %v927_v63  ;;  %v542_v7 = vor.u32 %v541_v60, %v538_v59  ;;  %v2165_v8 = vld [vmem:[%s2833_s27 + $0x40] sm:$0xe]  ;;  %2545 = vmatpush3.bf16.msra.mxu0 %v3165_v49 }
  0x73   : > { %v2166_v9 = vld [vmem:[%s2833_s27 + $0x44] sm:$0x1]  ;;  %v2173_v10 = vrot.slane %v2163_v56, 9  ;;  %v637_v11 = vrot.slane %v2164_v62, 5  ;;  %1885 = vmatprep.mubr.bf16.mxu0 %v2679_v1  ;;  %v556_v12 = vor.u32 %v555_v4, %v552_v3  ;;  %v2174_v13 = vrot.slane %v2165_v8, 9 }
  0x74   : > { %v641_v0 = vrot.slane %v2166_v9, 5  ;;  %v2181_v14 = vld [vmem:[%s2833_s27 + $0x40] sm:$0xf]  ;;  %1886 = vmatmul.mubr.bf16.gmra.mrb[24].mxu0 %v2246_v6  ;;  %v543_v16 = vrot.slane %v542_v7, 4  ;;  %675 = vst [vmem:[#allocation2 + $0x114] sm:$0xf] %v2182_v15  ;;  %2567 = vmatpush3.bf16.msra.mxu1 %v3133_v51 }
  0x75   : > { %v638_v17 = vsel %vm2853_vm4, %v2173_v10, %v637_v11  ;;  %674 = vst [vmem:[#allocation2 + $0xf0] sm:$0xf] %v2181_v14  ;;  %v2195_v18 = vld [vmem:[%s2833_s27 + $0x40] sm:$0xf]  ;;  %v2196_v19 = vld [vmem:[%s2833_s27 + $0x44] sm:$0x1]  ;;  %2560 = vmatprep.subr.bf16.mxu1 %v3153_v22 }
  0x76   : > { %v557_v20 = vrot.slane %v556_v12, 4  ;;  %v642_v21 = vsel %vm2853_vm4, %v2174_v13, %v641_v0  ;;  %657 = vst [vmem:[#allocation2 + $0xec] sm:$0xf] %v638_v17  ;;  %v2197_v23 = vld [vmem:[%s2833_s27 + $0x48] sm:$0xf]  ;;  %v777_v25 = vshrl.u32 %v2195_v18, 16  ;;  %v548_v26 = vsel %vm2859_vm5, %v543_v16, %v547_v61 }
  0x77   : > { %v2198_v24 = vld [vmem:[%s2833_s27 + $0x4c] sm:$0x1]  ;;  %658 = vst [vmem:[#allocation2 + $0x110] sm:$0xf] %v642_v21  ;;  %v780_v27 = vshll.u32 %v2195_v18, 16  ;;  %v786_v28 = vshll.u32 %v2196_v19, 16 }
  0x78   : > { %v791_v30 = vshrl.u32 %v2197_v23, 16  ;;  %v562_v51 = vsel %vm2859_vm5, %v557_v20, %v561_v5  ;;  %577 = vst [vmem:[#allocation2 + $0xe8] sm:$0xf] %v548_v26  ;;  %v779_v31 = vrot.slane %v777_v25, 4  ;;  %v794_v32 = vshll.u32 %v2197_v23, 16  ;;  %2568 = vmatpush3.bf16.msra.mxu1 %v3153_v22 }
  0x79   : > { %v800_v33 = vshll.u32 %v2198_v24, 16  ;;  %578 = vst [vmem:[#allocation2 + $0x10c] sm:$0xf] %v562_v51  ;;  %v782_v34 = vrot.slane %v780_v27, 5  ;;  %v2681_v36 = vld [vmem:[#allocation2 + $0xac] ss:$36 sps:$4 sm:$0xff]   ;;  %2561 = vmatprep.subr.bf16.mxu1 %v3165_v49 }
  0x7a   : > { %v793_v35 = vrot.slane %v791_v30, 4  ;;  %v2683_v37 = vld [vmem:[#allocation2 + $0xa8] ss:$36 sps:$4 sm:$0xff]   ;;  %v796_v38 = vrot.slane %v794_v32, 5  ;;  %v788_v40 = vrot.slane %v786_v28, 5  ;;  %1950 = vmatprep.mubr.bf16.mxu1 %v2681_v36 }
  0x7b   : > { %v783_v39 = vor.u32 %v782_v34, %v779_v31  ;;  %v802_v41 = vrot.slane %v800_v33, 5  ;;  %v2199_v42 = vld [vmem:[%s2833_s27 + $0x10] sm:$0xe]  ;;  %v2200_v44 = vld [vmem:[%s2833_s27 + $0x14] sm:$0x1]  ;;  %1951 = vmatmul.mubr.bf16.gmra.mrb[24].mxu1 %v2683_v37 }
  0x7c   : > { %v797_v43 = vor.u32 %v796_v38, %v793_v35  ;;  %v2201_v45 = vld [vmem:[%s2833_s27 + $0x18] sm:$0xe]  ;;  %v2202_v46 = vld [vmem:[%s2833_s27 + $0x1c] sm:$0x1]  ;;  %v2215_v48 = vrot.slane %v2199_v42, 9  ;;  %v854_v29 = vrot.slane %v2200_v44, 5  ;;  %2569 = vmatpush3.bf16.msra.mxu1 %v3165_v49 }
  0x7d   : > { %v784_v47 = vrot.slane %v783_v39, 4  ;;  %v2216_v22 = vrot.slane %v2201_v45, 9  ;;  %v2207_v50 = vld [vmem:[%s2833_s27 + $0x30] sm:$0xe]  ;;  %v858_v53 = vrot.slane %v2202_v46, 5 }
  0x7e   : > { %v798_v52 = vrot.slane %v797_v43, 4  ;;  %v2208_v56 = vld [vmem:[%s2833_s27 + $0x34] sm:$0x1]  ;;  %v2209_v58 = vld [vmem:[%s2833_s27 + $0x38] sm:$0xe]  ;;  %v855_v60 = vsel %vm2853_vm4, %v2215_v48, %v854_v29  ;;  %v2219_v62 = vrot.slane %v2207_v50, 9 }
  0x7f   : > { %v932_v57 = vld [vmem:[#allocation2 + $0xe8] sm:$0xff]  ;;  %v789_v59 = vsel %vm2859_vm5, %v784_v47, %v788_v40  ;;  %v2210_v61 = vld [vmem:[%s2833_s27 + $0x3c] sm:$0x1]  ;;  %v870_v63 = vrot.slane %v2208_v56, 5  ;;  %v859_v3 = vsel %vm2853_vm4, %v2216_v22, %v858_v53  ;;  %892 = vst [vmem:[#allocation2 + $0x20] sm:$0xf] %v855_v60 }
  0x80   : > { %v937_v1 = vld [vmem:[#allocation2 + $0x10c] sm:$0xff]  ;;  %v803_v49 = vsel %vm2859_vm5, %v798_v52, %v802_v41  ;;  %818 = vst [vmem:[#allocation2 + $0xf4] sm:$0xf] %v789_v59  ;;  %v2220_v4 = vrot.slane %v2209_v58, 9  ;;  %v874_v5 = vrot.slane %v2210_v61, 5 }
  0x81   : > { %v2686_v2 = vld [vmem:[#allocation2 + $0xec] ss:$36 sps:$4 sm:$0xff]   ;;  %819 = vst [vmem:[#allocation2 + $0x118] sm:$0xf] %v803_v49  ;;  %v2255_v6 = vcombine.low %v932_v57, %v937_v1  ;;  %893 = vst [vmem:[#allocation2 + $0x44] sm:$0xf] %v859_v3  ;;  %v871_v7 = vsel %vm2853_vm4, %v2219_v62, %v870_v63 }
  0x82   : > { %v2203_v8 = vld [vmem:[%s2833_s27 + $0x20] sm:$0xe]  ;;  %v2204_v55 = vld [vmem:[%s2833_s27 + $0x24] sm:$0x1]  ;;  %v2205_v9 = vld [vmem:[%s2833_s27 + $0x28] sm:$0xe]  ;;  %1893 = vmatprep.mubr.bf16.mxu0 %v2686_v2  ;;  %v875_v10 = vsel %vm2853_vm4, %v2220_v4, %v874_v5 }
  0x83   : > { %896 = vst [vmem:[#allocation2 + $0xb0] sm:$0xf] %v871_v7  ;;  %v2206_v11 = vld [vmem:[%s2833_s27 + $0x2c] sm:$0x1]  ;;  %v2217_v12 = vrot.slane %v2203_v8, 9  ;;  %v862_v13 = vrot.slane %v2204_v55, 5  ;;  %1894 = vmatmul.mubr.bf16.gmra.mrb[28].mxu0 %v2255_v6 }
  0x84   : > { %v2218_v0 = vrot.slane %v2205_v9, 9  ;;  %897 = vst [vmem:[#allocation2 + $0xd4] sm:$0xf] %v875_v10  ;;  %v866_v14 = vrot.slane %v2206_v11, 5  ;;  %v2211_v15 = vld [vmem:[%s2833_s27 + $0x40] sm:$0xe] }
  0x85   : > { %v2212_v16 = vld [vmem:[%s2833_s27 + $0x44] sm:$0x1]  ;;  %v863_v17 = vsel %vm2853_vm4, %v2217_v12, %v862_v13  ;;  %v2213_v18 = vld [vmem:[%s2833_s27 + $0x48] sm:$0xe]  ;;  %v2214_v19 = vld [vmem:[%s2833_s27 + $0x4c] sm:$0x1] }
  0x86   : > { %v2221_v20 = vrot.slane %v2211_v15, 9  ;;  %v878_v21 = vrot.slane %v2212_v16, 5  ;;  %v867_v23 = vsel %vm2853_vm4, %v2218_v0, %v866_v14  ;;  %894 = vst [vmem:[#allocation2 + $0x68] sm:$0xf] %v863_v17  ;;  %v2222_v24 = vrot.slane %v2213_v18, 9 }
  0x87   : > { %v882_v25 = vrot.slane %v2214_v19, 5  ;;  %895 = vst [vmem:[#allocation2 + $0x8c] sm:$0xf] %v867_v23  ;;  %v2690_v30 = vld [vmem:[#allocation2 + $0xf0] ss:$36 sps:$4 sm:$0xff]  }
  0x88   : > { %v879_v26 = vsel %vm2853_vm4, %v2221_v20, %v878_v21  ;;  %v2688_v28 = vld [vmem:[#allocation2 + $0xf4] ss:$36 sps:$4 sm:$0xff]   ;;  %v2693_v51 = vld [vmem:[#allocation2 + $0x20] ss:$36 sps:$4 sm:$0xff]  }
  0x89   : > { %v883_v27 = vsel %vm2853_vm4, %v2222_v24, %v882_v25  ;;  %898 = vst [vmem:[#allocation2 + $0xf8] sm:$0xf] %v879_v26  ;;  %1958 = vmatprep.mubr.bf16.mxu1 %v2688_v28  ;;  %2546 = vmatprep.mubr.bf16.mxu0 %v2693_v51  ;;  %v2223_v38 = vld [vmem:[%s3249_s2] ss:$0 sm:$0xff] }
  0x8a   : > { %899 = vst [vmem:[#allocation2 + $0x11c] sm:$0xf] %v883_v27  ;;  %1959 = vmatmul.mubr.bf16.gmra.mrb[28].mxu1 %v2690_v30 }
  0x8b   : > { %v2694_v31 = vld [vmem:[#allocation2 + $0xb0] ss:$36 sps:$4 sm:$0xff]  }
  0x8c   : > { %2550 = vmatprep.mubr.bf16.mxu1 %v2694_v31 }
  0x8e   : > { %v2695_v32 = vld [vmem:[#allocation2 + $0x68] ss:$36 sps:$4 sm:$0xff]  }
  0x8f   : > { %2547 = vmatmul.mubr.bf16.vlgmr.msra.gmra.mrb[32].mxu0 %v2695_v32 }
  0x91   : > { %v2696_v33 = vld [vmem:[#allocation2 + $0xf8] ss:$36 sps:$4 sm:$0xff]  }
  0x92   : > { %2551 = vmatmul.mubr.bf16.vlgmr.msra.gmra.mrb[32].mxu1 %v2696_v33 }
  0xfa   : > { %v2374_v36 = vpop.f32.mrb[0].mxu0 }
  0xfb   : > { %v2414_v34 = vpop.f32.mrb[0].mxu1  ;;  %v2375_v39 = vpop.f32.mrb[1].mxu0 }
  0xfc   : > { %v2415_v35 = vpop.f32.mrb[1].mxu1  ;;  %v2376_v41 = vadd.f32 %v2375_v39, %v2374_v36  ;;  %v2377_v42 = vpop.f32.mrb[2].mxu0 }
  0xfd   : > { %v2416_v37 = vadd.f32 %v2415_v35, %v2414_v34  ;;  %v2417_v54 = vpop.f32.mrb[2].mxu1  ;;  %v2378_v44 = vpop.f32.mrb[3].mxu0 }
  0xfe   : > { %v2418_v40 = vpop.f32.mrb[3].mxu1  ;;  %v1742_v45 = vadd.f32 %v2376_v41, %v2223_v38  ;;  %v2379_v46 = vadd.f32 %v2378_v44, %v2377_v42 }
  0xff   : > { %v2419_v43 = vadd.f32 %v2418_v40, %v2417_v54 }
 0x100   : > { %v1807_v47 = vadd.f32 %v2416_v37, %v1742_v45  ;;  %v1745_v48 = vadd.f32 %v2379_v46, %v2223_v38 }
 0x102   : > { %v1810_v29 = vadd.f32 %v2419_v43, %v1745_v48 }
 0x103   : > { %v2420_v22 = vpop.f32.mrb[4].mxu1 }
 0x104   : > { %v2421_v50 = vpop.f32.mrb[5].mxu1 }
 0x105   : > { %v2422_v52 = vadd.f32 %v2421_v50, %v2420_v22  ;;  %v2423_v53 = vpop.f32.mrb[6].mxu1 }
 0x106   : > { %v2424_v58 = vpop.f32.mrb[7].mxu1 }
 0x107   : > { %v2425_v59 = vadd.f32 %v2424_v58, %v2423_v53 }
 0x10b   : > { %v2380_v56 = vpop.f32.mrb[4].mxu0 }
 0x10c   : > { %v2381_v57 = vpop.f32.mrb[5].mxu0 }
 0x10d   : > { %v2382_v60 = vadd.f32 %v2381_v57, %v2380_v56  ;;  %v2383_v61 = vpop.f32.mrb[6].mxu0 }
 0x10e   : > { %v2384_v62 = vpop.f32.mrb[7].mxu0 }
 0x10f   : > { %v1750_v63 = vadd.f32 %v2382_v60, %v2223_v38  ;;  %v2385_v1 = vadd.f32 %v2384_v62, %v2383_v61  ;;  %v2426_v4 = vpop.f32.mrb[8].mxu1 }
 0x110   : > { %v2427_v5 = vpop.f32.mrb[9].mxu1 }
 0x111   : > { %v1815_v2 = vadd.f32 %v2422_v52, %v1750_v63  ;;  %v1753_v49 = vadd.f32 %v2385_v1, %v2223_v38  ;;  %v2428_v7 = vadd.f32 %v2427_v5, %v2426_v4  ;;  %v2429_v8 = vpop.f32.mrb[10].mxu1 }
 0x112   : > { %v2430_v9 = vpop.f32.mrb[11].mxu1 }
 0x113   : > { %v1818_v3 = vadd.f32 %v2425_v59, %v1753_v49  ;;  %v2386_v6 = vpop.f32.mrb[8].mxu0  ;;  %v2431_v12 = vadd.f32 %v2430_v9, %v2429_v8 }
 0x114   : > { %v2387_v55 = vpop.f32.mrb[9].mxu0 }
 0x115   : > { %v2388_v10 = vadd.f32 %v2387_v55, %v2386_v6  ;;  %v2389_v11 = vpop.f32.mrb[10].mxu0 }
 0x116   : > { %v2390_v13 = vpop.f32.mrb[11].mxu0 }
 0x117   : > { %v1758_v0 = vadd.f32 %v2388_v10, %v2223_v38  ;;  %v2391_v14 = vadd.f32 %v2390_v13, %v2389_v11 }
 0x119   : > { %v1823_v15 = vadd.f32 %v2428_v7, %v1758_v0  ;;  %v1761_v16 = vadd.f32 %v2391_v14, %v2223_v38 }
 0x11b   : > { %v1826_v17 = vadd.f32 %v2431_v12, %v1761_v16 }
 0x11d   : > { %v2432_v18 = vpop.f32.mrb[12].mxu1 }
 0x11e   : > { %v2433_v19 = vpop.f32.mrb[13].mxu1 }
 0x11f   : > { %v2392_v20 = vpop.f32.mrb[12].mxu0  ;;  %v2434_v21 = vadd.f32 %v2433_v19, %v2432_v18  ;;  %v2435_v23 = vpop.f32.mrb[14].mxu1 }
 0x120   : > { %v2393_v24 = vpop.f32.mrb[13].mxu0  ;;  %v2436_v25 = vpop.f32.mrb[15].mxu1 }
 0x121   : > { %v2394_v26 = vadd.f32 %v2393_v24, %v2392_v20  ;;  %v2395_v27 = vpop.f32.mrb[14].mxu0  ;;  %v2437_v28 = vadd.f32 %v2436_v25, %v2435_v23 }
 0x122   : > { %v2396_v30 = vpop.f32.mrb[15].mxu0 }
 0x123   : > { %v1766_v51 = vadd.f32 %v2394_v26, %v2223_v38  ;;  %v2397_v31 = vadd.f32 %v2396_v30, %v2395_v27 }
 0x125   : > { %v1831_v32 = vadd.f32 %v2434_v21, %v1766_v51  ;;  %v1769_v33 = vadd.f32 %v2397_v31, %v2223_v38 }
 0x127   : > { %v1834_v34 = vadd.f32 %v2437_v28, %v1769_v33 }
 0x128   : > { %v2454_v35 = vpop.f32.mrb[16].mxu0 }
 0x129   : > { %v2455_v36 = vpop.f32.mrb[17].mxu0 }
 0x12a   : > { %v2456_v37 = vadd.f32 %v2455_v36, %v2454_v35  ;;  %v2457_v54 = vpop.f32.mrb[18].mxu0 }
 0x12b   : > { %v2458_v39 = vpop.f32.mrb[19].mxu0 }
 0x12c   : > { %v1872_v40 = vadd.f32 %v2456_v37, %v1807_v47  ;;  %v2459_v41 = vadd.f32 %v2458_v39, %v2457_v54 }
 0x12e   : > { %v1875_v42 = vadd.f32 %v2459_v41, %v1810_v29 }
 0x132   : > { %v2494_v43 = vpop.f32.mrb[16].mxu1 }
 0x133   : > { %v2495_v44 = vpop.f32.mrb[17].mxu1 }
 0x134   : > { %v2496_v45 = vadd.f32 %v2495_v44, %v2494_v43  ;;  %v2497_v46 = vpop.f32.mrb[18].mxu1 }
 0x135   : > { %v2498_v48 = vpop.f32.mrb[19].mxu1 }
 0x136   : > { %v2499_v22 = vadd.f32 %v2498_v48, %v2497_v46  ;;  %v1937_v50 = vadd.f32 %v2496_v45, %v1872_v40 }
 0x138   : > { %v2460_v52 = vpop.f32.mrb[20].mxu0  ;;  %v1940_v56 = vadd.f32 %v2499_v22, %v1875_v42 }
 0x139   : > { %v2461_v53 = vpop.f32.mrb[21].mxu0 }
 0x13a   : > { %v2462_v38 = vadd.f32 %v2461_v53, %v2460_v52  ;;  %v2463_v58 = vpop.f32.mrb[22].mxu0 }
 0x13b   : > { %v2464_v57 = vpop.f32.mrb[23].mxu0 }
 0x13c   : > { %v1880_v59 = vadd.f32 %v2462_v38, %v1815_v2  ;;  %v2465_v60 = vadd.f32 %v2464_v57, %v2463_v58 }
 0x13e   : > { %v1883_v61 = vadd.f32 %v2465_v60, %v1818_v3 }
 0x140   : > { %v2500_v62 = vpop.f32.mrb[20].mxu1 }
 0x141   : > { %v2501_v47 = vpop.f32.mrb[21].mxu1 }
 0x142   : > { %v2502_v63 = vadd.f32 %v2501_v47, %v2500_v62  ;;  %v2503_v29 = vpop.f32.mrb[22].mxu1 }
 0x143   : > { %v2504_v1 = vpop.f32.mrb[23].mxu1 }
 0x144   : > { %v2505_v49 = vadd.f32 %v2504_v1, %v2503_v29  ;;  %v1945_v4 = vadd.f32 %v2502_v63, %v1880_v59 }
 0x146   : > { %v1948_v7 = vadd.f32 %v2505_v49, %v1883_v61 }
 0x147   : > { %v2466_v5 = vpop.f32.mrb[24].mxu0 }
 0x148   : > { %v2467_v6 = vpop.f32.mrb[25].mxu0 }
 0x149   : > { %v2468_v8 = vadd.f32 %v2467_v6, %v2466_v5  ;;  %v2469_v55 = vpop.f32.mrb[26].mxu0 }
 0x14a   : > { %v2470_v9 = vpop.f32.mrb[27].mxu0 }
 0x14b   : > { %v1888_v10 = vadd.f32 %v2468_v8, %v1823_v15  ;;  %v2471_v11 = vadd.f32 %v2470_v9, %v2469_v55 }
 0x14d   : > { %v1891_v12 = vadd.f32 %v2471_v11, %v1826_v17 }
 0x14e   : > { %v2506_v13 = vpop.f32.mrb[24].mxu1 }
 0x14f   : > { %v2507_v2 = vpop.f32.mrb[25].mxu1 }
 0x150   : > { %v2508_v0 = vadd.f32 %v2507_v2, %v2506_v13  ;;  %v2509_v3 = vpop.f32.mrb[26].mxu1 }
 0x151   : > { %v2510_v14 = vpop.f32.mrb[27].mxu1 }
 0x152   : > { %v2511_v16 = vadd.f32 %v2510_v14, %v2509_v3  ;;  %v1953_v18 = vadd.f32 %v2508_v0, %v1888_v10 }
 0x154   : > { %v1956_v20 = vadd.f32 %v2511_v16, %v1891_v12 }
 0x156   : > { %v2472_v19 = vpop.f32.mrb[28].mxu0 }
 0x157   : > { %v2473_v21 = vpop.f32.mrb[29].mxu0 }
 0x158   : > { %v2474_v23 = vadd.f32 %v2473_v21, %v2472_v19  ;;  %v2475_v24 = vpop.f32.mrb[30].mxu0 }
 0x159   : > { %v2476_v25 = vpop.f32.mrb[31].mxu0 }
 0x15a   : > { %v1896_v26 = vadd.f32 %v2474_v23, %v1831_v32  ;;  %v2477_v27 = vadd.f32 %v2476_v25, %v2475_v24 }
 0x15c   : > { %v1899_v28 = vadd.f32 %v2477_v27, %v1834_v34 }
 0x15d   : > { %v2512_v15 = vpop.f32.mrb[28].mxu1 }
 0x15e   : > { %v2513_v30 = vpop.f32.mrb[29].mxu1 }
 0x15f   : > { %v2514_v17 = vadd.f32 %v2513_v30, %v2512_v15  ;;  %v2515_v51 = vpop.f32.mrb[30].mxu1 }
 0x160   : > { %v2516_v31 = vpop.f32.mrb[31].mxu1 }
 0x161   : > { %v2517_v33 = vadd.f32 %v2516_v31, %v2515_v51  ;;  %v1961_v36 = vadd.f32 %v2514_v17, %v1896_v26 }
 0x162   : > { %v2548_v35 = vpop.f32.mrb[32].mxu0 }
 0x163   : > { %v2010_v37 = vadd.f32 %v2548_v35, %v1945_v4  ;;  %v2001_v54 = vpop.f32.mrb[33].mxu0  ;;  %v1964_v41 = vadd.f32 %v2517_v33, %v1899_v28 }
 0x164   : > { %v2002_v39 = vadd.f32 %v2001_v54, %v1937_v50  ;;  %v2549_v40 = vpop.f32.mrb[34].mxu0 }
 0x165   : > { %v2013_v42 = vadd.f32 %v2549_v40, %v1948_v7  ;;  %v2004_v43 = vpop.f32.mrb[35].mxu0  ;;  %v2552_v32 = vpop.f32.mrb[32].mxu1  ;;  %v2034_v45 = vmax.f32 %v2010_v37, 0.0 }
 0x166   : > { %v2005_v44 = vadd.f32 %v2004_v43, %v1940_v56  ;;  %v2026_v34 = vadd.f32 %v2552_v32, %v1961_v36  ;;  %v2017_v46 = vpop.f32.mrb[33].mxu1  ;;  %v2032_v22 = vmax.f32 %v2002_v39, 0.0 }
 0x167   : > { %v2035_v48 = vmax.f32 %v2013_v42, 0.0  ;;  %v2018_v52 = vadd.f32 %v2017_v46, %v1953_v18  ;;  %v2553_v53 = vpop.f32.mrb[34].mxu1 }
 0x168   : > { %v2033_v38 = vmax.f32 %v2005_v44, 0.0  ;;  %v2029_v58 = vadd.f32 %v2553_v53, %v1964_v41  ;;  %v2020_v57 = vpop.f32.mrb[35].mxu1  ;;  %v2038_v61 = vmax.f32 %v2026_v34, 0.0 }
 0x169   : > { %v2343_v50 = vpack.c.bf16 %v2035_v48, %v2034_v45  ;;  %v2021_v60 = vadd.f32 %v2020_v57, %v1956_v20  ;;  %v2036_v62 = vmax.f32 %v2018_v52, 0.0 }
 0x16a   : > { %v2338_v59 = vpack.c.bf16 %v2033_v38, %v2032_v22  ;;  %v2039_v56 = vmax.f32 %v2029_v58, 0.0 }
 0x16b   : > { %2355 = vst [vmem:[%s170_s19 + $0x8] sm:$0xff] %v2343_v50   ;;  %v2037_v47 = vmax.f32 %v2021_v60, 0.0 }
 0x16c   : > { %2339 = vst [vmem:[%s170_s19] sm:$0xff] %v2338_v59   ;;  %v2353_v63 = vpack.c.bf16 %v2039_v56, %v2038_v61 }
 0x16d   : > { %v2348_v29 = vpack.c.bf16 %v2037_v47, %v2036_v62 }
 0x16e   : > { %2357 = vst [vmem:[%s170_s19 + $0x18] sm:$0xff] %v2353_v63  }
 0x16f   : > { %2356 = vst [vmem:[%s170_s19 + $0x10] sm:$0xff] %v2348_v29  }
 0x170 PF: > { %s13_s12 = sadd.s32 1, %s2703_s12  }
 0x171   : > { %p10_p4 = scmp.ge.s32.totalorder %s13_s12, 4  }
 0x173   :  { %12 = sbr.rel (!%p10_p4) target bundleno = 1 (0x1), region = 64 }

// kernel: clip_feature_extractor_forward.20
= control target key start
LH: loop header
LB: loop body
LE: loop exit
PB: predicated region body
PF: predicated region fallthrough
CT: control target
= control target key end

     0   :  { %s5979_s12 = smov 0   ;;  %s6945_s0 = inlined_call_operand.vmem [shape: bf16[2,18,18,128], index: 0, kind: input, shape index: {}]   ;;  %s6946_s1 = inlined_call_operand.vmem [shape: bf16[1152,128], index: 1, kind: input, shape index: {}]   ;;  %s6947_s2 = inlined_call_operand.vmem [shape: f32[1,128], index: 2, kind: input, shape index: {}]   ;;  %s6948_s3 = inlined_call_operand.vmem [shape: bf16[2,16,16,128], index: 3, kind: output, shape index: {}]  }
   0x1 LB: > { %s4355_s13 = sadd.s32 4294967295, %s5957_s12   ;;  %p4359_p0 = scmp.ge.s32.totalorder %s5957_s12, 1  ;;  %s5957_s12 = sphi %s5979_s12, %s13_s12  }
   0x2   : > { %p137_p1 = scmp.lt.s32.totalorder %s5957_s12, 3 }
   0x4   : > { %p138_p2 = pnand %p4359_p0, %p137_p1 }
   0x5   : > { %v5639_v0 = vld [vmem:[%s6946_s1 + $0x40] sm:$0xff] (!%p138_p2)   ;;  %v5641_v2 = vld [vmem:[%s6946_s1 + $0x48] sm:$0xff] (!%p138_p2)   ;;  %p161_p3 = scmp.lt.s32.totalorder (!%p138_p2), %s4355_s13, 1  ;;  %v5643_v4 = vld [vmem:[%s6946_s1 + $0x50] sm:$0xff] (!%p138_p2)   ;;  %vm492_vm0 = vsmask.f32 (!%p138_p2), 7424 }
   0x6   : > { %141 = sbr.rel (%p138_p2) target bundleno = 544 (0x220), region = 32  ;;  %v5640_v1 = vld [vmem:[%s6946_s1] sm:$0xff] (!%p138_p2)   ;;  %5094 = vmatprep.subr.bf16.mxu0 (!%p138_p2), %v5639_v0  ;;  %5614 = vmatprep.subr.bf16.mxu1 (!%p138_p2), %v5639_v0  ;;  %v5642_v3 = vld [vmem:[%s6946_s1 + $0x8] sm:$0xff] (!%p138_p2)   ;;  %v5644_v5 = vld [vmem:[%s6946_s1 + $0x10] sm:$0xff] (!%p138_p2)   ;;  %vm893_vm1 = vcmask (!%p138_p2), 1046528  }
   0x7   : > { %5095 = vmatpush3.bf16.msra.mxu0 (!%p138_p2), %v5640_v1  ;;  %5622 = vmatpush3.bf16.msra.mxu1 (!%p138_p2), %v5640_v1  ;;  %v5645_v6 = vld [vmem:[%s6946_s1 + $0x58] sm:$0xff] (!%p138_p2)   ;;  %v5647_v8 = vld [vmem:[%s6946_s1 + $0x60] sm:$0xff] (!%p138_p2)   ;;  %v5649_v10 = vld [vmem:[%s6946_s1 + $0x68] sm:$0xff] (!%p138_p2)  }
   0x8   : > { %5096 = vmatprep.subr.bf16.mxu0 (!%p138_p2), %v5641_v2  ;;  %5615 = vmatprep.subr.bf16.mxu1 (!%p138_p2), %v5641_v2  ;;  %v5646_v7 = vld [vmem:[%s6946_s1 + $0x18] sm:$0xff] (!%p138_p2)   ;;  %v5648_v9 = vld [vmem:[%s6946_s1 + $0x20] sm:$0xff] (!%p138_p2)   ;;  %v5650_v11 = vld [vmem:[%s6946_s1 + $0x28] sm:$0xff] (!%p138_p2)  }
   0x9   : > { %v5651_v18 = vld [vmem:[%s6946_s1 + $0x70] sm:$0xff] (!%p138_p2)   ;;  %v5653_v28 = vld [vmem:[%s6946_s1 + $0x78] sm:$0xff] (!%p138_p2)   ;;  %v5661_v34 = vld [vmem:[%s6946_s1 + $0xc0] sm:$0xff] (!%p138_p2)  }
   0xa   : > { %v5652_v25 = vld [vmem:[%s6946_s1 + $0x30] sm:$0xff] (!%p138_p2)   ;;  %v5654_v32 = vld [vmem:[%s6946_s1 + $0x38] sm:$0xff] (!%p138_p2)   ;;  %v5664_v37 = vld [vmem:[%s6946_s1 + $0x140] sm:$0xff] (!%p138_p2)  }
   0xb   : > { %5097 = vmatpush3.bf16.msra.mxu0 (!%p138_p2), %v5642_v3  ;;  %5623 = vmatpush3.bf16.msra.mxu1 (!%p138_p2), %v5642_v3  ;;  %v5662_v38 = vld [vmem:[%s6946_s1 + $0x80] sm:$0xff] (!%p138_p2)   ;;  %v5663_v41 = vld [vmem:[%s6946_s1 + $0xc8] sm:$0xff] (!%p138_p2)   ;;  %v5673_v59 = vld [vmem:[%s6946_s1 + $0xd0] sm:$0xff] (!%p138_p2)  }
   0xc   : > { %5098 = vmatprep.subr.bf16.mxu0 (!%p138_p2), %v5643_v4  ;;  %5616 = vmatprep.subr.bf16.mxu1 (!%p138_p2), %v5643_v4  ;;  %v5666_v39 = vld [vmem:[%s6946_s1 + $0x100] sm:$0xff] (!%p138_p2)   ;;  %v5665_v51 = vld [vmem:[%s6946_s1 + $0x88] sm:$0xff] (!%p138_p2)   ;;  %v5674_v63 = vld [vmem:[%s6946_s1 + $0x90] sm:$0xff] (!%p138_p2)  }
   0xd   : > { %s6950_s13 = smov (!%p161_p3, %s4355_s13), 1  ;;  %v5675_v0 = vld [vmem:[%s6946_s1 + $0xd8] sm:$0xff]  }
   0xe   : > { %s5630_s28 = smul.u32 216, %s6950_s13 }
   0xf   : > { %5099 = vmatpush3.bf16.msra.mxu0 %v5644_v5  ;;  %5624 = vmatpush3.bf16.msra.mxu1 %v5644_v5 }
  0x10   : > { %5100 = vmatprep.subr.bf16.mxu0 %v5645_v6  ;;  %5617 = vmatprep.subr.bf16.mxu1 %v5645_v6  ;;  %s6023_s10 = scalar_lea.vmem %s6945_s0, %s5630_s28 }
  0x11   : > { %v5655_v12 = vld [vmem:[%s6023_s10] sm:$0xff]   ;;  %v5656_v13 = vld [vmem:[%s6023_s10 + $0x8] ss:$0 sps:$4 sm:$0x11]   ;;  %v5657_v17 = vld [vmem:[%s6023_s10 + $0x90] sm:$0xff]  }
  0x12   : > { %v494_v14 = vshrl.u32 %v5655_v12, 16  ;;  %v496_v15 = vshll.u32 %v5655_v12, 16  ;;  %v501_v16 = vshll.u32 %v5656_v13, 16  ;;  %v5658_v19 = vld [vmem:[%s6023_s10 + $0x98] ss:$0 sps:$4 sm:$0x11]  }
  0x13   : > { %5101 = vmatpush3.bf16.msra.mxu0 %v5646_v7  ;;  %5625 = vmatpush3.bf16.msra.mxu1 %v5646_v7  ;;  %v638_v22 = vshrl.u32 %v5657_v17, 16  ;;  %v640_v23 = vshll.u32 %v5657_v17, 16  ;;  %v645_v24 = vshll.u32 %v5658_v19, 16  ;;  %v5659_v35 = vld [vmem:[%s6023_s10] sm:$0xff]   ;;  %v5660_v36 = vld [vmem:[%s6023_s10 + $0x90] sm:$0xff]   ;;  %v5677_v1 = vld [vmem:[%s6023_s10 + $0x18] sm:$0xff]  }
  0x14   : > { %5102 = vmatprep.subr.bf16.mxu0 %v5647_v8  ;;  %5618 = vmatprep.subr.bf16.mxu1 %v5647_v8  ;;  %v498_v20 = vrot.slane %v496_v15, 1  ;;  %v503_v21 = vrot.slane %v501_v16, 1  ;;  %v5667_v40 = vld [vmem:[%s6023_s10 + $0xc] sm:$0xff]   ;;  %v5668_v42 = vld [vmem:[%s6023_s10 + $0x14] ss:$0 sps:$4 sm:$0x11]  }
  0x15   : > { %v642_v27 = vrot.slane %v640_v23, 1  ;;  %v647_v29 = vrot.slane %v645_v24, 1  ;;  %v5669_v43 = vld [vmem:[%s6023_s10 + $0x9c] sm:$0xff]   ;;  %v506_v44 = vshrl.u32 %v5667_v40, 16  ;;  %v508_v45 = vshll.u32 %v5667_v40, 16  ;;  %v5671_v58 = vld [vmem:[%s6023_s10 + $0xc] sm:$0xff]  }
  0x16   : > { %v499_v26 = vor.u32 %v498_v20, %v494_v14  ;;  %v513_v46 = vshll.u32 %v5668_v42, 16  ;;  %v5670_v47 = vld [vmem:[%s6023_s10 + $0xa4] ss:$0 sps:$4 sm:$0x11]   ;;  %v650_v48 = vshrl.u32 %v5669_v43, 16  ;;  %v652_v49 = vshll.u32 %v5669_v43, 16 }
  0x17   : > { %5103 = vmatpush3.bf16.msra.mxu0 %v5648_v9  ;;  %5626 = vmatpush3.bf16.msra.mxu1 %v5648_v9  ;;  %v643_v31 = vor.u32 %v642_v27, %v638_v22  ;;  %v510_v50 = vrot.slane %v508_v45, 1  ;;  %v657_v54 = vshll.u32 %v5670_v47, 16  ;;  %v5672_v61 = vld [vmem:[%s6023_s10 + $0x9c] sm:$0xff]   ;;  %v518_v3 = vshrl.u32 %v5677_v1, 16  ;;  %v5679_v6 = vld [vmem:[%s6023_s10 + $0xa8] sm:$0xff]   ;;  %v5694_v42 = vld [vmem:[%s6023_s10 + $0xb4] sm:$0xff]  }
  0x18   : > { %5104 = vmatprep.subr.bf16.mxu0 %v5649_v10  ;;  %5619 = vmatprep.subr.bf16.mxu1 %v5649_v10  ;;  %v504_v30 = vsel %vm492_vm0, %v499_v26, %v503_v21  ;;  %v515_v52 = vrot.slane %v513_v46, 1  ;;  %v654_v53 = vrot.slane %v652_v49, 1  ;;  %v5678_v2 = vld [vmem:[%s6023_s10 + $0x20] ss:$0 sps:$4 sm:$0x11]   ;;  %v520_v4 = vshll.u32 %v5677_v1, 16 }
  0x19   : > { %3335 = vmatprep.mubr.bf16.mxu0 %v504_v30  ;;  %v648_v33 = vsel %vm492_vm0, %v643_v31, %v647_v29  ;;  %v511_v55 = vor.u32 %v510_v50, %v506_v44  ;;  %v659_v57 = vrot.slane %v657_v54, 1  ;;  %v525_v5 = vshll.u32 %v5678_v2, 16  ;;  %v5676_v7 = vld [vmem:[%s6946_s1 + $0x98] sm:$0xff]   ;;  %v5680_v8 = vld [vmem:[%s6023_s10 + $0xb0] ss:$0 sps:$4 sm:$0x11]  }
  0x1a   : > { %3431 = vmatprep.mubr.bf16.mxu1 %v648_v33  ;;  %v655_v56 = vor.u32 %v654_v53, %v650_v48  ;;  %v522_v9 = vrot.slane %v520_v4, 1  ;;  %v664_v12 = vshll.u32 %v5679_v6, 16  ;;  %v669_v13 = vshll.u32 %v5680_v8, 16  ;;  %v5681_v14 = vld [vmem:[%s6023_s10 + $0x18] sm:$0xff]   ;;  %v5682_v17 = vld [vmem:[%s6023_s10 + $0xa8] sm:$0xff]   ;;  %v5685_v23 = vld [vmem:[%s6946_s1 + $0xa0] sm:$0xff]  }
  0x1b   : > { %5105 = vmatpush3.bf16.msra.mxu0 %v5650_v11  ;;  %5627 = vmatpush3.bf16.msra.mxu1 %v5650_v11  ;;  %v516_v60 = vsel %vm492_vm0, %v511_v55, %v515_v52  ;;  %v527_v10 = vrot.slane %v525_v5, 1  ;;  %v662_v11 = vshrl.u32 %v5679_v6, 16  ;;  %v5684_v20 = vld [vmem:[%s6946_s1 + $0x148] sm:$0xff]   ;;  %v5691_v30 = vld [vmem:[%s6023_s10 + $0xb4] sm:$0xff]   ;;  %v5707_v1 = vld [vmem:[%s6946_s1 + $0x1c0] sm:$0xff]  }
  0x1c   : > { %5106 = vmatprep.subr.bf16.mxu0 %v5651_v18  ;;  %5620 = vmatprep.subr.bf16.mxu1 %v5651_v18  ;;  %v660_v62 = vsel %vm492_vm0, %v655_v56, %v659_v57  ;;  %v523_v15 = vor.u32 %v522_v9, %v518_v3  ;;  %v666_v16 = vrot.slane %v664_v12, 1  ;;  %v5683_v18 = vld [vmem:[%s6946_s1 + $0xe0] sm:$0xff]   ;;  %v671_v19 = vrot.slane %v669_v13, 1  ;;  %v5686_v24 = vld [vmem:[%s6946_s1 + $0x108] sm:$0xff]   ;;  %v5695_v46 = vld [vmem:[%s6946_s1 + $0xf0] sm:$0xff]  }
  0x1d   : > { %v5687_v26 = vld [vmem:[%s6946_s1 + $0xe8] sm:$0xff]   ;;  %v5696_v48 = vld [vmem:[%s6946_s1 + $0xb0] sm:$0xff]   ;;  %v5697_v50 = vld [vmem:[%s6946_s1 + $0xf8] sm:$0xff]  }
  0x1e   : > { %v528_v21 = vsel %vm492_vm0, %v523_v15, %v527_v10  ;;  %v667_v22 = vor.u32 %v666_v16, %v662_v11  ;;  %v5688_v27 = vld [vmem:[%s6946_s1 + $0xa8] sm:$0xff]   ;;  %v5699_v52 = vld [vmem:[%s6946_s1 + $0xb8] sm:$0xff]   ;;  %v5700_v53 = vld [vmem:[%s6946_s1 + $0x110] sm:$0xff]  }
  0x1f   : > { %5107 = vmatpush3.bf16.msra.mxu0 %v5652_v25  ;;  %5628 = vmatpush3.bf16.msra.mxu1 %v5652_v25  ;;  %v5690_v29 = vld [vmem:[%s6023_s10 + $0x2c] ss:$0 sps:$4 sm:$0x11]   ;;  %v5701_v54 = vld [vmem:[%s6023_s10 + $0x30] sm:$0xff]   ;;  %v5708_v4 = vld [vmem:[%s6946_s1 + $0x180] sm:$0xff]  }
  0x20   : > { %5108 = vmatprep.subr.bf16.mxu0 %v5653_v28  ;;  %5621 = vmatprep.subr.bf16.mxu1 %v5653_v28  ;;  %v672_v25 = vsel %vm492_vm0, %v667_v22, %v671_v19  ;;  %v5689_v28 = vld [vmem:[%s6023_s10 + $0x24] sm:$0xff]   ;;  %v537_v33 = vshll.u32 %v5690_v29, 16  ;;  %v5702_v55 = vld [vmem:[%s6023_s10 + $0x38] ss:$0 sps:$4 sm:$0x11]   ;;  %v5703_v56 = vld [vmem:[%s6023_s10 + $0xc] sm:$0xff]  }
  0x21   : > { %v530_v31 = vshrl.u32 %v5689_v28, 16  ;;  %v542_v57 = vshrl.u32 %v5701_v54, 16  ;;  %v5709_v6 = vld [vmem:[%s6023_s10 + $0x3c] sm:$0xff]   ;;  %v5710_v9 = vld [vmem:[%s6023_s10 + $0x44] ss:$0 sps:$4 sm:$0x11]  }
  0x22   : > { %v554_v10 = vshrl.u32 %v5709_v6, 16  ;;  %v556_v11 = vshll.u32 %v5709_v6, 16  ;;  %v5711_v12 = vld [vmem:[%s6023_s10 + $0x18] sm:$0xff]  }
  0x23   : > { %5109 = vmatpush3.bf16.msra.mxu0 %v5654_v32  ;;  %5629 = vmatpush3.bf16.msra.mxu1 %v5654_v32  ;;  %v532_v32 = vshll.u32 %v5689_v28, 16  ;;  %v5715_v15 = vld [vmem:[%s6946_s1 + $0x158] sm:$0xff]  }
  0x24   : > { %5206 = vmatprep.subr.bf16.mxu1 %v5661_v34  ;;  %5318 = vmatprep.subr.bf16.mxu0 %v5664_v37  ;;  %v5692_v34 = vld [vmem:[%s6023_s10 + $0xbc] ss:$0 sps:$4 sm:$0x11]   ;;  %v558_v13 = vrot.slane %v556_v11, 1 }
  0x25   : > { %v534_v37 = vrot.slane %v532_v32, 1  ;;  %v5712_v16 = vld [vmem:[%s6023_s10 + $0x3c] sm:$0xff]  }
  0x26   : > { %3336 = vmatmul.mubr.bf16.vlgmr.msra.gmra.mrb[0].mxu0 %v5659_v35  ;;  %3432 = vmatmul.mubr.bf16.vlgmr.msra.gmra.mrb[0].mxu1 %v5660_v36  ;;  %v674_v35 = vshrl.u32 %v5691_v30, 16  ;;  %v676_v36 = vshll.u32 %v5691_v30, 16  ;;  %v5716_v22 = vld [vmem:[%s6946_s1 + $0x118] sm:$0xff]   ;;  %v5719_v30 = vld [vmem:[%s6023_s10 + $0x24] sm:$0xff]  }
  0x27   : > { %5207 = vmatpush3.bf16.msra.mxu1 %v5662_v38  ;;  %5319 = vmatpush3.bf16.msra.mxu0 %v5666_v39  ;;  %v5693_v38 = vld [vmem:[%s6023_s10 + $0x24] sm:$0xff]   ;;  %v539_v39 = vrot.slane %v537_v33, 1  ;;  %v535_v43 = vor.u32 %v534_v37, %v530_v31 }
  0x28   : > { %5208 = vmatprep.subr.bf16.mxu1 %v5663_v41  ;;  %3343 = vmatprep.mubr.bf16.mxu0 %v516_v60  ;;  %v678_v40 = vrot.slane %v676_v36, 1  ;;  %v681_v41 = vshll.u32 %v5692_v34, 16  ;;  %v5723_v33 = vld [vmem:[%s6946_s1 + $0x1c8] sm:$0xff]  }
  0x29   : > { %3439 = vmatprep.mubr.bf16.mxu1 %v660_v62  ;;  %5320 = vmatprep.subr.bf16.mxu0 %v5684_v20  ;;  %v540_v47 = vsel %vm492_vm0, %v535_v43, %v539_v39  ;;  %v5704_v62 = vld [vmem:[%s6023_s10 + $0x30] sm:$0xff]   ;;  %v5720_v34 = vld [vmem:[%s6023_s10 + $0x48] sm:$0xff]   ;;  %v5725_v43 = vld [vmem:[%s6946_s1 + $0x160] sm:$0xff]  }
  0x2a   : > { %v679_v44 = vor.u32 %v678_v40, %v674_v35  ;;  %v683_v45 = vrot.slane %v681_v41, 1  ;;  %v5714_v20 = vld [vmem:[%s6023_s10 + $0x14] ss:$0 sps:$4 sm:$0x11]   ;;  %v5721_v35 = vld [vmem:[%s6023_s10 + $0x18] sm:$0xfe]  }
  0x2b   : > { %5209 = vmatpush3.bf16.msra.mxu1 %v5665_v51  ;;  %5321 = vmatpush3.bf16.msra.mxu0 %v5686_v24  ;;  %v5698_v51 = vld [vmem:[%s6946_s1 + $0x150] sm:$0xff]   ;;  %v898_v24 = vrot.slane %v5714_v20, 1  ;;  %v900_v39 = vrot.slane %v5721_v35, 1  ;;  %v5724_v40 = vld [vmem:[%s6946_s1 + $0x188] sm:$0xff]  }
  0x2c   : > { %5210 = vmatprep.subr.bf16.mxu1 %v5673_v59  ;;  %v684_v49 = vsel %vm492_vm0, %v679_v44, %v683_v45  ;;  %5322 = vmatprep.subr.bf16.mxu0 %v5698_v51  ;;  %v549_v59 = vshll.u32 %v5702_v55, 16  ;;  %v5726_v45 = vld [vmem:[%s6946_s1 + $0x120] sm:$0xff]   ;;  %v5745_v20 = vld [vmem:[%s6023_s10 + $0x48] sm:$0xff]  }
  0x2d   : > { %v5731_v55 = vld [vmem:[%s6023_s10 + $0x24] sm:$0xfe]  }
  0x2e   : > { %3344 = vmatmul.mubr.bf16.gmra.mrb[4].mxu0 %v5671_v58  ;;  %3440 = vmatmul.mubr.bf16.gmra.mrb[4].mxu1 %v5672_v61  ;;  %v544_v58 = vshll.u32 %v5701_v54, 16  ;;  %v551_v61 = vrot.slane %v549_v59, 1  ;;  %v5730_v54 = vld [vmem:[%s6023_s10 + $0x54] sm:$0xff]   ;;  %v903_v59 = vrot.slane %v5731_v55, 1 }
  0x2f   : > { %5211 = vmatpush3.bf16.msra.mxu1 %v5674_v63  ;;  %3351 = vmatprep.mubr.bf16.mxu0 %v528_v21  ;;  %v5705_v63 = vld [vmem:[%s6023_s10] sm:$0xfe]   ;;  %v5760_v55 = vld [vmem:[%s6023_s10 + $0x8c] ss:$0 sps:$4 sm:$0x11]  }
  0x30   : > { %5212 = vmatprep.subr.bf16.mxu1 %v5675_v0  ;;  %3447 = vmatprep.mubr.bf16.mxu1 %v672_v25  ;;  %v546_v60 = vrot.slane %v544_v58, 1  ;;  %v5706_v0 = vld [vmem:[%s6023_s10 + $0x8] ss:$0 sps:$4 sm:$0x11]   ;;  %v894_v3 = vrot.slane %v5705_v63, 1 }
  0x31   : > { %5323 = vmatpush3.bf16.msra.mxu0 %v5700_v53  ;;  %v895_v5 = vrot.slane %v5706_v0, 1  ;;  %v5717_v25 = vld [vmem:[%s6023_s10 + $0x48] sm:$0xff]  }
  0x32   : > { %v547_v2 = vor.u32 %v546_v60, %v542_v57  ;;  %5324 = vmatprep.subr.bf16.mxu0 %v5715_v15  ;;  %v566_v28 = vshrl.u32 %v5717_v25, 16  ;;  %v568_v29 = vshll.u32 %v5717_v25, 16  ;;  %v5733_v57 = vld [vmem:[%s6023_s10 + $0x60] sm:$0xff]   ;;  %v5741_v15 = vld [vmem:[%s6946_s1 + $0x128] sm:$0xff]  }
  0x33   : > { %5213 = vmatpush3.bf16.msra.mxu1 %v5676_v7  ;;  %v896_v8 = vsel %vm893_vm1, %v894_v3, %v895_v5  ;;  %v5735_v60 = vld [vmem:[%s6023_s10 + $0x3c] sm:$0xff]   ;;  %v590_v63 = vshrl.u32 %v5733_v57, 16  ;;  %v592_v0 = vshll.u32 %v5733_v57, 16  ;;  %v5739_v5 = vld [vmem:[%s6946_s1 + $0x168] sm:$0xff]  }
  0x34   : > { %5214 = vmatprep.subr.bf16.mxu1 %v5683_v18  ;;  %v552_v7 = vsel %vm492_vm0, %v547_v2, %v551_v61  ;;  %v559_v18 = vor.u32 %v558_v13, %v554_v10  ;;  %v570_v31 = vrot.slane %v568_v29, 1  ;;  %v5736_v10 = vld [vmem:[%s6023_s10 + $0x60] sm:$0xff]   ;;  %v5746_v25 = vld [vmem:[%s6023_s10 + $0x6c] sm:$0xff]  }
  0x35   : > { %5325 = vmatpush3.bf16.msra.mxu0 %v5716_v22  ;;  %v594_v3 = vrot.slane %v592_v0, 1  ;;  %v5748_v29 = vld [vmem:[%s6023_s10 + $0x44] ss:$0 sps:$4 sm:$0x11]  }
  0x36   : > { %3352 = vmatmul.mubr.bf16.gmra.mrb[8].mxu0 %v5681_v14  ;;  %3448 = vmatmul.mubr.bf16.gmra.mrb[8].mxu1 %v5682_v17  ;;  %v561_v14 = vshll.u32 %v5710_v9, 16  ;;  %v5713_v17 = vld [vmem:[%s6023_s10 + $0xc] sm:$0xfe]   ;;  %v571_v36 = vor.u32 %v570_v31, %v566_v28  ;;  %v5738_v9 = vld [vmem:[%s6023_s10 + $0x38] ss:$0 sps:$4 sm:$0x11]  }
  0x37   : > { %5215 = vmatpush3.bf16.msra.mxu1 %v5685_v23  ;;  %3359 = vmatprep.mubr.bf16.mxu0 %v540_v47  ;;  %v897_v21 = vrot.slane %v5713_v17, 1  ;;  %v5728_v47 = vld [vmem:[%s6023_s10 + $0x5c] ss:$0 sps:$4 sm:$0x11]   ;;  %v595_v6 = vor.u32 %v594_v3, %v590_v63  ;;  %v907_v13 = vrot.slane %v5738_v9, 1  ;;  %v5742_v17 = vld [vmem:[%s6946_s1 + $0x190] sm:$0xff]  }
  0x38   : > { %5216 = vmatprep.subr.bf16.mxu1 %v5687_v26  ;;  %3455 = vmatprep.mubr.bf16.mxu1 %v684_v49  ;;  %v563_v19 = vrot.slane %v561_v14, 1  ;;  %v585_v51 = vshll.u32 %v5728_v47, 16  ;;  %v5740_v14 = vld [vmem:[%s6946_s1 + $0x1d0] sm:$0xff]   ;;  %v5747_v28 = vld [vmem:[%s6023_s10 + $0x3c] sm:$0xfe]  }
  0x39   : > { %v899_v26 = vsel %vm893_vm1, %v897_v21, %v898_v24  ;;  %5326 = vmatprep.subr.bf16.mxu0 %v5725_v43  ;;  %v909_v31 = vrot.slane %v5747_v28, 1  ;;  %v5757_v43 = vld [vmem:[%s6946_s1 + $0x1d8] sm:$0xff]   ;;  %v5755_v47 = vld [vmem:[%s6023_s10 + $0x48] sm:$0xfe]  }
  0x3a   : > { %v564_v23 = vsel %vm492_vm0, %v559_v18, %v563_v19  ;;  %5327 = vmatpush3.bf16.msra.mxu0 %v5726_v45  ;;  %v587_v53 = vrot.slane %v585_v51, 1  ;;  %v5743_v18 = vld [vmem:[%s6023_s10 + $0x6c] sm:$0xff]   ;;  %v5744_v19 = vld [vmem:[%s6023_s10 + $0x74] ss:$0 sps:$4 sm:$0x11]   ;;  %v5777_v28 = vld [vmem:[%s6023_s10 + $0x78] sm:$0xff]  }
  0x3b   : > { %5217 = vmatpush3.bf16.msra.mxu1 %v5688_v27  ;;  %v5718_v27 = vld [vmem:[%s6023_s10 + $0x50] ss:$0 sps:$4 sm:$0x11]   ;;  %5328 = vmatprep.subr.bf16.mxu0 %v5739_v5  ;;  %v602_v21 = vshrl.u32 %v5743_v18, 16  ;;  %v604_v22 = vshll.u32 %v5743_v18, 16 }
  0x3c   : > { %5218 = vmatprep.subr.bf16.mxu1 %v5695_v46  ;;  %v573_v32 = vshll.u32 %v5718_v27, 16  ;;  %v5727_v46 = vld [vmem:[%s6023_s10 + $0x54] sm:$0xff]   ;;  %v5768_v9 = vld [vmem:[%s6023_s10 + $0xc] sm:$0xfe]  }
  0x3d   : > { %v578_v49 = vshrl.u32 %v5727_v46, 16  ;;  %v606_v24 = vrot.slane %v604_v22, 1 }
  0x3e   : > { %3360 = vmatmul.mubr.bf16.gmra.mrb[12].mxu0 %v5693_v38  ;;  %3456 = vmatmul.mubr.bf16.gmra.mrb[12].mxu1 %v5694_v42  ;;  %v575_v37 = vrot.slane %v573_v32, 1  ;;  %v5722_v38 = vld [vmem:[%s6023_s10 + $0x20] ss:$0 sps:$4 sm:$0x11]   ;;  %v910_v32 = vrot.slane %v5748_v29, 1 }
  0x3f   : > { %5219 = vmatpush3.bf16.msra.mxu1 %v5696_v48  ;;  %3496 = vmatprep.mubr.bf16.mxu1 %v5703_v56  ;;  %v901_v42 = vrot.slane %v5722_v38, 1  ;;  %v5729_v48 = vld [vmem:[%s6023_s10 + $0x30] sm:$0xff]   ;;  %v5732_v56 = vld [vmem:[%s6023_s10 + $0x2c] ss:$0 sps:$4 sm:$0x11]  }
  0x40   : > { %5220 = vmatprep.subr.bf16.mxu1 %v5697_v50  ;;  %3367 = vmatprep.mubr.bf16.mxu0 %v552_v7  ;;  %v576_v41 = vsel %vm492_vm0, %v571_v36, %v575_v37  ;;  %v580_v50 = vshll.u32 %v5727_v46, 16  ;;  %v904_v61 = vrot.slane %v5732_v56, 1  ;;  %v911_v36 = vsel %vm893_vm1, %v909_v31, %v910_v32  ;;  %v5752_v37 = vld [vmem:[%s6023_s10 + $0x80] ss:$0 sps:$4 sm:$0x11]  }
  0x41   : > { %v902_v44 = vsel %vm893_vm1, %v900_v39, %v901_v42  ;;  %5329 = vmatpush3.bf16.msra.mxu0 %v5741_v15  ;;  %v621_v42 = vshll.u32 %v5752_v37, 16  ;;  %v5770_v15 = vld [vmem:[%s6023_s10 + $0x60] sm:$0xfe]   ;;  %v5778_v32 = vld [vmem:[%s6023_s10 + $0x18] sm:$0xfe]  }
  0x42   : > { %v905_v2 = vsel %vm893_vm1, %v903_v59, %v904_v61  ;;  %v5765_v61 = vld [vmem:[%s6946_s1 + $0x178] sm:$0xff]   ;;  %v918_v18 = vrot.slane %v5770_v15, 1 }
  0x43   : > { %5221 = vmatpush3.bf16.msra.mxu1 %v5699_v52  ;;  %v582_v52 = vrot.slane %v580_v50, 1  ;;  %v623_v46 = vrot.slane %v621_v42, 1  ;;  %v912_v50 = vrot.slane %v5755_v47, 1  ;;  %v5784_v47 = vld [vmem:[%s6023_s10 + $0x84] sm:$0xff]  }
  0x44   : > { %5430 = vmatprep.subr.bf16.mxu1 %v5707_v1 }
  0x45   : > { %v583_v58 = vor.u32 %v582_v52, %v578_v49  ;;  %v5758_v52 = vld [vmem:[%s6946_s1 + $0x198] sm:$0xff]  }
  0x46   : > { %3368 = vmatmul.mubr.bf16.gmra.mrb[16].mxu0 %v5704_v62  ;;  %3497 = vmatmul.mubr.bf16.vlgmr.msra.gmra.mrb[16].mxu1 %v896_v8  ;;  %v5734_v62 = vld [vmem:[%s6023_s10 + $0x68] ss:$0 sps:$4 sm:$0x11]   ;;  %v5737_v8 = vld [vmem:[%s6023_s10 + $0x30] sm:$0xfe]  }
  0x47   : > { %5431 = vmatpush3.bf16.msra.mxu1 %v5708_v4  ;;  %3504 = vmatprep.mubr.bf16.mxu1 %v5711_v12  ;;  %v588_v1 = vsel %vm492_vm0, %v583_v58, %v587_v53  ;;  %v597_v4 = vshll.u32 %v5734_v62, 16  ;;  %v906_v12 = vrot.slane %v5737_v8, 1  ;;  %v5759_v53 = vld [vmem:[%s6023_s10 + $0x84] sm:$0xff]  }
  0x48   : > { %3375 = vmatprep.mubr.bf16.mxu0 %v564_v23  ;;  %5432 = vmatprep.subr.bf16.mxu1 %v5723_v33  ;;  %v609_v23 = vshll.u32 %v5744_v19, 16  ;;  %v5750_v33 = vld [vmem:[%s6946_s1 + $0x130] sm:$0xff]   ;;  %v626_v56 = vshrl.u32 %v5759_v53, 16  ;;  %v628_v57 = vshll.u32 %v5759_v53, 16  ;;  %v5761_v58 = vld [vmem:[%s6023_s10 + $0x60] sm:$0xff]  }
  0x49   : > { %v599_v7 = vrot.slane %v597_v4, 1  ;;  %v5762_v62 = vld [vmem:[%s6023_s10 + $0x84] sm:$0xff]  }
  0x4a   : > { %v611_v27 = vrot.slane %v609_v23, 1  ;;  %v630_v59 = vrot.slane %v628_v57, 1  ;;  %v5775_v23 = vld [vmem:[%s6946_s1 + $0x1a0] sm:$0xff]  }
  0x4b   : > { %5433 = vmatpush3.bf16.msra.mxu1 %v5724_v40  ;;  %v600_v11 = vsel %vm492_vm0, %v595_v6, %v599_v7  ;;  %v5753_v40 = vld [vmem:[%s6023_s10 + $0x54] sm:$0xff]   ;;  %v5767_v7 = vld [vmem:[%s6023_s10 + $0x6c] sm:$0xff]  }
  0x4c   : > { %5434 = vmatprep.subr.bf16.mxu1 %v5740_v14  ;;  %v631_v63 = vor.u32 %v630_v59, %v626_v56  ;;  %v5766_v6 = vld [vmem:[%s6946_s1 + $0x138] sm:$0xff]  }
  0x4e   : > { %3376 = vmatmul.mubr.bf16.gmra.mrb[20].mxu0 %v5712_v16  ;;  %3505 = vmatmul.mubr.bf16.gmra.mrb[20].mxu1 %v899_v26  ;;  %v908_v16 = vsel %vm893_vm1, %v906_v12, %v907_v13  ;;  %v5749_v26 = vld [vmem:[%s6946_s1 + $0x170] sm:$0xff]   ;;  %v1695_v12 = vrot.slane %v5768_v9, 1  ;;  %v5774_v13 = vld [vmem:[%s6946_s1 + $0x1e0] sm:$0xff]  }
  0x4f   : > { %3512 = vmatprep.mubr.bf16.mxu1 %v5719_v30  ;;  %3383 = vmatprep.mubr.bf16.mxu0 %v576_v41  ;;  %v607_v30 = vor.u32 %v606_v24, %v602_v21  ;;  %v5794_v9 = vld [vmem:[%s6023_s10 + $0x90] sm:$0xff]  }
  0x50   : > { %5435 = vmatpush3.bf16.msra.mxu1 %v5742_v17  ;;  %5330 = vmatprep.subr.bf16.mxu0 %v5749_v26  ;;  %v5776_v26 = vld [vmem:[%s6946_s1 + $0x200] sm:$0xff]  }
  0x51   : > { %v612_v35 = vsel %vm492_vm0, %v607_v30, %v611_v27  ;;  %5331 = vmatpush3.bf16.msra.mxu0 %v5750_v33  ;;  %5436 = vmatprep.subr.bf16.mxu1 %v5757_v43  ;;  %v5782_v30 = vld [vmem:[%s6023_s10 + $0x18] sm:$0xff]   ;;  %v5779_v33 = vld [vmem:[%s6023_s10 + $0x20] ss:$0 sps:$4 sm:$0x11]  }
  0x52   : > { %5332 = vmatprep.subr.bf16.mxu0 %v5765_v61  ;;  %v1699_v37 = vrot.slane %v5779_v33, 1  ;;  %v5783_v43 = vld [vmem:[%s6023_s10 + $0x20] ss:$0 sps:$4 sm:$0x11]  }
  0x53   : > { %v5803_v33 = vld [vmem:[%s6023_s10 + $0x44] ss:$0 sps:$4 sm:$0x11]  }
  0x54   : > { %5437 = vmatpush3.bf16.msra.mxu1 %v5758_v52  ;;  %v5786_v52 = vld [vmem:[%s6023_s10 + $0x2c] ss:$0 sps:$4 sm:$0x11]  }
  0x55   : > { %5333 = vmatpush3.bf16.msra.mxu0 %v5766_v6  ;;  %5438 = vmatprep.subr.bf16.mxu1 %v5774_v13  ;;  %v1702_v57 = vrot.slane %v5786_v52, 1  ;;  %v5793_v6 = vld [vmem:[%s6946_s1 + $0x208] sm:$0xff]  }
  0x56   : > { %3384 = vmatmul.mubr.bf16.gmra.mrb[24].mxu0 %v5720_v34  ;;  %3513 = vmatmul.mubr.bf16.gmra.mrb[24].mxu1 %v902_v44  ;;  %v5751_v34 = vld [vmem:[%s6023_s10 + $0x78] sm:$0xff]   ;;  %v5811_v52 = vld [vmem:[%s6023_s10 + $0xa8] sm:$0xff]  }
  0x57   : > { %3520 = vmatprep.mubr.bf16.mxu1 %v5729_v48  ;;  %3391 = vmatprep.mubr.bf16.mxu0 %v588_v1  ;;  %v614_v38 = vshrl.u32 %v5751_v34, 16  ;;  %v616_v39 = vshll.u32 %v5751_v34, 16  ;;  %v5754_v44 = vld [vmem:[%s6023_s10 + $0x78] sm:$0xff]   ;;  %v5756_v48 = vld [vmem:[%s6023_s10 + $0x50] ss:$0 sps:$4 sm:$0x11]  }
  0x58   : > { %v913_v51 = vrot.slane %v5756_v48, 1  ;;  %v5763_v1 = vld [vmem:[%s6023_s10 + $0x54] sm:$0xfe]   ;;  %5439 = vmatpush3.bf16.msra.mxu1 %v5775_v23  ;;  %5566 = vmatprep.subr.bf16.mxu0 %v5776_v26  ;;  %v1308_v34 = vshrl.u32 %v5782_v30, 16 }
  0x59   : > { %v618_v41 = vrot.slane %v616_v39, 1  ;;  %v915_v4 = vrot.slane %v5763_v1, 1  ;;  %v5781_v39 = vld [vmem:[%s6023_s10 + $0x74] ss:$0 sps:$4 sm:$0x11]   ;;  %v5791_v1 = vld [vmem:[%s6946_s1 + $0x1e8] sm:$0xff]  }
  0x5a   : > { %5440 = vmatprep.subr.bf16.mxu1 %v5791_v1  ;;  %v5817_v1 = vld [vmem:[%s6023_s10 + $0x50] ss:$0 sps:$4 sm:$0x11]  }
  0x5b   : > { %v619_v45 = vor.u32 %v618_v41, %v614_v38  ;;  %v5780_v38 = vld [vmem:[%s6023_s10 + $0x6c] sm:$0xfe]  }
  0x5c   : > { %v921_v42 = vrot.slane %v5780_v38, 1  ;;  %v5804_v38 = vld [vmem:[%s6023_s10 + $0x90] sm:$0xfe]  }
  0x5d   : > { %v624_v49 = vsel %vm492_vm0, %v619_v45, %v623_v46  ;;  %v1315_v46 = vshll.u32 %v5783_v43, 16 }
  0x5e   : > { %3392 = vmatmul.mubr.bf16.gmra.mrb[28].mxu0 %v5730_v54  ;;  %3521 = vmatmul.mubr.bf16.gmra.mrb[28].mxu1 %v905_v2  ;;  %v914_v54 = vsel %vm893_vm1, %v912_v50, %v913_v51  ;;  %v5764_v2 = vld [vmem:[%s6023_s10 + $0x5c] ss:$0 sps:$4 sm:$0x11]   ;;  %v5785_v50 = vld [vmem:[%s6023_s10 + $0x24] sm:$0xfe]  }
  0x5f   : > { %3528 = vmatprep.mubr.bf16.mxu1 %v5735_v60  ;;  %3399 = vmatprep.mubr.bf16.mxu0 %v600_v11  ;;  %v633_v60 = vshll.u32 %v5760_v55, 16  ;;  %v916_v5 = vrot.slane %v5764_v2, 1  ;;  %v5772_v11 = vld [vmem:[%s6023_s10 + $0xc] sm:$0xff]   ;;  %v1317_v51 = vrot.slane %v1315_v46, 1  ;;  %v1701_v53 = vrot.slane %v5785_v50, 1  ;;  %v5789_v55 = vld [vmem:[%s6023_s10 + $0x24] sm:$0xff]  }
  0x60   : > { %v1296_v21 = vshrl.u32 %v5772_v11, 16  ;;  %v1298_v22 = vshll.u32 %v5772_v11, 16  ;;  %v5810_v50 = vld [vmem:[%s6946_s1 + $0x210] sm:$0xff]  }
  0x61   : > { %v635_v0 = vrot.slane %v633_v60, 1  ;;  %v917_v8 = vsel %vm893_vm1, %v915_v4, %v916_v5  ;;  %v1320_v60 = vshrl.u32 %v5789_v55, 16  ;;  %v1703_v61 = vsel %vm893_vm1, %v1701_v53, %v1702_v57  ;;  %v5792_v5 = vld [vmem:[%s6946_s1 + $0x1a8] sm:$0xff]  }
  0x62   : > { %v1300_v27 = vrot.slane %v1298_v22, 1  ;;  %5441 = vmatpush3.bf16.msra.mxu1 %v5792_v5  ;;  %v5800_v22 = vld [vmem:[%s6023_s10 + $0x38] ss:$0 sps:$4 sm:$0x11]   ;;  %v5812_v53 = vld [vmem:[%s6023_s10 + $0x48] sm:$0xfe]  }
  0x63   : > { %v636_v3 = vsel %vm492_vm0, %v631_v63, %v635_v0  ;;  %v5790_v63 = vld [vmem:[%s6023_s10 + $0x2c] ss:$0 sps:$4 sm:$0x11]   ;;  %v1322_v0 = vshll.u32 %v5789_v55, 16 }
  0x64   : > { %v1301_v31 = vor.u32 %v1300_v27, %v1296_v21  ;;  %v1327_v4 = vshll.u32 %v5790_v63, 16  ;;  %v1339_v27 = vshll.u32 %v5800_v22, 16  ;;  %v5813_v55 = vld [vmem:[%s6023_s10 + $0x50] ss:$0 sps:$4 sm:$0x11]   ;;  %v5816_v57 = vld [vmem:[%s6023_s10 + $0x48] sm:$0xff]  }
  0x66   : > { %3400 = vmatmul.mubr.bf16.gmra.mrb[32].mxu0 %v5736_v10  ;;  %3529 = vmatmul.mubr.bf16.gmra.mrb[32].mxu1 %v908_v16  ;;  %v5769_v10 = vld [vmem:[%s6023_s10 + $0x14] ss:$0 sps:$4 sm:$0x11]   ;;  %v5771_v16 = vld [vmem:[%s6023_s10 + $0x68] ss:$0 sps:$4 sm:$0x11]  }
  0x67   : > { %3536 = vmatprep.mubr.bf16.mxu1 %v5745_v20  ;;  %3407 = vmatprep.mubr.bf16.mxu0 %v612_v35  ;;  %v1696_v14 = vrot.slane %v5769_v10, 1  ;;  %v919_v19 = vrot.slane %v5771_v16, 1  ;;  %v5773_v20 = vld [vmem:[%s6023_s10 + $0x14] ss:$0 sps:$4 sm:$0x11]  }
  0x68   : > { %v5795_v10 = vld [vmem:[%s6023_s10 + $0x30] sm:$0xfe]   ;;  %v5797_v16 = vld [vmem:[%s6023_s10 + $0x84] sm:$0xfe]  }
  0x69   : > { %v1697_v17 = vsel %vm893_vm1, %v1695_v12, %v1696_v14  ;;  %v920_v24 = vsel %vm893_vm1, %v918_v18, %v919_v19  ;;  %v5796_v12 = vld [vmem:[%s6023_s10 + $0x38] ss:$0 sps:$4 sm:$0x11]   ;;  %v1704_v13 = vrot.slane %v5795_v10, 1  ;;  %v5799_v14 = vld [vmem:[%s6023_s10 + $0x30] sm:$0xff]   ;;  %v5801_v18 = vld [vmem:[%s6023_s10 + $0x9c] sm:$0xff]  }
  0x6a   : > { %v1705_v15 = vrot.slane %v5796_v12, 1  ;;  %v1332_v23 = vshrl.u32 %v5799_v14, 16  ;;  %v5820_v12 = vld [vmem:[%s6023_s10 + $0x5c] ss:$0 sps:$4 sm:$0x11]  }
  0x6c   : > { %v1706_v19 = vsel %vm893_vm1, %v1704_v13, %v1705_v15 }
  0x6e   : > { %3408 = vmatmul.mubr.bf16.gmra.mrb[36].mxu0 %v5746_v25  ;;  %3537 = vmatmul.mubr.bf16.gmra.mrb[36].mxu1 %v911_v36  ;;  %v1303_v25 = vshll.u32 %v5773_v20, 16  ;;  %v1698_v36 = vrot.slane %v5778_v32, 1  ;;  %v927_v20 = vrot.slane %v5797_v16, 1  ;;  %v1341_v32 = vrot.slane %v1339_v27, 1 }
  0x6f   : > { %3544 = vmatprep.mubr.bf16.mxu1 %v5753_v40  ;;  %3415 = vmatprep.mubr.bf16.mxu0 %v624_v49  ;;  %v1310_v40 = vshll.u32 %v5782_v30, 16  ;;  %v5802_v30 = vld [vmem:[%s6023_s10 + $0x3c] sm:$0xfe]   ;;  %v1714_v16 = vrot.slane %v5820_v12, 1 }
  0x70   : > { %v1305_v29 = vrot.slane %v1303_v25, 1  ;;  %v1700_v41 = vsel %vm893_vm1, %v1698_v36, %v1699_v37  ;;  %v5806_v25 = vld [vmem:[%s6023_s10 + $0x3c] sm:$0xff]   ;;  %v1708_v37 = vrot.slane %v5803_v33, 1 }
  0x71   : > { %v1312_v45 = vrot.slane %v1310_v40, 1  ;;  %v1346_v36 = vshll.u32 %v5806_v25, 16  ;;  %v5843_v12 = vld [vmem:[%s6023_s10 + $0x78] sm:$0xfe]  }
  0x72   : > { %v1306_v35 = vsel %vm492_vm0, %v1301_v31, %v1305_v29  ;;  %v1344_v31 = vshrl.u32 %v5806_v25, 16 }
  0x73   : > { %v1313_v49 = vor.u32 %v1312_v45, %v1308_v34  ;;  %v1348_v45 = vrot.slane %v1346_v36, 1 }
  0x75   : > { %v1318_v56 = vsel %vm492_vm0, %v1313_v49, %v1317_v51  ;;  %v5809_v49 = vld [vmem:[%s6946_s1 + $0x1b0] sm:$0xff]  }
  0x76   : > { %3416 = vmatmul.mubr.bf16.gmra.mrb[40].mxu0 %v5754_v44  ;;  %3545 = vmatmul.mubr.bf16.gmra.mrb[40].mxu1 %v914_v54  ;;  %v922_v44 = vrot.slane %v5781_v39, 1  ;;  %v5787_v54 = vld [vmem:[%s6023_s10 + $0x78] sm:$0xfe]   ;;  %v5805_v39 = vld [vmem:[%s6023_s10 + $0x98] ss:$0 sps:$4 sm:$0x11]  }
  0x77   : > { %3552 = vmatprep.mubr.bf16.mxu1 %v5761_v58  ;;  %3423 = vmatprep.mubr.bf16.mxu0 %v636_v3  ;;  %v5788_v58 = vld [vmem:[%s6023_s10 + $0x80] ss:$0 sps:$4 sm:$0x11]   ;;  %v924_v59 = vrot.slane %v5787_v54, 1  ;;  %v1324_v3 = vrot.slane %v1322_v0, 1  ;;  %v931_v43 = vrot.slane %v5805_v39, 1 }
  0x78   : > { %v923_v48 = vsel %vm893_vm1, %v921_v42, %v922_v44  ;;  %v930_v42 = vrot.slane %v5804_v38, 1  ;;  %v5807_v44 = vld [vmem:[%s6023_s10 + $0x44] ss:$0 sps:$4 sm:$0x11]   ;;  %v5831_v39 = vld [vmem:[%s6023_s10 + $0xb4] sm:$0xfe]  }
  0x7a   : > { %v932_v46 = vsel %vm893_vm1, %v930_v42, %v931_v43  ;;  %v939_v42 = vrot.slane %v5831_v39, 1 }
  0x7e   : > { %3424 = vmatmul.mubr.bf16.gmra.mrb[44].mxu0 %v5762_v62  ;;  %3553 = vmatmul.mubr.bf16.gmra.mrb[44].mxu1 %v917_v8  ;;  %v925_v62 = vrot.slane %v5788_v58, 1  ;;  %v1329_v8 = vrot.slane %v1327_v4, 1  ;;  %v1711_v58 = vrot.slane %v5813_v55, 1  ;;  %v5823_v4 = vld [vmem:[%s6023_s10 + $0x54] sm:$0xff]  }
  0x7f   : > { %3560 = vmatprep.mubr.bf16.mxu1 %v5767_v7  ;;  %3657 = vmatprep.mubr.bf16.mxu0 %v1697_v17  ;;  %v1325_v7 = vor.u32 %v1324_v3, %v1320_v60  ;;  %v5798_v17 = vld [vmem:[%s6023_s10 + $0x8c] ss:$0 sps:$4 sm:$0x11]   ;;  %v5815_v60 = vld [vmem:[%s6023_s10 + $0xa4] ss:$0 sps:$4 sm:$0x11]  }
  0x80   : > { %v926_v2 = vsel %vm893_vm1, %v924_v59, %v925_v62  ;;  %v928_v21 = vrot.slane %v5798_v17, 1  ;;  %v5814_v59 = vld [vmem:[%s6023_s10 + $0x9c] sm:$0xfe]   ;;  %v934_v0 = vrot.slane %v5815_v60, 1  ;;  %v1358_v3 = vshll.u32 %v5816_v57, 16  ;;  %v5839_v60 = vld [vmem:[%s6023_s10 + $0x6c] sm:$0xff]  }
  0x81   : > { %v1330_v11 = vsel %vm492_vm0, %v1325_v7, %v1329_v8  ;;  %v933_v63 = vrot.slane %v5814_v59, 1  ;;  %v5825_v7 = vld [vmem:[%s6946_s1 + $0x1f8] sm:$0xff]   ;;  %v1368_v10 = vshrl.u32 %v5823_v4, 16  ;;  %v1370_v15 = vshll.u32 %v5823_v4, 16  ;;  %v5821_v17 = vld [vmem:[%s6023_s10 + $0xa8] sm:$0xfe]  }
  0x82   : > { %v1360_v8 = vrot.slane %v1358_v3, 1  ;;  %v1394_v3 = vshll.u32 %v5839_v60, 16  ;;  %v5841_v4 = vld [vmem:[%s6023_s10 + $0x18] sm:$0xff]  }
  0x83   : > { %v935_v5 = vsel %vm893_vm1, %v933_v63, %v934_v0 }
  0x86   : > { %3561 = vmatmul.mubr.bf16.gmra.mrb[48].mxu1 %v920_v24  ;;  %3658 = vmatmul.mubr.bf16.vlgmr.msra.gmra.mrb[48].mxu0 %v1306_v35  ;;  %v1334_v24 = vshll.u32 %v5799_v14, 16  ;;  %v1707_v35 = vrot.slane %v5802_v30, 1 }
  0x87   : > { %3568 = vmatprep.mubr.bf16.mxu1 %v5777_v28  ;;  %5567 = vmatpush3.bf16.msra.mxu0 %v5776_v26  ;;  %v929_v26 = vsel %vm893_vm1, %v927_v20, %v928_v21  ;;  %v5808_v28 = vld [vmem:[%s6946_s1 + $0x1f0] sm:$0xff]   ;;  %v936_v21 = vrot.slane %v5821_v17, 1  ;;  %v1722_v17 = vrot.slane %v5843_v12, 1 }
  0x88   : > { %3665 = vmatprep.mubr.bf16.mxu0 %v1700_v41  ;;  %5568 = vmatprep.subr.bf16.mxu0 %v5793_v6  ;;  %v1336_v29 = vrot.slane %v1334_v24, 1  ;;  %v1709_v41 = vsel %vm893_vm1, %v1707_v35, %v1708_v37  ;;  %v1372_v24 = vrot.slane %v1370_v15, 1  ;;  %v5833_v35 = vld [vmem:[%s6023_s10 + $0x60] sm:$0xff]   ;;  %v5837_v37 = vld [vmem:[%s6023_s10 + $0x18] sm:$0xff]  }
  0x89   : > { %5442 = vmatprep.subr.bf16.mxu1 %v5808_v28  ;;  %v5826_v28 = vld [vmem:[%s6946_s1 + $0x1b8] sm:$0xff]   ;;  %v5844_v15 = vld [vmem:[%s6023_s10 + $0x80] ss:$0 sps:$4 sm:$0x11]  }
  0x8a   : > { %v1337_v34 = vor.u32 %v1336_v29, %v1332_v23  ;;  %5443 = vmatpush3.bf16.msra.mxu1 %v5809_v49  ;;  %v5824_v23 = vld [vmem:[%s6023_s10 + $0x5c] ss:$0 sps:$4 sm:$0x11]  }
  0x8b   : > { %5569 = vmatpush3.bf16.msra.mxu0 %v5793_v6  ;;  %v1363_v6 = vshll.u32 %v5817_v1, 16  ;;  %5444 = vmatprep.subr.bf16.mxu1 %v5825_v7  ;;  %v1375_v27 = vshll.u32 %v5824_v23, 16  ;;  %v5827_v29 = vld [vmem:[%s6946_s1 + $0x218] sm:$0xff]   ;;  %v5840_v1 = vld [vmem:[%s6023_s10 + $0x74] ss:$0 sps:$4 sm:$0x11]  }
  0x8c   : > { %v1342_v40 = vsel %vm492_vm0, %v1337_v34, %v1341_v32  ;;  %5570 = vmatprep.subr.bf16.mxu0 %v5810_v50  ;;  %v5829_v32 = vld [vmem:[%s6023_s10 + $0x60] sm:$0xfe]   ;;  %v5830_v34 = vld [vmem:[%s6023_s10 + $0x68] ss:$0 sps:$4 sm:$0x11]   ;;  %v1399_v7 = vshll.u32 %v5840_v1, 16 }
  0x8d   : > { %v1377_v30 = vrot.slane %v1375_v27, 1  ;;  %v1716_v36 = vrot.slane %v5829_v32, 1  ;;  %v1717_v38 = vrot.slane %v5830_v34, 1  ;;  %v5850_v34 = vld [vmem:[%s6023_s10 + $0x84] sm:$0xfe]  }
  0x8e   : > { %3569 = vmatmul.mubr.bf16.gmra.mrb[52].mxu1 %v923_v48  ;;  %3666 = vmatmul.mubr.bf16.gmra.mrb[52].mxu0 %v1318_v56  ;;  %v1351_v48 = vshll.u32 %v5807_v44, 16  ;;  %v1710_v56 = vrot.slane %v5812_v53, 1  ;;  %v5834_v44 = vld [vmem:[%s6023_s10 + $0x68] ss:$0 sps:$4 sm:$0x11]   ;;  %v1725_v39 = vrot.slane %v5850_v34, 1 }
  0x8f   : > { %3576 = vmatprep.mubr.bf16.mxu1 %v5784_v47  ;;  %3673 = vmatprep.mubr.bf16.mxu0 %v1703_v61  ;;  %v1349_v47 = vor.u32 %v1348_v45, %v1344_v31  ;;  %v5818_v61 = vld [vmem:[%s6023_s10 + $0xb4] sm:$0xff]   ;;  %v5828_v31 = vld [vmem:[%s6023_s10 + $0xc0] sm:$0xff]   ;;  %v1380_v45 = vshrl.u32 %v5833_v35, 16  ;;  %v1387_v49 = vshll.u32 %v5834_v44, 16 }
  0x90   : > { %v1353_v51 = vrot.slane %v1351_v48, 1  ;;  %5571 = vmatpush3.bf16.msra.mxu0 %v5810_v50  ;;  %v1712_v62 = vsel %vm893_vm1, %v1710_v56, %v1711_v58  ;;  %5445 = vmatpush3.bf16.msra.mxu1 %v5826_v28  ;;  %v5835_v50 = vld [vmem:[%s6023_s10 + $0x6c] sm:$0xfe]   ;;  %v5836_v53 = vld [vmem:[%s6023_s10 + $0x74] ss:$0 sps:$4 sm:$0x11]  }
  0x91   : > { %5572 = vmatprep.subr.bf16.mxu0 %v5827_v29  ;;  %v1719_v55 = vrot.slane %v5835_v50, 1  ;;  %v5838_v58 = vld [vmem:[%s6023_s10 + $0x20] ss:$0 sps:$4 sm:$0x11]   ;;  %v5849_v28 = vld [vmem:[%s6023_s10 + $0x24] sm:$0xff]  }
  0x92   : > { %v1354_v54 = vsel %vm492_vm0, %v1349_v47, %v1353_v51  ;;  %v2097_v47 = vshrl.u32 %v5837_v37, 16  ;;  %v2099_v51 = vshll.u32 %v5837_v37, 16  ;;  %v2104_v0 = vshll.u32 %v5838_v58, 16 }
  0x94   : > { %5573 = vmatpush3.bf16.msra.mxu0 %v5827_v29  ;;  %v2101_v59 = vrot.slane %v2099_v51, 1 }
  0x96   : > { %3577 = vmatmul.mubr.bf16.gmra.mrb[56].mxu1 %v926_v2  ;;  %3674 = vmatmul.mubr.bf16.gmra.mrb[56].mxu0 %v1330_v11  ;;  %v1356_v2 = vshrl.u32 %v5816_v57, 16  ;;  %v1365_v11 = vrot.slane %v1363_v6, 1  ;;  %v1720_v57 = vrot.slane %v5836_v53, 1  ;;  %v2102_v63 = vor.u32 %v2101_v59, %v2097_v47 }
  0x97   : > { %3584 = vmatprep.mubr.bf16.mxu1 %v5794_v9  ;;  %3681 = vmatprep.mubr.bf16.mxu0 %v1706_v19  ;;  %v5819_v9 = vld [vmem:[%s6023_s10 + $0x54] sm:$0xfe]   ;;  %v2106_v6 = vrot.slane %v2104_v0, 1 }
  0x98   : > { %v1361_v13 = vor.u32 %v1360_v8, %v1356_v2  ;;  %v1713_v14 = vrot.slane %v5819_v9, 1  ;;  %v1392_v2 = vshrl.u32 %v5839_v60, 16  ;;  %v1396_v8 = vrot.slane %v1394_v3, 1  ;;  %v5845_v9 = vld [vmem:[%s6023_s10 + $0x24] sm:$0xff]  }
  0x99   : > { %v5861_v3 = vld [vmem:[%s6023_s10 + $0x44] ss:$0 sps:$4 sm:$0x11]  }
  0x9a   : > { %v1366_v19 = vsel %vm492_vm0, %v1361_v13, %v1365_v11  ;;  %v1715_v20 = vsel %vm893_vm1, %v1713_v14, %v1714_v16  ;;  %v1401_v11 = vrot.slane %v1399_v7, 1  ;;  %v5847_v13 = vld [vmem:[%s6023_s10 + $0x78] sm:$0xff]   ;;  %v1397_v14 = vor.u32 %v1396_v8, %v1392_v2  ;;  %v5862_v8 = vld [vmem:[%s6023_s10 + $0x90] sm:$0xff]  }
  0x9b   : > { %v2109_v16 = vshrl.u32 %v5845_v9, 16  ;;  %v1404_v23 = vshrl.u32 %v5847_v13, 16  ;;  %v1406_v27 = vshll.u32 %v5847_v13, 16  ;;  %v5860_v2 = vld [vmem:[%s6023_s10 + $0x3c] sm:$0xff]   ;;  %v2140_v7 = vshll.u32 %v5861_v3, 16 }
  0x9c   : > { %v1428_v12 = vshrl.u32 %v5862_v8, 16  ;;  %v1430_v13 = vshll.u32 %v5862_v8, 16  ;;  %v5882_v3 = vld [vmem:[%s6023_s10 + $0x60] sm:$0xff]  }
  0x9e   : > { %3585 = vmatmul.mubr.bf16.gmra.mrb[60].mxu1 %v929_v26  ;;  %3682 = vmatmul.mubr.bf16.gmra.mrb[60].mxu0 %v1342_v40  ;;  %v1373_v26 = vor.u32 %v1372_v24, %v1368_v10  ;;  %v5832_v40 = vld [vmem:[%s6023_s10 + $0xbc] ss:$0 sps:$4 sm:$0x11]   ;;  %v2107_v10 = vsel %vm492_vm0, %v2102_v63, %v2106_v6  ;;  %v2135_v6 = vshll.u32 %v5860_v2, 16 }
  0x9f   : > { %3592 = vmatprep.mubr.bf16.mxu1 %v5801_v18  ;;  %3689 = vmatprep.mubr.bf16.mxu0 %v1709_v41  ;;  %v5822_v18 = vld [vmem:[%s6023_s10 + $0xb0] ss:$0 sps:$4 sm:$0x11]   ;;  %v1718_v41 = vsel %vm893_vm1, %v1716_v36, %v1717_v38  ;;  %v940_v43 = vrot.slane %v5832_v40, 1 }
  0xa0   : > { %v937_v22 = vrot.slane %v5822_v18, 1  ;;  %v1378_v33 = vsel %vm492_vm0, %v1373_v26, %v1377_v30  ;;  %v2111_v18 = vshll.u32 %v5845_v9, 16  ;;  %v5848_v26 = vld [vmem:[%s6023_s10 + $0x80] ss:$0 sps:$4 sm:$0x11]  }
  0xa1   : > { %v941_v48 = vsel %vm893_vm1, %v939_v42, %v940_v43  ;;  %v1411_v32 = vshll.u32 %v5848_v26, 16  ;;  %v5851_v38 = vld [vmem:[%s6023_s10 + $0x8c] ss:$0 sps:$4 sm:$0x11]  }
  0xa2   : > { %v938_v25 = vsel %vm893_vm1, %v936_v21, %v937_v22  ;;  %v5846_v21 = vld [vmem:[%s6023_s10 + $0x2c] ss:$0 sps:$4 sm:$0x11]   ;;  %v2113_v22 = vrot.slane %v2111_v18, 1  ;;  %v1726_v42 = vrot.slane %v5851_v38, 1  ;;  %v1432_v18 = vrot.slane %v1430_v13, 1 }
  0xa3   : > { %v1413_v37 = vrot.slane %v1411_v32, 1  ;;  %v5853_v40 = vld [vmem:[%s6023_s10 + $0x38] ss:$0 sps:$4 sm:$0x11]   ;;  %v5871_v38 = vld [vmem:[%s6023_s10 + $0x48] sm:$0xff]  }
  0xa4   : > { %v2114_v29 = vor.u32 %v2113_v22, %v2109_v16  ;;  %v1727_v47 = vsel %vm893_vm1, %v1725_v39, %v1726_v42  ;;  %v5863_v9 = vld [vmem:[%s6023_s10 + $0x98] ss:$0 sps:$4 sm:$0x11]   ;;  %v5867_v16 = vld [vmem:[%s6023_s10 + $0x48] sm:$0xff]  }
  0xa5   : > { %v2145_v22 = vshrl.u32 %v5867_v16, 16  ;;  %v5870_v32 = vld [vmem:[%s6023_s10 + $0xa4] ss:$0 sps:$4 sm:$0x11]  }
  0xa6   : > { %3593 = vmatmul.mubr.bf16.gmra.mrb[64].mxu1 %v932_v46  ;;  %3690 = vmatmul.mubr.bf16.gmra.mrb[64].mxu0 %v1354_v54  ;;  %v1382_v46 = vshll.u32 %v5833_v35, 16  ;;  %v1389_v54 = vrot.slane %v1387_v49, 1  ;;  %v5855_v49 = vld [vmem:[%s6023_s10 + $0x8c] ss:$0 sps:$4 sm:$0x11]  }
  0xa7   : > { %3600 = vmatprep.mubr.bf16.mxu1 %v5811_v52  ;;  %3697 = vmatprep.mubr.bf16.mxu0 %v1712_v62  ;;  %v1721_v62 = vsel %vm893_vm1, %v1719_v55, %v1720_v57  ;;  %v1423_v57 = vshll.u32 %v5855_v49, 16 }
  0xa8   : > { %v1384_v52 = vrot.slane %v1382_v46, 1  ;;  %v2128_v46 = vshll.u32 %v5853_v40, 16 }
  0xa9   : > { %v1425_v60 = vrot.slane %v1423_v57, 1 }
  0xaa   : > { %v1385_v56 = vor.u32 %v1384_v52, %v1380_v45  ;;  %v5854_v45 = vld [vmem:[%s6023_s10 + $0x84] sm:$0xff]   ;;  %v5856_v52 = vld [vmem:[%s6023_s10 + $0x30] sm:$0xff]   ;;  %v2130_v53 = vrot.slane %v2128_v46, 1 }
  0xab   : > { %v1416_v50 = vshrl.u32 %v5854_v45, 16  ;;  %v1418_v51 = vshll.u32 %v5854_v45, 16  ;;  %v5873_v45 = vld [vmem:[%s6023_s10 + $0xa8] sm:$0xfe]  }
  0xac   : > { %v5874_v46 = vld [vmem:[%s6023_s10 + $0xb0] ss:$0 sps:$4 sm:$0x11]   ;;  %v1734_v49 = vrot.slane %v5873_v45, 1 }
  0xad   : > { %v5889_v45 = vld [vmem:[%s6023_s10 + $0xc8] ss:$0 sps:$4 sm:$0x11]  }
  0xae   : > { %3601 = vmatmul.mubr.bf16.gmra.mrb[68].mxu1 %v935_v5  ;;  %3698 = vmatmul.mubr.bf16.gmra.mrb[68].mxu0 %v1366_v19  ;;  %v5842_v5 = vld [vmem:[%s6946_s1 + $0x220] sm:$0xff]   ;;  %v1402_v19 = vsel %vm492_vm0, %v1397_v14, %v1401_v11  ;;  %v2142_v11 = vrot.slane %v2140_v7, 1 }
  0xaf   : > { %3608 = vmatprep.mubr.bf16.mxu1 %v5818_v61  ;;  %3705 = vmatprep.mubr.bf16.mxu0 %v1715_v20  ;;  %v1390_v61 = vsel %vm492_vm0, %v1385_v56, %v1389_v54  ;;  %v1723_v20 = vrot.slane %v5844_v15, 1  ;;  %v5857_v54 = vld [vmem:[%s6946_s1 + $0x228] sm:$0xff]   ;;  %v1420_v56 = vrot.slane %v1418_v51, 1  ;;  %v5864_v14 = vld [vmem:[%s6023_s10 + $0x3c] sm:$0xff]   ;;  %v1435_v15 = vshll.u32 %v5863_v9, 16 }
  0xb0   : > { %5574 = vmatprep.subr.bf16.mxu0 %v5842_v5  ;;  %v5876_v51 = vld [vmem:[%s6023_s10 + $0x5c] ss:$0 sps:$4 sm:$0x11]  }
  0xb1   : > { %5575 = vmatpush3.bf16.msra.mxu0 %v5842_v5  ;;  %v1724_v24 = vsel %vm893_vm1, %v1722_v17, %v1723_v20  ;;  %v1421_v59 = vor.u32 %v1420_v56, %v1416_v50  ;;  %v2133_v5 = vshrl.u32 %v5860_v2, 16  ;;  %v5866_v20 = vld [vmem:[%s6023_s10 + $0xa4] ss:$0 sps:$4 sm:$0x11]   ;;  %v1735_v50 = vrot.slane %v5874_v46, 1 }
  0xb2   : > { %5576 = vmatprep.subr.bf16.mxu0 %v5857_v54  ;;  %v1732_v26 = vrot.slane %v5866_v20, 1  ;;  %v2164_v57 = vshll.u32 %v5876_v51, 16 }
  0xb3   : > { %v1426_v63 = vsel %vm492_vm0, %v1421_v59, %v1425_v60  ;;  %v1736_v56 = vsel %vm893_vm1, %v1734_v49, %v1735_v50  ;;  %v1741_v49 = vrot.slane %v5889_v45, 1  ;;  %v5891_v50 = vld [vmem:[%s6023_s10 + $0x74] ss:$0 sps:$4 sm:$0x11]  }
  0xb5   : > { %5577 = vmatpush3.bf16.msra.mxu0 %v5857_v54 }
  0xb6   : > { %3609 = vmatmul.mubr.bf16.gmra.mrb[72].mxu1 %v938_v25  ;;  %3706 = vmatmul.mubr.bf16.gmra.mrb[72].mxu0 %v1378_v33  ;;  %v2116_v25 = vshll.u32 %v5846_v21, 16  ;;  %v5852_v33 = vld [vmem:[%s6023_s10 + $0x30] sm:$0xff]   ;;  %v1437_v21 = vrot.slane %v1435_v15, 1 }
  0xb7   : > { %3616 = vmatprep.mubr.bf16.mxu1 %v5828_v31  ;;  %3713 = vmatprep.mubr.bf16.mxu0 %v1718_v41  ;;  %v1408_v31 = vrot.slane %v1406_v27, 1  ;;  %v2121_v43 = vshrl.u32 %v5852_v33, 16  ;;  %v2123_v44 = vshll.u32 %v5852_v33, 16  ;;  %v5868_v27 = vld [vmem:[%s6023_s10 + $0x50] ss:$0 sps:$4 sm:$0x11]  }
  0xb8   : > { %v2118_v30 = vrot.slane %v2116_v25, 1  ;;  %v2152_v34 = vshll.u32 %v5868_v27, 16  ;;  %v5884_v15 = vld [vmem:[%s6023_s10 + $0xb4] sm:$0xff]  }
  0xb9   : > { %v1409_v36 = vor.u32 %v1408_v31, %v1404_v23  ;;  %v5869_v31 = vld [vmem:[%s6023_s10 + $0x9c] sm:$0xff]   ;;  %v1464_v20 = vshrl.u32 %v5884_v15, 16 }
  0xba   : > { %v2119_v35 = vsel %vm492_vm0, %v2114_v29, %v2118_v30  ;;  %v2154_v40 = vrot.slane %v2152_v34, 1  ;;  %v5890_v34 = vld [vmem:[%s6023_s10 + $0x6c] sm:$0xff]  }
  0xbb   : > { %v1414_v41 = vsel %vm492_vm0, %v1409_v36, %v1413_v37  ;;  %v1442_v36 = vshll.u32 %v5869_v31, 16  ;;  %v1447_v37 = vshll.u32 %v5870_v32, 16  ;;  %v2183_v46 = vshll.u32 %v5890_v34, 16 }
  0xbd   : > { %v1444_v42 = vrot.slane %v1442_v36, 1  ;;  %v2185_v51 = vrot.slane %v2183_v46, 1 }
  0xbe   : > { %3617 = vmatmul.mubr.bf16.gmra.mrb[76].mxu1 %v941_v48  ;;  %3714 = vmatmul.mubr.bf16.gmra.mrb[76].mxu0 %v1390_v61  ;;  %v2125_v48 = vrot.slane %v2123_v44, 1  ;;  %v5858_v61 = vld [vmem:[%s6023_s10 + $0x90] sm:$0xfe]  }
  0xbf   : > { %3721 = vmatprep.mubr.bf16.mxu0 %v1721_v62  ;;  %3818 = vmatprep.mubr.bf16.mxu1 %v2107_v10  ;;  %v5859_v62 = vld [vmem:[%s6023_s10 + $0x98] ss:$0 sps:$4 sm:$0x11]   ;;  %v1728_v0 = vrot.slane %v5858_v61, 1  ;;  %v2137_v10 = vrot.slane %v2135_v6, 1 }
  0xc0   : > { %v2126_v55 = vor.u32 %v2125_v48, %v2121_v43  ;;  %v1729_v1 = vrot.slane %v5859_v62, 1  ;;  %v1449_v43 = vrot.slane %v1447_v37, 1  ;;  %v5879_v62 = vld [vmem:[%s6023_s10 + $0x54] sm:$0xff]   ;;  %v5881_v6 = vld [vmem:[%s6023_s10 + $0xbc] ss:$0 sps:$4 sm:$0x11]  }
  0xc1   : > { %v2138_v17 = vor.u32 %v2137_v10, %v2133_v5  ;;  %v5880_v5 = vld [vmem:[%s6023_s10 + $0xb4] sm:$0xfe]   ;;  %v1738_v10 = vrot.slane %v5881_v6, 1 }
  0xc2   : > { %v2131_v58 = vsel %vm492_vm0, %v2126_v55, %v2130_v53  ;;  %v5877_v55 = vld [vmem:[%s6023_s10 + $0xa8] sm:$0xff]   ;;  %v1737_v9 = vrot.slane %v5880_v5, 1  ;;  %v5895_v6 = vld [vmem:[%s6023_s10 + $0x78] sm:$0xff]  }
  0xc3   : > { %v2143_v23 = vsel %vm492_vm0, %v2138_v17, %v2142_v11  ;;  %v1452_v60 = vshrl.u32 %v5877_v55, 16  ;;  %v1454_v61 = vshll.u32 %v5877_v55, 16  ;;  %v5883_v11 = vld [vmem:[%s6023_s10 + $0x68] ss:$0 sps:$4 sm:$0x11]  }
  0xc4   : > { %v2176_v17 = vshll.u32 %v5883_v11, 16 }
  0xc5   : > { %v1456_v2 = vrot.slane %v1454_v61, 1 }
  0xc6   : > { %3819 = vmatmul.mubr.bf16.vlgmr.msra.gmra.mrb[80].mxu1 %v5841_v4  ;;  %3722 = vmatmul.mubr.bf16.gmra.mrb[80].mxu0 %v1402_v19  ;;  %v1730_v4 = vsel %vm893_vm1, %v1728_v0, %v1729_v1  ;;  %v5865_v19 = vld [vmem:[%s6023_s10 + $0x9c] sm:$0xfe]  }
  0xc7   : > { %3729 = vmatprep.mubr.bf16.mxu0 %v1724_v24  ;;  %3826 = vmatprep.mubr.bf16.mxu1 %v2119_v35  ;;  %v1433_v24 = vor.u32 %v1432_v18, %v1428_v12  ;;  %v1731_v25 = vrot.slane %v5865_v19, 1  ;;  %v1440_v35 = vshrl.u32 %v5869_v31, 16  ;;  %v1457_v8 = vor.u32 %v1456_v2, %v1452_v60  ;;  %v5885_v18 = vld [vmem:[%s6023_s10 + $0xbc] ss:$0 sps:$4 sm:$0x11]   ;;  %v5894_v60 = vld [vmem:[%s6023_s10 + $0x6c] sm:$0xff]  }
  0xc8   : > { %v2169_v12 = vshrl.u32 %v5882_v3, 16 }
  0xc9   : > { %v1438_v29 = vsel %vm492_vm0, %v1433_v24, %v1437_v21  ;;  %v1733_v30 = vsel %vm893_vm1, %v1731_v25, %v1732_v26  ;;  %v1445_v48 = vor.u32 %v1444_v42, %v1440_v35  ;;  %v1466_v21 = vshll.u32 %v5884_v15, 16  ;;  %v5887_v25 = vld [vmem:[%s6946_s1 + $0x238] sm:$0xff]   ;;  %v5888_v42 = vld [vmem:[%s6023_s10 + $0xc0] sm:$0xfe]  }
  0xca   : > { %v2193_v15 = vshrl.u32 %v5895_v6, 16 }
  0xcb   : > { %v1450_v53 = vsel %vm492_vm0, %v1445_v48, %v1449_v43  ;;  %v1468_v27 = vrot.slane %v1466_v21, 1  ;;  %v2181_v43 = vshrl.u32 %v5890_v34, 16  ;;  %v5898_v21 = vld [vmem:[%s6023_s10 + $0x20] ss:$0 sps:$4 sm:$0x11]  }
  0xcd   : > { %v1469_v36 = vor.u32 %v1468_v27, %v1464_v20  ;;  %v2186_v55 = vor.u32 %v2185_v51, %v2181_v43  ;;  %v5897_v20 = vld [vmem:[%s6023_s10 + $0x18] sm:$0xfe]  }
  0xce   : > { %3827 = vmatmul.mubr.bf16.gmra.mrb[84].mxu1 %v5849_v28  ;;  %3730 = vmatmul.mubr.bf16.gmra.mrb[84].mxu0 %v1414_v41  ;;  %v2147_v28 = vshll.u32 %v5867_v16, 16  ;;  %v5872_v41 = vld [vmem:[%s6946_s1 + $0x230] sm:$0xff]   ;;  %v1739_v16 = vsel %vm893_vm1, %v1737_v9, %v1738_v10  ;;  %v2496_v27 = vrot.slane %v5897_v20, 1 }
  0xcf   : > { %3737 = vmatprep.mubr.bf16.mxu0 %v1727_v47  ;;  %3834 = vmatprep.mubr.bf16.mxu1 %v2131_v58  ;;  %v5875_v47 = vld [vmem:[%s6023_s10 + $0x54] sm:$0xff]   ;;  %v5878_v58 = vld [vmem:[%s6023_s10 + $0xb0] ss:$0 sps:$4 sm:$0x11]  }
  0xd0   : > { %v2149_v33 = vrot.slane %v2147_v28, 1  ;;  %5578 = vmatprep.subr.bf16.mxu0 %v5872_v41  ;;  %v2159_v54 = vshll.u32 %v5875_v47, 16  ;;  %v1459_v0 = vshll.u32 %v5878_v58, 16  ;;  %v5886_v28 = vld [vmem:[%s6023_s10 + $0x60] sm:$0xff]  }
  0xd1   : > { %5579 = vmatpush3.bf16.msra.mxu0 %v5872_v41 }
  0xd2   : > { %v2150_v39 = vor.u32 %v2149_v33, %v2145_v22  ;;  %v2161_v59 = vrot.slane %v2159_v54, 1  ;;  %v2178_v22 = vrot.slane %v2176_v17, 1  ;;  %5580 = vmatprep.subr.bf16.mxu0 %v5887_v25 }
  0xd4   : > { %v2155_v44 = vsel %vm492_vm0, %v2150_v39, %v2154_v40 }
  0xd5   : > { %5581 = vmatpush3.bf16.msra.mxu0 %v5887_v25 }
  0xd6   : > { %3835 = vmatmul.mubr.bf16.gmra.mrb[88].mxu1 %v5856_v52  ;;  %3738 = vmatmul.mubr.bf16.gmra.mrb[88].mxu0 %v1426_v63  ;;  %v2157_v52 = vshrl.u32 %v5875_v47, 16  ;;  %v2166_v63 = vrot.slane %v2164_v57, 1  ;;  %v1740_v47 = vrot.slane %v5888_v42, 1  ;;  %v5893_v57 = vld [vmem:[%s6023_s10 + $0xc8] ss:$0 sps:$4 sm:$0x11]  }
  0xd7   : > { %3745 = vmatprep.mubr.bf16.mxu0 %v1730_v4  ;;  %3842 = vmatprep.mubr.bf16.mxu1 %v2143_v23  ;;  %v1461_v4 = vrot.slane %v1459_v0, 1  ;;  %v1471_v23 = vshll.u32 %v5885_v18, 16 }
  0xd8   : > { %v2162_v1 = vor.u32 %v2161_v59, %v2157_v52  ;;  %v1742_v54 = vsel %vm893_vm1, %v1740_v47, %v1741_v49  ;;  %v5903_v49 = vld [vmem:[%s6023_s10 + $0x8c] ss:$0 sps:$4 sm:$0x11]  }
  0xd9   : > { %v1462_v13 = vsel %vm492_vm0, %v1457_v8, %v1461_v4 }
  0xda   : > { %v2167_v7 = vsel %vm492_vm0, %v2162_v1, %v2166_v63  ;;  %v1483_v63 = vshll.u32 %v5893_v57, 16  ;;  %v2212_v57 = vshll.u32 %v5903_v49, 16  ;;  %v5915_v49 = vld [vmem:[%s6023_s10 + $0x5c] ss:$0 sps:$4 sm:$0x11]  }
  0xdc   : > { %v1485_v8 = vrot.slane %v1483_v63, 1  ;;  %v2214_v63 = vrot.slane %v2212_v57, 1 }
  0xde   : > { %3843 = vmatmul.mubr.bf16.gmra.mrb[92].mxu1 %v5864_v14  ;;  %3746 = vmatmul.mubr.bf16.gmra.mrb[92].mxu0 %v1438_v29  ;;  %v2171_v14 = vshll.u32 %v5882_v3, 16 }
  0xdf   : > { %3753 = vmatprep.mubr.bf16.mxu0 %v1733_v30  ;;  %3850 = vmatprep.mubr.bf16.mxu1 %v2155_v44  ;;  %v1473_v30 = vrot.slane %v1471_v23, 1 }
  0xe0   : > { %v2173_v19 = vrot.slane %v2171_v14, 1  ;;  %v5896_v14 = vld [vmem:[%s6023_s10 + $0x80] ss:$0 sps:$4 sm:$0x11]  }
  0xe1   : > { %v1474_v44 = vsel %vm492_vm0, %v1469_v36, %v1473_v30 }
  0xe2   : > { %v2174_v26 = vor.u32 %v2173_v19, %v2169_v12  ;;  %v2200_v19 = vshll.u32 %v5896_v14, 16 }
  0xe4   : > { %v2179_v35 = vsel %vm492_vm0, %v2174_v26, %v2178_v22  ;;  %v2202_v26 = vrot.slane %v2200_v19, 1 }
  0xe6   : > { %3851 = vmatmul.mubr.bf16.gmra.mrb[96].mxu1 %v5871_v38  ;;  %3754 = vmatmul.mubr.bf16.gmra.mrb[96].mxu0 %v1450_v53  ;;  %v5892_v53 = vld [vmem:[%s6023_s10 + $0xc0] sm:$0xff]  }
  0xe7   : > { %3761 = vmatprep.mubr.bf16.mxu0 %v1736_v56  ;;  %3858 = vmatprep.mubr.bf16.mxu1 %v2167_v7  ;;  %v2188_v56 = vshll.u32 %v5891_v50, 16  ;;  %v1476_v58 = vshrl.u32 %v5892_v53, 16  ;;  %v1478_v59 = vshll.u32 %v5892_v53, 16 }
  0xe9   : > { %v1480_v2 = vrot.slane %v1478_v59, 1  ;;  %v5906_v59 = vld [vmem:[%s6023_s10 + $0x84] sm:$0xff]  }
  0xeb   : > { %v1481_v12 = vor.u32 %v1480_v2, %v1476_v58  ;;  %v5904_v58 = vld [vmem:[%s6023_s10 + $0x30] sm:$0xfe]   ;;  %v5907_v2 = vld [vmem:[%s6023_s10 + $0x3c] sm:$0xfe]  }
  0xec   : > { %v2505_v14 = vrot.slane %v5907_v2, 1 }
  0xed   : > { %v1486_v18 = vsel %vm492_vm0, %v1481_v12, %v1485_v8 }
  0xee   : > { %3859 = vmatmul.mubr.bf16.gmra.mrb[100].mxu1 %v5879_v62  ;;  %3762 = vmatmul.mubr.bf16.gmra.mrb[100].mxu0 %v1462_v13  ;;  %v2190_v62 = vrot.slane %v2188_v56, 1 }
  0xef   : > { %3769 = vmatprep.mubr.bf16.mxu0 %v1739_v16  ;;  %3866 = vmatprep.mubr.bf16.mxu1 %v2179_v35  ;;  %v2195_v16 = vshll.u32 %v5895_v6, 16  ;;  %v5901_v35 = vld [vmem:[%s6023_s10 + $0x2c] ss:$0 sps:$4 sm:$0x11]  }
  0xf0   : > { %v2191_v7 = vsel %vm492_vm0, %v2186_v55, %v2190_v62  ;;  %v2500_v45 = vrot.slane %v5901_v35, 1  ;;  %v5908_v6 = vld [vmem:[%s6023_s10 + $0x44] ss:$0 sps:$4 sm:$0x11]  }
  0xf1   : > { %v2197_v23 = vrot.slane %v2195_v16, 1  ;;  %v5912_v35 = vld [vmem:[%s6023_s10 + $0x50] ss:$0 sps:$4 sm:$0x11]  }
  0xf3   : > { %v2198_v30 = vor.u32 %v2197_v23, %v2193_v15 }
  0xf6   : > { %3867 = vmatmul.mubr.bf16.gmra.mrb[104].mxu1 %v5886_v28  ;;  %3770 = vmatmul.mubr.bf16.gmra.mrb[104].mxu0 %v1474_v44  ;;  %v2497_v28 = vrot.slane %v5898_v21, 1  ;;  %v5910_v21 = vld [vmem:[%s6023_s10 + $0x98] ss:$0 sps:$4 sm:$0x11]  }
  0xf7   : > { %3777 = vmatprep.mubr.bf16.mxu0 %v1742_v54  ;;  %3874 = vmatprep.mubr.bf16.mxu1 %v2191_v7 }
  0xf8   : > { %v2498_v34 = vsel %vm893_vm1, %v2496_v27, %v2497_v28 }
  0xf9   : > { %v5182_v24 = vpop.f32.mrb[0].mxu1  ;;  %v5110_v32 = vpop.f32.mrb[0].mxu0 }
  0xfa   : > { %v5183_v29 = vpop.f32.mrb[1].mxu1  ;;  %v5111_v37 = vpop.f32.mrb[1].mxu0 }
  0xfb   : > { %v6455_v31 = vadd.f32 %v5183_v29, %v5182_v24  ;;  %v5185_v33 = vpop.f32.mrb[2].mxu1  ;;  %v6459_v39 = vadd.f32 %v5111_v37, %v5110_v32  ;;  %v5113_v41 = vpop.f32.mrb[2].mxu0  ;;  %v5899_v24 = vld [vmem:[%s6023_s10 + $0x78] sm:$0xff]   ;;  %v5900_v32 = vld [vmem:[%s6023_s10 + $0x24] sm:$0xfe]  }
  0xfc   : > { %v5186_v38 = vpop.f32.mrb[3].mxu1  ;;  %v5114_v48 = vpop.f32.mrb[3].mxu0  ;;  %v2499_v42 = vrot.slane %v5900_v32, 1  ;;  %v5913_v32 = vld [vmem:[%s6023_s10 + $0x90] sm:$0xff]  }
  0xfd   : > { %v6461_v40 = vadd.f32 %v5186_v38, %v5185_v33  ;;  %v6467_v52 = vadd.f32 %v5114_v48, %v5113_v41  ;;  %v5902_v38 = vld [vmem:[%s6023_s10 + $0x84] sm:$0xff]   ;;  %v2203_v41 = vsel %vm492_vm0, %v2198_v30, %v2202_v26 }
  0xfe   : > { %3875 = vmatmul.mubr.bf16.gmra.mrb[108].mxu1 %v5894_v60  ;;  %3778 = vmatmul.mubr.bf16.gmra.mrb[108].mxu0 %v1486_v18  ;;  %v2205_v50 = vshrl.u32 %v5902_v38, 16  ;;  %v2207_v51 = vshll.u32 %v5902_v38, 16  ;;  %v2501_v54 = vsel %vm893_vm1, %v2499_v42, %v2500_v45  ;;  %v5905_v60 = vld [vmem:[%s6023_s10 + $0x38] ss:$0 sps:$4 sm:$0x11]   ;;  %v2509_v42 = vrot.slane %v5912_v35, 1 }
  0xff   : > { %5582 = vmatprep.mubr.bf16.mxu0 %v2498_v34  ;;  %3882 = vmatprep.mubr.bf16.mxu1 %v2203_v41  ;;  %v5911_v30 = vld [vmem:[%s6023_s10 + $0x48] sm:$0xfe]   ;;  %v6526_v34 = vld [vmem:[%s6947_s2] ss:$0 sm:$0xff] }
 0x100   : > { %v2209_v56 = vrot.slane %v2207_v51, 1  ;;  %v2508_v41 = vrot.slane %v5911_v30, 1  ;;  %v3338_v45 = vadd.f32 %v6459_v39, %v6526_v34  ;;  %v2512_v39 = vrot.slane %v5915_v49, 1 }
 0x101   : > { %v5188_v61 = vpop.f32.mrb[4].mxu1  ;;  %v5116_v1 = vpop.f32.mrb[4].mxu0 }
 0x102   : > { %v5189_v0 = vpop.f32.mrb[5].mxu1  ;;  %v5117_v5 = vpop.f32.mrb[5].mxu0  ;;  %v2210_v62 = vor.u32 %v2209_v56, %v2205_v50  ;;  %v3341_v56 = vadd.f32 %v6467_v52, %v6526_v34  ;;  %v2510_v57 = vsel %vm893_vm1, %v2508_v41, %v2509_v42 }
 0x103   : > { %v6473_v3 = vadd.f32 %v5189_v0, %v5188_v61  ;;  %v5191_v4 = vpop.f32.mrb[6].mxu1  ;;  %v6477_v9 = vadd.f32 %v5117_v5, %v5116_v1  ;;  %v5119_v11 = vpop.f32.mrb[6].mxu0  ;;  %v2502_v0 = vrot.slane %v5904_v58, 1  ;;  %v2503_v1 = vrot.slane %v5905_v60, 1 }
 0x104   : > { %v5192_v10 = vpop.f32.mrb[7].mxu1  ;;  %v5120_v17 = vpop.f32.mrb[7].mxu0  ;;  %v2215_v5 = vsel %vm492_vm0, %v2210_v62, %v2214_v63 }
 0x105   : > { %v6479_v13 = vadd.f32 %v5192_v10, %v5191_v4  ;;  %v6485_v22 = vadd.f32 %v5120_v17, %v5119_v11  ;;  %v5909_v11 = vld [vmem:[%s6023_s10 + $0x90] sm:$0xff]   ;;  %v2504_v12 = vsel %vm893_vm1, %v2502_v0, %v2503_v1  ;;  %v2506_v17 = vrot.slane %v5908_v6, 1  ;;  %v5917_v1 = vld [vmem:[%s6023_s10 + $0xa4] ss:$0 sps:$4 sm:$0x11]  }
 0x106   : > { %3883 = vmatmul.mubr.bf16.gmra.mrb[112].mxu1 %v5899_v24  ;;  %5583 = vmatmul.mubr.bf16.vlgmr.msra.gmra.mrb[112].mxu0 %v2501_v54  ;;  %v2217_v23 = vshrl.u32 %v5909_v11, 16  ;;  %v2219_v24 = vshll.u32 %v5909_v11, 16  ;;  %v5916_v54 = vld [vmem:[%s6023_s10 + $0x9c] sm:$0xff]   ;;  %v2236_v11 = vshll.u32 %v5917_v1, 16 }
 0x107   : > { %3890 = vmatprep.mubr.bf16.mxu1 %v2215_v5  ;;  %5586 = vmatprep.mubr.bf16.mxu0 %v2504_v12  ;;  %v2507_v26 = vsel %vm893_vm1, %v2505_v14, %v2506_v17  ;;  %v2229_v52 = vshrl.u32 %v5916_v54, 16  ;;  %v2231_v2 = vshll.u32 %v5916_v54, 16  ;;  %v5918_v12 = vld [vmem:[%s6023_s10 + $0x60] sm:$0xfe]  }
 0x108   : > { %v2221_v28 = vrot.slane %v2219_v24, 1  ;;  %v5920_v14 = vld [vmem:[%s6023_s10 + $0x9c] sm:$0xff]   ;;  %v5921_v24 = vld [vmem:[%s6023_s10 + $0x6c] sm:$0xfe]  }
 0x109   : > { %v5194_v25 = vpop.f32.mrb[8].mxu1  ;;  %v5122_v36 = vpop.f32.mrb[8].mxu0  ;;  %v2517_v41 = vrot.slane %v5921_v24, 1 }
 0x10a   : > { %v5195_v29 = vpop.f32.mrb[9].mxu1  ;;  %v5123_v43 = vpop.f32.mrb[9].mxu0 }
 0x10b   : > { %v6489_v33 = vadd.f32 %v5195_v29, %v5194_v25  ;;  %v5197_v37 = vpop.f32.mrb[10].mxu1  ;;  %v6495_v46 = vadd.f32 %v5123_v43, %v5122_v36  ;;  %v5125_v48 = vpop.f32.mrb[10].mxu0  ;;  %v2224_v29 = vshll.u32 %v5910_v21, 16  ;;  %v5914_v43 = vld [vmem:[%s6023_s10 + $0x54] sm:$0xfe]   ;;  %v2514_v21 = vrot.slane %v5918_v12, 1 }
 0x10c   : > { %v5198_v44 = vpop.f32.mrb[11].mxu1  ;;  %v5126_v53 = vpop.f32.mrb[11].mxu0  ;;  %v2511_v58 = vrot.slane %v5914_v43, 1 }
 0x10d   : > { %v6497_v47 = vadd.f32 %v5198_v44, %v5197_v37  ;;  %v6501_v55 = vadd.f32 %v5126_v53, %v5125_v48  ;;  %v2222_v37 = vor.u32 %v2221_v28, %v2217_v23  ;;  %v2226_v38 = vrot.slane %v2224_v29, 1  ;;  %v5922_v29 = vld [vmem:[%s6023_s10 + $0x74] ss:$0 sps:$4 sm:$0x11]  }
 0x10e   : > { %3891 = vmatmul.mubr.bf16.gmra.mrb[116].mxu1 %v5906_v59  ;;  %5587 = vmatmul.mubr.bf16.gmra.mrb[116].mxu0 %v2507_v26  ;;  %v2513_v5 = vsel %vm893_vm1, %v2511_v58, %v2512_v39  ;;  %v3346_v26 = vadd.f32 %v6477_v9, %v6526_v34  ;;  %v2518_v9 = vrot.slane %v5922_v29, 1  ;;  %v5927_v39 = vld [vmem:[%s6023_s10 + $0xa8] sm:$0xff]  }
 0x10f   : > { %v2227_v48 = vsel %vm492_vm0, %v2222_v37, %v2226_v38  ;;  %5590 = vmatprep.mubr.bf16.mxu0 %v2510_v57  ;;  %v3349_v37 = vadd.f32 %v6485_v22, %v6526_v34 }
 0x110   : > { %3898 = vmatprep.mubr.bf16.mxu1 %v2227_v48  ;;  %v2519_v54 = vsel %vm893_vm1, %v2517_v41, %v2518_v9 }
 0x111   : > { %v5200_v61 = vpop.f32.mrb[12].mxu1  ;;  %v5128_v8 = vpop.f32.mrb[12].mxu0 }
 0x112   : > { %v5201_v4 = vpop.f32.mrb[13].mxu1  ;;  %v5129_v15 = vpop.f32.mrb[13].mxu0 }
 0x113   : > { %v6509_v7 = vadd.f32 %v5201_v4, %v5200_v61  ;;  %v5203_v10 = vpop.f32.mrb[14].mxu1  ;;  %v6513_v18 = vadd.f32 %v5129_v15, %v5128_v8  ;;  %v5131_v20 = vpop.f32.mrb[14].mxu0  ;;  %v5919_v15 = vld [vmem:[%s6023_s10 + $0x68] ss:$0 sps:$4 sm:$0x11]  }
 0x114   : > { %v5204_v16 = vpop.f32.mrb[15].mxu1  ;;  %v5132_v25 = vpop.f32.mrb[15].mxu0  ;;  %v2515_v23 = vrot.slane %v5919_v15, 1 }
 0x115   : > { %v6515_v19 = vadd.f32 %v5204_v16, %v5203_v10  ;;  %v6519_v27 = vadd.f32 %v5132_v25, %v5131_v20  ;;  %v2233_v10 = vrot.slane %v2231_v2, 1  ;;  %v2238_v20 = vrot.slane %v2236_v11, 1 }
 0x116   : > { %3899 = vmatmul.mubr.bf16.gmra.mrb[120].mxu1 %v5913_v32  ;;  %5591 = vmatmul.mubr.bf16.gmra.mrb[120].mxu0 %v2513_v5  ;;  %v2516_v38 = vsel %vm893_vm1, %v2514_v21, %v2515_v23  ;;  %v5928_v5 = vld [vmem:[%s6023_s10 + $0x84] sm:$0xfe]   ;;  %v3354_v11 = vadd.f32 %v6495_v46, %v6526_v34  ;;  %v3357_v21 = vadd.f32 %v6501_v55, %v6526_v34 }
 0x117   : > { %v2234_v17 = vor.u32 %v2233_v10, %v2229_v52  ;;  %5594 = vmatprep.mubr.bf16.mxu0 %v2516_v38  ;;  %v2523_v24 = vrot.slane %v5928_v5, 1  ;;  %v3365_v5 = vadd.f32 %v6519_v27, %v6526_v34 }
 0x119   : > { %v5222_v36 = vpop.f32.mrb[16].mxu1  ;;  %v5134_v51 = vpop.f32.mrb[16].mxu0  ;;  %v2239_v28 = vsel %vm492_vm0, %v2234_v17, %v2238_v20  ;;  %v5930_v20 = vld [vmem:[%s6023_s10 + $0xb4] sm:$0xff]  }
 0x11a   : > { %v5223_v44 = vpop.f32.mrb[17].mxu1  ;;  %v5135_v59 = vpop.f32.mrb[17].mxu0  ;;  %3906 = vmatprep.mubr.bf16.mxu1 %v2239_v28  ;;  %v2253_v55 = vshrl.u32 %v5930_v20, 16 }
 0x11b   : > { %v5224_v50 = vadd.f32 %v5223_v44, %v5222_v36  ;;  %v5225_v53 = vpop.f32.mrb[18].mxu1  ;;  %v6540_v62 = vadd.f32 %v5135_v59, %v5134_v51  ;;  %v5137_v0 = vpop.f32.mrb[18].mxu0  ;;  %v5923_v36 = vld [vmem:[%s6023_s10 + $0xa8] sm:$0xff]  }
 0x11c   : > { %v5226_v60 = vpop.f32.mrb[19].mxu1  ;;  %v5138_v4 = vpop.f32.mrb[19].mxu0  ;;  %v2241_v22 = vshrl.u32 %v5923_v36, 16  ;;  %v2243_v51 = vshll.u32 %v5923_v36, 16  ;;  %v2255_v36 = vshll.u32 %v5930_v20, 16 }
 0x11d   : > { %v6538_v61 = vadd.f32 %v5224_v50, %v3338_v45  ;;  %v5227_v63 = vadd.f32 %v5226_v60, %v5225_v53  ;;  %v6546_v8 = vadd.f32 %v5138_v4, %v5137_v0  ;;  %v5924_v50 = vld [vmem:[%s6023_s10 + $0xb0] ss:$0 sps:$4 sm:$0x11]   ;;  %v5925_v60 = vld [vmem:[%s6023_s10 + $0x78] sm:$0xfe]  }
 0x11e   : > { %3907 = vmatmul.mubr.bf16.gmra.mrb[124].mxu1 %v5920_v14  ;;  %5595 = vmatmul.mubr.bf16.gmra.mrb[124].mxu0 %v2519_v54  ;;  %v2245_v58 = vrot.slane %v2243_v51, 1  ;;  %v2248_v59 = vshll.u32 %v5924_v50, 16  ;;  %v2520_v2 = vrot.slane %v5925_v60, 1  ;;  %v5929_v14 = vld [vmem:[%s6023_s10 + $0x8c] ss:$0 sps:$4 sm:$0x11]  }
 0x11f   : > { %v6544_v6 = vadd.f32 %v5227_v63, %v3341_v56  ;;  %v5926_v63 = vld [vmem:[%s6023_s10 + $0x80] ss:$0 sps:$4 sm:$0x11]   ;;  %v2524_v46 = vrot.slane %v5929_v14, 1 }
 0x120   : > { %v2246_v1 = vor.u32 %v2245_v58, %v2241_v22  ;;  %v2250_v52 = vrot.slane %v2248_v59, 1  ;;  %v2521_v4 = vrot.slane %v5926_v63, 1  ;;  %v5933_v50 = vld [vmem:[%s6023_s10 + $0x98] ss:$0 sps:$4 sm:$0x11]  }
 0x121   : > { %v5228_v16 = vpop.f32.mrb[20].mxu1  ;;  %v5140_v32 = vpop.f32.mrb[20].mxu0  ;;  %v2525_v38 = vsel %vm893_vm1, %v2523_v24, %v2524_v46  ;;  %v2527_v58 = vrot.slane %v5933_v50, 1  ;;  %v5935_v59 = vld [vmem:[%s6023_s10 + $0x9c] sm:$0xfe]  }
 0x122   : > { %v5229_v25 = vpop.f32.mrb[21].mxu1  ;;  %v5141_v42 = vpop.f32.mrb[21].mxu0  ;;  %v2251_v12 = vsel %vm492_vm0, %v2246_v1, %v2250_v52  ;;  %v2522_v23 = vsel %vm893_vm1, %v2520_v2, %v2521_v4  ;;  %v5937_v4 = vld [vmem:[%s6023_s10 + $0xc0] sm:$0xff]  }
 0x123   : > { %v5230_v30 = vadd.f32 %v5229_v25, %v5228_v16  ;;  %v5231_v35 = vpop.f32.mrb[22].mxu1  ;;  %v6562_v45 = vadd.f32 %v5141_v42, %v5140_v32  ;;  %v5143_v49 = vpop.f32.mrb[22].mxu0  ;;  %3914 = vmatprep.mubr.bf16.mxu1 %v2251_v12  ;;  %5598 = vmatprep.mubr.bf16.mxu0 %v2522_v23  ;;  %v2265_v27 = vshrl.u32 %v5937_v4, 16  ;;  %v2267_v23 = vshll.u32 %v5937_v4, 16 }
 0x124   : > { %v5232_v43 = vpop.f32.mrb[23].mxu1  ;;  %v5144_v53 = vpop.f32.mrb[23].mxu0 }
 0x125   : > { %v6560_v44 = vadd.f32 %v5230_v30, %v3346_v26  ;;  %v5233_v48 = vadd.f32 %v5232_v43, %v5231_v35  ;;  %v6568_v57 = vadd.f32 %v5144_v53, %v5143_v49  ;;  %v5931_v35 = vld [vmem:[%s6023_s10 + $0xbc] ss:$0 sps:$4 sm:$0x11]   ;;  %v2257_v43 = vrot.slane %v2255_v36, 1  ;;  %v5934_v49 = vld [vmem:[%s6023_s10 + $0xb4] sm:$0xff]  }
 0x126   : > { %3915 = vmatmul.mubr.bf16.gmra.mrb[128].mxu1 %v5927_v39  ;;  %5599 = vmatmul.mubr.bf16.gmra.mrb[128].mxu0 %v2525_v38  ;;  %v2260_v9 = vshll.u32 %v5931_v35, 16  ;;  %v3362_v39 = vadd.f32 %v6513_v18, %v6526_v34  ;;  %v5939_v35 = vld [vmem:[%s6023_s10 + $0xa8] sm:$0xfe]   ;;  %v5940_v36 = vld [vmem:[%s6023_s10 + $0xb0] ss:$0 sps:$4 sm:$0x11]  }
 0x127   : > { %v6566_v56 = vadd.f32 %v5233_v48, %v3349_v37  ;;  %v5932_v48 = vld [vmem:[%s6023_s10 + $0x90] sm:$0xfe]   ;;  %v2258_v51 = vor.u32 %v2257_v43, %v2253_v55  ;;  %v5941_v55 = vld [vmem:[%s6023_s10 + $0xc0] sm:$0xff]  }
 0x128   : > { %v2262_v53 = vrot.slane %v2260_v9, 1  ;;  %v2526_v54 = vrot.slane %v5932_v48, 1  ;;  %v2532_v9 = vrot.slane %v5939_v35, 1  ;;  %v2533_v48 = vrot.slane %v5940_v36, 1 }
 0x129   : > { %v5234_v0 = vpop.f32.mrb[24].mxu1  ;;  %v5146_v16 = vpop.f32.mrb[24].mxu0 }
 0x12a   : > { %v5235_v10 = vpop.f32.mrb[25].mxu1  ;;  %v5147_v25 = vpop.f32.mrb[25].mxu0  ;;  %v2263_v63 = vsel %vm492_vm0, %v2258_v51, %v2262_v53  ;;  %v5943_v53 = vld [vmem:[%s6023_s10 + $0xbc] ss:$0 sps:$4 sm:$0x11]  }
 0x12b   : > { %v5236_v15 = vadd.f32 %v5235_v10, %v5234_v0  ;;  %v5237_v17 = vpop.f32.mrb[26].mxu1  ;;  %v6584_v29 = vadd.f32 %v5147_v25, %v5146_v16  ;;  %v5149_v32 = vpop.f32.mrb[26].mxu0  ;;  %v5936_v0 = vld [vmem:[%s6023_s10 + $0xa4] ss:$0 sps:$4 sm:$0x11]   ;;  %3922 = vmatprep.mubr.bf16.mxu1 %v2263_v63  ;;  %v2528_v10 = vsel %vm893_vm1, %v2526_v54, %v2527_v58  ;;  %v2534_v63 = vsel %vm893_vm1, %v2532_v9, %v2533_v48 }
 0x12c   : > { %v5238_v26 = vpop.f32.mrb[27].mxu1  ;;  %v5150_v37 = vpop.f32.mrb[27].mxu0  ;;  %5602 = vmatprep.mubr.bf16.mxu0 %v2528_v10  ;;  %v2530_v18 = vrot.slane %v5936_v0, 1  ;;  %v5950_v48 = vld [vmem:[%s6023_s10 + $0xd4] ss:$0 sps:$4 sm:$0x11]  }
 0x12d   : > { %v6582_v28 = vadd.f32 %v5236_v15, %v3354_v11  ;;  %v5239_v30 = vadd.f32 %v5238_v26, %v5237_v17  ;;  %v6590_v42 = vadd.f32 %v5150_v37, %v5149_v32  ;;  %v2529_v11 = vrot.slane %v5935_v59, 1 }
 0x12e   : > { %3923 = vmatmul.mubr.bf16.gmra.mrb[132].mxu1 %v5934_v49  ;;  %v5942_v49 = vld [vmem:[%s6023_s10 + $0xb4] sm:$0xfe]  }
 0x12f   : > { %v6588_v41 = vadd.f32 %v5239_v30, %v3357_v21  ;;  %v5938_v21 = vld [vmem:[%s6023_s10 + $0xc8] ss:$0 sps:$4 sm:$0x11]   ;;  %v2531_v25 = vsel %vm893_vm1, %v2529_v11, %v2530_v18  ;;  %v2269_v30 = vrot.slane %v2267_v23, 1  ;;  %v2535_v0 = vrot.slane %v5942_v49, 1 }
 0x130   : > { %5603 = vmatmul.mubr.bf16.gmra.mrb[132].mxu0 %v2531_v25  ;;  %v2272_v32 = vshll.u32 %v5938_v21, 16  ;;  %v5945_v11 = vld [vmem:[%s6023_s10 + $0xd4] ss:$0 sps:$4 sm:$0x11]   ;;  %v5946_v23 = vld [vmem:[%s6023_s10 + $0xc0] sm:$0xfe]  }
 0x131   : > { %v5240_v22 = vpop.f32.mrb[28].mxu1  ;;  %v5152_v52 = vpop.f32.mrb[28].mxu0  ;;  %v2270_v38 = vor.u32 %v2269_v30, %v2265_v27  ;;  %5606 = vmatprep.mubr.bf16.mxu0 %v2534_v63  ;;  %v2284_v27 = vshll.u32 %v5945_v11, 16  ;;  %v5947_v25 = vld [vmem:[%s6023_s10 + $0xc8] ss:$0 sps:$4 sm:$0x11]  }
 0x132   : > { %v5241_v60 = vpop.f32.mrb[29].mxu1  ;;  %v5153_v12 = vpop.f32.mrb[29].mxu0  ;;  %v2274_v43 = vrot.slane %v2272_v32, 1  ;;  %v2539_v36 = vrot.slane %v5947_v25, 1 }
 0x133   : > { %v5242_v1 = vadd.f32 %v5241_v60, %v5240_v22  ;;  %v5243_v2 = vpop.f32.mrb[30].mxu1  ;;  %v6606_v16 = vadd.f32 %v5153_v12, %v5152_v52  ;;  %v5155_v20 = vpop.f32.mrb[30].mxu0  ;;  %v3370_v22 = vadd.f32 %v6540_v62, %v6526_v34  ;;  %v5944_v60 = vld [vmem:[%s6023_s10 + $0xcc] sm:$0xff]   ;;  %v2536_v62 = vrot.slane %v5943_v53, 1 }
 0x134   : > { %v5244_v14 = vpop.f32.mrb[31].mxu1  ;;  %v5156_v24 = vpop.f32.mrb[31].mxu0  ;;  %v2275_v51 = vsel %vm492_vm0, %v2270_v38, %v2274_v43  ;;  %v2279_v12 = vshll.u32 %v5944_v60, 16  ;;  %v2286_v35 = vrot.slane %v2284_v27, 1  ;;  %v3378_v43 = vadd.f32 %v6562_v45, %v6526_v34 }
 0x135   : > { %v6604_v15 = vadd.f32 %v5242_v1, %v3362_v39  ;;  %v5245_v17 = vadd.f32 %v5244_v14, %v5243_v2  ;;  %v6612_v46 = vadd.f32 %v5156_v24, %v5155_v20  ;;  %v3373_v39 = vadd.f32 %v6546_v8, %v6526_v34  ;;  %3930 = vmatprep.mubr.bf16.mxu1 %v2275_v51  ;;  %v5948_v24 = vld [vmem:[%s6023_s10 + $0xcc] sm:$0xff]  }
 0x136   : > { %3931 = vmatmul.mubr.bf16.gmra.mrb[136].mxu1 %v5941_v55  ;;  %v2277_v8 = vshrl.u32 %v5944_v60, 16  ;;  %v2537_v18 = vsel %vm893_vm1, %v2535_v0, %v2536_v62  ;;  %v2281_v21 = vrot.slane %v2279_v12, 1  ;;  %v2538_v55 = vrot.slane %v5946_v23, 1 }
 0x137   : > { %v6610_v26 = vadd.f32 %v5245_v17, %v3365_v5  ;;  %v3381_v51 = vadd.f32 %v6568_v57, %v6526_v34  ;;  %v2542_v60 = vrot.slane %v5950_v48, 1  ;;  %v3386_v12 = vadd.f32 %v6584_v29, %v6526_v34 }
 0x138   : > { %5607 = vmatmul.mubr.bf16.gmra.mrb[136].mxu0 %v2537_v18  ;;  %v2282_v32 = vor.u32 %v2281_v21, %v2277_v8  ;;  %v2540_v53 = vsel %vm893_vm1, %v2538_v55, %v2539_v36  ;;  %v3389_v27 = vadd.f32 %v6590_v42, %v6526_v34  ;;  %v3394_v36 = vadd.f32 %v6606_v16, %v6526_v34 }
 0x139   : > { %v5246_v37 = vpop.f32.mrb[32].mxu1  ;;  %v5158_v58 = vpop.f32.mrb[32].mxu0  ;;  %5610 = vmatprep.mubr.bf16.mxu0 %v2540_v53  ;;  %v3397_v42 = vadd.f32 %v6612_v46, %v6526_v34 }
 0x13a   : > { %v5247_v50 = vpop.f32.mrb[33].mxu1  ;;  %v5159_v1 = vpop.f32.mrb[33].mxu0  ;;  %v2287_v9 = vsel %vm492_vm0, %v2282_v32, %v2286_v35 }
 0x13b   : > { %v5248_v54 = vadd.f32 %v5247_v50, %v5246_v37  ;;  %v5249_v59 = vpop.f32.mrb[34].mxu1  ;;  %v6628_v4 = vadd.f32 %v5159_v1, %v5158_v58  ;;  %v5161_v10 = vpop.f32.mrb[34].mxu0  ;;  %v5949_v37 = vld [vmem:[%s6023_s10 + $0xcc] sm:$0xfe]   ;;  %3938 = vmatprep.mubr.bf16.mxu1 %v2287_v9  ;;  %s4966_s10 = sshll.u32 %s6950_s13, 7 }
 0x13c   : > { %v5250_v52 = vpop.f32.mrb[35].mxu1  ;;  %v5162_v14 = vpop.f32.mrb[35].mxu0  ;;  %s6884_s21 = scalar_lea.vmem %s6948_s3, %s4966_s10 }
 0x13d   : > { %v6626_v2 = vadd.f32 %v5248_v54, %v3370_v22  ;;  %v5251_v5 = vadd.f32 %v5250_v52, %v5249_v59  ;;  %v6634_v20 = vadd.f32 %v5162_v14, %v5161_v10  ;;  %v2541_v54 = vrot.slane %v5949_v37, 1 }
 0x13e   : > { %3939 = vmatmul.mubr.bf16.gmra.mrb[140].mxu1 %v5948_v24  ;;  %v3402_v16 = vadd.f32 %v6628_v4, %v6526_v34 }
 0x13f   : > { %v6632_v17 = vadd.f32 %v5251_v5, %v3373_v39  ;;  %v2543_v5 = vsel %vm893_vm1, %v2541_v54, %v2542_v60  ;;  %v3405_v46 = vadd.f32 %v6634_v20, %v6526_v34 }
 0x140   : > { %5611 = vmatmul.mubr.bf16.gmra.mrb[140].mxu0 %v2543_v5 }
 0x141   : > { %v5252_v30 = vpop.f32.mrb[36].mxu1  ;;  %v5164_v50 = vpop.f32.mrb[36].mxu0 }
 0x142   : > { %v5253_v38 = vpop.f32.mrb[37].mxu1  ;;  %v5165_v58 = vpop.f32.mrb[37].mxu0 }
 0x143   : > { %v5254_v49 = vadd.f32 %v5253_v38, %v5252_v30  ;;  %v5255_v22 = vpop.f32.mrb[38].mxu1  ;;  %v5166_v45 = vadd.f32 %v5165_v58, %v5164_v50  ;;  %v5167_v0 = vpop.f32.mrb[38].mxu0 }
 0x144   : > { %v5256_v59 = vpop.f32.mrb[39].mxu1  ;;  %v5168_v52 = vpop.f32.mrb[39].mxu0 }
 0x145   : > { %v6647_v39 = vadd.f32 %v5254_v49, %v3378_v43  ;;  %v5257_v63 = vadd.f32 %v5256_v59, %v5255_v22  ;;  %v5169_v10 = vadd.f32 %v5168_v52, %v5167_v0  ;;  %v3410_v20 = vadd.f32 %v5166_v45, %v6526_v34 }
 0x147   : > { %v6650_v57 = vadd.f32 %v5257_v63, %v3381_v51 }
 0x149   : > { %v5258_v1 = vpop.f32.mrb[40].mxu1  ;;  %v5170_v11 = vpop.f32.mrb[40].mxu0 }
 0x14a   : > { %v5259_v62 = vpop.f32.mrb[41].mxu1  ;;  %v5171_v18 = vpop.f32.mrb[41].mxu0 }
 0x14b   : > { %v5261_v8 = vpop.f32.mrb[42].mxu1  ;;  %v5260_v14 = vadd.f32 %v5259_v62, %v5258_v1  ;;  %v5172_v23 = vadd.f32 %v5171_v18, %v5170_v11  ;;  %v5173_v25 = vpop.f32.mrb[42].mxu0 }
 0x14c   : > { %v5262_v21 = vpop.f32.mrb[43].mxu1  ;;  %v5174_v35 = vpop.f32.mrb[43].mxu0 }
 0x14d   : > { %v5263_v24 = vadd.f32 %v5262_v21, %v5261_v8  ;;  %v6656_v32 = vadd.f32 %v5260_v14, %v3386_v12  ;;  %v5175_v29 = vadd.f32 %v5174_v35, %v5173_v25 }
 0x14f   : > { %v6660_v37 = vadd.f32 %v5263_v24, %v3389_v27 }
 0x151   : > { %v5264_v30 = vpop.f32.mrb[44].mxu1  ;;  %v5176_v43 = vpop.f32.mrb[44].mxu0 }
 0x152   : > { %v5265_v55 = vpop.f32.mrb[45].mxu1  ;;  %v5177_v48 = vpop.f32.mrb[45].mxu0 }
 0x153   : > { %v5266_v38 = vadd.f32 %v5265_v55, %v5264_v30  ;;  %v5267_v9 = vpop.f32.mrb[46].mxu1  ;;  %v5178_v22 = vadd.f32 %v5177_v48, %v5176_v43  ;;  %v5179_v53 = vpop.f32.mrb[46].mxu0  ;;  %v3413_v43 = vadd.f32 %v5169_v10, %v6526_v34  ;;  %v3418_v10 = vadd.f32 %v5172_v23, %v6526_v34 }
 0x154   : > { %v5268_v49 = vpop.f32.mrb[47].mxu1  ;;  %v5180_v58 = vpop.f32.mrb[47].mxu0 }
 0x155   : > { %v6664_v50 = vadd.f32 %v5266_v38, %v3394_v36  ;;  %v5269_v51 = vadd.f32 %v5268_v49, %v5267_v9  ;;  %v5181_v63 = vadd.f32 %v5180_v58, %v5179_v53 }
 0x157   : > { %v6668_v60 = vadd.f32 %v5269_v51, %v3397_v42 }
 0x159   : > { %v5270_v54 = vpop.f32.mrb[48].mxu1  ;;  %v5334_v52 = vpop.f32.mrb[48].mxu0 }
 0x15a   : > { %v5271_v59 = vpop.f32.mrb[49].mxu1  ;;  %v5335_v11 = vpop.f32.mrb[49].mxu0 }
 0x15b   : > { %v5272_v0 = vadd.f32 %v5271_v59, %v5270_v54  ;;  %v5273_v1 = vpop.f32.mrb[50].mxu1  ;;  %v5336_v12 = vadd.f32 %v5335_v11, %v5334_v52  ;;  %v5337_v14 = vpop.f32.mrb[50].mxu0 }
 0x15c   : > { %v5274_v62 = vpop.f32.mrb[51].mxu1  ;;  %v5338_v21 = vpop.f32.mrb[51].mxu0 }
 0x15d   : > { %v6672_v5 = vadd.f32 %v5272_v0, %v3402_v16  ;;  %v5275_v8 = vadd.f32 %v5274_v62, %v5273_v1  ;;  %v6677_v4 = vadd.f32 %v5336_v12, %v6538_v61  ;;  %v5339_v27 = vadd.f32 %v5338_v21, %v5337_v14 }
 0x15e   : > { %v3421_v62 = vadd.f32 %v5175_v29, %v6526_v34  ;;  %v3426_v29 = vadd.f32 %v5178_v22, %v6526_v34 }
 0x15f   : > { %v6674_v18 = vadd.f32 %v5275_v8, %v3405_v46  ;;  %v6680_v24 = vadd.f32 %v5339_v27, %v6544_v6 }
 0x161   : > { %v5276_v25 = vpop.f32.mrb[52].mxu1  ;;  %v5340_v36 = vpop.f32.mrb[52].mxu0 }
 0x162   : > { %v5277_v30 = vpop.f32.mrb[53].mxu1  ;;  %v5341_v48 = vpop.f32.mrb[53].mxu0 }
 0x163   : > { %v5278_v35 = vadd.f32 %v5277_v30, %v5276_v25  ;;  %v5279_v55 = vpop.f32.mrb[54].mxu1  ;;  %v5342_v61 = vadd.f32 %v5341_v48, %v5340_v36  ;;  %v5343_v42 = vpop.f32.mrb[54].mxu0  ;;  %v3429_v36 = vadd.f32 %v5181_v63, %v6526_v34 }
 0x164   : > { %v5280_v38 = vpop.f32.mrb[55].mxu1  ;;  %v5344_v6 = vpop.f32.mrb[55].mxu0 }
 0x165   : > { %v6684_v9 = vadd.f32 %v5278_v35, %v3410_v20  ;;  %v5281_v49 = vadd.f32 %v5280_v38, %v5279_v55  ;;  %v6689_v53 = vadd.f32 %v5342_v61, %v6560_v44  ;;  %v5345_v54 = vadd.f32 %v5344_v6, %v5343_v42 }
 0x167   : > { %v6686_v51 = vadd.f32 %v5281_v49, %v3413_v43  ;;  %v6692_v58 = vadd.f32 %v5345_v54, %v6566_v56 }
 0x169   : > { %v5282_v45 = vpop.f32.mrb[56].mxu1  ;;  %v5346_v1 = vpop.f32.mrb[56].mxu0 }
 0x16a   : > { %v5283_v59 = vpop.f32.mrb[57].mxu1  ;;  %v5347_v11 = vpop.f32.mrb[57].mxu0 }
 0x16b   : > { %v5284_v16 = vadd.f32 %v5283_v59, %v5282_v45  ;;  %v5285_v0 = vpop.f32.mrb[58].mxu1  ;;  %v5348_v44 = vadd.f32 %v5347_v11, %v5346_v1  ;;  %v5349_v12 = vpop.f32.mrb[58].mxu0  ;;  %v3434_v59 = vadd.f32 %v6455_v31, %v6526_v34  ;;  %v3437_v1 = vadd.f32 %v6461_v40, %v6526_v34 }
 0x16c   : > { %v5286_v52 = vpop.f32.mrb[59].mxu1  ;;  %v5350_v21 = vpop.f32.mrb[59].mxu0  ;;  %v3442_v40 = vadd.f32 %v6473_v3, %v6526_v34 }
 0x16d   : > { %v6696_v46 = vadd.f32 %v5284_v16, %v3418_v10  ;;  %v5287_v8 = vadd.f32 %v5286_v52, %v5285_v0  ;;  %v6701_v56 = vadd.f32 %v5348_v44, %v6582_v28  ;;  %v5351_v27 = vadd.f32 %v5350_v21, %v5349_v12 }
 0x16f   : > { %v6698_v14 = vadd.f32 %v5287_v8, %v3421_v62  ;;  %v6704_v23 = vadd.f32 %v5351_v27, %v6588_v41 }
 0x171   : > { %v5288_v25 = vpop.f32.mrb[60].mxu1  ;;  %v5352_v48 = vpop.f32.mrb[60].mxu0 }
 0x172   : > { %v5289_v30 = vpop.f32.mrb[61].mxu1  ;;  %v5353_v49 = vpop.f32.mrb[61].mxu0 }
 0x173   : > { %v5290_v20 = vadd.f32 %v5289_v30, %v5288_v25  ;;  %v5291_v35 = vpop.f32.mrb[62].mxu1  ;;  %v5354_v61 = vadd.f32 %v5353_v49, %v5352_v48  ;;  %v5355_v42 = vpop.f32.mrb[62].mxu0 }
 0x174   : > { %v5292_v55 = vpop.f32.mrb[63].mxu1  ;;  %v5356_v41 = vpop.f32.mrb[63].mxu0 }
 0x175   : > { %v6708_v38 = vadd.f32 %v5290_v20, %v3426_v29  ;;  %v5293_v43 = vadd.f32 %v5292_v55, %v5291_v35  ;;  %v6713_v54 = vadd.f32 %v5354_v61, %v6604_v15  ;;  %v5357_v22 = vadd.f32 %v5356_v41, %v5355_v42 }
 0x176   : > { %v3445_v55 = vadd.f32 %v6479_v13, %v6526_v34 }
 0x177   : > { %v6710_v28 = vadd.f32 %v5293_v43, %v3429_v36  ;;  %v6718_v16 = vadd.f32 %v5357_v22, %v6610_v26 }
 0x179   : > { %v5294_v6 = vpop.f32.mrb[64].mxu1  ;;  %v5358_v11 = vpop.f32.mrb[64].mxu0 }
 0x17a   : > { %v5295_v45 = vpop.f32.mrb[65].mxu1  ;;  %v5359_v15 = vpop.f32.mrb[65].mxu0 }
 0x17b   : > { %v5296_v63 = vadd.f32 %v5295_v45, %v5294_v6  ;;  %v5297_v10 = vpop.f32.mrb[66].mxu1  ;;  %v5360_v44 = vadd.f32 %v5359_v15, %v5358_v11  ;;  %v5361_v12 = vpop.f32.mrb[66].mxu0  ;;  %v3450_v45 = vadd.f32 %v6489_v33, %v6526_v34 }
 0x17c   : > { %v5298_v0 = vpop.f32.mrb[67].mxu1  ;;  %v5362_v21 = vpop.f32.mrb[67].mxu0 }
 0x17d   : > { %v6722_v52 = vadd.f32 %v5296_v63, %v3434_v59  ;;  %v5299_v62 = vadd.f32 %v5298_v0, %v5297_v10  ;;  %v6727_v31 = vadd.f32 %v5360_v44, %v6626_v2  ;;  %v5363_v27 = vadd.f32 %v5362_v21, %v5361_v12 }
 0x17e   : > { %v3453_v0 = vadd.f32 %v6497_v47, %v6526_v34  ;;  %v3458_v47 = vadd.f32 %v6509_v7, %v6526_v34 }
 0x17f   : > { %v6724_v8 = vadd.f32 %v5299_v62, %v3437_v1  ;;  %v6730_v25 = vadd.f32 %v5363_v27, %v6632_v17 }
 0x181   : > { %v5300_v26 = vpop.f32.mrb[68].mxu1  ;;  %v5364_v2 = vpop.f32.mrb[68].mxu0 }
 0x182   : > { %v5301_v30 = vpop.f32.mrb[69].mxu1  ;;  %v5365_v48 = vpop.f32.mrb[69].mxu0 }
 0x183   : > { %v5302_v29 = vadd.f32 %v5301_v30, %v5300_v26  ;;  %v5303_v20 = vpop.f32.mrb[70].mxu1  ;;  %v5366_v61 = vadd.f32 %v5365_v48, %v5364_v2  ;;  %v5367_v17 = vpop.f32.mrb[70].mxu0 }
 0x184   : > { %v5304_v35 = vpop.f32.mrb[71].mxu1  ;;  %v5368_v42 = vpop.f32.mrb[71].mxu0 }
 0x185   : > { %v6736_v36 = vadd.f32 %v5302_v29, %v3442_v40  ;;  %v5305_v43 = vadd.f32 %v5304_v35, %v5303_v20  ;;  %v6741_v6 = vadd.f32 %v5366_v61, %v6647_v39  ;;  %v5369_v3 = vadd.f32 %v5368_v42, %v5367_v17 }
 0x186   : > { %v3461_v35 = vadd.f32 %v6515_v19, %v6526_v34 }
 0x187   : > { %v6738_v49 = vadd.f32 %v5305_v43, %v3445_v55  ;;  %v6746_v63 = vadd.f32 %v5369_v3, %v6650_v57 }
 0x189   : > { %v5306_v41 = vpop.f32.mrb[72].mxu1  ;;  %v5370_v11 = vpop.f32.mrb[72].mxu0 }
 0x18a   : > { %v5307_v22 = vpop.f32.mrb[73].mxu1  ;;  %v5371_v39 = vpop.f32.mrb[73].mxu0 }
 0x18b   : > { %v5308_v13 = vadd.f32 %v5307_v22, %v5306_v41  ;;  %v5309_v59 = vpop.f32.mrb[74].mxu1  ;;  %v5372_v44 = vadd.f32 %v5371_v39, %v5370_v11  ;;  %v5373_v12 = vpop.f32.mrb[74].mxu0 }
 0x18c   : > { %v5310_v10 = vpop.f32.mrb[75].mxu1  ;;  %v5374_v21 = vpop.f32.mrb[75].mxu0 }
 0x18d   : > { %v6750_v1 = vadd.f32 %v5308_v13, %v3450_v45  ;;  %v5311_v62 = vadd.f32 %v5310_v10, %v5309_v59  ;;  %v6755_v33 = vadd.f32 %v5372_v44, %v6656_v32  ;;  %v5375_v27 = vadd.f32 %v5374_v21, %v5373_v12 }
 0x18f   : > { %v6752_v15 = vadd.f32 %v5311_v62, %v3453_v0  ;;  %v6758_v26 = vadd.f32 %v5375_v27, %v6660_v37 }
 0x191   : > { %v5312_v57 = vpop.f32.mrb[76].mxu1  ;;  %v5376_v32 = vpop.f32.mrb[76].mxu0 }
 0x192   : > { %v5313_v30 = vpop.f32.mrb[77].mxu1  ;;  %v5377_v2 = vpop.f32.mrb[77].mxu0 }
 0x193   : > { %v5314_v40 = vadd.f32 %v5313_v30, %v5312_v57  ;;  %v5315_v29 = vpop.f32.mrb[78].mxu1  ;;  %v5378_v61 = vadd.f32 %v5377_v2, %v5376_v32  ;;  %v5379_v37 = vpop.f32.mrb[78].mxu0 }
 0x194   : > { %v5316_v20 = vpop.f32.mrb[79].mxu1  ;;  %v5380_v17 = vpop.f32.mrb[79].mxu0 }
 0x195   : > { %v6764_v55 = vadd.f32 %v5314_v40, %v3458_v47  ;;  %v5317_v43 = vadd.f32 %v5316_v20, %v5315_v29  ;;  %v6769_v42 = vadd.f32 %v5378_v61, %v6664_v50  ;;  %v5381_v7 = vadd.f32 %v5380_v17, %v5379_v37 }
 0x197   : > { %v6766_v48 = vadd.f32 %v5317_v43, %v3461_v35  ;;  %v6772_v3 = vadd.f32 %v5381_v7, %v6668_v60 }
 0x199   : > { %v5446_v41 = vpop.f32.mrb[80].mxu1  ;;  %v5382_v45 = vpop.f32.mrb[80].mxu0 }
 0x19a   : > { %v5447_v22 = vpop.f32.mrb[81].mxu1  ;;  %v5383_v59 = vpop.f32.mrb[81].mxu0 }
 0x19b   : > { %v5448_v19 = vadd.f32 %v5447_v22, %v5446_v41  ;;  %v5449_v34 = vpop.f32.mrb[82].mxu1  ;;  %v5384_v62 = vadd.f32 %v5383_v59, %v5382_v45  ;;  %v5385_v11 = vpop.f32.mrb[82].mxu0 }
 0x19c   : > { %v5450_v13 = vpop.f32.mrb[83].mxu1  ;;  %v5386_v39 = vpop.f32.mrb[83].mxu0 }
 0x19d   : > { %v5451_v10 = vadd.f32 %v5450_v13, %v5449_v34  ;;  %v6775_v0 = vadd.f32 %v5448_v19, %v6677_v4  ;;  %v6781_v44 = vadd.f32 %v5384_v62, %v6672_v5  ;;  %v5387_v60 = vadd.f32 %v5386_v39, %v5385_v11 }
 0x19f   : > { %v6778_v50 = vadd.f32 %v5451_v10, %v6680_v24  ;;  %v6784_v12 = vadd.f32 %v5387_v60, %v6674_v18 }
 0x1a1   : > { %v5452_v21 = vpop.f32.mrb[84].mxu1  ;;  %v5388_v57 = vpop.f32.mrb[84].mxu0 }
 0x1a2   : > { %v5453_v27 = vpop.f32.mrb[85].mxu1  ;;  %v5389_v4 = vpop.f32.mrb[85].mxu0 }
 0x1a3   : > { %v5454_v30 = vadd.f32 %v5453_v27, %v5452_v21  ;;  %v5455_v47 = vpop.f32.mrb[86].mxu1  ;;  %v5390_v29 = vadd.f32 %v5389_v4, %v5388_v57  ;;  %v5391_v20 = vpop.f32.mrb[86].mxu0 }
 0x1a4   : > { %v5456_v40 = vpop.f32.mrb[87].mxu1  ;;  %v5392_v43 = vpop.f32.mrb[87].mxu0 }
 0x1a5   : > { %v5457_v35 = vadd.f32 %v5456_v40, %v5455_v47  ;;  %v6787_v24 = vadd.f32 %v5454_v30, %v6689_v53  ;;  %v6790_v5 = vadd.f32 %v5390_v29, %v6684_v9  ;;  %v5393_v32 = vadd.f32 %v5392_v43, %v5391_v20 }
 0x1a7   : > { %v6793_v18 = vadd.f32 %v5457_v35, %v6692_v58  ;;  %v6796_v2 = vadd.f32 %v5393_v32, %v6686_v51 }
 0x1a9   : > { %v5458_v61 = vpop.f32.mrb[88].mxu1  ;;  %v5394_v17 = vpop.f32.mrb[88].mxu0 }
 0x1aa   : > { %v5459_v37 = vpop.f32.mrb[89].mxu1  ;;  %v5395_v22 = vpop.f32.mrb[89].mxu0 }
 0x1ab   : > { %v5460_v7 = vadd.f32 %v5459_v37, %v5458_v61  ;;  %v5461_v41 = vpop.f32.mrb[90].mxu1  ;;  %v5396_v53 = vadd.f32 %v5395_v22, %v5394_v17  ;;  %v5397_v34 = vpop.f32.mrb[90].mxu0 }
 0x1ac   : > { %v5462_v19 = vpop.f32.mrb[91].mxu1  ;;  %v5398_v13 = vpop.f32.mrb[91].mxu0 }
 0x1ad   : > { %v5463_v45 = vadd.f32 %v5462_v19, %v5461_v41  ;;  %v6799_v9 = vadd.f32 %v5460_v7, %v6701_v56  ;;  %v6802_v58 = vadd.f32 %v5396_v53, %v6696_v46  ;;  %v5399_v59 = vadd.f32 %v5398_v13, %v5397_v34 }
 0x1af   : > { %v6805_v51 = vadd.f32 %v5463_v45, %v6704_v23  ;;  %v6808_v10 = vadd.f32 %v5399_v59, %v6698_v14 }
 0x1b1   : > { %v5464_v62 = vpop.f32.mrb[92].mxu1  ;;  %v5400_v11 = vpop.f32.mrb[92].mxu0 }
 0x1b2   : > { %v5465_v39 = vpop.f32.mrb[93].mxu1  ;;  %v5401_v60 = vpop.f32.mrb[93].mxu0 }
 0x1b3   : > { %v5466_v21 = vadd.f32 %v5465_v39, %v5464_v62  ;;  %v5467_v27 = vpop.f32.mrb[94].mxu1  ;;  %v5402_v57 = vadd.f32 %v5401_v60, %v5400_v11  ;;  %v5403_v56 = vpop.f32.mrb[94].mxu0 }
 0x1b4   : > { %v5468_v30 = vpop.f32.mrb[95].mxu1  ;;  %v5404_v47 = vpop.f32.mrb[95].mxu0 }
 0x1b5   : > { %v5469_v4 = vadd.f32 %v5468_v30, %v5467_v27  ;;  %v6811_v46 = vadd.f32 %v5466_v21, %v6713_v54  ;;  %v6814_v23 = vadd.f32 %v5402_v57, %v6708_v38  ;;  %v5405_v40 = vadd.f32 %v5404_v47, %v5403_v56 }
 0x1b7   : > { %v6817_v14 = vadd.f32 %v5469_v4, %v6718_v16  ;;  %v6820_v29 = vadd.f32 %v5405_v40, %v6710_v28 }
 0x1b9   : > { %v5470_v20 = vpop.f32.mrb[96].mxu1  ;;  %v5406_v35 = vpop.f32.mrb[96].mxu0 }
 0x1ba   : > { %v5471_v43 = vpop.f32.mrb[97].mxu1  ;;  %v5407_v32 = vpop.f32.mrb[97].mxu0 }
 0x1bb   : > { %v5472_v61 = vadd.f32 %v5471_v43, %v5470_v20  ;;  %v5473_v37 = vpop.f32.mrb[98].mxu1  ;;  %v5408_v17 = vadd.f32 %v5407_v32, %v5406_v35  ;;  %v5409_v7 = vpop.f32.mrb[98].mxu0 }
 0x1bc   : > { %v5474_v54 = vpop.f32.mrb[99].mxu1  ;;  %v5410_v41 = vpop.f32.mrb[99].mxu0 }
 0x1bd   : > { %v5475_v22 = vadd.f32 %v5474_v54, %v5473_v37  ;;  %v6823_v38 = vadd.f32 %v5472_v61, %v6727_v31  ;;  %v6826_v16 = vadd.f32 %v5408_v17, %v6722_v52  ;;  %v5411_v19 = vadd.f32 %v5410_v41, %v5409_v7 }
 0x1bf   : > { %v6829_v28 = vadd.f32 %v5475_v22, %v6730_v25  ;;  %v6832_v53 = vadd.f32 %v5411_v19, %v6724_v8 }
 0x1c1   : > { %v5476_v34 = vpop.f32.mrb[100].mxu1  ;;  %v5412_v45 = vpop.f32.mrb[100].mxu0 }
 0x1c2   : > { %v5477_v13 = vpop.f32.mrb[101].mxu1  ;;  %v5413_v59 = vpop.f32.mrb[101].mxu0 }
 0x1c3   : > { %v5478_v62 = vadd.f32 %v5477_v13, %v5476_v34  ;;  %v5479_v11 = vpop.f32.mrb[102].mxu1  ;;  %v5414_v39 = vadd.f32 %v5413_v59, %v5412_v45  ;;  %v5415_v60 = vpop.f32.mrb[102].mxu0 }
 0x1c4   : > { %v5480_v31 = vpop.f32.mrb[103].mxu1  ;;  %v5416_v21 = vpop.f32.mrb[103].mxu0 }
 0x1c5   : > { %v5481_v27 = vadd.f32 %v5480_v31, %v5479_v11  ;;  %v6835_v52 = vadd.f32 %v5478_v62, %v6741_v6  ;;  %v6838_v25 = vadd.f32 %v5414_v39, %v6736_v36  ;;  %v5417_v57 = vadd.f32 %v5416_v21, %v5415_v60 }
 0x1c7   : > { %v6841_v8 = vadd.f32 %v5481_v27, %v6746_v63  ;;  %v6844_v56 = vadd.f32 %v5417_v57, %v6738_v49 }
 0x1c9   : > { %v5482_v30 = vpop.f32.mrb[104].mxu1  ;;  %v5418_v47 = vpop.f32.mrb[104].mxu0 }
 0x1ca   : > { %v5483_v4 = vpop.f32.mrb[105].mxu1  ;;  %v5419_v40 = vpop.f32.mrb[105].mxu0 }
 0x1cb   : > { %v5484_v20 = vadd.f32 %v5483_v4, %v5482_v30  ;;  %v5485_v35 = vpop.f32.mrb[106].mxu1  ;;  %v5420_v43 = vadd.f32 %v5419_v40, %v5418_v47  ;;  %v5421_v32 = vpop.f32.mrb[106].mxu0 }
 0x1cc   : > { %v5486_v6 = vpop.f32.mrb[107].mxu1  ;;  %v5422_v61 = vpop.f32.mrb[107].mxu0 }
 0x1cd   : > { %v5487_v37 = vadd.f32 %v5486_v6, %v5485_v35  ;;  %v6847_v36 = vadd.f32 %v5484_v20, %v6755_v33  ;;  %v6850_v63 = vadd.f32 %v5420_v43, %v6750_v1  ;;  %v5423_v17 = vadd.f32 %v5422_v61, %v5421_v32 }
 0x1cf   : > { %v6853_v49 = vadd.f32 %v5487_v37, %v6758_v26  ;;  %v6856_v7 = vadd.f32 %v5423_v17, %v6752_v15 }
 0x1d1   : > { %v5488_v54 = vpop.f32.mrb[108].mxu1  ;;  %v5424_v22 = vpop.f32.mrb[108].mxu0 }
 0x1d2   : > { %v5489_v41 = vpop.f32.mrb[109].mxu1  ;;  %v5425_v45 = vpop.f32.mrb[109].mxu0 }
 0x1d3   : > { %v5490_v19 = vadd.f32 %v5489_v41, %v5488_v54  ;;  %v5491_v34 = vpop.f32.mrb[110].mxu1  ;;  %v5426_v59 = vadd.f32 %v5425_v45, %v5424_v22  ;;  %v5427_v33 = vpop.f32.mrb[110].mxu0 }
 0x1d4   : > { %v5492_v13 = vpop.f32.mrb[111].mxu1  ;;  %v5428_v11 = vpop.f32.mrb[111].mxu0 }
 0x1d5   : > { %v5493_v62 = vadd.f32 %v5492_v13, %v5491_v34  ;;  %v6859_v1 = vadd.f32 %v5490_v19, %v6769_v42  ;;  %v6862_v26 = vadd.f32 %v5426_v59, %v6764_v55  ;;  %v5429_v15 = vadd.f32 %v5428_v11, %v5427_v33 }
 0x1d7   : > { %v6865_v39 = vadd.f32 %v5493_v62, %v6772_v3  ;;  %v6868_v60 = vadd.f32 %v5429_v15, %v6766_v48 }
 0x1d9   : > { %v5494_v31 = vpop.f32.mrb[112].mxu1  ;;  %v5584_v27 = vpop.f32.mrb[112].mxu0 }
 0x1da   : > { %v5495_v21 = vpop.f32.mrb[113].mxu1  ;;  %v3990_v42 = vadd.f32 %v5584_v27, %v6787_v24  ;;  %v3981_v47 = vpop.f32.mrb[113].mxu0 }
 0x1db   : > { %v5496_v57 = vadd.f32 %v5495_v21, %v5494_v31  ;;  %v5497_v30 = vpop.f32.mrb[114].mxu1  ;;  %v3982_v55 = vadd.f32 %v3981_v47, %v6775_v0  ;;  %v5585_v40 = vpop.f32.mrb[114].mxu0 }
 0x1dc   : > { %v5498_v4 = vpop.f32.mrb[115].mxu1  ;;  %v3993_v48 = vadd.f32 %v5585_v40, %v6793_v18  ;;  %v3984_v3 = vpop.f32.mrb[115].mxu0  ;;  %v4110_v6 = vmax.f32 %v3990_v42, 0.0 }
 0x1dd   : > { %v5499_v20 = vadd.f32 %v5498_v4, %v5497_v30  ;;  %v6873_v35 = vadd.f32 %v5496_v57, %v6781_v44  ;;  %v3985_v43 = vadd.f32 %v3984_v3, %v6778_v50  ;;  %v4108_v61 = vmax.f32 %v3982_v55, 0.0 }
 0x1de   : > { %v4111_v24 = vmax.f32 %v3993_v48, 0.0 }
 0x1df   : > { %v6879_v32 = vadd.f32 %v5499_v20, %v6784_v12  ;;  %v4109_v0 = vmax.f32 %v3985_v43, 0.0 }
 0x1e0   : > { %v5007_v37 = vpack.c.bf16 %v4111_v24, %v4110_v6 }
 0x1e1   : > { %v5500_v44 = vpop.f32.mrb[116].mxu1  ;;  %v5002_v17 = vpack.c.bf16 %v4109_v0, %v4108_v61  ;;  %v5588_v12 = vpop.f32.mrb[116].mxu0 }
 0x1e2   : > { %v5501_v18 = vpop.f32.mrb[117].mxu1  ;;  %5079 = vst [vmem:[%s6884_s21 + $0x8] sm:$0xff] %v5007_v37   ;;  %v4006_v22 = vadd.f32 %v5588_v12, %v6811_v46  ;;  %v3997_v19 = vpop.f32.mrb[117].mxu0 }
 0x1e3   : > { %v5502_v54 = vadd.f32 %v5501_v18, %v5500_v44  ;;  %v5503_v50 = vpop.f32.mrb[118].mxu1  ;;  %5003 = vst [vmem:[%s6884_s21] sm:$0xff] %v5002_v17   ;;  %v3998_v13 = vadd.f32 %v3997_v19, %v6799_v9  ;;  %v5589_v59 = vpop.f32.mrb[118].mxu0 }
 0x1e4   : > { %v5504_v41 = vpop.f32.mrb[119].mxu1  ;;  %v4009_v33 = vadd.f32 %v5589_v59, %v6817_v14  ;;  %v4000_v62 = vpop.f32.mrb[119].mxu0  ;;  %v4114_v31 = vmax.f32 %v4006_v22, 0.0 }
 0x1e5   : > { %v5505_v34 = vadd.f32 %v5504_v41, %v5503_v50  ;;  %v6890_v45 = vadd.f32 %v5502_v54, %v6790_v5  ;;  %v4001_v15 = vadd.f32 %v4000_v62, %v6805_v51  ;;  %v4112_v21 = vmax.f32 %v3998_v13, 0.0 }
 0x1e6   : > { %v4115_v46 = vmax.f32 %v4009_v33, 0.0 }
 0x1e7   : > { %v6895_v11 = vadd.f32 %v5505_v34, %v6796_v2  ;;  %v4113_v27 = vmax.f32 %v4001_v15, 0.0 }
 0x1e8   : > { %v5017_v5 = vpack.c.bf16 %v4115_v46, %v4114_v31 }
 0x1e9   : > { %v5506_v57 = vpop.f32.mrb[120].mxu1  ;;  %v5012_v42 = vpack.c.bf16 %v4113_v27, %v4112_v21  ;;  %v5592_v4 = vpop.f32.mrb[120].mxu0 }
 0x1ea   : > { %v5507_v30 = vpop.f32.mrb[121].mxu1  ;;  %5081 = vst [vmem:[%s6884_s21 + $0x18] sm:$0xff] %v5017_v5   ;;  %v4022_v55 = vadd.f32 %v5592_v4, %v6835_v52  ;;  %v4013_v2 = vpop.f32.mrb[121].mxu0 }
 0x1eb   : > { %v5508_v9 = vadd.f32 %v5507_v30, %v5506_v57  ;;  %v5509_v47 = vpop.f32.mrb[122].mxu1  ;;  %5080 = vst [vmem:[%s6884_s21 + $0x10] sm:$0xff] %v5012_v42   ;;  %v4014_v20 = vadd.f32 %v4013_v2, %v6823_v38  ;;  %v5593_v48 = vpop.f32.mrb[122].mxu0 }
 0x1ec   : > { %v5510_v14 = vpop.f32.mrb[123].mxu1  ;;  %v4025_v3 = vadd.f32 %v5593_v48, %v6841_v8  ;;  %v4016_v43 = vpop.f32.mrb[123].mxu0  ;;  %v4118_v61 = vmax.f32 %v4022_v55, 0.0 }
 0x1ed   : > { %v5511_v40 = vadd.f32 %v5510_v14, %v5509_v47  ;;  %v6902_v51 = vadd.f32 %v5508_v9, %v6802_v58  ;;  %v4017_v24 = vadd.f32 %v4016_v43, %v6829_v28  ;;  %v4116_v0 = vmax.f32 %v4014_v20, 0.0 }
 0x1ee   : > { %v4119_v52 = vmax.f32 %v4025_v3, 0.0 }
 0x1ef   : > { %v6907_v6 = vadd.f32 %v5511_v40, %v6808_v10  ;;  %v4117_v44 = vmax.f32 %v4017_v24, 0.0 }
 0x1f0   : > { %v5027_v58 = vpack.c.bf16 %v4119_v52, %v4118_v61 }
 0x1f1   : > { %v5512_v37 = vpop.f32.mrb[124].mxu1  ;;  %v5022_v17 = vpack.c.bf16 %v4117_v44, %v4116_v0  ;;  %v5596_v50 = vpop.f32.mrb[124].mxu0 }
 0x1f2   : > { %v5513_v18 = vpop.f32.mrb[125].mxu1  ;;  %5083 = vst [vmem:[%s6884_s21 + $0x28] sm:$0xff] %v5027_v58   ;;  %v4038_v12 = vadd.f32 %v5596_v50, %v6859_v1  ;;  %v4029_v10 = vpop.f32.mrb[125].mxu0 }
 0x1f3   : > { %v5514_v38 = vadd.f32 %v5513_v18, %v5512_v37  ;;  %v5515_v54 = vpop.f32.mrb[126].mxu1  ;;  %5082 = vst [vmem:[%s6884_s21 + $0x20] sm:$0xff] %v5022_v17   ;;  %v4030_v22 = vadd.f32 %v4029_v10, %v6847_v36  ;;  %v5597_v19 = vpop.f32.mrb[126].mxu0 }
 0x1f4   : > { %v5516_v8 = vpop.f32.mrb[127].mxu1  ;;  %v4041_v34 = vadd.f32 %v5597_v19, %v6865_v39  ;;  %v4032_v13 = vpop.f32.mrb[127].mxu0  ;;  %v4122_v62 = vmax.f32 %v4038_v12, 0.0 }
 0x1f5   : > { %v5517_v41 = vadd.f32 %v5516_v8, %v5515_v54  ;;  %v3909_v28 = vadd.f32 %v5514_v38, %v6814_v23  ;;  %v4033_v33 = vadd.f32 %v4032_v13, %v6853_v49  ;;  %v4120_v31 = vmax.f32 %v4030_v22, 0.0 }
 0x1f6   : > { %v4123_v15 = vmax.f32 %v4041_v34, 0.0 }
 0x1f7   : > { %v3912_v59 = vadd.f32 %v5517_v41, %v6820_v29  ;;  %v4121_v1 = vmax.f32 %v4033_v33, 0.0 }
 0x1f8   : > { %v5037_v21 = vpack.c.bf16 %v4123_v15, %v4122_v62 }
 0x1f9   : > { %v5518_v46 = vpop.f32.mrb[128].mxu1  ;;  %v5032_v23 = vpack.c.bf16 %v4121_v1, %v4120_v31  ;;  %v5600_v5 = vpop.f32.mrb[128].mxu0 }
 0x1fa   : > { %v5519_v27 = vpop.f32.mrb[129].mxu1  ;;  %5085 = vst [vmem:[%s6884_s21 + $0x38] sm:$0xff] %v5037_v21   ;;  %v4054_v39 = vadd.f32 %v5600_v5, %v6890_v45  ;;  %v4045_v42 = vpop.f32.mrb[129].mxu0 }
 0x1fb   : > { %v5520_v57 = vadd.f32 %v5519_v27, %v5518_v46  ;;  %v5521_v36 = vpop.f32.mrb[130].mxu1  ;;  %5084 = vst [vmem:[%s6884_s21 + $0x30] sm:$0xff] %v5032_v23   ;;  %v4046_v9 = vadd.f32 %v4045_v42, %v6873_v35  ;;  %v5601_v47 = vpop.f32.mrb[130].mxu0 }
 0x1fc   : > { %v5522_v30 = vpop.f32.mrb[131].mxu1  ;;  %v4057_v4 = vadd.f32 %v5601_v47, %v6895_v11  ;;  %v4048_v14 = vpop.f32.mrb[131].mxu0  ;;  %v4126_v40 = vmax.f32 %v4054_v39, 0.0 }
 0x1fd   : > { %v5523_v29 = vadd.f32 %v5522_v30, %v5521_v36  ;;  %v3917_v49 = vadd.f32 %v5520_v57, %v6826_v16  ;;  %v4049_v2 = vadd.f32 %v4048_v14, %v6879_v32  ;;  %v4124_v48 = vmax.f32 %v4046_v9, 0.0 }
 0x1fe   : > { %v4127_v20 = vmax.f32 %v4057_v4, 0.0 }
 0x1ff   : > { %v3920_v55 = vadd.f32 %v5523_v29, %v6832_v53  ;;  %v4125_v45 = vmax.f32 %v4049_v2, 0.0 }
 0x200   : > { %v5047_v43 = vpack.c.bf16 %v4127_v20, %v4126_v40 }
 0x201   : > { %v5524_v3 = vpop.f32.mrb[132].mxu1  ;;  %v5042_v16 = vpack.c.bf16 %v4125_v45, %v4124_v48 }
 0x202   : > { %v5525_v24 = vpop.f32.mrb[133].mxu1  ;;  %5087 = vst [vmem:[%s6884_s21 + $0x48] sm:$0xff] %v5047_v43  }
 0x203   : > { %v5526_v61 = vadd.f32 %v5525_v24, %v5524_v3  ;;  %v5527_v35 = vpop.f32.mrb[134].mxu1  ;;  %v5604_v52 = vpop.f32.mrb[132].mxu0  ;;  %5086 = vst [vmem:[%s6884_s21 + $0x40] sm:$0xff] %v5042_v16  }
 0x204   : > { %v5528_v0 = vpop.f32.mrb[135].mxu1  ;;  %v4070_v11 = vadd.f32 %v5604_v52, %v3909_v28  ;;  %v4061_v44 = vpop.f32.mrb[133].mxu0 }
 0x205   : > { %v5529_v37 = vadd.f32 %v5528_v0, %v5527_v35  ;;  %v3925_v53 = vadd.f32 %v5526_v61, %v6838_v25  ;;  %v4062_v32 = vadd.f32 %v4061_v44, %v6902_v51  ;;  %v5605_v58 = vpop.f32.mrb[134].mxu0 }
 0x206   : > { %v4073_v18 = vadd.f32 %v5605_v58, %v3912_v59  ;;  %v4064_v17 = vpop.f32.mrb[135].mxu0  ;;  %v4130_v50 = vmax.f32 %v4070_v11, 0.0 }
 0x207   : > { %v3928_v38 = vadd.f32 %v5529_v37, %v6844_v56  ;;  %v4065_v54 = vadd.f32 %v4064_v17, %v6907_v6  ;;  %v4128_v12 = vmax.f32 %v4062_v32, 0.0 }
 0x208   : > { %v4131_v8 = vmax.f32 %v4073_v18, 0.0 }
 0x209   : > { %v4129_v10 = vmax.f32 %v4065_v54, 0.0  ;;  %v5530_v41 = vpop.f32.mrb[136].mxu1 }
 0x20a   : > { %v5057_v28 = vpack.c.bf16 %v4131_v8, %v4130_v50  ;;  %v5531_v22 = vpop.f32.mrb[137].mxu1 }
 0x20b   : > { %v5052_v19 = vpack.c.bf16 %v4129_v10, %v4128_v12  ;;  %v5532_v25 = vadd.f32 %v5531_v22, %v5530_v41  ;;  %v5533_v34 = vpop.f32.mrb[138].mxu1  ;;  %v5608_v51 = vpop.f32.mrb[136].mxu0 }
 0x20c   : > { %5089 = vst [vmem:[%s6884_s21 + $0x58] sm:$0xff] %v5057_v28   ;;  %v5534_v13 = vpop.f32.mrb[139].mxu1  ;;  %v4086_v59 = vadd.f32 %v5608_v51, %v3925_v53  ;;  %v4077_v33 = vpop.f32.mrb[137].mxu0 }
 0x20d   : > { %5088 = vst [vmem:[%s6884_s21 + $0x50] sm:$0xff] %v5052_v19   ;;  %v5535_v62 = vadd.f32 %v5534_v13, %v5533_v34  ;;  %v3933_v56 = vadd.f32 %v5532_v25, %v6850_v63  ;;  %v4078_v6 = vadd.f32 %v4077_v33, %v3917_v49  ;;  %v5609_v15 = vpop.f32.mrb[138].mxu0 }
 0x20e   : > { %v4089_v31 = vadd.f32 %v5609_v15, %v3928_v38  ;;  %v4080_v1 = vpop.f32.mrb[139].mxu0  ;;  %v4134_v27 = vmax.f32 %v4086_v59, 0.0 }
 0x20f   : > { %v3936_v46 = vadd.f32 %v5535_v62, %v6856_v7  ;;  %v4081_v21 = vadd.f32 %v4080_v1, %v3920_v55  ;;  %v4132_v57 = vmax.f32 %v4078_v6, 0.0 }
 0x210   : > { %v4135_v23 = vmax.f32 %v4089_v31, 0.0 }
 0x211   : > { %v4133_v36 = vmax.f32 %v4081_v21, 0.0  ;;  %v5536_v5 = vpop.f32.mrb[140].mxu1 }
 0x212   : > { %v5067_v30 = vpack.c.bf16 %v4135_v23, %v4134_v27  ;;  %v5537_v39 = vpop.f32.mrb[141].mxu1 }
 0x213   : > { %v5062_v42 = vpack.c.bf16 %v4133_v36, %v4132_v57  ;;  %v5538_v29 = vadd.f32 %v5537_v39, %v5536_v5  ;;  %v5539_v9 = vpop.f32.mrb[142].mxu1  ;;  %v5612_v63 = vpop.f32.mrb[140].mxu0 }
 0x214   : > { %5091 = vst [vmem:[%s6884_s21 + $0x68] sm:$0xff] %v5067_v30   ;;  %v5540_v49 = vpop.f32.mrb[143].mxu1  ;;  %v4093_v4 = vpop.f32.mrb[141].mxu0 }
 0x215   : > { %5090 = vst [vmem:[%s6884_s21 + $0x60] sm:$0xff] %v5062_v42   ;;  %v3941_v47 = vadd.f32 %v5538_v29, %v6862_v26  ;;  %v5541_v7 = vadd.f32 %v5540_v49, %v5539_v9  ;;  %v4094_v14 = vadd.f32 %v4093_v4, %v3933_v56  ;;  %v5613_v55 = vpop.f32.mrb[142].mxu0 }
 0x216   : > { %v4096_v20 = vpop.f32.mrb[143].mxu0 }
 0x217   : > { %v4102_v2 = vadd.f32 %v5612_v63, %v3941_v47  ;;  %v3944_v40 = vadd.f32 %v5541_v7, %v6868_v60  ;;  %v4097_v48 = vadd.f32 %v4096_v20, %v3936_v46  ;;  %v4136_v3 = vmax.f32 %v4094_v14, 0.0 }
 0x219   : > { %v4105_v45 = vadd.f32 %v5613_v55, %v3944_v40  ;;  %v4137_v43 = vmax.f32 %v4097_v48, 0.0  ;;  %v4138_v24 = vmax.f32 %v4102_v2, 0.0 }
 0x21b   : > { %v4139_v16 = vmax.f32 %v4105_v45, 0.0  ;;  %v5072_v61 = vpack.c.bf16 %v4137_v43, %v4136_v3 }
 0x21d   : > { %v5077_v35 = vpack.c.bf16 %v4139_v16, %v4138_v24  ;;  %5092 = vst [vmem:[%s6884_s21 + $0x70] sm:$0xff] %v5072_v61  }
 0x21f   : > { %5093 = vst [vmem:[%s6884_s21 + $0x78] sm:$0xff] %v5077_v35  }
 0x220 PF: > { %s13_s12 = sadd.s32 1, %s5957_s12  }
 0x221   : > { %p10_p4 = scmp.ge.s32.totalorder %s13_s12, 4  }
 0x223   :  { %12 = sbr.rel (!%p10_p4) target bundleno = 1 (0x1), region = 64 }

// kernel: clip_feature_extractor_forward.28
= control target key start
LH: loop header
LB: loop body
LE: loop exit
PB: predicated region body
PF: predicated region fallthrough
CT: control target
= control target key end

     0   :  { %s687_s12 = smov 0   ;;  %s689_s13 = smov 0   ;;  %s790_s0 = inlined_call_operand.vmem [shape: bf16[32,512], index: 0, kind: input, shape index: {}]   ;;  %s791_s1 = inlined_call_operand.vmem [shape: bf16[128,128], index: 1, kind: input, shape index: {}]   ;;  %s792_s2 = inlined_call_operand.vmem [shape: f32[1,128], index: 2, kind: input, shape index: {}]   ;;  %s793_s3 = inlined_call_operand.vmem [shape: bf16[32,128], index: 3, kind: output, shape index: {}]  }
   0x1   :  { %s691_s14 = smov 0   ;;  %s693_s15 = smov 0  }
   0x2   :  { %s695_s16 = smov 0  }
   0x3 LB: > { %s22_s17 = sadd.s32 1, %s660_s15  ;;  %p41_p1 = scmp.ne.s32.totalorder %s652_s13, %s648_s12  ;;  %s664_s16 = sphi %s695_s16, %s13_s16   ;;  %s660_s15 = sphi %s693_s15, %s797_s15   ;;  %s656_s14 = sphi %s691_s14, %s796_s14   ;;  %s652_s13 = sphi %s689_s13, %s795_s13   ;;  %s648_s12 = sphi %s687_s12, %s794_s12  }
   0x4   : > { %p23_p0 = scmp.ge.s32.totalorder %s22_s17, 4  ;;  %p42_p2 = scmp.eq.s32.totalorder %s664_s16, 0 }
   0x5   : > { %s34_s19 = sadd.s32 1, %s652_s13  ;;  %p504_p5 = scmp.ge.s32.totalorder %s664_s16, 4 }
   0x6   : > { %s799_s17 = smov (%p23_p0, %s22_s17), 0  ;;  %p43_p3 = por %p42_p2, %p41_p1 }
   0x7   : > { %s30_s18 = ssub.s32 %s660_s15, %s799_s17  ;;  %141 = sbr.rel (%p504_p5) target bundleno = 21 (0x15), region = 24 }
   0x8   : > { %p32_p4 = scmp.eq.s32.totalorder %s30_s18, 0 }
   0xa   : > { %s722_s20 = scalar_select %p32_p4, %s652_s13, %s34_s19  }
   0xe   : > { %144 = sbr.rel (!%p43_p3) target bundleno = 21 (0x15), region = 28  ;;  %s146_s21 = sand.u32 (%p43_p3), 1, %s652_s13  }
   0xf   : > { %s506_s22 = sshll.u32 (%p43_p3), %s660_s15, 2  ;;  %s505_s23 = sshll.u32 (%p43_p3), %s146_s21, 4 }
  0x10   : > { %s153_s26 = scalar_lea.vmem (%p43_p3), %s790_s0, %s506_s22  ;;  %s148_s27 = scalar_lea.vmem (%p43_p3), [#allocation3], %s505_s23 }
  0x11   : > { %v169_v0 = vld [vmem:[%s153_s26] sm:$0xf] (%p43_p3)  ;;  %v171_v1 = vld [vmem:[%s153_s26 + $0x10] sm:$0xf] (%p43_p3) }
  0x12   : > { %170 = vst [vmem:[%s148_s27] sm:$0xf] (%p43_p3), %v169_v0  ;;  %172 = vst [vmem:[%s148_s27 + $0x4] sm:$0xf] (%p43_p3), %v171_v1  ;;  %v173_v2 = vld [vmem:[%s153_s26 + $0x20] sm:$0xf] (%p43_p3) }
  0x13   : > { %v175_v3 = vld [vmem:[%s153_s26 + $0x30] sm:$0xf] (%p43_p3)  ;;  %174 = vst [vmem:[%s148_s27 + $0x8] sm:$0xf] (%p43_p3), %v173_v2 }
  0x14   : > { %176 = vst [vmem:[%s148_s27 + $0xc] sm:$0xf] (%p43_p3), %v175_v3 }
  0x15 PF: > { %p507_p6 = scmp.ge.s32.totalorder %s664_s16, 1  ;;  %p206_p7 = scmp.lt.s32.totalorder %s664_s16, 5 }
  0x17   : > { %p207_p8 = pnand %p507_p6, %p206_p7 }
  0x18   : > { %s213_s28 = sand.u32 (!%p207_p8), 1, %s648_s12   ;;  %p509_p9 = scmp.ne.s32.totalorder (!%p207_p8), %s656_s14, 0 }
  0x19   : > { %210 = sbr.rel (%p207_p8) target bundleno = 302 (0x12e), region = 69  ;;  %s733_s29 = sshll.u32 (!%p207_p8), %s213_s28, 4 }
  0x1a   : > { %s215_s30 = scalar_lea.vmem (!%p207_p8), [#allocation3], %s733_s29 }
  0x20   : > { %247 = sbr.rel (%p509_p9) target bundleno = 39 (0x27), region = 77  ;;  %v666_v4 = vmov (!%p509_p9), 0.0  }
  0x21   : > { %248 = vst [vmem:[#allocation2] sm:$0xff] (!%p509_p9), %v666_v4  ;;  %249 = vst [vmem:[#allocation2 + $0x8] sm:$0xff] (!%p509_p9), %v666_v4 }
  0x22   : > { %250 = vst [vmem:[#allocation2 + $0x10] sm:$0xff] (!%p509_p9), %v666_v4  ;;  %251 = vst [vmem:[#allocation2 + $0x18] sm:$0xff] (!%p509_p9), %v666_v4 }
  0x27 PF: > { %v616_v5 = vld [vmem:[%s791_s1] sm:$0xff]   ;;  %v617_v6 = vld [vmem:[%s791_s1 + $0x8] sm:$0xff]   ;;  %v618_v7 = vld [vmem:[%s791_s1 + $0x10] sm:$0xff]   ;;  %p520_p10 = scmp.ne.s32.totalorder %s656_s14, 3 }
  0x28   : > { %555 = vmatprep.subr.bf16.mxu0 %v616_v5  ;;  %v619_v8 = vld [vmem:[%s791_s1 + $0x18] sm:$0xff]   ;;  %v624_v9 = vld [vmem:[%s215_s30] sm:$0xff]   ;;  %v621_v11 = vld [vmem:[%s791_s1 + $0x28] sm:$0xff]  }
  0x29   : > { %556 = vmatpush3.bf16.msra.mxu0 %v616_v5  ;;  %571 = vmatprep.mubr.bf16.mxu0 %v624_v9  ;;  %v620_v10 = vld [vmem:[%s791_s1 + $0x20] sm:$0xff]   ;;  %v622_v12 = vld [vmem:[%s791_s1 + $0x30] sm:$0xff]   ;;  %v623_v13 = vld [vmem:[%s791_s1 + $0x38] sm:$0xff]  }
  0x2a   : > { %557 = vmatprep.subr.bf16.mxu0 %v617_v6  ;;  %v625_v14 = vld [vmem:[%s215_s30 + $0x8] sm:$0xff]   ;;  %v254_v15 = vld [vmem:[#allocation2 + $0x10] sm:$0xff]  ;;  %v252_v16 = vld [vmem:[#allocation2] sm:$0xff] }
  0x2b   : > { %v255_v18 = vld [vmem:[#allocation2 + $0x18] sm:$0xff]  ;;  %v253_v21 = vld [vmem:[#allocation2 + $0x8] sm:$0xff]  ;;  %v521_v29 = vld [vmem:[%s792_s2] ss:$0 sm:$0xff] (!%p520_p10) }
  0x2d   : > { %558 = vmatpush3.bf16.msra.mxu0 %v617_v6 }
  0x2e   : > { %559 = vmatprep.subr.bf16.mxu0 %v618_v7 }
  0x31   : > { %560 = vmatpush3.bf16.msra.mxu0 %v618_v7 }
  0x32   : > { %561 = vmatprep.subr.bf16.mxu0 %v619_v8 }
  0x35   : > { %562 = vmatpush3.bf16.msra.mxu0 %v619_v8 }
  0x36   : > { %563 = vmatprep.subr.bf16.mxu0 %v620_v10 }
  0x39   : > { %564 = vmatpush3.bf16.msra.mxu0 %v620_v10 }
  0x3a   : > { %565 = vmatprep.subr.bf16.mxu0 %v621_v11 }
  0x3d   : > { %566 = vmatpush3.bf16.msra.mxu0 %v621_v11 }
  0x3e   : > { %567 = vmatprep.subr.bf16.mxu0 %v622_v12 }
  0x41   : > { %568 = vmatpush3.bf16.msra.mxu0 %v622_v12 }
  0x42   : > { %569 = vmatprep.subr.bf16.mxu0 %v623_v13 }
  0x45   : > { %570 = vmatpush3.bf16.msra.mxu0 %v623_v13 }
  0x48   : > { %572 = vmatmul.mubr.bf16.vlgmr.msra.gmra.mrb[0].mxu0 %v625_v14 }
 0x11b   : > { %v573_v17 = vpop.f32.mrb[0].mxu0  ;;  %396 = sbr.rel (%p520_p10) target bundleno = 302 (0x12e), region = 81 }
 0x11c   : > { %v387_v19 = vadd.f32 %v573_v17, %v254_v15  ;;  %v370_v20 = vpop.f32.mrb[1].mxu0 }
 0x11d   : > { %v385_v22 = vadd.f32 %v370_v20, %v252_v16  ;;  %v574_v23 = vpop.f32.mrb[2].mxu0 }
 0x11e   : > { %391 = vst [vmem:[#allocation2 + $0x10] sm:$0xff] %v387_v19  ;;  %v388_v24 = vadd.f32 %v574_v23, %v255_v18  ;;  %v373_v25 = vpop.f32.mrb[3].mxu0 }
 0x11f   : > { %389 = vst [vmem:[#allocation2] sm:$0xff] %v385_v22  ;;  %v386_v26 = vadd.f32 %v373_v25, %v253_v21 }
 0x120   : > { %392 = vst [vmem:[#allocation2 + $0x18] sm:$0xff] %v388_v24 }
 0x121   : > { %390 = vst [vmem:[#allocation2 + $0x8] sm:$0xff] %v386_v26 }
 0x125   : > { %v399_v32 = vld [vmem:[#allocation2 + $0x10] sm:$0xff] }
 0x126   : > { %v397_v27 = vld [vmem:[#allocation2] sm:$0xff]  ;;  %v410_v34 = vadd.f32 %v521_v29, %v399_v32 }
 0x127   : > { %v408_v30 = vadd.f32 %v521_v29, %v397_v27  ;;  %v400_v33 = vld [vmem:[#allocation2 + $0x18] sm:$0xff] }
 0x128   : > { %v398_v28 = vld [vmem:[#allocation2 + $0x8] sm:$0xff]  ;;  %v411_v35 = vadd.f32 %v521_v29, %v400_v33 }
 0x129   : > { %v409_v31 = vadd.f32 %v521_v29, %v398_v28 }
 0x12a   : > { %v542_v37 = vpack.c.bf16 %v411_v35, %v410_v34 }
 0x12b   : > { %v537_v36 = vpack.c.bf16 %v409_v31, %v408_v30 }
 0x12c   : > { %544 = vst [vmem:[%s793_s3 + $0x8] sm:$0xff] %v542_v37  }
 0x12d   : > { %538 = vst [vmem:[%s793_s3] sm:$0xff] %v537_v36  }
 0x12e PF: > { %s13_s16 = sadd.s32 1, %s664_s16   ;;  %s794_s12 = smov %s652_s13 }
 0x12f   : > { %p10_p11 = scmp.ge.s32.totalorder %s13_s16, 6   ;;  %s795_s13 = smov %s722_s20 }
 0x130   : > { %s796_s14 = smov %s660_s15  ;;  %s797_s15 = smov %s799_s17 }
 0x131   :  { %12 = sbr.rel (!%p10_p11) target bundleno = 3 (0x3), region = 116 }

// kernel: clip_feature_extractor_forward.29
= control target key start
LH: loop header
LB: loop body
LE: loop exit
PB: predicated region body
PF: predicated region fallthrough
CT: control target
= control target key end

     0   :  { %s782_s15 = smov 0   ;;  %s784_s16 = smov 0   ;;  %s891_s0 = inlined_call_operand.vmem [shape: bf16[32,512], index: 0, kind: input, shape index: {}]   ;;  %s892_s1 = inlined_call_operand.vmem [shape: bf16[128,128], index: 1, kind: input, shape index: {}]   ;;  %s893_s2 = inlined_call_operand.vmem [shape: f32[1,128], index: 2, kind: input, shape index: {}]   ;;  %s894_s3 = inlined_call_operand.vmem [shape: bf16[32,128], index: 3, kind: input, shape index: {}]   ;;  %s895_s4 = inlined_call_operand.vmem [shape: bf16[32,128], index: 4, kind: output, shape index: {}]  }
   0x1   :  { %s786_s17 = smov 0   ;;  %s788_s18 = smov 0  }
   0x2   :  { %s790_s19 = smov 0  }
   0x3 LB: > { %s23_s20 = sadd.s32 1, %s750_s18  ;;  %p42_p1 = scmp.ne.s32.totalorder %s742_s16, %s738_s15  ;;  %s754_s19 = sphi %s790_s19, %s14_s19   ;;  %s750_s18 = sphi %s788_s18, %s899_s18   ;;  %s746_s17 = sphi %s786_s17, %s898_s17   ;;  %s742_s16 = sphi %s784_s16, %s897_s16   ;;  %s738_s15 = sphi %s782_s15, %s896_s15  }
   0x4   : > { %p24_p0 = scmp.ge.s32.totalorder %s23_s20, 4  ;;  %p43_p2 = scmp.eq.s32.totalorder %s754_s19, 0 }
   0x5   : > { %s35_s22 = sadd.s32 1, %s742_s16  ;;  %p585_p5 = scmp.ge.s32.totalorder %s754_s19, 4 }
   0x6   : > { %s901_s20 = smov (%p24_p0, %s23_s20), 0  ;;  %p44_p3 = por %p43_p2, %p42_p1 }
   0x7   : > { %s31_s21 = ssub.s32 %s750_s18, %s901_s20  ;;  %177 = sbr.rel (%p585_p5) target bundleno = 21 (0x15), region = 28 }
   0x8   : > { %p33_p4 = scmp.eq.s32.totalorder %s31_s21, 0 }
   0xa   : > { %s817_s23 = scalar_select %p33_p4, %s742_s16, %s35_s22  }
   0xe   : > { %180 = sbr.rel (!%p44_p3) target bundleno = 21 (0x15), region = 32  ;;  %s182_s24 = sand.u32 (%p44_p3), 1, %s742_s16  }
   0xf   : > { %s587_s25 = sshll.u32 (%p44_p3), %s750_s18, 2  ;;  %s586_s26 = sshll.u32 (%p44_p3), %s182_s24, 4 }
  0x10   : > { %s189_s29 = scalar_lea.vmem (%p44_p3), %s891_s0, %s587_s25  ;;  %s184_s30 = scalar_lea.vmem (%p44_p3), [#allocation3], %s586_s26 }
  0x11   : > { %v205_v0 = vld [vmem:[%s189_s29] sm:$0xf] (%p44_p3)  ;;  %v207_v1 = vld [vmem:[%s189_s29 + $0x10] sm:$0xf] (%p44_p3) }
  0x12   : > { %206 = vst [vmem:[%s184_s30] sm:$0xf] (%p44_p3), %v205_v0  ;;  %208 = vst [vmem:[%s184_s30 + $0x4] sm:$0xf] (%p44_p3), %v207_v1  ;;  %v209_v2 = vld [vmem:[%s189_s29 + $0x20] sm:$0xf] (%p44_p3) }
  0x13   : > { %v211_v3 = vld [vmem:[%s189_s29 + $0x30] sm:$0xf] (%p44_p3)  ;;  %210 = vst [vmem:[%s184_s30 + $0x8] sm:$0xf] (%p44_p3), %v209_v2 }
  0x14   : > { %212 = vst [vmem:[%s184_s30 + $0xc] sm:$0xf] (%p44_p3), %v211_v3 }
  0x15 PF: > { %p588_p6 = scmp.ge.s32.totalorder %s754_s19, 1  ;;  %p242_p7 = scmp.lt.s32.totalorder %s754_s19, 5 }
  0x17   : > { %p243_p8 = pnand %p588_p6, %p242_p7 }
  0x18   : > { %s249_s5 = sand.u32 (!%p243_p8), 1, %s738_s15   ;;  %p590_p9 = scmp.ne.s32.totalorder (!%p243_p8), %s746_s17, 0 }
  0x19   : > { %246 = sbr.rel (%p243_p8) target bundleno = 306 (0x132), region = 73  ;;  %s828_s6 = sshll.u32 (!%p243_p8), %s249_s5, 4 }
  0x1a   : > { %s251_s7 = scalar_lea.vmem (!%p243_p8), [#allocation3], %s828_s6 }
  0x20   : > { %296 = sbr.rel (%p590_p9) target bundleno = 39 (0x27), region = 81  ;;  %v756_v4 = vmov (!%p590_p9), 0.0  }
  0x21   : > { %297 = vst [vmem:[#allocation2] sm:$0xff] (!%p590_p9), %v756_v4  ;;  %298 = vst [vmem:[#allocation2 + $0x8] sm:$0xff] (!%p590_p9), %v756_v4 }
  0x22   : > { %299 = vst [vmem:[#allocation2 + $0x10] sm:$0xff] (!%p590_p9), %v756_v4  ;;  %300 = vst [vmem:[#allocation2 + $0x18] sm:$0xff] (!%p590_p9), %v756_v4 }
  0x27 PF: > { %v706_v5 = vld [vmem:[%s892_s1] sm:$0xff]   ;;  %v707_v6 = vld [vmem:[%s892_s1 + $0x8] sm:$0xff]   ;;  %v708_v7 = vld [vmem:[%s892_s1 + $0x10] sm:$0xff]   ;;  %p601_p10 = scmp.ne.s32.totalorder %s746_s17, 3 }
  0x28   : > { %645 = vmatprep.subr.bf16.mxu0 %v706_v5  ;;  %v709_v8 = vld [vmem:[%s892_s1 + $0x18] sm:$0xff]   ;;  %v714_v9 = vld [vmem:[%s251_s7] sm:$0xff]   ;;  %v711_v11 = vld [vmem:[%s892_s1 + $0x28] sm:$0xff]  }
  0x29   : > { %646 = vmatpush3.bf16.msra.mxu0 %v706_v5  ;;  %661 = vmatprep.mubr.bf16.mxu0 %v714_v9  ;;  %v710_v10 = vld [vmem:[%s892_s1 + $0x20] sm:$0xff]   ;;  %v712_v12 = vld [vmem:[%s892_s1 + $0x30] sm:$0xff]   ;;  %v713_v13 = vld [vmem:[%s892_s1 + $0x38] sm:$0xff]  }
  0x2a   : > { %647 = vmatprep.subr.bf16.mxu0 %v707_v6  ;;  %v715_v14 = vld [vmem:[%s251_s7 + $0x8] sm:$0xff]   ;;  %v303_v15 = vld [vmem:[#allocation2 + $0x10] sm:$0xff]  ;;  %v301_v16 = vld [vmem:[#allocation2] sm:$0xff] }
  0x2b   : > { %v304_v18 = vld [vmem:[#allocation2 + $0x18] sm:$0xff]  ;;  %v302_v21 = vld [vmem:[#allocation2 + $0x8] sm:$0xff]  ;;  %v602_v29 = vld [vmem:[%s893_s2] ss:$0 sm:$0xff] (!%p601_p10) }
  0x2c   : > { %v616_v32 = vld [vmem:[%s894_s3] sm:$0xff] (!%p601_p10)   ;;  %v633_v39 = vld [vmem:[%s894_s3 + $0x8] sm:$0xff] (!%p601_p10)  }
  0x2d   : > { %648 = vmatpush3.bf16.msra.mxu0 %v707_v6  ;;  %v617_v35 = vunpack.c.l.bf16 (!%p601_p10), %v616_v32  ;;  %v618_v36 = vunpack.c.h.bf16 (!%p601_p10), %v616_v32  ;;  %v621_v40 = vunpack.c.l.bf16 (!%p601_p10), %v633_v39  ;;  %v622_v41 = vunpack.c.h.bf16 (!%p601_p10), %v633_v39 }
  0x2e   : > { %649 = vmatprep.subr.bf16.mxu0 %v708_v7 }
  0x31   : > { %650 = vmatpush3.bf16.msra.mxu0 %v708_v7 }
  0x32   : > { %651 = vmatprep.subr.bf16.mxu0 %v709_v8 }
  0x35   : > { %652 = vmatpush3.bf16.msra.mxu0 %v709_v8 }
  0x36   : > { %653 = vmatprep.subr.bf16.mxu0 %v710_v10 }
  0x39   : > { %654 = vmatpush3.bf16.msra.mxu0 %v710_v10 }
  0x3a   : > { %655 = vmatprep.subr.bf16.mxu0 %v711_v11 }
  0x3d   : > { %656 = vmatpush3.bf16.msra.mxu0 %v711_v11 }
  0x3e   : > { %657 = vmatprep.subr.bf16.mxu0 %v712_v12 }
  0x41   : > { %658 = vmatpush3.bf16.msra.mxu0 %v712_v12 }
  0x42   : > { %659 = vmatprep.subr.bf16.mxu0 %v713_v13 }
  0x45   : > { %660 = vmatpush3.bf16.msra.mxu0 %v713_v13 }
  0x48   : > { %662 = vmatmul.mubr.bf16.vlgmr.msra.gmra.mrb[0].mxu0 %v715_v14 }
 0x11b   : > { %v663_v17 = vpop.f32.mrb[0].mxu0  ;;  %445 = sbr.rel (%p601_p10) target bundleno = 306 (0x132), region = 85 }
 0x11c   : > { %v436_v19 = vadd.f32 %v663_v17, %v303_v15  ;;  %v419_v20 = vpop.f32.mrb[1].mxu0 }
 0x11d   : > { %v434_v22 = vadd.f32 %v419_v20, %v301_v16  ;;  %v664_v23 = vpop.f32.mrb[2].mxu0 }
 0x11e   : > { %440 = vst [vmem:[#allocation2 + $0x10] sm:$0xff] %v436_v19  ;;  %v437_v24 = vadd.f32 %v664_v23, %v304_v18  ;;  %v422_v25 = vpop.f32.mrb[3].mxu0 }
 0x11f   : > { %438 = vst [vmem:[#allocation2] sm:$0xff] %v434_v22  ;;  %v435_v26 = vadd.f32 %v422_v25, %v302_v21 }
 0x120   : > { %441 = vst [vmem:[#allocation2 + $0x18] sm:$0xff] %v437_v24 }
 0x121   : > { %439 = vst [vmem:[#allocation2 + $0x8] sm:$0xff] %v435_v26 }
 0x125   : > { %v448_v33 = vld [vmem:[#allocation2 + $0x10] sm:$0xff] }
 0x126   : > { %v446_v27 = vld [vmem:[#allocation2] sm:$0xff]  ;;  %v459_v37 = vadd.f32 %v602_v29, %v448_v33 }
 0x127   : > { %v457_v30 = vadd.f32 %v602_v29, %v446_v27  ;;  %v449_v34 = vld [vmem:[#allocation2 + $0x18] sm:$0xff] }
 0x128   : > { %v447_v28 = vld [vmem:[#allocation2 + $0x8] sm:$0xff]  ;;  %v460_v38 = vadd.f32 %v602_v29, %v449_v34  ;;  %v471_v44 = vadd.f32 %v621_v40, %v459_v37 }
 0x129   : > { %v458_v31 = vadd.f32 %v602_v29, %v447_v28  ;;  %v469_v42 = vadd.f32 %v617_v35, %v457_v30 }
 0x12a   : > { %v472_v45 = vadd.f32 %v622_v41, %v460_v38  ;;  %v475_v48 = vmax.f32 %v471_v44, 0.0 }
 0x12b   : > { %v470_v43 = vadd.f32 %v618_v36, %v458_v31  ;;  %v473_v46 = vmax.f32 %v469_v42, 0.0 }
 0x12c   : > { %v476_v49 = vmax.f32 %v472_v45, 0.0 }
 0x12d   : > { %v474_v47 = vmax.f32 %v470_v43, 0.0 }
 0x12e   : > { %v631_v51 = vpack.c.bf16 %v476_v49, %v475_v48 }
 0x12f   : > { %v626_v50 = vpack.c.bf16 %v474_v47, %v473_v46 }
 0x130   : > { %634 = vst [vmem:[%s895_s4 + $0x8] sm:$0xff] %v631_v51  }
 0x131   : > { %627 = vst [vmem:[%s895_s4] sm:$0xff] %v626_v50  }
 0x132 PF: > { %s14_s19 = sadd.s32 1, %s754_s19   ;;  %s896_s15 = smov %s742_s16 }
 0x133   : > { %p11_p11 = scmp.ge.s32.totalorder %s14_s19, 6   ;;  %s897_s16 = smov %s817_s23 }
 0x134   : > { %s898_s17 = smov %s750_s18  ;;  %s899_s18 = smov %s901_s20 }
 0x135   :  { %13 = sbr.rel (!%p11_p11) target bundleno = 3 (0x3), region = 123 }

// kernel: clip_feature_extractor_forward.30
= control target key start
LH: loop header
LB: loop body
LE: loop exit
PB: predicated region body
PF: predicated region fallthrough
CT: control target
= control target key end

     0   :  { %s308_s1 = inlined_call_operand.vmem [shape: bf16[128,128], index: 1, kind: input, shape index: {}]   ;;  %s309_s0 = inlined_call_operand.vmem [shape: bf16[32,128], index: 0, kind: input, shape index: {}]   ;;  %s310_s2 = inlined_call_operand.vmem [shape: f32[1,128], index: 2, kind: input, shape index: {}]   ;;  %s311_s3 = inlined_call_operand.vmem [shape: bf16[32,128], index: 3, kind: output, shape index: {}]  }
   0x1   :  { %v239_v0 = vld [vmem:[%s308_s1] sm:$0xff]   ;;  %v240_v1 = vld [vmem:[%s308_s1 + $0x8] sm:$0xff]   ;;  %v241_v2 = vld [vmem:[%s308_s1 + $0x10] sm:$0xff]  }
   0x2   :  { %219 = vmatprep.subr.bf16.mxu0 %v239_v0  ;;  %v242_v3 = vld [vmem:[%s308_s1 + $0x18] sm:$0xff]   ;;  %v247_v4 = vld [vmem:[%s309_s0] sm:$0xff]   ;;  %v244_v6 = vld [vmem:[%s308_s1 + $0x28] sm:$0xff]  }
   0x3   :  { %220 = vmatpush3.bf16.msra.mxu0 %v239_v0  ;;  %235 = vmatprep.mubr.bf16.mxu0 %v247_v4  ;;  %v243_v5 = vld [vmem:[%s308_s1 + $0x20] sm:$0xff]   ;;  %v245_v7 = vld [vmem:[%s308_s1 + $0x30] sm:$0xff]   ;;  %v246_v8 = vld [vmem:[%s308_s1 + $0x38] sm:$0xff]  }
   0x4   :  { %221 = vmatprep.subr.bf16.mxu0 %v240_v1  ;;  %v248_v9 = vld [vmem:[%s309_s0 + $0x8] sm:$0xff]   ;;  %v179_v10 = vld [vmem:[%s310_s2] ss:$0 sm:$0xff] }
   0x7   :  { %222 = vmatpush3.bf16.msra.mxu0 %v240_v1 }
   0x8   :  { %223 = vmatprep.subr.bf16.mxu0 %v241_v2 }
   0xb   :  { %224 = vmatpush3.bf16.msra.mxu0 %v241_v2 }
   0xc   :  { %225 = vmatprep.subr.bf16.mxu0 %v242_v3 }
   0xf   :  { %226 = vmatpush3.bf16.msra.mxu0 %v242_v3 }
  0x10   :  { %227 = vmatprep.subr.bf16.mxu0 %v243_v5 }
  0x13   :  { %228 = vmatpush3.bf16.msra.mxu0 %v243_v5 }
  0x14   :  { %229 = vmatprep.subr.bf16.mxu0 %v244_v6 }
  0x17   :  { %230 = vmatpush3.bf16.msra.mxu0 %v244_v6 }
  0x18   :  { %231 = vmatprep.subr.bf16.mxu0 %v245_v7 }
  0x1b   :  { %232 = vmatpush3.bf16.msra.mxu0 %v245_v7 }
  0x1c   :  { %233 = vmatprep.subr.bf16.mxu0 %v246_v8 }
  0x1f   :  { %234 = vmatpush3.bf16.msra.mxu0 %v246_v8 }
  0x22   :  { %236 = vmatmul.mubr.bf16.vlgmr.msra.gmra.mrb[0].mxu0 %v248_v9 }
  0xf5   :  { %v237_v11 = vpop.f32.mrb[0].mxu0 }
  0xf6   :  { %v145_v12 = vadd.f32 %v237_v11, %v179_v10  ;;  %v136_v13 = vpop.f32.mrb[1].mxu0 }
  0xf7   :  { %v137_v14 = vadd.f32 %v179_v10, %v136_v13  ;;  %v238_v15 = vpop.f32.mrb[2].mxu0 }
  0xf8   :  { %v148_v16 = vadd.f32 %v238_v15, %v179_v10  ;;  %v139_v17 = vpop.f32.mrb[3].mxu0  ;;  %v153_v19 = vmax.f32 %v145_v12, 0.0 }
  0xf9   :  { %v140_v18 = vadd.f32 %v179_v10, %v139_v17  ;;  %v151_v21 = vmax.f32 %v137_v14, 0.0 }
  0xfa   :  { %v154_v20 = vmax.f32 %v148_v16, 0.0 }
  0xfb   :  { %v152_v22 = vmax.f32 %v140_v18, 0.0 }
  0xfc   :  { %v206_v23 = vpack.c.bf16 %v154_v20, %v153_v19 }
  0xfd   :  { %v201_v24 = vpack.c.bf16 %v152_v22, %v151_v21 }
  0xfe   :  { %208 = vst [vmem:[%s311_s3 + $0x8] sm:$0xff] %v206_v23  }
  0xff   :  { %202 = vst [vmem:[%s311_s3] sm:$0xff] %v201_v24  }

// kernel: clip_feature_extractor_forward.32
= control target key start
LH: loop header
LB: loop body
LE: loop exit
PB: predicated region body
PF: predicated region fallthrough
CT: control target
= control target key end

     0   :  { %s678_s12 = smov 0   ;;  %s680_s13 = smov 0   ;;  %s803_s0 = inlined_call_operand.vmem [shape: bf16[16,512], index: 0, kind: input, shape index: {}]   ;;  %s804_s1 = inlined_call_operand.vmem [shape: bf16[128,256], index: 1, kind: input, shape index: {}]   ;;  %s805_s2 = inlined_call_operand.vmem [shape: f32[1,256], index: 2, kind: input, shape index: {}]   ;;  %s806_s3 = inlined_call_operand.vmem [shape: bf16[16,256], index: 3, kind: output, shape index: {}]  }
   0x1   :  { %s682_s14 = smov 0   ;;  %s684_s15 = smov 0  }
   0x2   :  { %s686_s16 = smov 0  }
   0x3 LB: > { %s22_s17 = sadd.s32 1, %s650_s15  ;;  %p41_p1 = scmp.ne.s32.totalorder %s642_s13, %s638_s12  ;;  %s654_s16 = sphi %s686_s16, %s13_s16   ;;  %s650_s15 = sphi %s684_s15, %s810_s15   ;;  %s646_s14 = sphi %s682_s14, %s809_s14   ;;  %s642_s13 = sphi %s680_s13, %s808_s13   ;;  %s638_s12 = sphi %s678_s12, %s807_s12  }
   0x4   : > { %p23_p0 = scmp.ge.s32.totalorder %s22_s17, 4  ;;  %p42_p2 = scmp.eq.s32.totalorder %s654_s16, 0 }
   0x5   : > { %s34_s19 = sadd.s32 1, %s642_s13  ;;  %p517_p5 = scmp.ge.s32.totalorder %s654_s16, 4 }
   0x6   : > { %s812_s17 = smov (%p23_p0, %s22_s17), 0  ;;  %p43_p3 = por %p42_p2, %p41_p1 }
   0x7   : > { %s30_s18 = ssub.s32 %s650_s15, %s812_s17  ;;  %141 = sbr.rel (%p517_p5) target bundleno = 21 (0x15), region = 24 }
   0x8   : > { %p32_p4 = scmp.eq.s32.totalorder %s30_s18, 0 }
   0xa   : > { %s713_s20 = scalar_select %p32_p4, %s642_s13, %s34_s19  }
   0xe   : > { %144 = sbr.rel (!%p43_p3) target bundleno = 21 (0x15), region = 28  ;;  %s146_s21 = sand.u32 (%p43_p3), 1, %s642_s13  }
   0xf   : > { %s519_s22 = sshll.u32 (%p43_p3), %s650_s15, 2  ;;  %s518_s23 = sshll.u32 (%p43_p3), %s146_s21, 3 }
  0x10   : > { %s153_s26 = scalar_lea.vmem (%p43_p3), %s803_s0, %s519_s22  ;;  %s148_s27 = scalar_lea.vmem (%p43_p3), [#allocation3], %s518_s23 }
  0x11   : > { %v169_v0 = vld [vmem:[%s153_s26] sm:$0xf] (%p43_p3)  ;;  %v171_v1 = vld [vmem:[%s153_s26 + $0x10] sm:$0xf] (%p43_p3) }
  0x12   : > { %170 = vst [vmem:[%s148_s27] sm:$0xf] (%p43_p3), %v169_v0  ;;  %172 = vst [vmem:[%s148_s27 + $0x4] sm:$0xf] (%p43_p3), %v171_v1 }
  0x15 PF: > { %p520_p6 = scmp.ge.s32.totalorder %s654_s16, 1  ;;  %p198_p7 = scmp.lt.s32.totalorder %s654_s16, 5 }
  0x17   : > { %p199_p8 = pnand %p520_p6, %p198_p7 }
  0x18   : > { %s205_s28 = sand.u32 (!%p199_p8), 1, %s638_s12   ;;  %p522_p9 = scmp.ne.s32.totalorder (!%p199_p8), %s646_s14, 0 }
  0x19   : > { %202 = sbr.rel (%p199_p8) target bundleno = 302 (0x12e), region = 69  ;;  %s724_s29 = sshll.u32 (!%p199_p8), %s205_s28, 3 }
  0x1a   : > { %s207_s30 = scalar_lea.vmem (!%p199_p8), [#allocation3], %s724_s29 }
  0x20   : > { %241 = sbr.rel (%p522_p9) target bundleno = 39 (0x27), region = 77  ;;  %v656_v2 = vmov (!%p522_p9), 0.0  }
  0x21   : > { %242 = vst [vmem:[#allocation2] sm:$0xff] (!%p522_p9), %v656_v2  ;;  %243 = vst [vmem:[#allocation2 + $0x8] sm:$0xff] (!%p522_p9), %v656_v2 }
  0x22   : > { %244 = vst [vmem:[#allocation2 + $0x10] sm:$0xff] (!%p522_p9), %v656_v2  ;;  %245 = vst [vmem:[#allocation2 + $0x18] sm:$0xff] (!%p522_p9), %v656_v2 }
  0x27 PF: > { %v591_v3 = vld [vmem:[%s804_s1 + $0x4] ss:$8 sps:$4 sm:$0xff]   ;;  %v593_v4 = vld [vmem:[%s804_s1] ss:$8 sps:$4 sm:$0xff]   ;;  %v657_v5 = vmov 0   ;;  %p540_p10 = scmp.ne.s32.totalorder %s646_s14, 3 }
  0x28   : > { %386 = vmatprep.mubr.bf16.mxu0 %v657_v5  ;;  %354 = vmatprep.subr.bf16.mxu0 %v591_v3  ;;  %v594_v6 = vld [vmem:[%s804_s1 + $0x14] ss:$8 sps:$4 sm:$0xff]   ;;  %v596_v7 = vld [vmem:[%s804_s1 + $0x10] ss:$8 sps:$4 sm:$0xff]   ;;  %v597_v8 = vld [vmem:[%s804_s1 + $0x24] ss:$8 sps:$4 sm:$0xff]   ;;  %v415_v33 = vlaneseq (!%p540_p10) }
  0x29   : > { %355 = vmatpush1.bf16.msra.mxu0 %v593_v4  ;;  %v599_v9 = vld [vmem:[%s804_s1 + $0x20] ss:$8 sps:$4 sm:$0xff]   ;;  %v600_v10 = vld [vmem:[%s804_s1 + $0x34] ss:$8 sps:$4 sm:$0xff]   ;;  %v602_v11 = vld [vmem:[%s804_s1 + $0x30] ss:$8 sps:$4 sm:$0xff]  }
  0x2a   : > { %356 = vmatprep.subr.bf16.mxu0 %v594_v6  ;;  %v603_v12 = vld [vmem:[%s804_s1 + $0x44] ss:$8 sps:$4 sm:$0xff]   ;;  %v605_v13 = vld [vmem:[%s804_s1 + $0x40] ss:$8 sps:$4 sm:$0xff]   ;;  %v606_v14 = vld [vmem:[%s804_s1 + $0x54] ss:$8 sps:$4 sm:$0xff]  }
  0x2b   : > { %v608_v15 = vld [vmem:[%s804_s1 + $0x50] ss:$8 sps:$4 sm:$0xff]   ;;  %v609_v16 = vld [vmem:[%s804_s1 + $0x64] ss:$8 sps:$4 sm:$0xff]   ;;  %v611_v17 = vld [vmem:[%s804_s1 + $0x60] ss:$8 sps:$4 sm:$0xff]  }
  0x2c   : > { %v612_v18 = vld [vmem:[%s804_s1 + $0x74] ss:$8 sps:$4 sm:$0xff]   ;;  %v614_v19 = vld [vmem:[%s804_s1 + $0x70] ss:$8 sps:$4 sm:$0xff]   ;;  %v615_v20 = vld [vmem:[%s207_s30] sm:$0xff]   ;;  %v416_v34 = vshrl.u32 (!%p540_p10), %v415_v33, 7 }
  0x2d   : > { %357 = vmatpush1.bf16.msra.mxu0 %v596_v7  ;;  %v246_v21 = vld [vmem:[#allocation2] sm:$0xff]  ;;  %v247_v22 = vld [vmem:[#allocation2 + $0x8] sm:$0xff]  ;;  %v248_v24 = vld [vmem:[#allocation2 + $0x10] sm:$0xff] }
  0x2e   : > { %358 = vmatprep.subr.bf16.mxu0 %v597_v8  ;;  %v249_v27 = vld [vmem:[#allocation2 + $0x18] sm:$0xff]  ;;  %v413_v35 = vld [vmem:[%s805_s2] sm:$0x3] (!%p540_p10)  ;;  %v417_v37 = vsub.s32 (!%p540_p10), 0, %v416_v34  ;;  %v421_v38 = vsub.s32 (!%p540_p10), 1, %v416_v34 }
  0x30   : > { %v418_v42 = vrot.slane (!%p540_p10), %v413_v35, %v417_v37  ;;  %v422_v43 = vrot.slane (!%p540_p10), %v413_v35, %v421_v38 }
  0x31   : > { %359 = vmatpush1.bf16.msra.mxu0 %v599_v9 }
  0x32   : > { %360 = vmatprep.subr.bf16.mxu0 %v600_v10 }
  0x35   : > { %361 = vmatpush1.bf16.msra.mxu0 %v602_v11 }
  0x36   : > { %362 = vmatprep.subr.bf16.mxu0 %v603_v12 }
  0x39   : > { %363 = vmatpush1.bf16.msra.mxu0 %v605_v13 }
  0x3a   : > { %364 = vmatprep.subr.bf16.mxu0 %v606_v14 }
  0x3d   : > { %365 = vmatpush1.bf16.msra.mxu0 %v608_v15 }
  0x3e   : > { %366 = vmatprep.subr.bf16.mxu0 %v609_v16 }
  0x41   : > { %367 = vmatpush1.bf16.msra.mxu0 %v611_v17 }
  0x42   : > { %368 = vmatprep.subr.bf16.mxu0 %v612_v18 }
  0x45   : > { %369 = vmatpush1.bf16.msra.mxu0 %v614_v19 }
  0x48   : > { %387 = vmatmul.mubr.bf16.vlgmr.msra.gmra.mrb[0].mxu0 %v615_v20 }
 0x11b   : > { %v388_v23 = vpop.f32.mrb[0].mxu0  ;;  %408 = sbr.rel (%p540_p10) target bundleno = 302 (0x12e), region = 81 }
 0x11c   : > { %v397_v25 = vadd.f32 %v388_v23, %v246_v21  ;;  %v390_v26 = vpop.f32.mrb[1].mxu0 }
 0x11d   : > { %v398_v28 = vadd.f32 %v390_v26, %v247_v22  ;;  %v392_v29 = vpop.f32.mrb[2].mxu0 }
 0x11e   : > { %401 = vst [vmem:[#allocation2] sm:$0xff] %v397_v25  ;;  %v399_v30 = vadd.f32 %v392_v29, %v248_v24  ;;  %v394_v31 = vpop.f32.mrb[3].mxu0 }
 0x11f   : > { %402 = vst [vmem:[#allocation2 + $0x8] sm:$0xff] %v398_v28  ;;  %v400_v32 = vadd.f32 %v394_v31, %v249_v27 }
 0x120   : > { %403 = vst [vmem:[#allocation2 + $0x10] sm:$0xff] %v399_v30 }
 0x121   : > { %404 = vst [vmem:[#allocation2 + $0x18] sm:$0xff] %v400_v32 }
 0x125   : > { %v409_v36 = vld [vmem:[#allocation2] sm:$0xff] }
 0x126   : > { %v410_v39 = vld [vmem:[#allocation2 + $0x8] sm:$0xff]  ;;  %v425_v44 = vadd.f32 %v418_v42, %v409_v36 }
 0x127   : > { %v411_v40 = vld [vmem:[#allocation2 + $0x10] sm:$0xff]  ;;  %v426_v45 = vadd.f32 %v422_v43, %v410_v39 }
 0x128   : > { %v412_v41 = vld [vmem:[#allocation2 + $0x18] sm:$0xff]  ;;  %v427_v46 = vadd.f32 %v418_v42, %v411_v40 }
 0x129   : > { %v428_v47 = vadd.f32 %v422_v43, %v412_v41  ;;  %v547_v48 = vpack.c.bf16 %v426_v45, %v425_v44 }
 0x12b   : > { %v548_v49 = vpack.c.bf16 %v428_v47, %v427_v46  ;;  %441 = vst [vmem:[%s806_s3] sm:$0xff] %v547_v48 }
 0x12d   : > { %442 = vst [vmem:[%s806_s3 + $0x8] sm:$0xff] %v548_v49 }
 0x12e PF: > { %s13_s16 = sadd.s32 1, %s654_s16   ;;  %s807_s12 = smov %s642_s13 }
 0x12f   : > { %p10_p11 = scmp.ge.s32.totalorder %s13_s16, 6   ;;  %s808_s13 = smov %s713_s20 }
 0x130   : > { %s809_s14 = smov %s650_s15  ;;  %s810_s15 = smov %s812_s17 }
 0x131   :  { %12 = sbr.rel (!%p10_p11) target bundleno = 3 (0x3), region = 116 }

// kernel: clip_feature_extractor_forward.31
= control target key start
LH: loop header
LB: loop body
LE: loop exit
PB: predicated region body
PF: predicated region fallthrough
CT: control target
= control target key end

     0   :  { %s2087_s12 = smov 0   ;;  %s2424_s0 = inlined_call_operand.vmem [shape: bf16[2,6,6,128], index: 0, kind: input, shape index: {}]   ;;  %s2425_s1 = inlined_call_operand.vmem [shape: bf16[1152,128], index: 1, kind: input, shape index: {}]   ;;  %s2426_s2 = inlined_call_operand.vmem [shape: f32[1,128], index: 2, kind: input, shape index: {}]   ;;  %s2427_s3 = inlined_call_operand.vmem [shape: bf16[2,4,4,128], index: 3, kind: output, shape index: {}]  }
   0x1 LB: > { %s1697_s13 = sadd.s32 4294967295, %s2062_s12   ;;  %p1701_p0 = scmp.ge.s32.totalorder %s2062_s12, 1  ;;  %s2062_s12 = sphi %s2087_s12, %s13_s12  }
   0x2   : > { %p137_p1 = scmp.lt.s32.totalorder %s2062_s12, 3 }
   0x4   : > { %p138_p2 = pnand %p1701_p0, %p137_p1 }
   0x5   : > { %v1970_v0 = vld [vmem:[%s2425_s1 + $0x40] sm:$0xff] (!%p138_p2)   ;;  %v1974_v4 = vld [vmem:[%s2425_s1 + $0x48] sm:$0xff] (!%p138_p2)   ;;  %v1978_v8 = vld [vmem:[%s2425_s1 + $0x50] sm:$0xff] (!%p138_p2)   ;;  %p161_p3 = scmp.lt.s32.totalorder (!%p138_p2), %s1697_s13, 1  ;;  %vm331_vm0 = vcmask (!%p138_p2), 1040384   ;;  %vm332_vm1 = vcmask (!%p138_p2), 1042434  }
   0x6   : > { %141 = sbr.rel (%p138_p2) target bundleno = 339 (0x153), region = 32  ;;  %v1971_v1 = vld [vmem:[%s2425_s1] sm:$0xff] (!%p138_p2)   ;;  %1841 = vmatprep.subr.bf16.mxu0 (!%p138_p2), %v1970_v0  ;;  %v1975_v5 = vld [vmem:[%s2425_s1 + $0x8] sm:$0xff] (!%p138_p2)   ;;  %v1979_v9 = vld [vmem:[%s2425_s1 + $0x10] sm:$0xff] (!%p138_p2)   ;;  %vm334_vm2 = vcmask (!%p138_p2), 1044484   ;;  %vm336_vm5 = vcmask (!%p138_p2), 1046534  }
   0x7   : > { %v1972_v2 = vld [vmem:[%s2425_s1 + $0xc0] sm:$0xff] (!%p138_p2)   ;;  %1842 = vmatpush3.bf16.msra.mxu0 (!%p138_p2), %v1971_v1  ;;  %v1976_v6 = vld [vmem:[%s2425_s1 + $0xc8] sm:$0xff] (!%p138_p2)   ;;  %v1980_v10 = vld [vmem:[%s2425_s1 + $0xd0] sm:$0xff] (!%p138_p2)   ;;  %vm220_vm3 = vsmask.f32 (!%p138_p2), 1280  ;;  %vm2066_vm14 = vmmov (!%p138_p2), 0  }
   0x8   : > { %v1973_v3 = vld [vmem:[%s2425_s1 + $0x80] sm:$0xff] (!%p138_p2)   ;;  %1863 = vmatprep.subr.bf16.mxu1 (!%p138_p2), %v1972_v2  ;;  %1843 = vmatprep.subr.bf16.mxu0 (!%p138_p2), %v1974_v4  ;;  %v1977_v7 = vld [vmem:[%s2425_s1 + $0x88] sm:$0xff] (!%p138_p2)   ;;  %v1981_v11 = vld [vmem:[%s2425_s1 + $0x90] sm:$0xff] (!%p138_p2)   ;;  %vm221_vm4 = vsmask.f32 (!%p138_p2), 3336 }
   0x9   : > { %1864 = vmatpush3.bf16.msra.mxu1 (!%p138_p2), %v1973_v3  ;;  %v1982_v12 = vld [vmem:[%s2425_s1 + $0x58] sm:$0xff] (!%p138_p2)   ;;  %v1986_v16 = vld [vmem:[%s2425_s1 + $0x60] sm:$0xff] (!%p138_p2)   ;;  %v1990_v20 = vld [vmem:[%s2425_s1 + $0x68] sm:$0xff] (!%p138_p2)   ;;  %vm223_vm7 = vsmask.f32 (!%p138_p2), 5392 }
   0xa   : > { %1865 = vmatprep.subr.bf16.mxu1 (!%p138_p2), %v1976_v6  ;;  %v1983_v13 = vld [vmem:[%s2425_s1 + $0x18] sm:$0xff] (!%p138_p2)   ;;  %v1987_v17 = vld [vmem:[%s2425_s1 + $0x20] sm:$0xff] (!%p138_p2)   ;;  %v1991_v21 = vld [vmem:[%s2425_s1 + $0x28] sm:$0xff] (!%p138_p2)   ;;  %vm225_vm8 = vsmask.f32 (!%p138_p2), 7448 }
   0xb   : > { %1844 = vmatpush3.bf16.msra.mxu0 (!%p138_p2), %v1975_v5  ;;  %v1984_v14 = vld [vmem:[%s2425_s1 + $0xd8] sm:$0xff] (!%p138_p2)   ;;  %v1988_v18 = vld [vmem:[%s2425_s1 + $0xe0] sm:$0xff] (!%p138_p2)   ;;  %v1992_v22 = vld [vmem:[%s2425_s1 + $0xe8] sm:$0xff] (!%p138_p2)  }
   0xc   : > { %1845 = vmatprep.subr.bf16.mxu0 (!%p138_p2), %v1978_v8  ;;  %v1985_v15 = vld [vmem:[%s2425_s1 + $0x98] sm:$0xff] (!%p138_p2)   ;;  %v1989_v19 = vld [vmem:[%s2425_s1 + $0xa0] sm:$0xff] (!%p138_p2)   ;;  %v1993_v23 = vld [vmem:[%s2425_s1 + $0xa8] sm:$0xff] (!%p138_p2)  }
   0xd   : > { %1866 = vmatpush3.bf16.msra.mxu1 %v1977_v7  ;;  %s2439_s13 = smov (!%p161_p3, %s1697_s13), 1  ;;  %v1994_v24 = vld [vmem:[%s2425_s1 + $0x70] sm:$0xff]   ;;  %v1998_v28 = vld [vmem:[%s2425_s1 + $0x78] sm:$0xff]   ;;  %vm222_vm6 = vmor %vm220_vm3, %vm221_vm4 }
   0xe   : > { %1867 = vmatprep.subr.bf16.mxu1 %v1980_v10  ;;  %v1995_v25 = vld [vmem:[%s2425_s1 + $0x30] sm:$0xff]   ;;  %s1958_s16 = smul.u32 24, %s2439_s13  ;;  %v1999_v29 = vld [vmem:[%s2425_s1 + $0x38] sm:$0xff]   ;;  %vm2210_vm9 = vmor %vm222_vm6, %vm223_vm7 }
   0xf   : > { %1846 = vmatpush3.bf16.msra.mxu0 %v1979_v9  ;;  %v1996_v26 = vld [vmem:[%s2425_s1 + $0xf0] sm:$0xff]   ;;  %v2000_v30 = vld [vmem:[%s2425_s1 + $0xf8] sm:$0xff]   ;;  %vm2217_vm10 = vmor %vm331_vm0, %vm332_vm1 }
  0x10   : > { %1847 = vmatprep.subr.bf16.mxu0 %v1982_v12  ;;  %v1997_v27 = vld [vmem:[%s2425_s1 + $0xb0] sm:$0xff]   ;;  %s2195_s27 = scalar_lea.vmem %s2424_s0, %s1958_s16  ;;  %v2005_v3 = vld [vmem:[%s2425_s1 + $0xb8] sm:$0xff]   ;;  %vm2228_vm11 = vmor %vm2210_vm9, %vm225_vm8  ;;  %s1840_s16 = sshll.u32 %s2439_s13, 3 }
  0x11   : > { %1868 = vmatpush3.bf16.msra.mxu1 %v1981_v11  ;;  %v172_v31 = vld [vmem:[%s2195_s27] sm:$0x3]  ;;  %v173_v32 = vld [vmem:[%s2195_s27 + $0x4] sm:$0x3]  ;;  %v174_v33 = vld [vmem:[%s2195_s27 + $0x8] sm:$0x3]  ;;  %s170_s19 = scalar_lea.vmem %s2427_s3, %s1840_s16 }
  0x12   : > { %1869 = vmatprep.subr.bf16.mxu1 %v1984_v14  ;;  %v175_v34 = vld [vmem:[%s2195_s27 + $0xc] sm:$0x3]  ;;  %176 = vst [vmem:[#allocation2] sm:$0x3] %v172_v31  ;;  %177 = vst [vmem:[#allocation2 + $0x12] sm:$0x3] %v173_v32 }
  0x13   : > { %1848 = vmatpush3.bf16.msra.mxu0 %v1983_v13  ;;  %178 = vst [vmem:[#allocation2 + $0x24] sm:$0x3] %v174_v33  ;;  %v1705_v35 = vld.sshfl [vmem:[%s2195_s27] sm:$0x13 pattern:$0x76325410]  ;;  %vm2239_vm12 = vmor %vm2217_vm10, %vm334_vm2 }
  0x14   : > { %1849 = vmatprep.subr.bf16.mxu0 %v1986_v16  ;;  %179 = vst [vmem:[#allocation2 + $0x36] sm:$0x3] %v175_v34  ;;  %v1706_v36 = vld.sshfl [vmem:[%s2195_s27 + $0x4] sm:$0x13 pattern:$0x76325410]  ;;  %v195_v37 = vcombine.high %v1705_v35, %v1705_v35  ;;  %vm2252_vm13 = vmor %vm2239_vm12, %vm336_vm5 }
  0x15   : > { %1870 = vmatpush3.bf16.msra.mxu1 %v1985_v15  ;;  %v1707_v38 = vld.sshfl [vmem:[%s2195_s27 + $0x8] sm:$0x13 pattern:$0x76325410]  ;;  %v203_v39 = vcombine.high %v1706_v36, %v1706_v36  ;;  %v228_v43 = vshrl.u32 %v1705_v35, 16  ;;  %v231_v44 = vshll.u32 %v1705_v35, 16  ;;  %v898_v15 = vlaneseq }
  0x16   : > { %1871 = vmatprep.subr.bf16.mxu1 %v1988_v18  ;;  %v1708_v40 = vld.sshfl [vmem:[%s2195_s27 + $0xc] sm:$0x13 pattern:$0x76325410]  ;;  %v211_v41 = vcombine.high %v1707_v38, %v1707_v38  ;;  %v1717_v45 = vld [vmem:[%s2195_s27 + $0x4] sm:$0x3] }
  0x17   : > { %1850 = vmatpush3.bf16.msra.mxu0 %v1987_v17  ;;  %v219_v42 = vcombine.high %v1708_v40, %v1708_v40  ;;  %v237_v46 = vshll.u32 %v195_v37, 16  ;;  %v242_v47 = vshrl.u32 %v1706_v36, 16  ;;  %v245_v48 = vshll.u32 %v1706_v36, 16  ;;  %v1718_v50 = vld [vmem:[%s2195_s27 + $0x8] sm:$0x3]  ;;  %v2006_v9 = vld [vmem:[%s2425_s1 + $0x140] sm:$0xff]  }
  0x18   : > { %1851 = vmatprep.subr.bf16.mxu0 %v1990_v20  ;;  %v251_v49 = vshll.u32 %v203_v39, 16  ;;  %367 = vst [vmem:[#allocation2 + $0x6] sm:$0x3] %v1717_v45  ;;  %v230_v52 = vrot.slane %v228_v43, 6  ;;  %v233_v53 = vrot.slane %v231_v44, 7  ;;  %v256_v54 = vshrl.u32 %v1707_v38, 16 }
  0x19   : > { %1872 = vmatpush3.bf16.msra.mxu1 %v1989_v19  ;;  %v259_v55 = vshll.u32 %v1707_v38, 16  ;;  %v1719_v56 = vld [vmem:[%s2195_s27 + $0xc] sm:$0x3]  ;;  %368 = vst [vmem:[#allocation2 + $0x18] sm:$0x3] %v1718_v50  ;;  %v239_v57 = vrot.slane %v237_v46, 7 }
  0x1a   : > { %1873 = vmatprep.subr.bf16.mxu1 %v1992_v22  ;;  %v244_v58 = vrot.slane %v242_v47, 6  ;;  %v247_v59 = vrot.slane %v245_v48, 7  ;;  %v253_v60 = vrot.slane %v251_v49, 7  ;;  %v1720_v62 = vld [vmem:[%s2195_s27 + $0x10] sm:$0x3]  ;;  %v234_v63 = vor.u32 %v233_v53, %v230_v52  ;;  %v2009_v61 = vld [vmem:[%s2425_s1 + $0x100] sm:$0xff]  }
  0x1b   : > { %1852 = vmatpush3.bf16.msra.mxu0 %v1991_v21  ;;  %369 = vst [vmem:[#allocation2 + $0x2a] sm:$0x3] %v1719_v56  ;;  %v258_v0 = vrot.slane %v256_v54, 6  ;;  %v261_v1 = vrot.slane %v259_v55, 7  ;;  %v265_v2 = vshll.u32 %v211_v41, 16  ;;  %v270_v6 = vshrl.u32 %v1708_v40, 16 }
  0x1c   : > { %1853 = vmatprep.subr.bf16.mxu0 %v1994_v24  ;;  %370 = vst [vmem:[#allocation2 + $0x3c] sm:$0x3] %v1720_v62  ;;  %v248_v5 = vor.u32 %v247_v59, %v244_v58  ;;  %v273_v7 = vshll.u32 %v1708_v40, 16  ;;  %v279_v8 = vshll.u32 %v219_v42, 16  ;;  %v235_v10 = vrot.slane %v234_v63, 2  ;;  %v2010_v40 = vld [vmem:[%s2425_s1 + $0x1c0] sm:$0xff]  }
  0x1d   : > { %1874 = vmatpush3.bf16.msra.mxu1 %v1993_v23  ;;  %v262_v11 = vor.u32 %v261_v1, %v258_v0  ;;  %v267_v12 = vrot.slane %v265_v2, 7  ;;  %v1709_v13 = vld.sshfl [vmem:[%s2195_s27] sm:$0x12 pattern:$0x76325410]  ;;  %v272_v17 = vrot.slane %v270_v6, 6 }
  0x1e   : > { %1875 = vmatprep.subr.bf16.mxu1 %v1996_v26  ;;  %v249_v16 = vrot.slane %v248_v5, 2  ;;  %v275_v18 = vrot.slane %v273_v7, 7  ;;  %v281_v19 = vrot.slane %v279_v8, 7  ;;  %v240_v20 = vsel %vm2228_vm11, %v235_v10, %v239_v57  ;;  %v2011_v62 = vld [vmem:[%s2425_s1 + $0x180] sm:$0xff]   ;;  %v2014_v5 = vld [vmem:[%s2425_s1 + $0x1c8] sm:$0xff]   ;;  %v2016_v8 = vld [vmem:[%s2425_s1 + $0x150] sm:$0xff]  }
  0x1f   : > { %1854 = vmatpush3.bf16.msra.mxu0 %v1995_v25  ;;  %v263_v21 = vrot.slane %v262_v11, 2  ;;  %v1710_v22 = vld.sshfl [vmem:[%s2195_s27 + $0x4] sm:$0x12 pattern:$0x76325410]  ;;  %v306_v23 = vcombine.high %v1709_v13, %v1709_v13  ;;  %v1713_v24 = vrot.slane %v1709_v13, 9 }
  0x20   : > { %1855 = vmatprep.subr.bf16.mxu0 %v1998_v28  ;;  %v254_v25 = vsel %vm2228_vm11, %v249_v16, %v253_v60  ;;  %v276_v26 = vor.u32 %v275_v18, %v272_v17  ;;  %287 = vst [vmem:[#allocation2 + $0x2] sm:$0x3] %v240_v20  ;;  %v314_v28 = vcombine.high %v1710_v22, %v1710_v22  ;;  %v1712_v32 = vld.sshfl [vmem:[%s2195_s27 + $0xc] sm:$0x12 pattern:$0x76325410] }
  0x21   : > { %1876 = vmatpush3.bf16.msra.mxu1 %v1997_v27  ;;  %v1711_v27 = vld.sshfl [vmem:[%s2195_s27 + $0x8] sm:$0x12 pattern:$0x76325410]  ;;  %v268_v31 = vsel %vm2228_vm11, %v263_v21, %v267_v12  ;;  %288 = vst [vmem:[#allocation2 + $0x14] sm:$0x3] %v254_v25  ;;  %v330_v37 = vcombine.high %v1712_v32, %v1712_v32 }
  0x22   : > { %1877 = vmatprep.subr.bf16.mxu1 %v2000_v30  ;;  %v1714_v30 = vrot.slane %v1710_v22, 9  ;;  %v322_v33 = vcombine.high %v1711_v27, %v1711_v27  ;;  %v340_v34 = vrot.slane %v306_v23, 7  ;;  %v1715_v35 = vrot.slane %v1711_v27, 9  ;;  %471 = vst [vmem:[#allocation2 + $0x8] sm:$0x3] %v254_v25  ;;  %v2013_v6 = vld [vmem:[%s2425_s1 + $0x108] sm:$0xff]  }
  0x23   : > { %1856 = vmatpush3.bf16.msra.mxu0 %v1999_v29  ;;  %v277_v36 = vrot.slane %v276_v26, 2  ;;  %289 = vst [vmem:[#allocation2 + $0x26] sm:$0x3] %v268_v31  ;;  %v344_v38 = vrot.slane %v314_v28, 7  ;;  %v1716_v39 = vrot.slane %v1712_v32, 9  ;;  %v899_v43 = vshrl.u32 %v898_v15, 7 }
  0x24   : > { %1885 = vmatprep.subr.bf16.mxu0 %v2006_v9  ;;  %472 = vst [vmem:[#allocation2 + $0x1a] sm:$0x3] %v268_v31  ;;  %648 = vst [vmem:[#allocation2 + $0xe] sm:$0x3] %v268_v31  ;;  %v341_v41 = vsel %vm2252_vm13, %v1713_v24, %v340_v34  ;;  %v348_v42 = vrot.slane %v322_v33, 7  ;;  %v352_v46 = vrot.slane %v330_v37, 7 }
  0x25   : > { %1878 = vmatpush3.bf16.msra.mxu1 %v2005_v3  ;;  %v282_v44 = vsel %vm2228_vm11, %v277_v36, %v281_v19  ;;  %v345_v45 = vsel %vm2252_vm13, %v1714_v30, %v344_v38  ;;  %358 = vst [vmem:[#allocation2 + $0x4] sm:$0x3] %v341_v41  ;;  %v2064_v47 = vmov 1983009808   ;;  %v2012_v3 = vld [vmem:[%s2425_s1 + $0x148] sm:$0xff]   ;;  %v2018_v9 = vld [vmem:[%s2425_s1 + $0x1d0] sm:$0xff]  }
  0x26   : > { %v896_v48 = vunpack.c.l.s4 %v2064_v47  ;;  %1907 = vmatprep.subr.bf16.mxu1 %v2010_v40  ;;  %290 = vst [vmem:[#allocation2 + $0x38] sm:$0x3] %v282_v44  ;;  %v349_v49 = vsel %vm2252_vm13, %v1715_v35, %v348_v42  ;;  %359 = vst [vmem:[#allocation2 + $0x16] sm:$0x3] %v345_v45  ;;  %v353_v50 = vsel %vm2252_vm13, %v1716_v39, %v352_v46  ;;  %v2015_v7 = vld [vmem:[%s2425_s1 + $0x188] sm:$0xff]   ;;  %v2017_v10 = vld [vmem:[%s2425_s1 + $0x110] sm:$0xff]  }
  0x27   : > { %473 = vst [vmem:[#allocation2 + $0x2c] sm:$0x3] %v282_v44  ;;  %535 = vst [vmem:[#allocation2 + $0xa] sm:$0x3] %v345_v45  ;;  %v2019_v11 = vld [vmem:[%s2425_s1 + $0x190] sm:$0xff]   ;;  %v2020_v12 = vld [vmem:[%s2425_s1 + $0x158] sm:$0xff]  }
  0x28   : > { %649 = vst [vmem:[#allocation2 + $0x20] sm:$0x3] %v282_v44  ;;  %360 = vst [vmem:[#allocation2 + $0x28] sm:$0x3] %v349_v49  ;;  %v897_v51 = vunpack.c.0.s8 %v896_v48  ;;  %v2001_v53 = vld [vmem:[#allocation2] ss:$18 sps:$4 sm:$0xff]  }
  0x29   : > { %536 = vst [vmem:[#allocation2 + $0x1c] sm:$0x3] %v349_v49  ;;  %712 = vst [vmem:[#allocation2 + $0x10] sm:$0x3] %v349_v49  ;;  %v2022_v13 = vld [vmem:[%s2425_s1 + $0x1d8] sm:$0xff]   ;;  %v2024_v16 = vld [vmem:[%s2425_s1 + $0x160] sm:$0xff]  }
  0x2a   : > { %361 = vst [vmem:[#allocation2 + $0x3a] sm:$0x3] %v353_v50  ;;  %537 = vst [vmem:[#allocation2 + $0x2e] sm:$0x3] %v353_v50  ;;  %v2272_v52 = vsub.s32 %v897_v51, %v899_v43  ;;  %v2021_v14 = vld [vmem:[%s2425_s1 + $0x118] sm:$0xff]   ;;  %v2026_v17 = vld [vmem:[%s2425_s1 + $0x1e0] sm:$0xff]  }
  0x2b   : > { %713 = vst [vmem:[#allocation2 + $0x22] sm:$0x3] %v353_v50  ;;  %v2023_v15 = vld [vmem:[%s2425_s1 + $0x198] sm:$0xff]   ;;  %v2025_v18 = vld [vmem:[%s2425_s1 + $0x120] sm:$0xff]   ;;  %v2028_v20 = vld [vmem:[%s2425_s1 + $0x168] sm:$0xff]  }
  0x2c   : > { %v901_v56 = vrot.slane %v2001_v53, %v2272_v52  ;;  %v2027_v19 = vld [vmem:[%s2425_s1 + $0x1a0] sm:$0xff]   ;;  %v2030_v21 = vld [vmem:[%s2425_s1 + $0x1e8] sm:$0xff]   ;;  %v1728_v22 = vld.sshfl [vmem:[%s2195_s27 + $0x10] sm:$0x13 pattern:$0x76325410] }
  0x2d   : > { %v2007_v54 = vld [vmem:[#allocation2 + $0x4] ss:$18 sps:$4 sm:$0xff]   ;;  %v2029_v23 = vld [vmem:[%s2425_s1 + $0x128] sm:$0xff]   ;;  %v410_v24 = vcombine.high %v1728_v22, %v1728_v22  ;;  %v454_v25 = vshrl.u32 %v1728_v22, 16  ;;  %v457_v26 = vshll.u32 %v1728_v22, 16 }
  0x2e   : > { %v2003_v55 = vld [vmem:[#allocation2 + $0x24] ss:$18 sps:$4 sm:$0xff]   ;;  %v908_v58 = vrot.slane %v2007_v54, %v2272_v52  ;;  %v1736_v27 = vld.sshfl [vmem:[%s2195_s27 + $0x10] sm:$0x12 pattern:$0x76325410] }
  0x2f   : > { %v915_v59 = vrot.slane %v2003_v55, %v2272_v52  ;;  %v2031_v28 = vld [vmem:[%s2425_s1 + $0x1a8] sm:$0xff]   ;;  %v514_v30 = vcombine.high %v1736_v27, %v1736_v27  ;;  %v1740_v31 = vrot.slane %v1736_v27, 9  ;;  %v2032_v34 = vld [vmem:[%s2425_s1 + $0x170] sm:$0xff]   ;;  %v456_v35 = vrot.slane %v454_v25, 6  ;;  %v2036_v51 = vld [vmem:[%s2425_s1 + $0x178] sm:$0xff]  }
  0x30   : > { %v1741_v32 = vld [vmem:[%s2195_s27 + $0x8] sm:$0x3]  ;;  %v1742_v33 = vld [vmem:[%s2195_s27 + $0xc] sm:$0x3]  ;;  %v459_v36 = vrot.slane %v457_v26, 7  ;;  %v463_v37 = vshll.u32 %v410_v24, 16 }
  0x31   : > { %v2008_v57 = vld [vmem:[#allocation2 + $0x28] ss:$18 sps:$4 sm:$0xff]   ;;  %v924_v63 = vcombine.high %v901_v56, %v915_v59  ;;  %v923_v0 = vcombine.low %v901_v56, %v915_v59  ;;  %v1743_v38 = vld [vmem:[%s2195_s27 + $0x10] sm:$0x3]  ;;  %544 = vst [vmem:[#allocation2 + $0xc] sm:$0x3] %v1741_v32 }
  0x32   : > { %v922_v60 = vrot.slane %v2008_v57, %v2272_v52  ;;  %545 = vst [vmem:[#allocation2 + $0x1e] sm:$0x3] %v1742_v33  ;;  %v2034_v39 = vld [vmem:[%s2425_s1 + $0x1f0] sm:$0xff]   ;;  %v529_v40 = vrot.slane %v514_v30, 7  ;;  %546 = vst [vmem:[#allocation2 + $0x30] sm:$0x3] %v1743_v38  ;;  %v460_v44 = vor.u32 %v459_v36, %v456_v35 }
  0x33   : > { %1453 = vmatprep.mubr.bf16.mxu0 %v924_v63  ;;  %v1744_v41 = vld [vmem:[%s2195_s27 + $0x14] sm:$0x3]  ;;  %v465_v45 = vrot.slane %v463_v37, 7  ;;  %v2038_v54 = vld [vmem:[%s2425_s1 + $0x1f8] sm:$0xff]   ;;  %v2050_v22 = vld [vmem:[%s2425_s1 + $0x220] sm:$0xff]  }
  0x34   : > { %v926_v1 = vcombine.high %v908_v58, %v922_v60  ;;  %v925_v2 = vcombine.low %v908_v58, %v922_v60  ;;  %1454 = vmatmul.mubr.bf16.vlgmr.msra.gmra.mrb[0].mxu0 %v923_v0  ;;  %v2033_v42 = vld [vmem:[%s2425_s1 + $0x130] sm:$0xff]   ;;  %547 = vst [vmem:[#allocation2 + $0x42] sm:$0x3] %v1744_v41  ;;  %v530_v47 = vsel %vm2252_vm13, %v1740_v31, %v529_v40  ;;  %v461_v53 = vrot.slane %v460_v44, 2  ;;  %v2037_v59 = vld [vmem:[%s2425_s1 + $0x138] sm:$0xff]  }
  0x35   : > { %1886 = vmatpush3.bf16.msra.mxu0 %v2009_v61  ;;  %v2035_v43 = vld [vmem:[%s2425_s1 + $0x1b0] sm:$0xff]   ;;  %538 = vst [vmem:[#allocation2 + $0x40] sm:$0x3] %v530_v47  ;;  %714 = vst [vmem:[#allocation2 + $0x34] sm:$0x3] %v530_v47  ;;  %v2053_v30 = vld [vmem:[%s2425_s1 + $0x238] sm:$0xff]  }
  0x36   : > { %1494 = vmatprep.mubr.bf16.mxu1 %v926_v1  ;;  %1887 = vmatprep.subr.bf16.mxu0 %v2012_v3  ;;  %v1752_v46 = vld.sshfl [vmem:[%s2195_s27 + $0x14] sm:$0x13 pattern:$0x76325410]  ;;  %v466_v58 = vsel %vm2228_vm11, %v461_v53, %v465_v45 }
  0x37   : > { %1495 = vmatmul.mubr.bf16.vlgmr.msra.gmra.mrb[0].mxu1 %v925_v2  ;;  %v587_v48 = vcombine.high %v1752_v46, %v1752_v46  ;;  %v631_v49 = vshrl.u32 %v1752_v46, 16  ;;  %v634_v50 = vshll.u32 %v1752_v46, 16  ;;  %474 = vst [vmem:[#allocation2 + $0x3e] sm:$0x3] %v466_v58  ;;  %650 = vst [vmem:[#allocation2 + $0x32] sm:$0x3] %v466_v58 }
  0x38   : > { %1908 = vmatpush3.bf16.msra.mxu1 %v2011_v62  ;;  %v2043_v62 = vld [vmem:[%s2425_s1 + $0x1b8] sm:$0xff]   ;;  %v1760_v1 = vld.sshfl [vmem:[%s2195_s27 + $0x14] sm:$0x12 pattern:$0x76325410]  ;;  %v2065_v2 = vmov 0.0  }
  0x39   : > { %1909 = vmatprep.subr.bf16.mxu1 %v2014_v5  ;;  %1888 = vmatpush3.bf16.msra.mxu0 %v2013_v6  ;;  %v633_v55 = vrot.slane %v631_v49, 6  ;;  %v636_v56 = vrot.slane %v634_v50, 7  ;;  %v640_v57 = vshll.u32 %v587_v48, 16  ;;  %v691_v3 = vcombine.high %v1760_v1, %v1760_v1  ;;  %v2039_v6 = vld [vmem:[#allocation2 + $0x8] ss:$18 sps:$4 sm:$0xff]   ;;  %v2052_v26 = vld [vmem:[%s2425_s1 + $0x230] sm:$0xff]  }
  0x3a   : > { %1889 = vmatprep.subr.bf16.mxu0 %v2016_v8  ;;  %v1764_v5 = vrot.slane %v1760_v1, 9  ;;  %v2054_v24 = vld [vmem:[#allocation2 + $0x10] ss:$18 sps:$4 sm:$0x33]  }
  0x3b   : > { %v637_v60 = vor.u32 %v636_v56, %v633_v55  ;;  %v642_v61 = vrot.slane %v640_v57, 7  ;;  %v706_v8 = vrot.slane %v691_v3, 7  ;;  %v971_v27 = vrot.slane %v2054_v24, %v2272_v52 }
  0x3c   : > { %1910 = vmatpush3.bf16.msra.mxu1 %v2015_v7  ;;  %v2044_v7 = vld [vmem:[#allocation2 + $0xc] ss:$18 sps:$4 sm:$0xff]  }
  0x3d   : > { %1911 = vmatprep.subr.bf16.mxu1 %v2018_v9  ;;  %1890 = vmatpush3.bf16.msra.mxu0 %v2017_v10  ;;  %v638_v63 = vrot.slane %v637_v60, 2  ;;  %v707_v9 = vsel %vm2252_vm13, %v1764_v5, %v706_v8 }
  0x3e   : > { %1891 = vmatprep.subr.bf16.mxu0 %v2020_v12  ;;  %715 = vst [vmem:[#allocation2 + $0x46] sm:$0x3] %v707_v9  ;;  %v2041_v10 = vld [vmem:[#allocation2 + $0x2c] ss:$18 sps:$4 sm:$0xff]   ;;  %v944_v12 = vrot.slane %v2044_v7, %v2272_v52 }
  0x3f   : > { %v643_v0 = vsel %vm2228_vm11, %v638_v63, %v642_v61 }
  0x40   : > { %1912 = vmatpush3.bf16.msra.mxu1 %v2019_v11  ;;  %651 = vst [vmem:[#allocation2 + $0x44] sm:$0x3] %v643_v0  ;;  %v937_v11 = vrot.slane %v2039_v6, %v2272_v52 }
  0x41   : > { %1913 = vmatprep.subr.bf16.mxu1 %v2022_v13  ;;  %1892 = vmatpush3.bf16.msra.mxu0 %v2021_v14  ;;  %v951_v13 = vrot.slane %v2041_v10, %v2272_v52 }
  0x42   : > { %1893 = vmatprep.subr.bf16.mxu0 %v2024_v16 }
  0x43   : > { %v959_v16 = vcombine.low %v937_v11, %v951_v13 }
  0x44   : > { %1914 = vmatpush3.bf16.msra.mxu1 %v2023_v15  ;;  %v960_v15 = vcombine.high %v937_v11, %v951_v13 }
  0x45   : > { %1915 = vmatprep.subr.bf16.mxu1 %v2026_v17  ;;  %1894 = vmatpush3.bf16.msra.mxu0 %v2025_v18  ;;  %v2046_v18 = vld [vmem:[%s2425_s1 + $0x200] sm:$0xff]  }
  0x46   : > { %1895 = vmatprep.subr.bf16.mxu0 %v2028_v20  ;;  %1535 = vmatprep.mubr.bf16.mxu0 %v960_v15  ;;  %v2048_v20 = vld [vmem:[%s2425_s1 + $0x210] sm:$0xff]  }
  0x47   : > { %v2045_v4 = vld [vmem:[#allocation2 + $0x30] ss:$18 sps:$4 sm:$0xff]   ;;  %v2055_v25 = vld [vmem:[#allocation2 + $0x34] ss:$18 sps:$4 sm:$0x33]  }
  0x48   : > { %1916 = vmatpush3.bf16.msra.mxu1 %v2027_v19  ;;  %v958_v14 = vrot.slane %v2045_v4, %v2272_v52  ;;  %v2047_v19 = vld [vmem:[%s2425_s1 + $0x208] sm:$0xff]  }
  0x49   : > { %1917 = vmatprep.subr.bf16.mxu1 %v2030_v21  ;;  %1896 = vmatpush3.bf16.msra.mxu0 %v2029_v23  ;;  %v2049_v21 = vld [vmem:[%s2425_s1 + $0x218] sm:$0xff]   ;;  %v2051_v23 = vld [vmem:[%s2425_s1 + $0x228] sm:$0xff]  }
  0x4a   : > { %1897 = vmatprep.subr.bf16.mxu0 %v2032_v34  ;;  %v962_v17 = vcombine.high %v944_v12, %v958_v14  ;;  %v961_v29 = vcombine.low %v944_v12, %v958_v14  ;;  %v1765_v34 = vld [vmem:[%s2426_s2] ss:$0 sm:$0xff] }
  0x4c   : > { %1918 = vmatpush3.bf16.msra.mxu1 %v2031_v28  ;;  %1576 = vmatprep.mubr.bf16.mxu1 %v962_v17  ;;  %v978_v28 = vrot.slane %v2055_v25, %v2272_v52 }
  0x4d   : > { %1919 = vmatprep.subr.bf16.mxu1 %v2034_v39  ;;  %1898 = vmatpush3.bf16.msra.mxu0 %v2033_v42 }
  0x4e   : > { %1899 = vmatprep.subr.bf16.mxu0 %v2036_v51  ;;  %v979_v31 = vcombine.low %v971_v27, %v978_v28 }
  0x50   : > { %1920 = vmatpush3.bf16.msra.mxu1 %v2035_v43 }
  0x51   : > { %1921 = vmatprep.subr.bf16.mxu1 %v2038_v54  ;;  %1900 = vmatpush3.bf16.msra.mxu0 %v2037_v59 }
  0x52   : > { %1938 = vmatprep.subr.bf16.mxu0 %v2065_v2 }
  0x54   : > { %1922 = vmatpush3.bf16.msra.mxu1 %v2043_v62  ;;  %1536 = vmatmul.mubr.bf16.vlgmr.msra.gmra.mrb[4].mxu0 %v959_v16 }
  0x55   : > { %1939 = vmatpush3.bf16.msra.mxu0 %v2046_v18  ;;  %1954 = vmatprep.mubr.msk.bf16.mxu0 %vm2066_vm14, %v2065_v2 }
  0x56   : > { %1940 = vmatprep.subr.bf16.mxu0 %v2065_v2 }
  0x57   : > { %1577 = vmatmul.mubr.bf16.vlgmr.msra.gmra.mrb[4].mxu1 %v961_v29 }
  0x59   : > { %1941 = vmatpush3.bf16.msra.mxu0 %v2047_v19 }
  0x5a   : > { %1942 = vmatprep.subr.bf16.mxu0 %v2065_v2 }
  0x5d   : > { %1943 = vmatpush3.bf16.msra.mxu0 %v2048_v20 }
  0x5e   : > { %1944 = vmatprep.subr.bf16.mxu0 %v2065_v2 }
  0x61   : > { %1945 = vmatpush3.bf16.msra.mxu0 %v2049_v21 }
  0x62   : > { %1946 = vmatprep.subr.bf16.mxu0 %v2065_v2 }
  0x65   : > { %1947 = vmatpush3.bf16.msra.mxu0 %v2050_v22 }
  0x66   : > { %1948 = vmatprep.subr.bf16.mxu0 %v2065_v2 }
  0x69   : > { %1949 = vmatpush3.bf16.msra.mxu0 %v2051_v23 }
  0x6a   : > { %1950 = vmatprep.subr.bf16.mxu0 %v2065_v2 }
  0x6d   : > { %1951 = vmatpush3.bf16.msra.mxu0 %v2052_v26 }
  0x6e   : > { %1952 = vmatprep.subr.bf16.mxu0 %v2065_v2 }
  0x71   : > { %1953 = vmatpush3.bf16.msra.mxu0 %v2053_v30 }
  0x74   : > { %1955 = vmatmul.mubr.bf16.vlgmr.msra.gmra.mrb[8].mxu0 %v979_v31 }
 0x107   : > { %v1857_v32 = vpop.f32.mrb[0].mxu0 }
 0x108   : > { %v1858_v35 = vpop.f32.mrb[1].mxu0 }
 0x109   : > { %v1859_v37 = vadd.f32 %v1858_v35, %v1857_v32  ;;  %v1860_v38 = vpop.f32.mrb[2].mxu0 }
 0x10a   : > { %v1879_v33 = vpop.f32.mrb[0].mxu1  ;;  %v1861_v40 = vpop.f32.mrb[3].mxu0 }
 0x10b   : > { %v1880_v36 = vpop.f32.mrb[1].mxu1  ;;  %v1456_v42 = vadd.f32 %v1859_v37, %v1765_v34  ;;  %v1862_v43 = vadd.f32 %v1861_v40, %v1860_v38 }
 0x10c   : > { %v1881_v52 = vadd.f32 %v1880_v36, %v1879_v33  ;;  %v1882_v39 = vpop.f32.mrb[2].mxu1 }
 0x10d   : > { %v1883_v41 = vpop.f32.mrb[3].mxu1  ;;  %v1459_v45 = vadd.f32 %v1862_v43, %v1765_v34 }
 0x10e   : > { %v1884_v44 = vadd.f32 %v1883_v41, %v1882_v39  ;;  %v1497_v46 = vadd.f32 %v1881_v52, %v1456_v42 }
 0x110   : > { %v1500_v47 = vadd.f32 %v1884_v44, %v1459_v45 }
 0x127   : > { %v1901_v48 = vpop.f32.mrb[4].mxu0 }
 0x128   : > { %v1902_v50 = vpop.f32.mrb[5].mxu0 }
 0x129   : > { %v1903_v53 = vadd.f32 %v1902_v50, %v1901_v48  ;;  %v1904_v54 = vpop.f32.mrb[6].mxu0 }
 0x12a   : > { %v1923_v49 = vpop.f32.mrb[4].mxu1  ;;  %v1905_v57 = vpop.f32.mrb[7].mxu0 }
 0x12b   : > { %v1924_v51 = vpop.f32.mrb[5].mxu1  ;;  %v1538_v59 = vadd.f32 %v1903_v53, %v1497_v46  ;;  %v1906_v60 = vadd.f32 %v1905_v57, %v1904_v54 }
 0x12c   : > { %v1925_v55 = vadd.f32 %v1924_v51, %v1923_v49  ;;  %v1926_v56 = vpop.f32.mrb[6].mxu1 }
 0x12d   : > { %v1927_v58 = vpop.f32.mrb[7].mxu1  ;;  %v1541_v62 = vadd.f32 %v1906_v60, %v1500_v47 }
 0x12e   : > { %v1928_v61 = vadd.f32 %v1927_v58, %v1926_v56  ;;  %v1579_v63 = vadd.f32 %v1925_v55, %v1538_v59 }
 0x130   : > { %v1582_v0 = vadd.f32 %v1928_v61, %v1541_v62 }
 0x147   : > { %v1619_v1 = vpop.f32.mrb[8].mxu0 }
 0x148   : > { %v1620_v2 = vadd.f32 %v1619_v1, %v1579_v63  ;;  %v1956_v3 = vpop.f32.mrb[9].mxu0 }
 0x149   : > { %v1622_v5 = vpop.f32.mrb[10].mxu0 }
 0x14a   : > { %v1626_v6 = vmax.f32 %v1620_v2, 0.0  ;;  %v1623_v7 = vadd.f32 %v1622_v5, %v1582_v0  ;;  %v1957_v8 = vpop.f32.mrb[11].mxu0 }
 0x14c   : > { %v1630_v9 = vcombine.high %v1626_v6, %v1626_v6  ;;  %v1634_v10 = vpack.c.bf16 %v1626_v6, %v1626_v6  ;;  %v1627_v11 = vmax.f32 %v1623_v7, 0.0 }
 0x14e   : > { %v1635_v4 = vpack.c.bf16 %v1630_v9, %v1630_v9  ;;  %1638 = vst [vmem:[%s170_s19] sm:$0x3] %v1634_v10  ;;  %v1631_v12 = vcombine.high %v1627_v11, %v1627_v11  ;;  %v1636_v13 = vpack.c.bf16 %v1627_v11, %v1627_v11 }
 0x150   : > { %1639 = vst [vmem:[%s170_s19 + $0x2] sm:$0x3] %v1635_v4  ;;  %v1637_v14 = vpack.c.bf16 %v1631_v12, %v1631_v12  ;;  %1640 = vst [vmem:[%s170_s19 + $0x4] sm:$0x3] %v1636_v13 }
 0x152   : > { %1641 = vst [vmem:[%s170_s19 + $0x6] sm:$0x3] %v1637_v14 }
 0x153 PF: > { %s13_s12 = sadd.s32 1, %s2062_s12  }
 0x154   : > { %p10_p4 = scmp.ge.s32.totalorder %s13_s12, 4  }
 0x156   :  { %12 = sbr.rel (!%p10_p4) target bundleno = 1 (0x1), region = 64 }

// kernel: clip_feature_extractor_forward.33
= control target key start
LH: loop header
LB: loop body
LE: loop exit
PB: predicated region body
PF: predicated region fallthrough
CT: control target
= control target key end

     0   :  { %s765_s15 = smov 0   ;;  %s767_s16 = smov 0   ;;  %s896_s0 = inlined_call_operand.vmem [shape: bf16[16,512], index: 0, kind: input, shape index: {}]   ;;  %s897_s1 = inlined_call_operand.vmem [shape: bf16[128,256], index: 1, kind: input, shape index: {}]   ;;  %s898_s2 = inlined_call_operand.vmem [shape: f32[1,256], index: 2, kind: input, shape index: {}]   ;;  %s899_s3 = inlined_call_operand.vmem [shape: bf16[16,256], index: 3, kind: input, shape index: {}]   ;;  %s900_s4 = inlined_call_operand.vmem [shape: bf16[16,256], index: 4, kind: output, shape index: {}]  }
   0x1   :  { %s769_s17 = smov 0   ;;  %s771_s18 = smov 0  }
   0x2   :  { %s773_s19 = smov 0  }
   0x3 LB: > { %s23_s20 = sadd.s32 1, %s732_s18  ;;  %p42_p1 = scmp.ne.s32.totalorder %s724_s16, %s720_s15  ;;  %s736_s19 = sphi %s773_s19, %s14_s19   ;;  %s732_s18 = sphi %s771_s18, %s904_s18   ;;  %s728_s17 = sphi %s769_s17, %s903_s17   ;;  %s724_s16 = sphi %s767_s16, %s902_s16   ;;  %s720_s15 = sphi %s765_s15, %s901_s15  }
   0x4   : > { %p24_p0 = scmp.ge.s32.totalorder %s23_s20, 4  ;;  %p43_p2 = scmp.eq.s32.totalorder %s736_s19, 0 }
   0x5   : > { %s35_s22 = sadd.s32 1, %s724_s16  ;;  %p599_p5 = scmp.ge.s32.totalorder %s736_s19, 4 }
   0x6   : > { %s906_s20 = smov (%p24_p0, %s23_s20), 0  ;;  %p44_p3 = por %p43_p2, %p42_p1 }
   0x7   : > { %s31_s21 = ssub.s32 %s732_s18, %s906_s20  ;;  %178 = sbr.rel (%p599_p5) target bundleno = 21 (0x15), region = 28 }
   0x8   : > { %p33_p4 = scmp.eq.s32.totalorder %s31_s21, 0 }
   0xa   : > { %s800_s23 = scalar_select %p33_p4, %s724_s16, %s35_s22  }
   0xe   : > { %181 = sbr.rel (!%p44_p3) target bundleno = 21 (0x15), region = 32  ;;  %s183_s24 = sand.u32 (%p44_p3), 1, %s724_s16  }
   0xf   : > { %s601_s25 = sshll.u32 (%p44_p3), %s732_s18, 2  ;;  %s600_s26 = sshll.u32 (%p44_p3), %s183_s24, 3 }
  0x10   : > { %s190_s29 = scalar_lea.vmem (%p44_p3), %s896_s0, %s601_s25  ;;  %s185_s30 = scalar_lea.vmem (%p44_p3), [#allocation3], %s600_s26 }
  0x11   : > { %v206_v0 = vld [vmem:[%s190_s29] sm:$0xf] (%p44_p3)  ;;  %v208_v1 = vld [vmem:[%s190_s29 + $0x10] sm:$0xf] (%p44_p3) }
  0x12   : > { %207 = vst [vmem:[%s185_s30] sm:$0xf] (%p44_p3), %v206_v0  ;;  %209 = vst [vmem:[%s185_s30 + $0x4] sm:$0xf] (%p44_p3), %v208_v1 }
  0x15 PF: > { %p602_p6 = scmp.ge.s32.totalorder %s736_s19, 1  ;;  %p235_p7 = scmp.lt.s32.totalorder %s736_s19, 5 }
  0x17   : > { %p236_p8 = pnand %p602_p6, %p235_p7 }
  0x18   : > { %s242_s5 = sand.u32 (!%p236_p8), 1, %s720_s15   ;;  %p604_p9 = scmp.ne.s32.totalorder (!%p236_p8), %s728_s17, 0 }
  0x19   : > { %239 = sbr.rel (%p236_p8) target bundleno = 306 (0x132), region = 73  ;;  %s811_s6 = sshll.u32 (!%p236_p8), %s242_s5, 3 }
  0x1a   : > { %s244_s7 = scalar_lea.vmem (!%p236_p8), [#allocation3], %s811_s6 }
  0x20   : > { %293 = sbr.rel (%p604_p9) target bundleno = 39 (0x27), region = 81  ;;  %v738_v2 = vmov (!%p604_p9), 0.0  }
  0x21   : > { %294 = vst [vmem:[#allocation2] sm:$0xff] (!%p604_p9), %v738_v2  ;;  %295 = vst [vmem:[#allocation2 + $0x8] sm:$0xff] (!%p604_p9), %v738_v2 }
  0x22   : > { %296 = vst [vmem:[#allocation2 + $0x10] sm:$0xff] (!%p604_p9), %v738_v2  ;;  %297 = vst [vmem:[#allocation2 + $0x18] sm:$0xff] (!%p604_p9), %v738_v2 }
  0x27 PF: > { %v673_v3 = vld [vmem:[%s897_s1 + $0x4] ss:$8 sps:$4 sm:$0xff]   ;;  %v675_v4 = vld [vmem:[%s897_s1] ss:$8 sps:$4 sm:$0xff]   ;;  %v739_v5 = vmov 0   ;;  %p622_p10 = scmp.ne.s32.totalorder %s728_s17, 3 }
  0x28   : > { %438 = vmatprep.mubr.bf16.mxu0 %v739_v5  ;;  %406 = vmatprep.subr.bf16.mxu0 %v673_v3  ;;  %v676_v6 = vld [vmem:[%s897_s1 + $0x14] ss:$8 sps:$4 sm:$0xff]   ;;  %v678_v7 = vld [vmem:[%s897_s1 + $0x10] ss:$8 sps:$4 sm:$0xff]   ;;  %v679_v8 = vld [vmem:[%s897_s1 + $0x24] ss:$8 sps:$4 sm:$0xff]   ;;  %v467_v33 = vlaneseq (!%p622_p10) }
  0x29   : > { %407 = vmatpush1.bf16.msra.mxu0 %v675_v4  ;;  %v681_v9 = vld [vmem:[%s897_s1 + $0x20] ss:$8 sps:$4 sm:$0xff]   ;;  %v682_v10 = vld [vmem:[%s897_s1 + $0x34] ss:$8 sps:$4 sm:$0xff]   ;;  %v684_v11 = vld [vmem:[%s897_s1 + $0x30] ss:$8 sps:$4 sm:$0xff]  }
  0x2a   : > { %408 = vmatprep.subr.bf16.mxu0 %v676_v6  ;;  %v685_v12 = vld [vmem:[%s897_s1 + $0x44] ss:$8 sps:$4 sm:$0xff]   ;;  %v687_v13 = vld [vmem:[%s897_s1 + $0x40] ss:$8 sps:$4 sm:$0xff]   ;;  %v688_v14 = vld [vmem:[%s897_s1 + $0x54] ss:$8 sps:$4 sm:$0xff]  }
  0x2b   : > { %v690_v15 = vld [vmem:[%s897_s1 + $0x50] ss:$8 sps:$4 sm:$0xff]   ;;  %v691_v16 = vld [vmem:[%s897_s1 + $0x64] ss:$8 sps:$4 sm:$0xff]   ;;  %v693_v17 = vld [vmem:[%s897_s1 + $0x60] ss:$8 sps:$4 sm:$0xff]  }
  0x2c   : > { %v694_v18 = vld [vmem:[%s897_s1 + $0x74] ss:$8 sps:$4 sm:$0xff]   ;;  %v696_v19 = vld [vmem:[%s897_s1 + $0x70] ss:$8 sps:$4 sm:$0xff]   ;;  %v697_v20 = vld [vmem:[%s244_s7] sm:$0xff]   ;;  %v468_v34 = vshrl.u32 (!%p622_p10), %v467_v33, 7 }
  0x2d   : > { %409 = vmatpush1.bf16.msra.mxu0 %v678_v7  ;;  %v298_v21 = vld [vmem:[#allocation2] sm:$0xff]  ;;  %v299_v22 = vld [vmem:[#allocation2 + $0x8] sm:$0xff]  ;;  %v300_v24 = vld [vmem:[#allocation2 + $0x10] sm:$0xff] }
  0x2e   : > { %410 = vmatprep.subr.bf16.mxu0 %v679_v8  ;;  %v301_v27 = vld [vmem:[#allocation2 + $0x18] sm:$0xff]  ;;  %v481_v35 = vld [vmem:[%s899_s3] sm:$0xff] (!%p622_p10)  ;;  %v482_v37 = vld [vmem:[%s899_s3 + $0x8] sm:$0xff] (!%p622_p10)  ;;  %v469_v39 = vsub.s32 (!%p622_p10), 0, %v468_v34  ;;  %v473_v40 = vsub.s32 (!%p622_p10), 1, %v468_v34 }
  0x2f   : > { %v465_v36 = vld [vmem:[%s898_s2] sm:$0x3] (!%p622_p10)  ;;  %v483_v42 = vunpack.c.l.bf16 (!%p622_p10), %v481_v35  ;;  %v484_v43 = vunpack.c.h.bf16 (!%p622_p10), %v481_v35  ;;  %v485_v48 = vunpack.c.l.bf16 (!%p622_p10), %v482_v37  ;;  %v486_v49 = vunpack.c.h.bf16 (!%p622_p10), %v482_v37 }
  0x30   : > { %v470_v46 = vrot.slane (!%p622_p10), %v465_v36, %v469_v39  ;;  %v474_v47 = vrot.slane (!%p622_p10), %v465_v36, %v473_v40 }
  0x31   : > { %411 = vmatpush1.bf16.msra.mxu0 %v681_v9 }
  0x32   : > { %412 = vmatprep.subr.bf16.mxu0 %v682_v10 }
  0x35   : > { %413 = vmatpush1.bf16.msra.mxu0 %v684_v11 }
  0x36   : > { %414 = vmatprep.subr.bf16.mxu0 %v685_v12 }
  0x39   : > { %415 = vmatpush1.bf16.msra.mxu0 %v687_v13 }
  0x3a   : > { %416 = vmatprep.subr.bf16.mxu0 %v688_v14 }
  0x3d   : > { %417 = vmatpush1.bf16.msra.mxu0 %v690_v15 }
  0x3e   : > { %418 = vmatprep.subr.bf16.mxu0 %v691_v16 }
  0x41   : > { %419 = vmatpush1.bf16.msra.mxu0 %v693_v17 }
  0x42   : > { %420 = vmatprep.subr.bf16.mxu0 %v694_v18 }
  0x45   : > { %421 = vmatpush1.bf16.msra.mxu0 %v696_v19 }
  0x48   : > { %439 = vmatmul.mubr.bf16.vlgmr.msra.gmra.mrb[0].mxu0 %v697_v20 }
 0x11b   : > { %v440_v23 = vpop.f32.mrb[0].mxu0  ;;  %460 = sbr.rel (%p622_p10) target bundleno = 306 (0x132), region = 85 }
 0x11c   : > { %v449_v25 = vadd.f32 %v440_v23, %v298_v21  ;;  %v442_v26 = vpop.f32.mrb[1].mxu0 }
 0x11d   : > { %v450_v28 = vadd.f32 %v442_v26, %v299_v22  ;;  %v444_v29 = vpop.f32.mrb[2].mxu0 }
 0x11e   : > { %453 = vst [vmem:[#allocation2] sm:$0xff] %v449_v25  ;;  %v451_v30 = vadd.f32 %v444_v29, %v300_v24  ;;  %v446_v31 = vpop.f32.mrb[3].mxu0 }
 0x11f   : > { %454 = vst [vmem:[#allocation2 + $0x8] sm:$0xff] %v450_v28  ;;  %v452_v32 = vadd.f32 %v446_v31, %v301_v27 }
 0x120   : > { %455 = vst [vmem:[#allocation2 + $0x10] sm:$0xff] %v451_v30 }
 0x121   : > { %456 = vst [vmem:[#allocation2 + $0x18] sm:$0xff] %v452_v32 }
 0x125   : > { %v461_v38 = vld [vmem:[#allocation2] sm:$0xff] }
 0x126   : > { %v462_v41 = vld [vmem:[#allocation2 + $0x8] sm:$0xff]  ;;  %v477_v50 = vadd.f32 %v470_v46, %v461_v38 }
 0x127   : > { %v463_v44 = vld [vmem:[#allocation2 + $0x10] sm:$0xff]  ;;  %v478_v51 = vadd.f32 %v474_v47, %v462_v41 }
 0x128   : > { %v464_v45 = vld [vmem:[#allocation2 + $0x18] sm:$0xff]  ;;  %v479_v52 = vadd.f32 %v470_v46, %v463_v44  ;;  %v487_v54 = vadd.f32 %v483_v42, %v477_v50 }
 0x129   : > { %v480_v53 = vadd.f32 %v474_v47, %v464_v45  ;;  %v488_v55 = vadd.f32 %v484_v43, %v478_v51 }
 0x12a   : > { %v489_v56 = vadd.f32 %v485_v48, %v479_v52  ;;  %v491_v58 = vmax.f32 %v487_v54, 0.0 }
 0x12b   : > { %v490_v57 = vadd.f32 %v486_v49, %v480_v53  ;;  %v492_v59 = vmax.f32 %v488_v55, 0.0 }
 0x12c   : > { %v493_v60 = vmax.f32 %v489_v56, 0.0 }
 0x12d   : > { %v494_v61 = vmax.f32 %v490_v57, 0.0  ;;  %v629_v62 = vpack.c.bf16 %v492_v59, %v491_v58 }
 0x12f   : > { %v630_v63 = vpack.c.bf16 %v494_v61, %v493_v60  ;;  %507 = vst [vmem:[%s900_s4] sm:$0xff] %v629_v62 }
 0x131   : > { %508 = vst [vmem:[%s900_s4 + $0x8] sm:$0xff] %v630_v63 }
 0x132 PF: > { %s14_s19 = sadd.s32 1, %s736_s19   ;;  %s901_s15 = smov %s724_s16 }
 0x133   : > { %p11_p11 = scmp.ge.s32.totalorder %s14_s19, 6   ;;  %s902_s16 = smov %s800_s23 }
 0x134   : > { %s903_s17 = smov %s732_s18  ;;  %s904_s18 = smov %s906_s20 }
 0x135   :  { %13 = sbr.rel (!%p11_p11) target bundleno = 3 (0x3), region = 123 }

// kernel: clip_feature_extractor_forward.36
= control target key start
LH: loop header
LB: loop body
LE: loop exit
PB: predicated region body
PF: predicated region fallthrough
CT: control target
= control target key end

     0   :  { %s1183_s12 = smov 0   ;;  %s1185_s13 = smov 0   ;;  %s1460_s0 = inlined_call_operand.vmem [shape: bf16[16,1024], index: 0, kind: input, shape index: {}]   ;;  %s1461_s1 = inlined_call_operand.vmem [shape: bf16[256,512], index: 1, kind: input, shape index: {}]   ;;  %s1462_s2 = inlined_call_operand.vmem [shape: f32[1,512], index: 2, kind: input, shape index: {}]   ;;  %s1463_s3 = inlined_call_operand.vmem [shape: bf16[16,512], index: 3, kind: output, shape index: {}]  }
   0x1   :  { %s1187_s14 = smov 0   ;;  %s1189_s15 = smov 0  }
   0x2   :  { %s1191_s16 = smov 0  }
   0x3 LB: > { %s22_s17 = sadd.s32 1, %s1156_s15  ;;  %p41_p1 = scmp.ne.s32.totalorder %s1148_s13, %s1144_s12  ;;  %s1160_s16 = sphi %s1191_s16, %s13_s16   ;;  %s1156_s15 = sphi %s1189_s15, %s1467_s15   ;;  %s1152_s14 = sphi %s1187_s14, %s1466_s14   ;;  %s1148_s13 = sphi %s1185_s13, %s1465_s13   ;;  %s1144_s12 = sphi %s1183_s12, %s1464_s12  }
   0x4   : > { %p23_p0 = scmp.ge.s32.totalorder %s22_s17, 4  ;;  %p42_p2 = scmp.eq.s32.totalorder %s1160_s16, 0 }
   0x5   : > { %s34_s19 = sadd.s32 1, %s1148_s13  ;;  %p895_p5 = scmp.ge.s32.totalorder %s1160_s16, 4 }
   0x6   : > { %s1469_s17 = smov (%p23_p0, %s22_s17), 0  ;;  %p43_p3 = por %p42_p2, %p41_p1 }
   0x7   : > { %s30_s18 = ssub.s32 %s1156_s15, %s1469_s17  ;;  %141 = sbr.rel (%p895_p5) target bundleno = 21 (0x15), region = 24 }
   0x8   : > { %p32_p4 = scmp.eq.s32.totalorder %s30_s18, 0 }
   0xa   : > { %s1218_s20 = scalar_select %p32_p4, %s1148_s13, %s34_s19  }
   0xe   : > { %144 = sbr.rel (!%p43_p3) target bundleno = 21 (0x15), region = 28  ;;  %s146_s21 = sand.u32 (%p43_p3), 1, %s1148_s13  }
   0xf   : > { %s977_s22 = sshll.u32 (%p43_p3), %s1156_s15, 3  ;;  %s896_s23 = sshll.u32 (%p43_p3), %s146_s21, 4 }
  0x10   : > { %s154_s26 = scalar_lea.vmem (%p43_p3), %s1460_s0, %s977_s22  ;;  %s148_s27 = scalar_lea.vmem (%p43_p3), [#allocation3], %s896_s23 }
  0x11   : > { %v184_v0 = vld [vmem:[%s154_s26] sm:$0xff] (%p43_p3) }
  0x12   : > { %v186_v1 = vld [vmem:[%s154_s26 + $0x20] sm:$0xff] (%p43_p3)  ;;  %185 = vst [vmem:[%s148_s27] sm:$0xff] (%p43_p3), %v184_v0 }
  0x13   : > { %187 = vst [vmem:[%s148_s27 + $0x8] sm:$0xff] (%p43_p3), %v186_v1 }
  0x15 PF: > { %p899_p6 = scmp.ge.s32.totalorder %s1160_s16, 1  ;;  %p192_p7 = scmp.lt.s32.totalorder %s1160_s16, 5 }
  0x17   : > { %p193_p8 = pnand %p899_p6, %p192_p7 }
  0x18   : > { %s199_s28 = sand.u32 (!%p193_p8), 1, %s1144_s12   ;;  %p901_p9 = scmp.ne.s32.totalorder (!%p193_p8), %s1152_s14, 0 }
  0x19   : > { %196 = sbr.rel (%p193_p8) target bundleno = 334 (0x14e), region = 66  ;;  %s1229_s29 = sshll.u32 (!%p193_p8), %s199_s28, 4 }
  0x1a   : > { %s201_s30 = scalar_lea.vmem (!%p193_p8), [#allocation3], %s1229_s29 }
  0x20   : > { %235 = sbr.rel (%p901_p9) target bundleno = 39 (0x27), region = 74  ;;  %v1162_v2 = vmov (!%p901_p9), 0.0  }
  0x21   : > { %236 = vst [vmem:[#allocation2] sm:$0xff] (!%p901_p9), %v1162_v2  ;;  %237 = vst [vmem:[#allocation2 + $0x8] sm:$0xff] (!%p901_p9), %v1162_v2 }
  0x22   : > { %238 = vst [vmem:[#allocation2 + $0x10] sm:$0xff] (!%p901_p9), %v1162_v2  ;;  %239 = vst [vmem:[#allocation2 + $0x18] sm:$0xff] (!%p901_p9), %v1162_v2 }
  0x23   : > { %240 = vst [vmem:[#allocation2 + $0x20] sm:$0xff] (!%p901_p9), %v1162_v2  ;;  %241 = vst [vmem:[#allocation2 + $0x28] sm:$0xff] (!%p901_p9), %v1162_v2 }
  0x24   : > { %242 = vst [vmem:[#allocation2 + $0x30] sm:$0xff] (!%p901_p9), %v1162_v2  ;;  %243 = vst [vmem:[#allocation2 + $0x38] sm:$0xff] (!%p901_p9), %v1162_v2 }
  0x27 PF: > { %v1023_v3 = vld [vmem:[%s1461_s1 + $0x4] ss:$16 sps:$4 sm:$0xff]   ;;  %v1025_v4 = vld [vmem:[%s1461_s1 + $0xc] ss:$16 sps:$4 sm:$0xff]   ;;  %v1027_v5 = vld [vmem:[%s1461_s1] ss:$16 sps:$4 sm:$0xff]  }
  0x28   : > { %648 = vmatprep.subr.bf16.mxu0 %v1023_v3  ;;  %v1028_v6 = vld [vmem:[%s1461_s1 + $0x8] ss:$16 sps:$4 sm:$0xff]   ;;  %691 = vmatprep.subr.bf16.mxu1 %v1025_v4  ;;  %v1029_v7 = vld [vmem:[%s1461_s1 + $0x24] ss:$16 sps:$4 sm:$0xff]   ;;  %v1031_v8 = vld [vmem:[%s1461_s1 + $0x2c] ss:$16 sps:$4 sm:$0xff]  }
  0x29   : > { %649 = vmatpush1.bf16.msra.mxu0 %v1027_v5  ;;  %692 = vmatpush1.bf16.msra.mxu1 %v1028_v6  ;;  %v1033_v9 = vld [vmem:[%s1461_s1 + $0x20] ss:$16 sps:$4 sm:$0xff]   ;;  %v1034_v10 = vld [vmem:[%s1461_s1 + $0x28] ss:$16 sps:$4 sm:$0xff]   ;;  %v1035_v11 = vld [vmem:[%s1461_s1 + $0x44] ss:$16 sps:$4 sm:$0xff]  }
  0x2a   : > { %650 = vmatprep.subr.bf16.mxu0 %v1029_v7  ;;  %693 = vmatprep.subr.bf16.mxu1 %v1031_v8  ;;  %v1037_v12 = vld [vmem:[%s1461_s1 + $0x4c] ss:$16 sps:$4 sm:$0xff]   ;;  %v1039_v13 = vld [vmem:[%s1461_s1 + $0x40] ss:$16 sps:$4 sm:$0xff]   ;;  %v1040_v14 = vld [vmem:[%s1461_s1 + $0x48] ss:$16 sps:$4 sm:$0xff]  }
  0x2b   : > { %v1041_v15 = vld [vmem:[%s1461_s1 + $0x64] ss:$16 sps:$4 sm:$0xff]   ;;  %v1043_v16 = vld [vmem:[%s1461_s1 + $0x6c] ss:$16 sps:$4 sm:$0xff]   ;;  %v1045_v17 = vld [vmem:[%s1461_s1 + $0x60] ss:$16 sps:$4 sm:$0xff]  }
  0x2c   : > { %v1046_v18 = vld [vmem:[%s1461_s1 + $0x68] ss:$16 sps:$4 sm:$0xff]   ;;  %v1047_v19 = vld [vmem:[%s1461_s1 + $0x84] ss:$16 sps:$4 sm:$0xff]   ;;  %v1049_v20 = vld [vmem:[%s1461_s1 + $0x8c] ss:$16 sps:$4 sm:$0xff]  }
  0x2d   : > { %651 = vmatpush1.bf16.msra.mxu0 %v1033_v9  ;;  %694 = vmatpush1.bf16.msra.mxu1 %v1034_v10  ;;  %v1051_v21 = vld [vmem:[%s1461_s1 + $0x80] ss:$16 sps:$4 sm:$0xff]   ;;  %v1052_v22 = vld [vmem:[%s1461_s1 + $0x88] ss:$16 sps:$4 sm:$0xff]   ;;  %v1053_v23 = vld [vmem:[%s1461_s1 + $0xa4] ss:$16 sps:$4 sm:$0xff]  }
  0x2e   : > { %652 = vmatprep.subr.bf16.mxu0 %v1035_v11  ;;  %695 = vmatprep.subr.bf16.mxu1 %v1037_v12  ;;  %v1055_v24 = vld [vmem:[%s1461_s1 + $0xac] ss:$16 sps:$4 sm:$0xff]   ;;  %v1057_v25 = vld [vmem:[%s1461_s1 + $0xa0] ss:$16 sps:$4 sm:$0xff]   ;;  %v1058_v26 = vld [vmem:[%s1461_s1 + $0xa8] ss:$16 sps:$4 sm:$0xff]  }
  0x2f   : > { %v1059_v27 = vld [vmem:[%s1461_s1 + $0xc4] ss:$16 sps:$4 sm:$0xff]   ;;  %v1061_v28 = vld [vmem:[%s1461_s1 + $0xcc] ss:$16 sps:$4 sm:$0xff]   ;;  %v1063_v29 = vld [vmem:[%s1461_s1 + $0xc0] ss:$16 sps:$4 sm:$0xff]  }
  0x30   : > { %v1064_v30 = vld [vmem:[%s1461_s1 + $0xc8] ss:$16 sps:$4 sm:$0xff]   ;;  %v1065_v31 = vld [vmem:[%s1461_s1 + $0xe4] ss:$16 sps:$4 sm:$0xff]   ;;  %v1067_v32 = vld [vmem:[%s1461_s1 + $0xec] ss:$16 sps:$4 sm:$0xff]  }
  0x31   : > { %653 = vmatpush1.bf16.msra.mxu0 %v1039_v13  ;;  %696 = vmatpush1.bf16.msra.mxu1 %v1040_v14  ;;  %v1069_v33 = vld [vmem:[%s1461_s1 + $0xe0] ss:$16 sps:$4 sm:$0xff]   ;;  %v1070_v34 = vld [vmem:[%s1461_s1 + $0xe8] ss:$16 sps:$4 sm:$0xff]   ;;  %v1071_v35 = vld [vmem:[%s1461_s1 + $0x104] ss:$16 sps:$4 sm:$0xff]  }
  0x32   : > { %654 = vmatprep.subr.bf16.mxu0 %v1041_v15  ;;  %697 = vmatprep.subr.bf16.mxu1 %v1043_v16  ;;  %v1073_v36 = vld [vmem:[%s1461_s1 + $0x10c] ss:$16 sps:$4 sm:$0xff]   ;;  %v1075_v37 = vld [vmem:[%s1461_s1 + $0x100] ss:$16 sps:$4 sm:$0xff]   ;;  %v1076_v38 = vld [vmem:[%s1461_s1 + $0x108] ss:$16 sps:$4 sm:$0xff]  }
  0x33   : > { %v1077_v39 = vld [vmem:[%s1461_s1 + $0x124] ss:$16 sps:$4 sm:$0xff]   ;;  %v1079_v40 = vld [vmem:[%s1461_s1 + $0x12c] ss:$16 sps:$4 sm:$0xff]   ;;  %v1081_v41 = vld [vmem:[%s1461_s1 + $0x120] ss:$16 sps:$4 sm:$0xff]  }
  0x34   : > { %v1082_v42 = vld [vmem:[%s1461_s1 + $0x128] ss:$16 sps:$4 sm:$0xff]   ;;  %v1083_v43 = vld [vmem:[%s1461_s1 + $0x144] ss:$16 sps:$4 sm:$0xff]   ;;  %v1085_v44 = vld [vmem:[%s1461_s1 + $0x14c] ss:$16 sps:$4 sm:$0xff]  }
  0x35   : > { %655 = vmatpush1.bf16.msra.mxu0 %v1045_v17  ;;  %698 = vmatpush1.bf16.msra.mxu1 %v1046_v18  ;;  %v1087_v45 = vld [vmem:[%s1461_s1 + $0x140] ss:$16 sps:$4 sm:$0xff]   ;;  %v1088_v46 = vld [vmem:[%s1461_s1 + $0x148] ss:$16 sps:$4 sm:$0xff]   ;;  %v1089_v47 = vld [vmem:[%s1461_s1 + $0x164] ss:$16 sps:$4 sm:$0xff]  }
  0x36   : > { %656 = vmatprep.subr.bf16.mxu0 %v1047_v19  ;;  %699 = vmatprep.subr.bf16.mxu1 %v1049_v20  ;;  %v1091_v48 = vld [vmem:[%s1461_s1 + $0x16c] ss:$16 sps:$4 sm:$0xff]   ;;  %v1093_v50 = vld [vmem:[%s1461_s1 + $0x160] ss:$16 sps:$4 sm:$0xff]   ;;  %v1094_v51 = vld [vmem:[%s1461_s1 + $0x168] ss:$16 sps:$4 sm:$0xff]  }
  0x37   : > { %v1121_v49 = vld [vmem:[%s201_s30 + $0x4] ss:$8 sps:$4 sm:$0xff]   ;;  %v1099_v54 = vld [vmem:[%s1461_s1 + $0x180] ss:$16 sps:$4 sm:$0xff]   ;;  %v1100_v55 = vld [vmem:[%s1461_s1 + $0x188] ss:$16 sps:$4 sm:$0xff]  }
  0x38   : > { %v1095_v52 = vld [vmem:[%s1461_s1 + $0x184] ss:$16 sps:$4 sm:$0xff]   ;;  %v1097_v53 = vld [vmem:[%s1461_s1 + $0x18c] ss:$16 sps:$4 sm:$0xff]   ;;  %680 = vmatprep.mubr.bf16.mxu0 %v1121_v49  ;;  %723 = vmatprep.mubr.bf16.mxu1 %v1121_v49  ;;  %v1105_v58 = vld [vmem:[%s1461_s1 + $0x1a0] ss:$16 sps:$4 sm:$0xff]  }
  0x39   : > { %657 = vmatpush1.bf16.msra.mxu0 %v1051_v21  ;;  %700 = vmatpush1.bf16.msra.mxu1 %v1052_v22  ;;  %v1101_v56 = vld [vmem:[%s1461_s1 + $0x1a4] ss:$16 sps:$4 sm:$0xff]   ;;  %v1103_v57 = vld [vmem:[%s1461_s1 + $0x1ac] ss:$16 sps:$4 sm:$0xff]   ;;  %v1106_v59 = vld [vmem:[%s1461_s1 + $0x1a8] ss:$16 sps:$4 sm:$0xff]  }
  0x3a   : > { %658 = vmatprep.subr.bf16.mxu0 %v1053_v23  ;;  %701 = vmatprep.subr.bf16.mxu1 %v1055_v24  ;;  %v1107_v60 = vld [vmem:[%s1461_s1 + $0x1c4] ss:$16 sps:$4 sm:$0xff]   ;;  %v1109_v61 = vld [vmem:[%s1461_s1 + $0x1cc] ss:$16 sps:$4 sm:$0xff]   ;;  %v1111_v62 = vld [vmem:[%s1461_s1 + $0x1c0] ss:$16 sps:$4 sm:$0xff]  }
  0x3b   : > { %v1112_v63 = vld [vmem:[%s1461_s1 + $0x1c8] ss:$16 sps:$4 sm:$0xff]   ;;  %v1113_v0 = vld [vmem:[%s1461_s1 + $0x1e4] ss:$16 sps:$4 sm:$0xff]   ;;  %v1115_v1 = vld [vmem:[%s1461_s1 + $0x1ec] ss:$16 sps:$4 sm:$0xff]  }
  0x3c   : > { %v1117_v2 = vld [vmem:[%s1461_s1 + $0x1e0] ss:$16 sps:$4 sm:$0xff]   ;;  %v1118_v3 = vld [vmem:[%s1461_s1 + $0x1e8] ss:$16 sps:$4 sm:$0xff]   ;;  %p968_p10 = scmp.ne.s32.totalorder %s1152_s14, 3 }
  0x3d   : > { %659 = vmatpush1.bf16.msra.mxu0 %v1057_v25  ;;  %702 = vmatpush1.bf16.msra.mxu1 %v1058_v26  ;;  %v1119_v4 = vld [vmem:[%s201_s30] ss:$8 sps:$4 sm:$0xff]  }
  0x3e   : > { %660 = vmatprep.subr.bf16.mxu0 %v1059_v27  ;;  %703 = vmatprep.subr.bf16.mxu1 %v1061_v28  ;;  %v244_v5 = vld [vmem:[#allocation2] sm:$0xff]  ;;  %v246_v6 = vld [vmem:[#allocation2 + $0x10] sm:$0xff]  ;;  %v245_v7 = vld [vmem:[#allocation2 + $0x8] sm:$0xff] }
  0x3f   : > { %v247_v8 = vld [vmem:[#allocation2 + $0x18] sm:$0xff]  ;;  %v248_v11 = vld [vmem:[#allocation2 + $0x20] sm:$0xff]  ;;  %v250_v12 = vld [vmem:[#allocation2 + $0x30] sm:$0xff] }
  0x40   : > { %v249_v17 = vld [vmem:[#allocation2 + $0x28] sm:$0xff]  ;;  %v251_v18 = vld [vmem:[#allocation2 + $0x38] sm:$0xff] }
  0x41   : > { %661 = vmatpush1.bf16.msra.mxu0 %v1063_v29  ;;  %704 = vmatpush1.bf16.msra.mxu1 %v1064_v30  ;;  %v764_v29 = vlaneseq (!%p968_p10) }
  0x42   : > { %662 = vmatprep.subr.bf16.mxu0 %v1065_v31  ;;  %705 = vmatprep.subr.bf16.mxu1 %v1067_v32  ;;  %v762_v31 = vld [vmem:[%s1462_s2] sm:$0xf] (!%p968_p10) }
  0x43   : > { %v765_v30 = vshrl.u32 (!%p968_p10), %v764_v29, 7 }
  0x45   : > { %663 = vmatpush1.bf16.msra.mxu0 %v1069_v33  ;;  %706 = vmatpush1.bf16.msra.mxu1 %v1070_v34  ;;  %v766_v34 = vsub.s32 (!%p968_p10), 0, %v765_v30 }
  0x46   : > { %664 = vmatprep.subr.bf16.mxu0 %v1071_v35  ;;  %707 = vmatprep.subr.bf16.mxu1 %v1073_v36  ;;  %v770_v35 = vsub.s32 (!%p968_p10), 1, %v765_v30  ;;  %v774_v36 = vsub.s32 (!%p968_p10), 2, %v765_v30 }
  0x49   : > { %665 = vmatpush1.bf16.msra.mxu0 %v1075_v37  ;;  %708 = vmatpush1.bf16.msra.mxu1 %v1076_v38  ;;  %v778_v37 = vsub.s32 (!%p968_p10), 3, %v765_v30 }
  0x4a   : > { %666 = vmatprep.subr.bf16.mxu0 %v1077_v39  ;;  %709 = vmatprep.subr.bf16.mxu1 %v1079_v40 }
  0x4d   : > { %667 = vmatpush1.bf16.msra.mxu0 %v1081_v41  ;;  %710 = vmatpush1.bf16.msra.mxu1 %v1082_v42  ;;  %v767_v41 = vrot.slane (!%p968_p10), %v762_v31, %v766_v34  ;;  %v771_v42 = vrot.slane (!%p968_p10), %v762_v31, %v770_v35 }
  0x4e   : > { %668 = vmatprep.subr.bf16.mxu0 %v1083_v43  ;;  %711 = vmatprep.subr.bf16.mxu1 %v1085_v44  ;;  %v775_v43 = vrot.slane (!%p968_p10), %v762_v31, %v774_v36  ;;  %v779_v44 = vrot.slane (!%p968_p10), %v762_v31, %v778_v37 }
  0x51   : > { %669 = vmatpush1.bf16.msra.mxu0 %v1087_v45  ;;  %712 = vmatpush1.bf16.msra.mxu1 %v1088_v46 }
  0x52   : > { %670 = vmatprep.subr.bf16.mxu0 %v1089_v47  ;;  %713 = vmatprep.subr.bf16.mxu1 %v1091_v48 }
  0x55   : > { %671 = vmatpush1.bf16.msra.mxu0 %v1093_v50  ;;  %714 = vmatpush1.bf16.msra.mxu1 %v1094_v51 }
  0x56   : > { %672 = vmatprep.subr.bf16.mxu0 %v1095_v52  ;;  %715 = vmatprep.subr.bf16.mxu1 %v1097_v53 }
  0x59   : > { %673 = vmatpush1.bf16.msra.mxu0 %v1099_v54  ;;  %716 = vmatpush1.bf16.msra.mxu1 %v1100_v55 }
  0x5a   : > { %674 = vmatprep.subr.bf16.mxu0 %v1101_v56  ;;  %717 = vmatprep.subr.bf16.mxu1 %v1103_v57 }
  0x5d   : > { %675 = vmatpush1.bf16.msra.mxu0 %v1105_v58  ;;  %718 = vmatpush1.bf16.msra.mxu1 %v1106_v59 }
  0x5e   : > { %676 = vmatprep.subr.bf16.mxu0 %v1107_v60  ;;  %719 = vmatprep.subr.bf16.mxu1 %v1109_v61 }
  0x61   : > { %677 = vmatpush1.bf16.msra.mxu0 %v1111_v62  ;;  %720 = vmatpush1.bf16.msra.mxu1 %v1112_v63 }
  0x62   : > { %678 = vmatprep.subr.bf16.mxu0 %v1113_v0  ;;  %721 = vmatprep.subr.bf16.mxu1 %v1115_v1 }
  0x65   : > { %679 = vmatpush1.bf16.msra.mxu0 %v1117_v2  ;;  %722 = vmatpush1.bf16.msra.mxu1 %v1118_v3 }
  0x68   : > { %681 = vmatmul.mubr.bf16.vlgmr.msra.gmra.mrb[0].mxu0 %v1119_v4  ;;  %724 = vmatmul.mubr.bf16.vlgmr.msra.gmra.mrb[0].mxu1 %v1119_v4 }
 0x13b   : > { %v682_v9 = vpop.f32.mrb[0].mxu0  ;;  %v725_v10 = vpop.f32.mrb[0].mxu1  ;;  %753 = sbr.rel (%p968_p10) target bundleno = 334 (0x14e), region = 78 }
 0x13c   : > { %v734_v13 = vadd.f32 %v682_v9, %v244_v5  ;;  %v736_v14 = vadd.f32 %v725_v10, %v246_v6  ;;  %v684_v15 = vpop.f32.mrb[1].mxu0  ;;  %v727_v16 = vpop.f32.mrb[1].mxu1 }
 0x13d   : > { %v735_v19 = vadd.f32 %v684_v15, %v245_v7  ;;  %v737_v20 = vadd.f32 %v727_v16, %v247_v8  ;;  %v686_v21 = vpop.f32.mrb[2].mxu0  ;;  %v729_v22 = vpop.f32.mrb[2].mxu1 }
 0x13e   : > { %742 = vst [vmem:[#allocation2] sm:$0xff] %v734_v13  ;;  %744 = vst [vmem:[#allocation2 + $0x10] sm:$0xff] %v736_v14  ;;  %v738_v23 = vadd.f32 %v686_v21, %v248_v11  ;;  %v740_v24 = vadd.f32 %v729_v22, %v250_v12  ;;  %v688_v25 = vpop.f32.mrb[3].mxu0  ;;  %v731_v26 = vpop.f32.mrb[3].mxu1 }
 0x13f   : > { %743 = vst [vmem:[#allocation2 + $0x8] sm:$0xff] %v735_v19  ;;  %745 = vst [vmem:[#allocation2 + $0x18] sm:$0xff] %v737_v20  ;;  %v739_v27 = vadd.f32 %v688_v25, %v249_v17  ;;  %v741_v28 = vadd.f32 %v731_v26, %v251_v18 }
 0x140   : > { %746 = vst [vmem:[#allocation2 + $0x20] sm:$0xff] %v738_v23  ;;  %748 = vst [vmem:[#allocation2 + $0x30] sm:$0xff] %v740_v24 }
 0x141   : > { %747 = vst [vmem:[#allocation2 + $0x28] sm:$0xff] %v739_v27  ;;  %749 = vst [vmem:[#allocation2 + $0x38] sm:$0xff] %v741_v28 }
 0x145   : > { %v754_v32 = vld [vmem:[#allocation2] sm:$0xff]  ;;  %v756_v38 = vld [vmem:[#allocation2 + $0x10] sm:$0xff] }
 0x146   : > { %v755_v33 = vld [vmem:[#allocation2 + $0x8] sm:$0xff]  ;;  %v757_v39 = vld [vmem:[#allocation2 + $0x18] sm:$0xff]  ;;  %v784_v48 = vadd.f32 %v767_v41, %v754_v32  ;;  %v786_v50 = vadd.f32 %v775_v43, %v756_v38 }
 0x147   : > { %v758_v40 = vld [vmem:[#allocation2 + $0x20] sm:$0xff]  ;;  %v760_v46 = vld [vmem:[#allocation2 + $0x30] sm:$0xff]  ;;  %v785_v49 = vadd.f32 %v771_v42, %v755_v33  ;;  %v787_v51 = vadd.f32 %v779_v44, %v757_v39 }
 0x148   : > { %v759_v45 = vld [vmem:[#allocation2 + $0x28] sm:$0xff]  ;;  %v761_v47 = vld [vmem:[#allocation2 + $0x38] sm:$0xff]  ;;  %v788_v52 = vadd.f32 %v767_v41, %v758_v40  ;;  %v790_v54 = vadd.f32 %v775_v43, %v760_v46 }
 0x149   : > { %v789_v53 = vadd.f32 %v771_v42, %v759_v45  ;;  %v791_v55 = vadd.f32 %v779_v44, %v761_v47  ;;  %v978_v56 = vpack.c.bf16 %v785_v49, %v784_v48  ;;  %v979_v57 = vpack.c.bf16 %v787_v51, %v786_v50 }
 0x14b   : > { %v980_v58 = vpack.c.bf16 %v789_v53, %v788_v52  ;;  %v981_v59 = vpack.c.bf16 %v791_v55, %v790_v54  ;;  %816 = vst [vmem:[%s1463_s3] sm:$0xff] %v978_v56  ;;  %817 = vst [vmem:[%s1463_s3 + $0x8] sm:$0xff] %v979_v57 }
 0x14d   : > { %818 = vst [vmem:[%s1463_s3 + $0x10] sm:$0xff] %v980_v58  ;;  %819 = vst [vmem:[%s1463_s3 + $0x18] sm:$0xff] %v981_v59 }
 0x14e PF: > { %s13_s16 = sadd.s32 1, %s1160_s16   ;;  %s1464_s12 = smov %s1148_s13 }
 0x14f   : > { %p10_p11 = scmp.ge.s32.totalorder %s13_s16, 6   ;;  %s1465_s13 = smov %s1218_s20 }
 0x150   : > { %s1466_s14 = smov %s1156_s15  ;;  %s1467_s15 = smov %s1469_s17 }
 0x151   :  { %12 = sbr.rel (!%p10_p11) target bundleno = 3 (0x3), region = 113 }

// kernel: clip_feature_extractor_forward.34
= control target key start
LH: loop header
LB: loop body
LE: loop exit
PB: predicated region body
PF: predicated region fallthrough
CT: control target
= control target key end

     0   :  { %s368_s1 = inlined_call_operand.vmem [shape: bf16[256,128], index: 1, kind: input, shape index: {}]   ;;  %s369_s0 = inlined_call_operand.vmem [shape: bf16[16,256], index: 0, kind: input, shape index: {}]   ;;  %s370_s2 = inlined_call_operand.vmem [shape: f32[1,128], index: 2, kind: input, shape index: {}]   ;;  %s371_s3 = inlined_call_operand.vmem [shape: bf16[16,128], index: 3, kind: output, shape index: {}]  }
   0x1   :  { %v269_v0 = vld [vmem:[%s368_s1 + $0x40] sm:$0xff]   ;;  %v271_v2 = vld [vmem:[%s368_s1 + $0x48] sm:$0xff]   ;;  %v273_v4 = vld [vmem:[%s368_s1 + $0x50] sm:$0xff]  }
   0x2   :  { %v270_v1 = vld [vmem:[%s368_s1] sm:$0xff]   ;;  %247 = vmatprep.subr.bf16.mxu0 %v269_v0  ;;  %v272_v3 = vld [vmem:[%s368_s1 + $0x8] sm:$0xff]   ;;  %v274_v5 = vld [vmem:[%s368_s1 + $0x10] sm:$0xff]  }
   0x3   :  { %248 = vmatpush3.bf16.msra.mxu0 %v270_v1  ;;  %v275_v6 = vld [vmem:[%s368_s1 + $0x58] sm:$0xff]   ;;  %v277_v8 = vld [vmem:[%s368_s1 + $0x60] sm:$0xff]   ;;  %v279_v10 = vld [vmem:[%s368_s1 + $0x68] sm:$0xff]  }
   0x4   :  { %249 = vmatprep.subr.bf16.mxu0 %v271_v2  ;;  %v276_v7 = vld [vmem:[%s368_s1 + $0x18] sm:$0xff]   ;;  %v278_v9 = vld [vmem:[%s368_s1 + $0x20] sm:$0xff]   ;;  %v280_v12 = vld [vmem:[%s368_s1 + $0x28] sm:$0xff]  }
   0x5   :  { %v287_v11 = vld [vmem:[%s369_s0 + $0x4] ss:$8 sps:$4 sm:$0xff]   ;;  %v281_v13 = vld [vmem:[%s368_s1 + $0x70] sm:$0xff]   ;;  %v283_v15 = vld [vmem:[%s368_s1 + $0x78] sm:$0xff]  }
   0x6   :  { %194 = vmatprep.mubr.bf16.mxu0 %v287_v11  ;;  %v282_v14 = vld [vmem:[%s368_s1 + $0x30] sm:$0xff]   ;;  %v284_v16 = vld [vmem:[%s368_s1 + $0x38] sm:$0xff]   ;;  %v285_v17 = vld [vmem:[%s369_s0] ss:$8 sps:$4 sm:$0xff]  }
   0x7   :  { %250 = vmatpush3.bf16.msra.mxu0 %v272_v3  ;;  %v219_v19 = vld [vmem:[%s370_s2] ss:$0 sm:$0xff] }
   0x8   :  { %251 = vmatprep.subr.bf16.mxu0 %v273_v4 }
   0xb   :  { %252 = vmatpush3.bf16.msra.mxu0 %v274_v5 }
   0xc   :  { %253 = vmatprep.subr.bf16.mxu0 %v275_v6 }
   0xf   :  { %254 = vmatpush3.bf16.msra.mxu0 %v276_v7 }
  0x10   :  { %255 = vmatprep.subr.bf16.mxu0 %v277_v8 }
  0x13   :  { %256 = vmatpush3.bf16.msra.mxu0 %v278_v9 }
  0x14   :  { %257 = vmatprep.subr.bf16.mxu0 %v279_v10 }
  0x17   :  { %258 = vmatpush3.bf16.msra.mxu0 %v280_v12 }
  0x18   :  { %259 = vmatprep.subr.bf16.mxu0 %v281_v13 }
  0x1b   :  { %260 = vmatpush3.bf16.msra.mxu0 %v282_v14 }
  0x1c   :  { %261 = vmatprep.subr.bf16.mxu0 %v283_v15 }
  0x1f   :  { %262 = vmatpush3.bf16.msra.mxu0 %v284_v16 }
  0x22   :  { %195 = vmatmul.mubr.bf16.vlgmr.msra.gmra.mrb[0].mxu0 %v285_v17 }
  0xf5   :  { %v263_v18 = vpop.f32.mrb[0].mxu0 }
  0xf6   :  { %v264_v20 = vpop.f32.mrb[1].mxu0 }
  0xf7   :  { %v265_v21 = vadd.f32 %v264_v20, %v263_v18  ;;  %v266_v22 = vpop.f32.mrb[2].mxu0 }
  0xf8   :  { %v267_v23 = vpop.f32.mrb[3].mxu0 }
  0xf9   :  { %v197_v24 = vadd.f32 %v265_v21, %v219_v19  ;;  %v268_v25 = vadd.f32 %v267_v23, %v266_v22 }
  0xfb   :  { %v200_v26 = vadd.f32 %v268_v25, %v219_v19  ;;  %v203_v27 = vmax.f32 %v197_v24, 0.0 }
  0xfd   :  { %v204_v28 = vmax.f32 %v200_v26, 0.0 }
  0xff   :  { %v245_v29 = vpack.c.bf16 %v204_v28, %v203_v27 }
 0x101   :  { %246 = vst [vmem:[%s371_s3] sm:$0xff] %v245_v29  }

// kernel: clip_feature_extractor_forward.37
= control target key start
LH: loop header
LB: loop body
LE: loop exit
PB: predicated region body
PF: predicated region fallthrough
CT: control target
= control target key end

     0   :  { %s1010_s15 = smov 0   ;;  %s1012_s16 = smov 0   ;;  %s1201_s0 = inlined_call_operand.vmem [shape: bf16[16,512], index: 0, kind: input, shape index: {}]   ;;  %s1202_s1 = inlined_call_operand.vmem [shape: bf16[128,512], index: 1, kind: input, shape index: {}]   ;;  %s1203_s2 = inlined_call_operand.vmem [shape: f32[1,512], index: 2, kind: input, shape index: {}]   ;;  %s1204_s3 = inlined_call_operand.vmem [shape: bf16[16,512], index: 3, kind: input, shape index: {}]   ;;  %s1205_s4 = inlined_call_operand.vmem [shape: bf16[16,512], index: 4, kind: output, shape index: {}]  }
   0x1   :  { %s1014_s17 = smov 0   ;;  %s1016_s18 = smov 0  }
   0x2   :  { %s1018_s19 = smov 0  }
   0x3 LB: > { %s23_s20 = sadd.s32 1, %s977_s18  ;;  %p42_p1 = scmp.ne.s32.totalorder %s969_s16, %s965_s15  ;;  %s981_s19 = sphi %s1018_s19, %s14_s19   ;;  %s977_s18 = sphi %s1016_s18, %s1209_s18   ;;  %s973_s17 = sphi %s1014_s17, %s1208_s17   ;;  %s969_s16 = sphi %s1012_s16, %s1207_s16   ;;  %s965_s15 = sphi %s1010_s15, %s1206_s15  }
   0x4   : > { %p24_p0 = scmp.ge.s32.totalorder %s23_s20, 4  ;;  %p43_p2 = scmp.eq.s32.totalorder %s981_s19, 0 }
   0x5   : > { %s35_s22 = sadd.s32 1, %s969_s16  ;;  %p800_p5 = scmp.ge.s32.totalorder %s981_s19, 4 }
   0x6   : > { %s1211_s20 = smov (%p24_p0, %s23_s20), 0  ;;  %p44_p3 = por %p43_p2, %p42_p1 }
   0x7   : > { %s31_s21 = ssub.s32 %s977_s18, %s1211_s20  ;;  %178 = sbr.rel (%p800_p5) target bundleno = 21 (0x15), region = 28 }
   0x8   : > { %p33_p4 = scmp.eq.s32.totalorder %s31_s21, 0 }
   0xa   : > { %s1045_s23 = scalar_select %p33_p4, %s969_s16, %s35_s22  }
   0xe   : > { %181 = sbr.rel (!%p44_p3) target bundleno = 21 (0x15), region = 32  ;;  %s183_s24 = sand.u32 (%p44_p3), 1, %s969_s16  }
   0xf   : > { %s802_s25 = sshll.u32 (%p44_p3), %s977_s18, 2  ;;  %s801_s26 = sshll.u32 (%p44_p3), %s183_s24, 3 }
  0x10   : > { %s190_s29 = scalar_lea.vmem (%p44_p3), %s1201_s0, %s802_s25  ;;  %s185_s30 = scalar_lea.vmem (%p44_p3), [#allocation3], %s801_s26 }
  0x11   : > { %v206_v0 = vld [vmem:[%s190_s29] sm:$0xf] (%p44_p3)  ;;  %v208_v1 = vld [vmem:[%s190_s29 + $0x10] sm:$0xf] (%p44_p3) }
  0x12   : > { %207 = vst [vmem:[%s185_s30] sm:$0xf] (%p44_p3), %v206_v0  ;;  %209 = vst [vmem:[%s185_s30 + $0x4] sm:$0xf] (%p44_p3), %v208_v1 }
  0x15 PF: > { %p803_p6 = scmp.ge.s32.totalorder %s981_s19, 1  ;;  %p235_p7 = scmp.lt.s32.totalorder %s981_s19, 5 }
  0x17   : > { %p236_p8 = pnand %p803_p6, %p235_p7 }
  0x18   : > { %s242_s5 = sand.u32 (!%p236_p8), 1, %s965_s15   ;;  %p805_p9 = scmp.ne.s32.totalorder (!%p236_p8), %s973_s17, 0 }
  0x19   : > { %239 = sbr.rel (%p236_p8) target bundleno = 307 (0x133), region = 73  ;;  %s1056_s6 = sshll.u32 (!%p236_p8), %s242_s5, 3 }
  0x1a   : > { %s244_s7 = scalar_lea.vmem (!%p236_p8), [#allocation3], %s1056_s6 }
  0x20   : > { %293 = sbr.rel (%p805_p9) target bundleno = 39 (0x27), region = 81  ;;  %v983_v2 = vmov (!%p805_p9), 0.0  }
  0x21   : > { %294 = vst [vmem:[#allocation2] sm:$0xff] (!%p805_p9), %v983_v2  ;;  %295 = vst [vmem:[#allocation2 + $0x8] sm:$0xff] (!%p805_p9), %v983_v2 }
  0x22   : > { %296 = vst [vmem:[#allocation2 + $0x10] sm:$0xff] (!%p805_p9), %v983_v2  ;;  %297 = vst [vmem:[#allocation2 + $0x18] sm:$0xff] (!%p805_p9), %v983_v2 }
  0x23   : > { %298 = vst [vmem:[#allocation2 + $0x20] sm:$0xff] (!%p805_p9), %v983_v2  ;;  %299 = vst [vmem:[#allocation2 + $0x28] sm:$0xff] (!%p805_p9), %v983_v2 }
  0x24   : > { %300 = vst [vmem:[#allocation2 + $0x30] sm:$0xff] (!%p805_p9), %v983_v2  ;;  %301 = vst [vmem:[#allocation2 + $0x38] sm:$0xff] (!%p805_p9), %v983_v2 }
  0x27 PF: > { %v894_v3 = vld [vmem:[%s1202_s1 + $0x4] ss:$16 sps:$4 sm:$0xff]   ;;  %v896_v4 = vld [vmem:[%s1202_s1 + $0xc] ss:$16 sps:$4 sm:$0xff]   ;;  %v984_v5 = vmov 0   ;;  %p839_p10 = scmp.ne.s32.totalorder %s973_s17, 3 }
  0x28   : > { %542 = vmatprep.mubr.bf16.mxu0 %v984_v5  ;;  %585 = vmatprep.mubr.bf16.mxu1 %v984_v5  ;;  %v898_v6 = vld [vmem:[%s1202_s1] ss:$16 sps:$4 sm:$0xff]   ;;  %v899_v7 = vld [vmem:[%s1202_s1 + $0x8] ss:$16 sps:$4 sm:$0xff]   ;;  %v900_v8 = vld [vmem:[%s1202_s1 + $0x24] ss:$16 sps:$4 sm:$0xff]   ;;  %v626_v61 = vlaneseq (!%p839_p10) }
  0x29   : > { %510 = vmatprep.subr.bf16.mxu0 %v894_v3  ;;  %553 = vmatprep.subr.bf16.mxu1 %v896_v4  ;;  %v902_v9 = vld [vmem:[%s1202_s1 + $0x2c] ss:$16 sps:$4 sm:$0xff]   ;;  %v904_v10 = vld [vmem:[%s1202_s1 + $0x20] ss:$16 sps:$4 sm:$0xff]   ;;  %v905_v11 = vld [vmem:[%s1202_s1 + $0x28] ss:$16 sps:$4 sm:$0xff]  }
  0x2a   : > { %511 = vmatpush1.bf16.msra.mxu0 %v898_v6  ;;  %554 = vmatpush1.bf16.msra.mxu1 %v899_v7  ;;  %v906_v12 = vld [vmem:[%s1202_s1 + $0x44] ss:$16 sps:$4 sm:$0xff]   ;;  %v908_v13 = vld [vmem:[%s1202_s1 + $0x4c] ss:$16 sps:$4 sm:$0xff]   ;;  %v910_v14 = vld [vmem:[%s1202_s1 + $0x40] ss:$16 sps:$4 sm:$0xff]  }
  0x2b   : > { %512 = vmatprep.subr.bf16.mxu0 %v900_v8  ;;  %555 = vmatprep.subr.bf16.mxu1 %v902_v9  ;;  %v911_v15 = vld [vmem:[%s1202_s1 + $0x48] ss:$16 sps:$4 sm:$0xff]   ;;  %v912_v16 = vld [vmem:[%s1202_s1 + $0x64] ss:$16 sps:$4 sm:$0xff]   ;;  %v914_v17 = vld [vmem:[%s1202_s1 + $0x6c] ss:$16 sps:$4 sm:$0xff]  }
  0x2c   : > { %v916_v18 = vld [vmem:[%s1202_s1 + $0x60] ss:$16 sps:$4 sm:$0xff]   ;;  %v917_v19 = vld [vmem:[%s1202_s1 + $0x68] ss:$16 sps:$4 sm:$0xff]   ;;  %v918_v20 = vld [vmem:[%s1202_s1 + $0x84] ss:$16 sps:$4 sm:$0xff]  }
  0x2d   : > { %v920_v21 = vld [vmem:[%s1202_s1 + $0x8c] ss:$16 sps:$4 sm:$0xff]   ;;  %v922_v22 = vld [vmem:[%s1202_s1 + $0x80] ss:$16 sps:$4 sm:$0xff]   ;;  %v923_v23 = vld [vmem:[%s1202_s1 + $0x88] ss:$16 sps:$4 sm:$0xff]  }
  0x2e   : > { %513 = vmatpush1.bf16.msra.mxu0 %v904_v10  ;;  %556 = vmatpush1.bf16.msra.mxu1 %v905_v11  ;;  %v924_v24 = vld [vmem:[%s1202_s1 + $0xa4] ss:$16 sps:$4 sm:$0xff]   ;;  %v926_v25 = vld [vmem:[%s1202_s1 + $0xac] ss:$16 sps:$4 sm:$0xff]   ;;  %v928_v26 = vld [vmem:[%s1202_s1 + $0xa0] ss:$16 sps:$4 sm:$0xff]  }
  0x2f   : > { %514 = vmatprep.subr.bf16.mxu0 %v906_v12  ;;  %557 = vmatprep.subr.bf16.mxu1 %v908_v13  ;;  %v929_v27 = vld [vmem:[%s1202_s1 + $0xa8] ss:$16 sps:$4 sm:$0xff]   ;;  %v930_v28 = vld [vmem:[%s1202_s1 + $0xc4] ss:$16 sps:$4 sm:$0xff]   ;;  %v932_v29 = vld [vmem:[%s1202_s1 + $0xcc] ss:$16 sps:$4 sm:$0xff]  }
  0x30   : > { %v934_v30 = vld [vmem:[%s1202_s1 + $0xc0] ss:$16 sps:$4 sm:$0xff]   ;;  %v935_v31 = vld [vmem:[%s1202_s1 + $0xc8] ss:$16 sps:$4 sm:$0xff]   ;;  %v936_v32 = vld [vmem:[%s1202_s1 + $0xe4] ss:$16 sps:$4 sm:$0xff]  }
  0x31   : > { %v938_v33 = vld [vmem:[%s1202_s1 + $0xec] ss:$16 sps:$4 sm:$0xff]   ;;  %v940_v34 = vld [vmem:[%s1202_s1 + $0xe0] ss:$16 sps:$4 sm:$0xff]   ;;  %v941_v35 = vld [vmem:[%s1202_s1 + $0xe8] ss:$16 sps:$4 sm:$0xff]  }
  0x32   : > { %515 = vmatpush1.bf16.msra.mxu0 %v910_v14  ;;  %558 = vmatpush1.bf16.msra.mxu1 %v911_v15  ;;  %v942_v36 = vld [vmem:[%s244_s7] sm:$0xff]   ;;  %v304_v38 = vld [vmem:[#allocation2 + $0x10] sm:$0xff]  ;;  %v305_v40 = vld [vmem:[#allocation2 + $0x18] sm:$0xff]  ;;  %v627_v62 = vshrl.u32 (!%p839_p10), %v626_v61, 7 }
  0x33   : > { %516 = vmatprep.subr.bf16.mxu0 %v912_v16  ;;  %559 = vmatprep.subr.bf16.mxu1 %v914_v17  ;;  %v302_v37 = vld [vmem:[#allocation2] sm:$0xff]  ;;  %v303_v39 = vld [vmem:[#allocation2 + $0x8] sm:$0xff]  ;;  %v308_v44 = vld [vmem:[#allocation2 + $0x30] sm:$0xff] }
  0x34   : > { %v306_v43 = vld [vmem:[#allocation2 + $0x20] sm:$0xff]  ;;  %v307_v49 = vld [vmem:[#allocation2 + $0x28] sm:$0xff]  ;;  %v309_v50 = vld [vmem:[#allocation2 + $0x38] sm:$0xff]  ;;  %v628_v4 = vsub.s32 (!%p839_p10), 0, %v627_v62  ;;  %v632_v5 = vsub.s32 (!%p839_p10), 1, %v627_v62  ;;  %v636_v6 = vsub.s32 (!%p839_p10), 2, %v627_v62 }
  0x35   : > { %v654_v63 = vld [vmem:[%s1204_s3] sm:$0xff] (!%p839_p10)  ;;  %v655_v0 = vld [vmem:[%s1204_s3 + $0x8] sm:$0xff] (!%p839_p10)  ;;  %v640_v7 = vsub.s32 (!%p839_p10), 3, %v627_v62  ;;  %v656_v8 = vld [vmem:[%s1204_s3 + $0x10] sm:$0xff] (!%p839_p10) }
  0x36   : > { %517 = vmatpush1.bf16.msra.mxu0 %v916_v18  ;;  %560 = vmatpush1.bf16.msra.mxu1 %v917_v19  ;;  %v624_v3 = vld [vmem:[%s1203_s2] sm:$0xf] (!%p839_p10)  ;;  %v657_v9 = vld [vmem:[%s1204_s3 + $0x18] sm:$0xff] (!%p839_p10)  ;;  %v658_v10 = vunpack.c.l.bf16 (!%p839_p10), %v654_v63  ;;  %v659_v11 = vunpack.c.h.bf16 (!%p839_p10), %v654_v63  ;;  %v660_v14 = vunpack.c.l.bf16 (!%p839_p10), %v655_v0  ;;  %v661_v15 = vunpack.c.h.bf16 (!%p839_p10), %v655_v0 }
  0x37   : > { %518 = vmatprep.subr.bf16.mxu0 %v918_v20  ;;  %561 = vmatprep.subr.bf16.mxu1 %v920_v21  ;;  %v629_v17 = vrot.slane (!%p839_p10), %v624_v3, %v628_v4  ;;  %v633_v18 = vrot.slane (!%p839_p10), %v624_v3, %v632_v5  ;;  %v637_v19 = vrot.slane (!%p839_p10), %v624_v3, %v636_v6 }
  0x38   : > { %v641_v20 = vrot.slane (!%p839_p10), %v624_v3, %v640_v7 }
  0x3a   : > { %519 = vmatpush1.bf16.msra.mxu0 %v922_v22  ;;  %562 = vmatpush1.bf16.msra.mxu1 %v923_v23 }
  0x3b   : > { %520 = vmatprep.subr.bf16.mxu0 %v924_v24  ;;  %563 = vmatprep.subr.bf16.mxu1 %v926_v25  ;;  %v662_v24 = vunpack.c.l.bf16 (!%p839_p10), %v656_v8  ;;  %v663_v25 = vunpack.c.h.bf16 (!%p839_p10), %v656_v8 }
  0x3e   : > { %521 = vmatpush1.bf16.msra.mxu0 %v928_v26  ;;  %564 = vmatpush1.bf16.msra.mxu1 %v929_v27  ;;  %v664_v26 = vunpack.c.l.bf16 (!%p839_p10), %v657_v9  ;;  %v665_v27 = vunpack.c.h.bf16 (!%p839_p10), %v657_v9 }
  0x3f   : > { %522 = vmatprep.subr.bf16.mxu0 %v930_v28  ;;  %565 = vmatprep.subr.bf16.mxu1 %v932_v29 }
  0x42   : > { %523 = vmatpush1.bf16.msra.mxu0 %v934_v30  ;;  %566 = vmatpush1.bf16.msra.mxu1 %v935_v31 }
  0x43   : > { %524 = vmatprep.subr.bf16.mxu0 %v936_v32  ;;  %567 = vmatprep.subr.bf16.mxu1 %v938_v33 }
  0x46   : > { %525 = vmatpush1.bf16.msra.mxu0 %v940_v34  ;;  %568 = vmatpush1.bf16.msra.mxu1 %v941_v35 }
  0x49   : > { %543 = vmatmul.mubr.bf16.vlgmr.msra.gmra.mrb[0].mxu0 %v942_v36  ;;  %586 = vmatmul.mubr.bf16.vlgmr.msra.gmra.mrb[0].mxu1 %v942_v36 }
 0x11c   : > { %v544_v41 = vpop.f32.mrb[0].mxu0  ;;  %v587_v42 = vpop.f32.mrb[0].mxu1  ;;  %615 = sbr.rel (%p839_p10) target bundleno = 307 (0x133), region = 85 }
 0x11d   : > { %v596_v45 = vadd.f32 %v544_v41, %v302_v37  ;;  %v598_v46 = vadd.f32 %v587_v42, %v304_v38  ;;  %v546_v47 = vpop.f32.mrb[1].mxu0  ;;  %v589_v48 = vpop.f32.mrb[1].mxu1 }
 0x11e   : > { %v597_v51 = vadd.f32 %v546_v47, %v303_v39  ;;  %v599_v52 = vadd.f32 %v589_v48, %v305_v40  ;;  %v548_v53 = vpop.f32.mrb[2].mxu0  ;;  %v591_v54 = vpop.f32.mrb[2].mxu1 }
 0x11f   : > { %604 = vst [vmem:[#allocation2] sm:$0xff] %v596_v45  ;;  %606 = vst [vmem:[#allocation2 + $0x10] sm:$0xff] %v598_v46  ;;  %v600_v55 = vadd.f32 %v548_v53, %v306_v43  ;;  %v602_v56 = vadd.f32 %v591_v54, %v308_v44  ;;  %v550_v57 = vpop.f32.mrb[3].mxu0  ;;  %v593_v58 = vpop.f32.mrb[3].mxu1 }
 0x120   : > { %605 = vst [vmem:[#allocation2 + $0x8] sm:$0xff] %v597_v51  ;;  %607 = vst [vmem:[#allocation2 + $0x18] sm:$0xff] %v599_v52  ;;  %v601_v59 = vadd.f32 %v550_v57, %v307_v49  ;;  %v603_v60 = vadd.f32 %v593_v58, %v309_v50 }
 0x121   : > { %608 = vst [vmem:[#allocation2 + $0x20] sm:$0xff] %v600_v55  ;;  %610 = vst [vmem:[#allocation2 + $0x30] sm:$0xff] %v602_v56 }
 0x122   : > { %609 = vst [vmem:[#allocation2 + $0x28] sm:$0xff] %v601_v59  ;;  %611 = vst [vmem:[#allocation2 + $0x38] sm:$0xff] %v603_v60 }
 0x126   : > { %v616_v1 = vld [vmem:[#allocation2] sm:$0xff]  ;;  %v618_v12 = vld [vmem:[#allocation2 + $0x10] sm:$0xff] }
 0x127   : > { %v617_v2 = vld [vmem:[#allocation2 + $0x8] sm:$0xff]  ;;  %v619_v13 = vld [vmem:[#allocation2 + $0x18] sm:$0xff]  ;;  %v646_v28 = vadd.f32 %v629_v17, %v616_v1  ;;  %v648_v30 = vadd.f32 %v637_v19, %v618_v12 }
 0x128   : > { %v620_v16 = vld [vmem:[#allocation2 + $0x20] sm:$0xff]  ;;  %v622_v22 = vld [vmem:[#allocation2 + $0x30] sm:$0xff]  ;;  %v647_v29 = vadd.f32 %v633_v18, %v617_v2  ;;  %v649_v31 = vadd.f32 %v641_v20, %v619_v13 }
 0x129   : > { %v621_v21 = vld [vmem:[#allocation2 + $0x28] sm:$0xff]  ;;  %v623_v23 = vld [vmem:[#allocation2 + $0x38] sm:$0xff]  ;;  %v650_v32 = vadd.f32 %v629_v17, %v620_v16  ;;  %v652_v34 = vadd.f32 %v637_v19, %v622_v22  ;;  %v666_v36 = vadd.f32 %v658_v10, %v646_v28  ;;  %v668_v38 = vadd.f32 %v660_v14, %v648_v30 }
 0x12a   : > { %v651_v33 = vadd.f32 %v633_v18, %v621_v21  ;;  %v653_v35 = vadd.f32 %v641_v20, %v623_v23  ;;  %v667_v37 = vadd.f32 %v659_v11, %v647_v29  ;;  %v669_v39 = vadd.f32 %v661_v15, %v649_v31 }
 0x12b   : > { %v670_v40 = vadd.f32 %v662_v24, %v650_v32  ;;  %v672_v42 = vadd.f32 %v664_v26, %v652_v34  ;;  %v674_v44 = vmax.f32 %v666_v36, 0.0  ;;  %v676_v46 = vmax.f32 %v668_v38, 0.0 }
 0x12c   : > { %v671_v41 = vadd.f32 %v663_v25, %v651_v33  ;;  %v673_v43 = vadd.f32 %v665_v27, %v653_v35  ;;  %v675_v45 = vmax.f32 %v667_v37, 0.0  ;;  %v677_v47 = vmax.f32 %v669_v39, 0.0 }
 0x12d   : > { %v678_v48 = vmax.f32 %v670_v40, 0.0  ;;  %v680_v50 = vmax.f32 %v672_v42, 0.0 }
 0x12e   : > { %v679_v49 = vmax.f32 %v671_v41, 0.0  ;;  %v681_v51 = vmax.f32 %v673_v43, 0.0  ;;  %v848_v52 = vpack.c.bf16 %v675_v45, %v674_v44  ;;  %v849_v53 = vpack.c.bf16 %v677_v47, %v676_v46 }
 0x130   : > { %v850_v54 = vpack.c.bf16 %v679_v49, %v678_v48  ;;  %v851_v55 = vpack.c.bf16 %v681_v51, %v680_v50  ;;  %706 = vst [vmem:[%s1205_s4] sm:$0xff] %v848_v52  ;;  %707 = vst [vmem:[%s1205_s4 + $0x8] sm:$0xff] %v849_v53 }
 0x132   : > { %708 = vst [vmem:[%s1205_s4 + $0x10] sm:$0xff] %v850_v54  ;;  %709 = vst [vmem:[%s1205_s4 + $0x18] sm:$0xff] %v851_v55 }
 0x133 PF: > { %s14_s19 = sadd.s32 1, %s981_s19   ;;  %s1206_s15 = smov %s969_s16 }
 0x134   : > { %p11_p11 = scmp.ge.s32.totalorder %s14_s19, 6   ;;  %s1207_s16 = smov %s1045_s23 }
 0x135   : > { %s1208_s17 = smov %s977_s18  ;;  %s1209_s18 = smov %s1211_s20 }
 0x136   :  { %13 = sbr.rel (!%p11_p11) target bundleno = 3 (0x3), region = 123 }

// kernel: clip_feature_extractor_forward.35
= control target key start
LH: loop header
LB: loop body
LE: loop exit
PB: predicated region body
PF: predicated region fallthrough
CT: control target
= control target key end

     0   :  { %s1682_s12 = smov 0   ;;  %s1974_s0 = inlined_call_operand.vmem [shape: bf16[2,4,4,128], index: 0, kind: input, shape index: {}]   ;;  %s1975_s1 = inlined_call_operand.vmem [shape: bf16[1152,128], index: 1, kind: input, shape index: {}]   ;;  %s1976_s2 = inlined_call_operand.vmem [shape: f32[1,128], index: 2, kind: input, shape index: {}]   ;;  %s1977_s3 = inlined_call_operand.vmem [shape: bf16[2,2,2,128], index: 3, kind: output, shape index: {}]  }
   0x1 LB: > { %s1331_s13 = sadd.s32 4294967295, %s1656_s12   ;;  %p1335_p0 = scmp.ge.s32.totalorder %s1656_s12, 1  ;;  %s1656_s12 = sphi %s1682_s12, %s13_s12  }
   0x2   : > { %p137_p1 = scmp.lt.s32.totalorder %s1656_s12, 3 }
   0x4   : > { %p138_p2 = pnand %p1335_p0, %p137_p1 }
   0x5   : > { %v1574_v0 = vld [vmem:[%s1975_s1 + $0x40] sm:$0xff] (!%p138_p2)   ;;  %v1578_v4 = vld [vmem:[%s1975_s1 + $0x48] sm:$0xff] (!%p138_p2)   ;;  %v1582_v8 = vld [vmem:[%s1975_s1 + $0x50] sm:$0xff] (!%p138_p2)   ;;  %p160_p3 = scmp.lt.s32.totalorder (!%p138_p2), %s1331_s13, 1  ;;  %vm194_vm0 = vsmask.f32 (!%p138_p2), 256 }
   0x6   : > { %141 = sbr.rel (%p138_p2) target bundleno = 328 (0x148), region = 32  ;;  %v1575_v1 = vld [vmem:[%s1975_s1] sm:$0xff] (!%p138_p2)   ;;  %1445 = vmatprep.subr.bf16.mxu0 (!%p138_p2), %v1574_v0  ;;  %v1579_v5 = vld [vmem:[%s1975_s1 + $0x8] sm:$0xff] (!%p138_p2)   ;;  %v1583_v9 = vld [vmem:[%s1975_s1 + $0x10] sm:$0xff] (!%p138_p2)   ;;  %vm195_vm1 = vsmask.f32 (!%p138_p2), 1284 }
   0x7   : > { %v1576_v2 = vld [vmem:[%s1975_s1 + $0xc0] sm:$0xff] (!%p138_p2)   ;;  %1446 = vmatpush3.bf16.msra.mxu0 (!%p138_p2), %v1575_v1  ;;  %v1580_v6 = vld [vmem:[%s1975_s1 + $0xc8] sm:$0xff] (!%p138_p2)   ;;  %v1584_v10 = vld [vmem:[%s1975_s1 + $0xd0] sm:$0xff] (!%p138_p2)   ;;  %vm197_vm3 = vsmask.f32 (!%p138_p2), 2312  ;;  %vm1660_vm15 = vmmov (!%p138_p2), 0  }
   0x8   : > { %v1577_v3 = vld [vmem:[%s1975_s1 + $0x80] sm:$0xff] (!%p138_p2)   ;;  %1467 = vmatprep.subr.bf16.mxu1 (!%p138_p2), %v1576_v2  ;;  %1447 = vmatprep.subr.bf16.mxu0 (!%p138_p2), %v1578_v4  ;;  %v1581_v7 = vld [vmem:[%s1975_s1 + $0x88] sm:$0xff] (!%p138_p2)   ;;  %v1585_v11 = vld [vmem:[%s1975_s1 + $0x90] sm:$0xff] (!%p138_p2)   ;;  %vm199_vm5 = vsmask.f32 (!%p138_p2), 3340 }
   0x9   : > { %1468 = vmatpush3.bf16.msra.mxu1 (!%p138_p2), %v1577_v3  ;;  %v1586_v12 = vld [vmem:[%s1975_s1 + $0x58] sm:$0xff] (!%p138_p2)   ;;  %v1590_v16 = vld [vmem:[%s1975_s1 + $0x60] sm:$0xff] (!%p138_p2)   ;;  %v1594_v20 = vld [vmem:[%s1975_s1 + $0x68] sm:$0xff] (!%p138_p2)   ;;  %vm201_vm6 = vsmask.f32 (!%p138_p2), 4368  ;;  %v561_v3 = vlaneseq (!%p138_p2) }
   0xa   : > { %1469 = vmatprep.subr.bf16.mxu1 (!%p138_p2), %v1580_v6  ;;  %v1587_v13 = vld [vmem:[%s1975_s1 + $0x18] sm:$0xff] (!%p138_p2)   ;;  %v1591_v17 = vld [vmem:[%s1975_s1 + $0x20] sm:$0xff] (!%p138_p2)   ;;  %v1595_v21 = vld [vmem:[%s1975_s1 + $0x28] sm:$0xff] (!%p138_p2)   ;;  %vm203_vm7 = vsmask.f32 (!%p138_p2), 5396 }
   0xb   : > { %1448 = vmatpush3.bf16.msra.mxu0 (!%p138_p2), %v1579_v5  ;;  %v1588_v14 = vld [vmem:[%s1975_s1 + $0xd8] sm:$0xff] (!%p138_p2)   ;;  %v1592_v18 = vld [vmem:[%s1975_s1 + $0xe0] sm:$0xff] (!%p138_p2)   ;;  %v1596_v22 = vld [vmem:[%s1975_s1 + $0xe8] sm:$0xff] (!%p138_p2)   ;;  %vm205_vm9 = vsmask.f32 (!%p138_p2), 6424 }
   0xc   : > { %1449 = vmatprep.subr.bf16.mxu0 (!%p138_p2), %v1582_v8  ;;  %v1589_v15 = vld [vmem:[%s1975_s1 + $0x98] sm:$0xff] (!%p138_p2)   ;;  %v1593_v19 = vld [vmem:[%s1975_s1 + $0xa0] sm:$0xff] (!%p138_p2)   ;;  %v1597_v23 = vld [vmem:[%s1975_s1 + $0xa8] sm:$0xff] (!%p138_p2)   ;;  %vm207_vm10 = vsmask.f32 (!%p138_p2), 7452 }
   0xd   : > { %1470 = vmatpush3.bf16.msra.mxu1 %v1581_v7  ;;  %s1981_s13 = smov (!%p160_p3, %s1331_s13), 1  ;;  %v1598_v24 = vld [vmem:[%s1975_s1 + $0x70] sm:$0xff]   ;;  %v1602_v28 = vld [vmem:[%s1975_s1 + $0x78] sm:$0xff]   ;;  %vm196_vm2 = vmor %vm194_vm0, %vm195_vm1  ;;  %v1658_v1 = vmov 1966171168   ;;  %v1830_v7 = vshrl.u32 %v561_v3, 7 }
   0xe   : > { %1471 = vmatprep.subr.bf16.mxu1 %v1584_v10  ;;  %v1599_v25 = vld [vmem:[%s1975_s1 + $0x30] sm:$0xff]   ;;  %s1444_s18 = sshll.u32 %s1981_s13, 3  ;;  %v1603_v29 = vld [vmem:[%s1975_s1 + $0x38] sm:$0xff]   ;;  %vm198_vm4 = vmor %vm196_vm2, %vm197_vm3  ;;  %v559_v2 = vunpack.c.l.s4 %v1658_v1  ;;  %s1338_s16 = sshll.u32 %s1981_s13, 1 }
   0xf   : > { %1450 = vmatpush3.bf16.msra.mxu0 %v1583_v9  ;;  %v1600_v26 = vld [vmem:[%s1975_s1 + $0xf0] sm:$0xff]   ;;  %s1790_s27 = scalar_lea.vmem %s1974_s0, %s1444_s18  ;;  %v1604_v30 = vld [vmem:[%s1975_s1 + $0xf8] sm:$0xff]   ;;  %vm200_vm8 = vmor %vm198_vm4, %vm199_vm5  ;;  %s168_s19 = scalar_lea.vmem %s1977_s3, %s1338_s16 }
  0x10   : > { %1451 = vmatprep.subr.bf16.mxu0 %v1586_v12  ;;  %v1601_v27 = vld [vmem:[%s1975_s1 + $0xb0] sm:$0xff]   ;;  %v170_v31 = vld [vmem:[%s1790_s27] sm:$0x1]  ;;  %v171_v32 = vld [vmem:[%s1790_s27 + $0x2] sm:$0x1]  ;;  %v560_v6 = vunpack.c.0.s8 %v559_v2 }
  0x11   : > { %1472 = vmatpush3.bf16.msra.mxu1 %v1585_v11  ;;  %172 = vst [vmem:[#allocation2] sm:$0x1] %v170_v31  ;;  %173 = vst [vmem:[#allocation2 + $0x9] sm:$0x1] %v171_v32  ;;  %v1345_v44 = vld [vmem:[%s1790_s27 + $0x2] sm:$0x1] }
  0x12   : > { %1473 = vmatprep.subr.bf16.mxu1 %v1588_v14  ;;  %v1339_v33 = vld.sshfl [vmem:[%s1790_s27] sm:$0x11 pattern:$0x75316420]  ;;  %vm202_vm11 = vmor %vm200_vm8, %vm201_vm6  ;;  %v1346_v46 = vld [vmem:[%s1790_s27 + $0x4] sm:$0x1]  ;;  %v1833_v8 = vsub.s32 %v560_v6, %v1830_v7 }
  0x13   : > { %1452 = vmatpush3.bf16.msra.mxu0 %v1587_v13  ;;  %v1340_v34 = vld.sshfl [vmem:[%s1790_s27 + $0x2] sm:$0x11 pattern:$0x75316420]  ;;  %v185_v35 = vcombine.high %v1339_v33, %v1339_v33  ;;  %v210_v37 = vshrl.u32 %v1339_v33, 16  ;;  %vm204_vm12 = vmor %vm202_vm11, %vm203_vm7  ;;  %v1608_v52 = vld [vmem:[%s1975_s1 + $0xb8] sm:$0xff]  }
  0x14   : > { %1453 = vmatprep.subr.bf16.mxu0 %v1590_v16  ;;  %v193_v36 = vcombine.high %v1340_v34, %v1340_v34  ;;  %v219_v39 = vshrl.u32 %v1340_v34, 16  ;;  %v1343_v41 = vld.sshfl [vmem:[%s1790_s27] sm:$0x10 pattern:$0x75316420]  ;;  %vm206_vm13 = vmor %vm204_vm12, %vm205_vm9  ;;  %v1620_v31 = vld [vmem:[%s1975_s1 + $0x190] sm:$0xff]  }
  0x15   : > { %1474 = vmatpush3.bf16.msra.mxu1 %v1589_v15  ;;  %v215_v38 = vshll.u32 %v185_v35, 16  ;;  %v1344_v42 = vld.sshfl [vmem:[%s1790_s27 + $0x2] sm:$0x10 pattern:$0x75316420]  ;;  %v242_v43 = vcombine.high %v1343_v41, %v1343_v41  ;;  %vm1805_vm14 = vmor %vm206_vm13, %vm207_vm10  ;;  %v1623_v32 = vld [vmem:[%s1975_s1 + $0x1d8] sm:$0xff]  }
  0x16   : > { %1475 = vmatprep.subr.bf16.mxu1 %v1592_v18  ;;  %v224_v40 = vshll.u32 %v193_v36, 16  ;;  %v250_v45 = vcombine.high %v1344_v42, %v1344_v42  ;;  %258 = vst [vmem:[#allocation2 + $0x3] sm:$0x1] %v1345_v44  ;;  %259 = vst [vmem:[#allocation2 + $0xc] sm:$0x1] %v1346_v46  ;;  %v1609_v60 = vld [vmem:[%s1975_s1 + $0x140] sm:$0xff]  }
  0x17   : > { %1454 = vmatpush3.bf16.msra.mxu0 %v1591_v17  ;;  %v1350_v47 = vld.sshfl [vmem:[%s1790_s27 + $0x4] sm:$0x11 pattern:$0x75316420]  ;;  %253 = vst [vmem:[#allocation2 + $0x2] sm:$0x1] %v242_v43  ;;  %v217_v53 = vsel %vm1805_vm14, %v210_v37, %v215_v38 }
  0x18   : > { %1455 = vmatprep.subr.bf16.mxu0 %v1594_v20  ;;  %v279_v49 = vcombine.high %v1350_v47, %v1350_v47  ;;  %v290_v50 = vshrl.u32 %v1350_v47, 16  ;;  %v1356_v51 = vld.sshfl [vmem:[%s1790_s27 + $0x4] sm:$0x10 pattern:$0x75316420]  ;;  %v226_v54 = vsel %vm1805_vm14, %v219_v39, %v224_v40  ;;  %v1613_v20 = vld [vmem:[%s1975_s1 + $0x148] sm:$0xff]  }
  0x19   : > { %1476 = vmatpush3.bf16.msra.mxu1 %v1593_v19  ;;  %254 = vst [vmem:[#allocation2 + $0xb] sm:$0x1] %v250_v45  ;;  %v321_v55 = vcombine.high %v1356_v51, %v1356_v51  ;;  %324 = vst [vmem:[#allocation2 + $0x5] sm:$0x1] %v250_v45  ;;  %v1357_v56 = vld [vmem:[%s1790_s27 + $0x4] sm:$0x1] }
  0x1a   : > { %1477 = vmatprep.subr.bf16.mxu1 %v1596_v22  ;;  %v1358_v57 = vld [vmem:[%s1790_s27 + $0x6] sm:$0x1]  ;;  %229 = vst [vmem:[#allocation2 + $0x1] sm:$0x1] %v217_v53  ;;  %230 = vst [vmem:[#allocation2 + $0xa] sm:$0x1] %v226_v54 }
  0x1b   : > { %1456 = vmatpush3.bf16.msra.mxu0 %v1595_v21  ;;  %v295_v58 = vshll.u32 %v279_v49, 16  ;;  %300 = vst [vmem:[#allocation2 + $0x4] sm:$0x1] %v226_v54  ;;  %329 = vst [vmem:[#allocation2 + $0x6] sm:$0x1] %v1357_v56  ;;  %v1611_v4 = vld [vmem:[%s1975_s1 + $0x1c0] sm:$0xff]  }
  0x1c   : > { %1457 = vmatprep.subr.bf16.mxu0 %v1598_v24  ;;  %330 = vst [vmem:[#allocation2 + $0xf] sm:$0x1] %v1358_v57  ;;  %v1362_v59 = vld.sshfl [vmem:[%s1790_s27 + $0x6] sm:$0x11 pattern:$0x75316420] }
  0x1d   : > { %1478 = vmatpush3.bf16.msra.mxu1 %v1597_v23  ;;  %325 = vst [vmem:[#allocation2 + $0xe] sm:$0x1] %v321_v55  ;;  %v350_v61 = vcombine.high %v1362_v59, %v1362_v59  ;;  %v361_v62 = vshrl.u32 %v1362_v59, 16  ;;  %395 = vst [vmem:[#allocation2 + $0x8] sm:$0x1] %v321_v55  ;;  %v297_v63 = vsel %vm1805_vm14, %v290_v50, %v295_v58  ;;  %v1610_v17 = vld [vmem:[%s1975_s1 + $0x100] sm:$0xff]  }
  0x1e   : > { %1479 = vmatprep.subr.bf16.mxu1 %v1600_v26  ;;  %301 = vst [vmem:[#allocation2 + $0xd] sm:$0x1] %v297_v63  ;;  %371 = vst [vmem:[#allocation2 + $0x7] sm:$0x1] %v297_v63  ;;  %v1612_v22 = vld [vmem:[%s1975_s1 + $0x180] sm:$0xff]   ;;  %v1615_v23 = vld [vmem:[%s1975_s1 + $0x1c8] sm:$0xff]  }
  0x1f   : > { %1458 = vmatpush3.bf16.msra.mxu0 %v1599_v25  ;;  %v366_v0 = vshll.u32 %v350_v61, 16  ;;  %v1614_v25 = vld [vmem:[%s1975_s1 + $0x108] sm:$0xff]   ;;  %v1617_v26 = vld [vmem:[%s1975_s1 + $0x150] sm:$0xff]   ;;  %v1622_v33 = vld [vmem:[%s1975_s1 + $0x118] sm:$0xff]   ;;  %v1659_v55 = vmov 0.0  }
  0x20   : > { %1459 = vmatprep.subr.bf16.mxu0 %v1602_v28  ;;  %v1619_v28 = vld [vmem:[%s1975_s1 + $0x1d0] sm:$0xff]   ;;  %v1625_v34 = vld [vmem:[%s1975_s1 + $0x160] sm:$0xff]   ;;  %v1624_v35 = vld [vmem:[%s1975_s1 + $0x198] sm:$0xff]  }
  0x21   : > { %1480 = vmatpush3.bf16.msra.mxu1 %v1601_v27  ;;  %v368_v5 = vsel %vm1805_vm14, %v361_v62, %v366_v0  ;;  %v1605_v9 = vld [vmem:[#allocation2] ss:$9 sps:$4 sm:$0xff]   ;;  %v1633_v42 = vld [vmem:[%s1975_s1 + $0x170] sm:$0xff]   ;;  %v1637_v47 = vld [vmem:[%s1975_s1 + $0x178] sm:$0xff]  }
  0x22   : > { %1481 = vmatprep.subr.bf16.mxu1 %v1604_v30  ;;  %372 = vst [vmem:[#allocation2 + $0x10] sm:$0x1] %v368_v5  ;;  %v564_v11 = vrot.slane %v1605_v9, %v1833_v8  ;;  %v1616_v27 = vld [vmem:[%s1975_s1 + $0x188] sm:$0xff]   ;;  %v1621_v30 = vld [vmem:[%s1975_s1 + $0x158] sm:$0xff]   ;;  %v1627_v36 = vld [vmem:[%s1975_s1 + $0x1e0] sm:$0xff]  }
  0x23   : > { %1460 = vmatpush3.bf16.msra.mxu0 %v1603_v29  ;;  %v1618_v29 = vld [vmem:[%s1975_s1 + $0x110] sm:$0xff]   ;;  %v1626_v37 = vld [vmem:[%s1975_s1 + $0x120] sm:$0xff]   ;;  %v1629_v38 = vld [vmem:[%s1975_s1 + $0x168] sm:$0xff]  }
  0x24   : > { %1489 = vmatprep.subr.bf16.mxu0 %v1609_v60  ;;  %v572_v13 = vcombine.high %v564_v11, %v564_v11  ;;  %v580_v14 = vrot.slane %v564_v11, %v1833_v8  ;;  %v1628_v39 = vld [vmem:[%s1975_s1 + $0x1a0] sm:$0xff]   ;;  %v1631_v40 = vld [vmem:[%s1975_s1 + $0x1e8] sm:$0xff]   ;;  %v1635_v44 = vld [vmem:[%s1975_s1 + $0x1f0] sm:$0xff]  }
  0x25   : > { %1482 = vmatpush3.bf16.msra.mxu1 %v1608_v52  ;;  %v1630_v41 = vld [vmem:[%s1975_s1 + $0x128] sm:$0xff]   ;;  %v1634_v45 = vld [vmem:[%s1975_s1 + $0x130] sm:$0xff]   ;;  %v1368_v46 = vld.sshfl [vmem:[%s1790_s27 + $0x6] sm:$0x10 pattern:$0x75316420] }
  0x26   : > { %1511 = vmatprep.subr.bf16.mxu1 %v1611_v4  ;;  %v594_v16 = vrot.slane %v572_v13, %v1833_v8  ;;  %v602_v19 = vcombine.high %v580_v14, %v580_v14  ;;  %v1632_v43 = vld [vmem:[%s1975_s1 + $0x1a8] sm:$0xff]   ;;  %v392_v48 = vcombine.high %v1368_v46, %v1368_v46  ;;  %v1636_v49 = vld [vmem:[%s1975_s1 + $0x1b0] sm:$0xff]   ;;  %v1639_v50 = vld [vmem:[%s1975_s1 + $0x1f8] sm:$0xff]  }
  0x27   : > { %v1638_v51 = vld [vmem:[%s1975_s1 + $0x138] sm:$0xff]   ;;  %v1641_v54 = vld [vmem:[%s1975_s1 + $0x200] sm:$0xff]   ;;  %v1642_v57 = vld [vmem:[%s1975_s1 + $0x208] sm:$0xff]  }
  0x28   : > { %1094 = vmatprep.mubr.bf16.mxu0 %v594_v16  ;;  %v604_v21 = vcombine.high %v594_v16, %v594_v16  ;;  %396 = vst [vmem:[#allocation2 + $0x11] sm:$0x1] %v392_v48  ;;  %v1640_v53 = vld [vmem:[%s1975_s1 + $0x1b8] sm:$0xff]   ;;  %v1643_v58 = vld [vmem:[%s1975_s1 + $0x210] sm:$0xff]   ;;  %v1645_v60 = vld [vmem:[%s1975_s1 + $0x220] sm:$0xff]  }
  0x29   : > { %v1607_v10 = vld [vmem:[#allocation2 + $0x4] ss:$9 sps:$4 sm:$0xff]   ;;  %1095 = vmatmul.mubr.bf16.vlgmr.msra.gmra.mrb[0].mxu0 %v580_v14  ;;  %v1644_v59 = vld [vmem:[%s1975_s1 + $0x218] sm:$0xff]   ;;  %v1369_v4 = vld [vmem:[%s1976_s2] ss:$0 sm:$0xff] }
  0x2a   : > { %v1837_v12 = vrot.slane %v1607_v10, %v1833_v8  ;;  %1134 = vmatprep.mubr.bf16.mxu1 %v604_v21  ;;  %1490 = vmatpush3.bf16.msra.mxu0 %v1610_v17  ;;  %v1646_v61 = vld [vmem:[%s1975_s1 + $0x228] sm:$0xff]   ;;  %v1647_v63 = vld [vmem:[%s1975_s1 + $0x230] sm:$0xff]   ;;  %v1648_v1 = vld [vmem:[%s1975_s1 + $0x238] sm:$0xff]  }
  0x2b   : > { %1135 = vmatmul.mubr.bf16.vlgmr.msra.gmra.mrb[0].mxu1 %v602_v19  ;;  %1491 = vmatprep.subr.bf16.mxu0 %v1613_v20 }
  0x2c   : > { %v573_v15 = vcombine.high %v1837_v12, %v1837_v12  ;;  %1512 = vmatpush3.bf16.msra.mxu1 %v1612_v22  ;;  %v587_v52 = vrot.slane %v1837_v12, %v1833_v8 }
  0x2d   : > { %1513 = vmatprep.subr.bf16.mxu1 %v1615_v23 }
  0x2e   : > { %v601_v18 = vrot.slane %v573_v15, %v1833_v8  ;;  %1492 = vmatpush3.bf16.msra.mxu0 %v1614_v25  ;;  %v603_v56 = vcombine.high %v587_v52, %v587_v52 }
  0x2f   : > { %1493 = vmatprep.subr.bf16.mxu0 %v1617_v26  ;;  %v1649_v62 = vld [vmem:[#allocation2 + $0x8] ss:$9 sps:$4 sm:$0x11]  }
  0x30   : > { %v605_v24 = vcombine.high %v601_v18, %v601_v18  ;;  %1174 = vmatprep.mubr.bf16.mxu0 %v601_v18  ;;  %1514 = vmatpush3.bf16.msra.mxu1 %v1616_v27  ;;  %v613_v0 = vrot.slane %v1649_v62, %v1833_v8 }
  0x31   : > { %1515 = vmatprep.subr.bf16.mxu1 %v1619_v28 }
  0x32   : > { %1214 = vmatprep.mubr.bf16.mxu1 %v605_v24  ;;  %1494 = vmatpush3.bf16.msra.mxu0 %v1618_v29  ;;  %v620_v2 = vrot.slane %v613_v0, %v1833_v8  ;;  %v1661_v29 = vmov 1983009808  }
  0x33   : > { %1495 = vmatprep.subr.bf16.mxu0 %v1621_v30  ;;  %v1265_v30 = vunpack.c.l.s4 %v1661_v29 }
  0x34   : > { %1516 = vmatpush3.bf16.msra.mxu1 %v1620_v31 }
  0x35   : > { %1517 = vmatprep.subr.bf16.mxu1 %v1623_v32  ;;  %v1266_v31 = vunpack.c.0.s8 %v1265_v30 }
  0x36   : > { %1496 = vmatpush3.bf16.msra.mxu0 %v1622_v33 }
  0x37   : > { %1497 = vmatprep.subr.bf16.mxu0 %v1625_v34  ;;  %v1269_v34 = vsub.s32 %v1266_v31, %v1830_v7 }
  0x38   : > { %1518 = vmatpush3.bf16.msra.mxu1 %v1624_v35 }
  0x39   : > { %1519 = vmatprep.subr.bf16.mxu1 %v1627_v36 }
  0x3a   : > { %1498 = vmatpush3.bf16.msra.mxu0 %v1626_v37 }
  0x3b   : > { %1499 = vmatprep.subr.bf16.mxu0 %v1629_v38 }
  0x3c   : > { %1520 = vmatpush3.bf16.msra.mxu1 %v1628_v39 }
  0x3d   : > { %1521 = vmatprep.subr.bf16.mxu1 %v1631_v40 }
  0x3e   : > { %1500 = vmatpush3.bf16.msra.mxu0 %v1630_v41 }
  0x3f   : > { %1501 = vmatprep.subr.bf16.mxu0 %v1633_v42 }
  0x40   : > { %1522 = vmatpush3.bf16.msra.mxu1 %v1632_v43 }
  0x41   : > { %1523 = vmatprep.subr.bf16.mxu1 %v1635_v44 }
  0x42   : > { %1502 = vmatpush3.bf16.msra.mxu0 %v1634_v45 }
  0x43   : > { %1503 = vmatprep.subr.bf16.mxu0 %v1637_v47 }
  0x44   : > { %1524 = vmatpush3.bf16.msra.mxu1 %v1636_v49 }
  0x45   : > { %1525 = vmatprep.subr.bf16.mxu1 %v1639_v50 }
  0x46   : > { %1504 = vmatpush3.bf16.msra.mxu0 %v1638_v51 }
  0x47   : > { %1542 = vmatprep.subr.bf16.mxu0 %v1659_v55 }
  0x48   : > { %1526 = vmatpush3.bf16.msra.mxu1 %v1640_v53 }
  0x49   : > { %1175 = vmatmul.mubr.bf16.vlgmr.msra.gmra.mrb[4].mxu0 %v587_v52 }
  0x4a   : > { %1543 = vmatpush3.bf16.msra.mxu0 %v1641_v54  ;;  %1558 = vmatprep.mubr.msk.bf16.mxu0 %vm1660_vm15, %v1659_v55 }
  0x4b   : > { %1215 = vmatmul.mubr.bf16.vlgmr.msra.gmra.mrb[4].mxu1 %v603_v56  ;;  %1544 = vmatprep.subr.bf16.mxu0 %v1659_v55 }
  0x4e   : > { %1545 = vmatpush3.bf16.msra.mxu0 %v1642_v57 }
  0x4f   : > { %1546 = vmatprep.subr.bf16.mxu0 %v1659_v55 }
  0x52   : > { %1547 = vmatpush3.bf16.msra.mxu0 %v1643_v58 }
  0x53   : > { %1548 = vmatprep.subr.bf16.mxu0 %v1659_v55 }
  0x56   : > { %1549 = vmatpush3.bf16.msra.mxu0 %v1644_v59 }
  0x57   : > { %1550 = vmatprep.subr.bf16.mxu0 %v1659_v55 }
  0x5a   : > { %1551 = vmatpush3.bf16.msra.mxu0 %v1645_v60 }
  0x5b   : > { %1552 = vmatprep.subr.bf16.mxu0 %v1659_v55 }
  0x5e   : > { %1553 = vmatpush3.bf16.msra.mxu0 %v1646_v61 }
  0x5f   : > { %1554 = vmatprep.subr.bf16.mxu0 %v1659_v55 }
  0x62   : > { %1555 = vmatpush3.bf16.msra.mxu0 %v1647_v63 }
  0x63   : > { %1556 = vmatprep.subr.bf16.mxu0 %v1659_v55 }
  0x66   : > { %1557 = vmatpush3.bf16.msra.mxu0 %v1648_v1 }
  0x69   : > { %1559 = vmatmul.mubr.bf16.vlgmr.msra.gmra.mrb[8].mxu0 %v620_v2 }
  0xfc   : > { %v1461_v3 = vpop.f32.mrb[0].mxu0 }
  0xfd   : > { %v1462_v5 = vpop.f32.mrb[1].mxu0 }
  0xfe   : > { %v1463_v6 = vadd.f32 %v1462_v5, %v1461_v3  ;;  %v1464_v9 = vpop.f32.mrb[2].mxu0  ;;  %v1483_v10 = vpop.f32.mrb[0].mxu1 }
  0xff   : > { %v1465_v11 = vpop.f32.mrb[3].mxu0  ;;  %v1484_v12 = vpop.f32.mrb[1].mxu1 }
 0x100   : > { %v1097_v13 = vadd.f32 %v1463_v6, %v1369_v4  ;;  %v1485_v14 = vadd.f32 %v1484_v12, %v1483_v10  ;;  %v1486_v15 = vpop.f32.mrb[2].mxu1 }
 0x101   : > { %v1487_v16 = vpop.f32.mrb[3].mxu1 }
 0x102   : > { %v1137_v17 = vadd.f32 %v1485_v14, %v1097_v13 }
 0x11c   : > { %v1505_v18 = vpop.f32.mrb[4].mxu0 }
 0x11d   : > { %v1506_v8 = vpop.f32.mrb[5].mxu0 }
 0x11e   : > { %v1507_v19 = vadd.f32 %v1506_v8, %v1505_v18  ;;  %v1508_v20 = vpop.f32.mrb[6].mxu0  ;;  %v1527_v21 = vpop.f32.mrb[4].mxu1 }
 0x11f   : > { %v1509_v22 = vpop.f32.mrb[7].mxu0  ;;  %v1528_v23 = vpop.f32.mrb[5].mxu1 }
 0x120   : > { %v1177_v24 = vadd.f32 %v1507_v19, %v1137_v17  ;;  %v1529_v25 = vadd.f32 %v1528_v23, %v1527_v21  ;;  %v1530_v26 = vpop.f32.mrb[6].mxu1 }
 0x121   : > { %v1531_v27 = vpop.f32.mrb[7].mxu1 }
 0x122   : > { %v1217_v28 = vadd.f32 %v1529_v25, %v1177_v24 }
 0x13c   : > { %v1256_v32 = vpop.f32.mrb[8].mxu0 }
 0x13d   : > { %v1257_v33 = vadd.f32 %v1256_v32, %v1217_v28  ;;  %v1560_v35 = vpop.f32.mrb[9].mxu0 }
 0x13e   : > { %v1259_v36 = vpop.f32.mrb[10].mxu0 }
 0x13f   : > { %v1262_v37 = vmax.f32 %v1257_v33, 0.0  ;;  %v1561_v38 = vpop.f32.mrb[11].mxu0 }
 0x141   : > { %v1270_v39 = vrot.slane %v1262_v37, %v1269_v34 }
 0x143   : > { %v1271_v40 = vcombine.high %v1270_v39, %v1270_v39  ;;  %v1274_v41 = vpack.c.bf16 %v1270_v39, %v1270_v39 }
 0x145   : > { %v1275_v42 = vpack.c.bf16 %v1271_v40, %v1271_v40  ;;  %1276 = vst [vmem:[%s168_s19] sm:$0x1] %v1274_v41 }
 0x147   : > { %1277 = vst [vmem:[%s168_s19 + $0x1] sm:$0x1] %v1275_v42 }
 0x148 PF: > { %s13_s12 = sadd.s32 1, %s1656_s12  }
 0x149   : > { %p10_p4 = scmp.ge.s32.totalorder %s13_s12, 4  }
 0x14b   :  { %12 = sbr.rel (!%p10_p4) target bundleno = 1 (0x1), region = 64 }

</bundles_post_ra>
